<compile_context>
chip_gen: v7x
topology: tpu7x:2x2x1
jax: 0.10.0
libtpu: 0.0.40
codegen_flags: <defaults>
</compile_context>

<pallas_src>
import jax
import jax.numpy as jnp
from jax.experimental import pallas as pl
from jax.experimental.pallas import tpu as pltpu

# ---------------- module hyper-parameters ----------------
TILE_SLEN = 2            # tile_slen
PTILE_SLEN = 10          # ptile_slen (even -> source stamp side = PTILE_SLEN + 1)
N_BANDS = 2
MAX_SOURCES = 2
LATENT_DIM = 8           # n_galaxy_params
HIDDEN_DIM = 32
DEC_SLEN = 7             # galaxy-decoder output side (must be odd)
SRC_SLEN = PTILE_SLEN + (1 if PTILE_SLEN % 2 == 0 else 0)   # 11
PAD_OFF = (SRC_SLEN - DEC_SLEN) // 2                        # 2 (Tiler._expand_source offset)

# ---------------- kernel layout constants ----------------
PT_BLK = 128             # ptiles per grid step == lane-axis width (lane-dense everywhere)
ROW_STRIDE = 8           # decoded-stamp row stride in the packed feature axis (8-aligned)
BAND_STRIDE = 64         # per-band stride in the packed feature axis (8-aligned)
OUT_PAD = N_BANDS * BAND_STRIDE                             # 128 packed decoder features


# ====================== fused decoder + pad + mask + tiler kernel ======================
def _fused_kernel(z_ref, locs_ref, bools_ref, w1t_ref, b1t_ref, w2t_ref, b2t_ref, out_ref):
    """One block of PT_BLK ptiles; the ptile index lives on the 128-wide lane axis.

    Ref shapes:
      z_ref     : (MAX_SOURCES, LATENT_DIM, PT_BLK)   latents, feature-major
      locs_ref  : (2 * MAX_SOURCES, PT_BLK)           rows = [y0, x0, y1, x1]
      bools_ref : (MAX_SOURCES, PT_BLK)
      w1t_ref   : (HIDDEN_DIM, LATENT_DIM)            w1.T   (resident: constant index_map)
      b1t_ref   : (HIDDEN_DIM, 1)
      w2t_ref   : (OUT_PAD, HIDDEN_DIM)               packed w2.T
      b2t_ref   : (OUT_PAD, 1)
      out_ref   : (N_BANDS, PTILE_SLEN, PTILE_SLEN, PT_BLK)
    """
    P, D = PTILE_SLEN, DEC_SLEN
    ratio = TILE_SLEN / PTILE_SLEN
    pad_frac = ((PTILE_SLEN - TILE_SLEN) / 2.0) / PTILE_SLEN
    offg = (P - 1) / 2.0
    gscale = (P - 1) / P
    samp_scale = 0.5 * (SRC_SLEN - 1)

    # grid- / source- / band-invariant scaffolding, built once per ptile block
    base = (jax.lax.broadcasted_iota(jnp.int32, (P, PT_BLK), 0).astype(jnp.float32)
            - offg) / offg * gscale                          # cached_grid 1-D values

    w1t = w1t_ref[...]
    b1t = b1t_ref[...]
    w2t = w2t_ref[...]
    b2t = b2t_ref[...]

    stamps, wy_all, wx_all = [], [], []
    for n in range(MAX_SOURCES):
        # ---- CenteredGalaxyDecoder stand-in (MXU), computed feature-major (feat, ptile) ----
        # TODO(synk): exact CenteredGalaxyDecoder (conv-transpose stack) is not given in the
        # reference code; a 2-layer MLP with ReLU output stands in for it.
        zT = z_ref[n]                                        # (LATENT_DIM, PT_BLK)
        hT = jnp.maximum(jnp.dot(w1t, zT, preferred_element_type=jnp.float32) + b1t, 0.0)
        gT = jnp.maximum(jnp.dot(w2t, hT, preferred_element_type=jnp.float32) + b2t, 0.0)

        # gal[b == 1] = decoded, followed by "* galaxy_bools"  ==  decoded * b * (b == 1)
        b_row = bools_ref[n:n + 1, :]                        # (1, PT_BLK)
        gT = gT * jnp.where(b_row == 1.0, b_row, 0.0)        # mask folded in once per source
        stamps.append(gT)                                    # (OUT_PAD, PT_BLK)

        # ---- separable bilinear grid_sample weights (align_corners=True, zeros padding) ----
        ly = locs_ref[2 * n:2 * n + 1, :]                    # (1, PT_BLK)
        lx = locs_ref[2 * n + 1:2 * n + 2, :]
        lyt = (ly * ratio + pad_frac - 0.5) * 2.0
        lxt = (lx * ratio + pad_frac - 0.5) * 2.0
        ys = (base - lyt + 1.0) * samp_scale                 # sample row coordinate (P, PT_BLK)
        xs = (base - lxt + 1.0) * samp_scale                 # sample col coordinate (P, PT_BLK)
        # only the DxD decoded region of the 11x11 stamp is non-zero, so only source-pixel
        # indices PAD_OFF .. PAD_OFF + D - 1 can contribute.
        wy_all.append([jnp.maximum(1.0 - jnp.abs(ys - float(k + PAD_OFF)), 0.0)
                       for k in range(D)])                   # D x (P, PT_BLK)
        wx_all.append([jnp.maximum(1.0 - jnp.abs(xs - float(l + PAD_OFF)), 0.0)
                       for l in range(D)])                   # D x (P, PT_BLK)

    # ---- interpolate + accumulate over sources (pure lane-vectorized VPU work) ----
    for band in range(N_BANDS):
        acc = jnp.zeros((P, P, PT_BLK), jnp.float32)
        cb = band * BAND_STRIDE
        for n in range(MAX_SOURCES):
            gT, wy, wx = stamps[n], wy_all[n], wx_all[n]
            # row interpolation: tmp[l, i, p] = sum_k stamp[k, l, p] * wy_k[i, p]
            tmp = jnp.zeros((D, P, PT_BLK), jnp.float32)
            for k in range(D):
                src_k = gT[cb + k * ROW_STRIDE:cb + k * ROW_STRIDE + D, :]   # (D, PT_BLK)
                tmp = tmp + src_k[:, None, :] * wy[k][None, :, :]
            # column interpolation: out[i, j, p] += sum_l tmp[l, i, p] * wx_l[j, p]
            for l in range(D):
                acc = acc + tmp[l][:, None, :] * wx[l][None, :, :]
        out_ref[band] = acc


# ====================== wrappers ======================
def _pack_decoder_params(decoder_params):
    """Transpose + scatter the MLP weights into the kernel's packed feature layout.

    The packed feature column for decoded pixel (band, row, col) is
    band * BAND_STRIDE + row * ROW_STRIDE + col: 8-aligned rows, 128-wide (lane-exact)
    feature axis; unused columns stay zero.
    """
    w1, b1, w2, b2 = decoder_params
    f = jnp.arange(N_BANDS * DEC_SLEN * DEC_SLEN)
    band = f // (DEC_SLEN * DEC_SLEN)
    rem = f % (DEC_SLEN * DEC_SLEN)
    cols = band * BAND_STRIDE + (rem // DEC_SLEN) * ROW_STRIDE + rem % DEC_SLEN
    w2p = jnp.zeros((HIDDEN_DIM, OUT_PAD), jnp.float32).at[:, cols].set(w2)
    b2p = jnp.zeros((1, OUT_PAD), jnp.float32).at[:, cols].set(b2)
    return w1.T, b1.T, w2p.T, b2p.T


def galaxy_tile_decoder_forward(locs, galaxy_params, galaxy_bools, decoder_params):
    """GalaxyTileDecoder.forward -> (n_ptiles, n_bands, ptile_slen, ptile_slen)."""
    n_ptiles = locs.shape[0]
    n_pad = ((n_ptiles + PT_BLK - 1) // PT_BLK) * PT_BLK
    pad = n_pad - n_ptiles

    w1t, b1t, w2t, b2t = _pack_decoder_params(decoder_params)

    # ptile index -> last (lane) axis; padded ptiles are killed by galaxy_bools == 0
    z_t = jnp.transpose(galaxy_params.astype(jnp.float32), (1, 2, 0))
    locs_t = jnp.transpose(locs.astype(jnp.float32), (1, 2, 0)).reshape(2 * MAX_SOURCES, n_ptiles)
    bools_t = jnp.transpose(galaxy_bools.astype(jnp.float32), (1, 2, 0)).reshape(MAX_SOURCES,
                                                                                 n_ptiles)
    if pad:
        z_t = jnp.pad(z_t, ((0, 0), (0, 0), (0, pad)))
        locs_t = jnp.pad(locs_t, ((0, 0), (0, pad)))
        bools_t = jnp.pad(bools_t, ((0, 0), (0, pad)))

    out = pl.pallas_call(
        _fused_kernel,
        out_shape=jax.ShapeDtypeStruct((N_BANDS, PTILE_SLEN, PTILE_SLEN, n_pad), jnp.float32),
        grid=(n_pad // PT_BLK,),
        in_specs=[
            pl.BlockSpec((MAX_SOURCES, LATENT_DIM, PT_BLK), lambda i: (0, 0, i)),
            pl.BlockSpec((2 * MAX_SOURCES, PT_BLK), lambda i: (0, i)),
            pl.BlockSpec((MAX_SOURCES, PT_BLK), lambda i: (0, i)),
            # decoder weights: constant block index -> resident across grid steps
            pl.BlockSpec((HIDDEN_DIM, LATENT_DIM), lambda i: (0, 0)),
            pl.BlockSpec((HIDDEN_DIM, 1), lambda i: (0, 0)),
            pl.BlockSpec((OUT_PAD, HIDDEN_DIM), lambda i: (0, 0)),
            pl.BlockSpec((OUT_PAD, 1), lambda i: (0, 0)),
        ],
        out_specs=pl.BlockSpec((N_BANDS, PTILE_SLEN, PTILE_SLEN, PT_BLK),
                               lambda i: (0, 0, 0, i)),
        compiler_params=pltpu.CompilerParams(dimension_semantics=("parallel",)),
    )(z_t, locs_t, bools_t, w1t, b1t, w2t, b2t)

    # lane-dense kernel layout (n_bands, P, P, n_pad) -> module layout (n_ptiles, n_bands, P, P)
    return jnp.transpose(out, (3, 0, 1, 2))[:n_ptiles]


# ====================== pure-JAX reference (validation) ======================
def _reference_forward(locs, galaxy_params, galaxy_bools, decoder_params):
    """High-precision pure-JAX replica of GalaxyTileDecoder.forward (same math)."""
    w1, b1, w2, b2 = decoder_params
    hp = jax.lax.Precision.HIGHEST
    n_ptiles = locs.shape[0]

    # _render_single_galaxies + _size_galaxy (expand-pad) with the stand-in decoder
    z = galaxy_params.reshape(n_ptiles * MAX_SOURCES, LATENT_DIM).astype(jnp.float32)
    h = jnp.maximum(jnp.dot(z, w1, precision=hp) + b1, 0.0)
    g = jnp.maximum(jnp.dot(h, w2, precision=hp) + b2, 0.0)
    gal = g.reshape(n_ptiles, MAX_SOURCES, N_BANDS, DEC_SLEN, DEC_SLEN)
    b = galaxy_bools.reshape(n_ptiles, MAX_SOURCES).astype(jnp.float32)
    gal = gal * jnp.where(b == 1.0, b, 0.0)[:, :, None, None, None]
    rpad = SRC_SLEN - DEC_SLEN - PAD_OFF
    gal = jnp.pad(gal, ((0, 0), (0, 0), (0, 0), (PAD_OFF, rpad), (PAD_OFF, rpad)))

    # Tiler.forward: separable bilinear grid_sample(align_corners=True), summed over sources
    P, S = PTILE_SLEN, SRC_SLEN
    ratio = TILE_SLEN / PTILE_SLEN
    pad_frac = ((PTILE_SLEN - TILE_SLEN) / 2.0) / PTILE_SLEN
    offg = (P - 1) / 2.0
    gscale = (P - 1) / P
    base = (jnp.arange(P, dtype=jnp.float32) - offg) / offg * gscale
    karr = jnp.arange(S, dtype=jnp.float32)
    out = jnp.zeros((n_ptiles, N_BANDS, P, P), jnp.float32)
    for n in range(MAX_SOURCES):
        lyt = (locs[:, n, 0] * ratio + pad_frac - 0.5) * 2.0
        lxt = (locs[:, n, 1] * ratio + pad_frac - 0.5) * 2.0
        ys = (base[None, :] - lyt[:, None] + 1.0) * 0.5 * (S - 1)
        xs = (base[None, :] - lxt[:, None] + 1.0) * 0.5 * (S - 1)
        wy = jnp.maximum(1.0 - jnp.abs(ys[..., None] - karr[None, None, :]), 0.0)
        wx = jnp.maximum(1.0 - jnp.abs(xs[..., None] - karr[None, None, :]), 0.0)
        out = out + jnp.einsum("pik,pbkl,pjl->pbij", wy, gal[:, n], wx, precision=hp)
    return out


# ====================== main ======================
if __name__ == "__main__":
    key = jax.random.PRNGKey(0)
    k1, k2, k3, k4, k5 = jax.random.split(key, 5)

    n_ptiles = 256                           # two grid steps of PT_BLK = 128 ptiles
    locs = jax.random.uniform(k1, (n_ptiles, MAX_SOURCES, 2), jnp.float32)
    galaxy_params = jax.random.normal(k2, (n_ptiles, MAX_SOURCES, LATENT_DIM), jnp.float32)
    galaxy_bools = jax.random.bernoulli(k3, 0.7, (n_ptiles, MAX_SOURCES, 1)).astype(jnp.float32)

    # deterministic synthetic decoder parameters (stand-in CenteredGalaxyDecoder)
    w1 = 0.3 * jax.random.normal(k4, (LATENT_DIM, HIDDEN_DIM), jnp.float32)
    b1 = jnp.zeros((1, HIDDEN_DIM), jnp.float32)
    w2 = 0.3 * jax.random.normal(k5, (HIDDEN_DIM, N_BANDS * DEC_SLEN * DEC_SLEN), jnp.float32)
    b2 = jnp.zeros((1, N_BANDS * DEC_SLEN * DEC_SLEN), jnp.float32)
    decoder_params = (w1, b1, w2, b2)

    fwd = jax.jit(galaxy_tile_decoder_forward)
    out = jax.block_until_ready(fwd(locs, galaxy_params, galaxy_bools, decoder_params))
    assert out.shape == (n_ptiles, N_BANDS, PTILE_SLEN, PTILE_SLEN)

    ref = jax.block_until_ready(
        _reference_forward(locs, galaxy_params, galaxy_bools, decoder_params))
    err = float(jnp.max(jnp.abs(out - ref)))
    assert err < 2e-3, f"fused kernel mismatch vs reference: {err}"
    print("KERNEL_OK")
</pallas_src>

<mosaic_0001>
module attributes {stable_mosaic.version = 11 : i64} {
  func.func @_fused_kernel(%arg0: i32, %arg1: memref<2x8x128xf32, #tpu.memory_space<vmem>>, %arg2: memref<4x128xf32, #tpu.memory_space<vmem>>, %arg3: memref<2x128xf32, #tpu.memory_space<vmem>>, %arg4: memref<32x8xf32, #tpu.memory_space<vmem>>, %arg5: memref<32x1xf32, #tpu.memory_space<vmem>>, %arg6: memref<128x32xf32, #tpu.memory_space<vmem>>, %arg7: memref<128x1xf32, #tpu.memory_space<vmem>>, %arg8: memref<2x10x10x128xf32, #tpu.memory_space<vmem>>) attributes {dimension_semantics = [#tpu.dimension_semantics<parallel>], iteration_bounds = array<i64: 2>, scalar_prefetch = 0 : i64, scratch_operands = 0 : i64, tpu.core_type = #tpu.core_type<tc>, window_params = [{transform_indices = @transform_0, window_bounds = array<i64: 2, 8, 128>}, {transform_indices = @transform_1, window_bounds = array<i64: 4, 128>}, {transform_indices = @transform_2, window_bounds = array<i64: 2, 128>}, {pipeline_mode = #tpu.pipeline_mode<synchronous>, transform_indices = @transform_3, window_bounds = array<i64: 32, 8>}, {pipeline_mode = #tpu.pipeline_mode<synchronous>, transform_indices = @transform_4, window_bounds = array<i64: 32, 1>}, {pipeline_mode = #tpu.pipeline_mode<synchronous>, transform_indices = @transform_5, window_bounds = array<i64: 128, 32>}, {pipeline_mode = #tpu.pipeline_mode<synchronous>, transform_indices = @transform_6, window_bounds = array<i64: 128, 1>}, {transform_indices = @transform_7, window_bounds = array<i64: 2, 10, 10, 128>}]} {
    %0 = tpu.iota {dimensions = array<i32: 0>} : vector<10x128xi32>
    %1 = arith.sitofp %0 : vector<10x128xi32> to vector<10x128xf32>
    %cst = arith.constant 4.500000e+00 : f32
    %2 = vector.broadcast %cst : f32 to vector<10x128xf32>
    %3 = arith.subf %1, %2 : vector<10x128xf32>
    %cst_0 = arith.constant 4.500000e+00 : f32
    %4 = vector.broadcast %cst_0 : f32 to vector<10x128xf32>
    %5 = arith.divf %3, %4 : vector<10x128xf32>
    %cst_1 = arith.constant 0.899999976 : f32
    %6 = vector.broadcast %cst_1 : f32 to vector<10x128xf32>
    %7 = arith.mulf %5, %6 : vector<10x128xf32>
    %c0 = arith.constant 0 : index
    %c0_2 = arith.constant 0 : index
    %8 = vector.load %arg4[%c0, %c0_2] : memref<32x8xf32, #tpu.memory_space<vmem>>, vector<32x8xf32>
    %c0_3 = arith.constant 0 : index
    %c0_4 = arith.constant 0 : index
    %9 = vector.load %arg5[%c0_3, %c0_4] : memref<32x1xf32, #tpu.memory_space<vmem>>, vector<32x1xf32>
    %c0_5 = arith.constant 0 : index
    %c0_6 = arith.constant 0 : index
    %10 = vector.load %arg6[%c0_5, %c0_6] : memref<128x32xf32, #tpu.memory_space<vmem>>, vector<128x32xf32>
    %c0_7 = arith.constant 0 : index
    %c0_8 = arith.constant 0 : index
    %11 = vector.load %arg7[%c0_7, %c0_8] : memref<128x1xf32, #tpu.memory_space<vmem>>, vector<128x1xf32>
    %c0_9 = arith.constant 0 : index
    %c0_10 = arith.constant 0 : index
    %c0_11 = arith.constant 0 : index
    %12 = vector.load %arg1[%c0_9, %c0_10, %c0_11] : memref<2x8x128xf32, #tpu.memory_space<vmem>>, vector<1x8x128xf32>
    %13 = vector.shape_cast %12 : vector<1x8x128xf32> to vector<8x128xf32>
    %cst_12 = arith.constant dense<0.000000e+00> : vector<32x128xf32>
    %14 = tpu.matmul %8, %13, %cst_12 {dimension_numbers = #tpu.dot_dimension_numbers<[1], [0], [0], [1], [0, 0, 1, 1], [], []>} : vector<32x8xf32>, vector<8x128xf32>, vector<32x128xf32> -> vector<32x128xf32>
    %15 = vector.broadcast %9 : vector<32x1xf32> to vector<32x128xf32>
    %16 = arith.addf %14, %15 : vector<32x128xf32>
    %cst_13 = arith.constant 0.000000e+00 : f32
    %17 = vector.broadcast %cst_13 : f32 to vector<32x128xf32>
    %18 = arith.maximumf %16, %17 : vector<32x128xf32>
    %cst_14 = arith.constant dense<0.000000e+00> : vector<128x128xf32>
    %19 = tpu.matmul %10, %18, %cst_14 {dimension_numbers = #tpu.dot_dimension_numbers<[1], [0], [0], [1], [0, 0, 1, 1], [], []>} : vector<128x32xf32>, vector<32x128xf32>, vector<128x128xf32> -> vector<128x128xf32>
    %20 = vector.broadcast %11 : vector<128x1xf32> to vector<128x128xf32>
    %21 = arith.addf %19, %20 : vector<128x128xf32>
    %cst_15 = arith.constant 0.000000e+00 : f32
    %22 = vector.broadcast %cst_15 : f32 to vector<128x128xf32>
    %23 = arith.maximumf %21, %22 : vector<128x128xf32>
    %c0_16 = arith.constant 0 : index
    %c0_17 = arith.constant 0 : index
    %24 = vector.load %arg3[%c0_16, %c0_17] : memref<2x128xf32, #tpu.memory_space<vmem>>, vector<1x128xf32>
    %cst_18 = arith.constant 1.000000e+00 : f32
    %25 = vector.broadcast %cst_18 : f32 to vector<1x128xf32>
    %26 = arith.cmpf oeq, %24, %25 : vector<1x128xf32>
    %cst_19 = arith.constant 0.000000e+00 : f32
    %27 = vector.broadcast %cst_19 : f32 to vector<1x128xf32>
    %28 = arith.select %26, %24, %27 : vector<1x128xi1>, vector<1x128xf32>
    %29 = vector.broadcast %28 : vector<1x128xf32> to vector<128x128xf32>
    %30 = arith.mulf %23, %29 : vector<128x128xf32>
    %c0_20 = arith.constant 0 : index
    %c0_21 = arith.constant 0 : index
    %31 = vector.load %arg2[%c0_20, %c0_21] : memref<4x128xf32, #tpu.memory_space<vmem>>, vector<1x128xf32>
    %c1 = arith.constant 1 : index
    %c0_22 = arith.constant 0 : index
    %32 = vector.load %arg2[%c1, %c0_22] : memref<4x128xf32, #tpu.memory_space<vmem>>, vector<1x128xf32>
    %cst_23 = arith.constant 2.000000e-01 : f32
    %33 = vector.broadcast %cst_23 : f32 to vector<1x128xf32>
    %34 = arith.mulf %31, %33 : vector<1x128xf32>
    %cst_24 = arith.constant 4.000000e-01 : f32
    %35 = vector.broadcast %cst_24 : f32 to vector<1x128xf32>
    %36 = arith.addf %34, %35 : vector<1x128xf32>
    %cst_25 = arith.constant 5.000000e-01 : f32
    %37 = vector.broadcast %cst_25 : f32 to vector<1x128xf32>
    %38 = arith.subf %36, %37 : vector<1x128xf32>
    %cst_26 = arith.constant 2.000000e+00 : f32
    %39 = vector.broadcast %cst_26 : f32 to vector<1x128xf32>
    %40 = arith.mulf %38, %39 : vector<1x128xf32>
    %cst_27 = arith.constant 2.000000e-01 : f32
    %41 = vector.broadcast %cst_27 : f32 to vector<1x128xf32>
    %42 = arith.mulf %32, %41 : vector<1x128xf32>
    %cst_28 = arith.constant 4.000000e-01 : f32
    %43 = vector.broadcast %cst_28 : f32 to vector<1x128xf32>
    %44 = arith.addf %42, %43 : vector<1x128xf32>
    %cst_29 = arith.constant 5.000000e-01 : f32
    %45 = vector.broadcast %cst_29 : f32 to vector<1x128xf32>
    %46 = arith.subf %44, %45 : vector<1x128xf32>
    %cst_30 = arith.constant 2.000000e+00 : f32
    %47 = vector.broadcast %cst_30 : f32 to vector<1x128xf32>
    %48 = arith.mulf %46, %47 : vector<1x128xf32>
    %49 = vector.broadcast %40 : vector<1x128xf32> to vector<10x128xf32>
    %50 = arith.subf %7, %49 : vector<10x128xf32>
    %cst_31 = arith.constant 1.000000e+00 : f32
    %51 = vector.broadcast %cst_31 : f32 to vector<10x128xf32>
    %52 = arith.addf %50, %51 : vector<10x128xf32>
    %cst_32 = arith.constant 5.000000e+00 : f32
    %53 = vector.broadcast %cst_32 : f32 to vector<10x128xf32>
    %54 = arith.mulf %52, %53 : vector<10x128xf32>
    %55 = vector.broadcast %48 : vector<1x128xf32> to vector<10x128xf32>
    %56 = arith.subf %7, %55 : vector<10x128xf32>
    %cst_33 = arith.constant 1.000000e+00 : f32
    %57 = vector.broadcast %cst_33 : f32 to vector<10x128xf32>
    %58 = arith.addf %56, %57 : vector<10x128xf32>
    %cst_34 = arith.constant 5.000000e+00 : f32
    %59 = vector.broadcast %cst_34 : f32 to vector<10x128xf32>
    %60 = arith.mulf %58, %59 : vector<10x128xf32>
    %cst_35 = arith.constant 2.000000e+00 : f32
    %61 = vector.broadcast %cst_35 : f32 to vector<10x128xf32>
    %62 = arith.subf %54, %61 : vector<10x128xf32>
    %63 = math.absf %62 : vector<10x128xf32>
    %cst_36 = arith.constant 1.000000e+00 : f32
    %64 = vector.broadcast %cst_36 : f32 to vector<10x128xf32>
    %65 = arith.subf %64, %63 : vector<10x128xf32>
    %cst_37 = arith.constant 0.000000e+00 : f32
    %66 = vector.broadcast %cst_37 : f32 to vector<10x128xf32>
    %67 = arith.maximumf %65, %66 : vector<10x128xf32>
    %cst_38 = arith.constant 3.000000e+00 : f32
    %68 = vector.broadcast %cst_38 : f32 to vector<10x128xf32>
    %69 = arith.subf %54, %68 : vector<10x128xf32>
    %70 = math.absf %69 : vector<10x128xf32>
    %cst_39 = arith.constant 1.000000e+00 : f32
    %71 = vector.broadcast %cst_39 : f32 to vector<10x128xf32>
    %72 = arith.subf %71, %70 : vector<10x128xf32>
    %cst_40 = arith.constant 0.000000e+00 : f32
    %73 = vector.broadcast %cst_40 : f32 to vector<10x128xf32>
    %74 = arith.maximumf %72, %73 : vector<10x128xf32>
    %cst_41 = arith.constant 4.000000e+00 : f32
    %75 = vector.broadcast %cst_41 : f32 to vector<10x128xf32>
    %76 = arith.subf %54, %75 : vector<10x128xf32>
    %77 = math.absf %76 : vector<10x128xf32>
    %cst_42 = arith.constant 1.000000e+00 : f32
    %78 = vector.broadcast %cst_42 : f32 to vector<10x128xf32>
    %79 = arith.subf %78, %77 : vector<10x128xf32>
    %cst_43 = arith.constant 0.000000e+00 : f32
    %80 = vector.broadcast %cst_43 : f32 to vector<10x128xf32>
    %81 = arith.maximumf %79, %80 : vector<10x128xf32>
    %cst_44 = arith.constant 5.000000e+00 : f32
    %82 = vector.broadcast %cst_44 : f32 to vector<10x128xf32>
    %83 = arith.subf %54, %82 : vector<10x128xf32>
    %84 = math.absf %83 : vector<10x128xf32>
    %cst_45 = arith.constant 1.000000e+00 : f32
    %85 = vector.broadcast %cst_45 : f32 to vector<10x128xf32>
    %86 = arith.subf %85, %84 : vector<10x128xf32>
    %cst_46 = arith.constant 0.000000e+00 : f32
    %87 = vector.broadcast %cst_46 : f32 to vector<10x128xf32>
    %88 = arith.maximumf %86, %87 : vector<10x128xf32>
    %cst_47 = arith.constant 6.000000e+00 : f32
    %89 = vector.broadcast %cst_47 : f32 to vector<10x128xf32>
    %90 = arith.subf %54, %89 : vector<10x128xf32>
    %91 = math.absf %90 : vector<10x128xf32>
    %cst_48 = arith.constant 1.000000e+00 : f32
    %92 = vector.broadcast %cst_48 : f32 to vector<10x128xf32>
    %93 = arith.subf %92, %91 : vector<10x128xf32>
    %cst_49 = arith.constant 0.000000e+00 : f32
    %94 = vector.broadcast %cst_49 : f32 to vector<10x128xf32>
    %95 = arith.maximumf %93, %94 : vector<10x128xf32>
    %cst_50 = arith.constant 7.000000e+00 : f32
    %96 = vector.broadcast %cst_50 : f32 to vector<10x128xf32>
    %97 = arith.subf %54, %96 : vector<10x128xf32>
    %98 = math.absf %97 : vector<10x128xf32>
    %cst_51 = arith.constant 1.000000e+00 : f32
    %99 = vector.broadcast %cst_51 : f32 to vector<10x128xf32>
    %100 = arith.subf %99, %98 : vector<10x128xf32>
    %cst_52 = arith.constant 0.000000e+00 : f32
    %101 = vector.broadcast %cst_52 : f32 to vector<10x128xf32>
    %102 = arith.maximumf %100, %101 : vector<10x128xf32>
    %cst_53 = arith.constant 8.000000e+00 : f32
    %103 = vector.broadcast %cst_53 : f32 to vector<10x128xf32>
    %104 = arith.subf %54, %103 : vector<10x128xf32>
    %105 = math.absf %104 : vector<10x128xf32>
    %cst_54 = arith.constant 1.000000e+00 : f32
    %106 = vector.broadcast %cst_54 : f32 to vector<10x128xf32>
    %107 = arith.subf %106, %105 : vector<10x128xf32>
    %cst_55 = arith.constant 0.000000e+00 : f32
    %108 = vector.broadcast %cst_55 : f32 to vector<10x128xf32>
    %109 = arith.maximumf %107, %108 : vector<10x128xf32>
    %cst_56 = arith.constant 2.000000e+00 : f32
    %110 = vector.broadcast %cst_56 : f32 to vector<10x128xf32>
    %111 = arith.subf %60, %110 : vector<10x128xf32>
    %112 = math.absf %111 : vector<10x128xf32>
    %cst_57 = arith.constant 1.000000e+00 : f32
    %113 = vector.broadcast %cst_57 : f32 to vector<10x128xf32>
    %114 = arith.subf %113, %112 : vector<10x128xf32>
    %cst_58 = arith.constant 0.000000e+00 : f32
    %115 = vector.broadcast %cst_58 : f32 to vector<10x128xf32>
    %116 = arith.maximumf %114, %115 : vector<10x128xf32>
    %cst_59 = arith.constant 3.000000e+00 : f32
    %117 = vector.broadcast %cst_59 : f32 to vector<10x128xf32>
    %118 = arith.subf %60, %117 : vector<10x128xf32>
    %119 = math.absf %118 : vector<10x128xf32>
    %cst_60 = arith.constant 1.000000e+00 : f32
    %120 = vector.broadcast %cst_60 : f32 to vector<10x128xf32>
    %121 = arith.subf %120, %119 : vector<10x128xf32>
    %cst_61 = arith.constant 0.000000e+00 : f32
    %122 = vector.broadcast %cst_61 : f32 to vector<10x128xf32>
    %123 = arith.maximumf %121, %122 : vector<10x128xf32>
    %cst_62 = arith.constant 4.000000e+00 : f32
    %124 = vector.broadcast %cst_62 : f32 to vector<10x128xf32>
    %125 = arith.subf %60, %124 : vector<10x128xf32>
    %126 = math.absf %125 : vector<10x128xf32>
    %cst_63 = arith.constant 1.000000e+00 : f32
    %127 = vector.broadcast %cst_63 : f32 to vector<10x128xf32>
    %128 = arith.subf %127, %126 : vector<10x128xf32>
    %cst_64 = arith.constant 0.000000e+00 : f32
    %129 = vector.broadcast %cst_64 : f32 to vector<10x128xf32>
    %130 = arith.maximumf %128, %129 : vector<10x128xf32>
    %cst_65 = arith.constant 5.000000e+00 : f32
    %131 = vector.broadcast %cst_65 : f32 to vector<10x128xf32>
    %132 = arith.subf %60, %131 : vector<10x128xf32>
    %133 = math.absf %132 : vector<10x128xf32>
    %cst_66 = arith.constant 1.000000e+00 : f32
    %134 = vector.broadcast %cst_66 : f32 to vector<10x128xf32>
    %135 = arith.subf %134, %133 : vector<10x128xf32>
    %cst_67 = arith.constant 0.000000e+00 : f32
    %136 = vector.broadcast %cst_67 : f32 to vector<10x128xf32>
    %137 = arith.maximumf %135, %136 : vector<10x128xf32>
    %cst_68 = arith.constant 6.000000e+00 : f32
    %138 = vector.broadcast %cst_68 : f32 to vector<10x128xf32>
    %139 = arith.subf %60, %138 : vector<10x128xf32>
    %140 = math.absf %139 : vector<10x128xf32>
    %cst_69 = arith.constant 1.000000e+00 : f32
    %141 = vector.broadcast %cst_69 : f32 to vector<10x128xf32>
    %142 = arith.subf %141, %140 : vector<10x128xf32>
    %cst_70 = arith.constant 0.000000e+00 : f32
    %143 = vector.broadcast %cst_70 : f32 to vector<10x128xf32>
    %144 = arith.maximumf %142, %143 : vector<10x128xf32>
    %cst_71 = arith.constant 7.000000e+00 : f32
    %145 = vector.broadcast %cst_71 : f32 to vector<10x128xf32>
    %146 = arith.subf %60, %145 : vector<10x128xf32>
    %147 = math.absf %146 : vector<10x128xf32>
    %cst_72 = arith.constant 1.000000e+00 : f32
    %148 = vector.broadcast %cst_72 : f32 to vector<10x128xf32>
    %149 = arith.subf %148, %147 : vector<10x128xf32>
    %cst_73 = arith.constant 0.000000e+00 : f32
    %150 = vector.broadcast %cst_73 : f32 to vector<10x128xf32>
    %151 = arith.maximumf %149, %150 : vector<10x128xf32>
    %cst_74 = arith.constant 8.000000e+00 : f32
    %152 = vector.broadcast %cst_74 : f32 to vector<10x128xf32>
    %153 = arith.subf %60, %152 : vector<10x128xf32>
    %154 = math.absf %153 : vector<10x128xf32>
    %cst_75 = arith.constant 1.000000e+00 : f32
    %155 = vector.broadcast %cst_75 : f32 to vector<10x128xf32>
    %156 = arith.subf %155, %154 : vector<10x128xf32>
    %cst_76 = arith.constant 0.000000e+00 : f32
    %157 = vector.broadcast %cst_76 : f32 to vector<10x128xf32>
    %158 = arith.maximumf %156, %157 : vector<10x128xf32>
    %c1_77 = arith.constant 1 : index
    %c0_78 = arith.constant 0 : index
    %c0_79 = arith.constant 0 : index
    %159 = vector.load %arg1[%c1_77, %c0_78, %c0_79] : memref<2x8x128xf32, #tpu.memory_space<vmem>>, vector<1x8x128xf32>
    %160 = vector.shape_cast %159 : vector<1x8x128xf32> to vector<8x128xf32>
    %cst_80 = arith.constant dense<0.000000e+00> : vector<32x128xf32>
    %161 = tpu.matmul %8, %160, %cst_80 {dimension_numbers = #tpu.dot_dimension_numbers<[1], [0], [0], [1], [0, 0, 1, 1], [], []>} : vector<32x8xf32>, vector<8x128xf32>, vector<32x128xf32> -> vector<32x128xf32>
    %162 = vector.broadcast %9 : vector<32x1xf32> to vector<32x128xf32>
    %163 = arith.addf %161, %162 : vector<32x128xf32>
    %cst_81 = arith.constant 0.000000e+00 : f32
    %164 = vector.broadcast %cst_81 : f32 to vector<32x128xf32>
    %165 = arith.maximumf %163, %164 : vector<32x128xf32>
    %cst_82 = arith.constant dense<0.000000e+00> : vector<128x128xf32>
    %166 = tpu.matmul %10, %165, %cst_82 {dimension_numbers = #tpu.dot_dimension_numbers<[1], [0], [0], [1], [0, 0, 1, 1], [], []>} : vector<128x32xf32>, vector<32x128xf32>, vector<128x128xf32> -> vector<128x128xf32>
    %167 = vector.broadcast %11 : vector<128x1xf32> to vector<128x128xf32>
    %168 = arith.addf %166, %167 : vector<128x128xf32>
    %cst_83 = arith.constant 0.000000e+00 : f32
    %169 = vector.broadcast %cst_83 : f32 to vector<128x128xf32>
    %170 = arith.maximumf %168, %169 : vector<128x128xf32>
    %c1_84 = arith.constant 1 : index
    %c0_85 = arith.constant 0 : index
    %171 = vector.load %arg3[%c1_84, %c0_85] : memref<2x128xf32, #tpu.memory_space<vmem>>, vector<1x128xf32>
    %cst_86 = arith.constant 1.000000e+00 : f32
    %172 = vector.broadcast %cst_86 : f32 to vector<1x128xf32>
    %173 = arith.cmpf oeq, %171, %172 : vector<1x128xf32>
    %cst_87 = arith.constant 0.000000e+00 : f32
    %174 = vector.broadcast %cst_87 : f32 to vector<1x128xf32>
    %175 = arith.select %173, %171, %174 : vector<1x128xi1>, vector<1x128xf32>
    %176 = vector.broadcast %175 : vector<1x128xf32> to vector<128x128xf32>
    %177 = arith.mulf %170, %176 : vector<128x128xf32>
    %c2 = arith.constant 2 : index
    %c0_88 = arith.constant 0 : index
    %178 = vector.load %arg2[%c2, %c0_88] : memref<4x128xf32, #tpu.memory_space<vmem>>, vector<1x128xf32>
    %c3 = arith.constant 3 : index
    %c0_89 = arith.constant 0 : index
    %179 = vector.load %arg2[%c3, %c0_89] : memref<4x128xf32, #tpu.memory_space<vmem>>, vector<1x128xf32>
    %cst_90 = arith.constant 2.000000e-01 : f32
    %180 = vector.broadcast %cst_90 : f32 to vector<1x128xf32>
    %181 = arith.mulf %178, %180 : vector<1x128xf32>
    %cst_91 = arith.constant 4.000000e-01 : f32
    %182 = vector.broadcast %cst_91 : f32 to vector<1x128xf32>
    %183 = arith.addf %181, %182 : vector<1x128xf32>
    %cst_92 = arith.constant 5.000000e-01 : f32
    %184 = vector.broadcast %cst_92 : f32 to vector<1x128xf32>
    %185 = arith.subf %183, %184 : vector<1x128xf32>
    %cst_93 = arith.constant 2.000000e+00 : f32
    %186 = vector.broadcast %cst_93 : f32 to vector<1x128xf32>
    %187 = arith.mulf %185, %186 : vector<1x128xf32>
    %cst_94 = arith.constant 2.000000e-01 : f32
    %188 = vector.broadcast %cst_94 : f32 to vector<1x128xf32>
    %189 = arith.mulf %179, %188 : vector<1x128xf32>
    %cst_95 = arith.constant 4.000000e-01 : f32
    %190 = vector.broadcast %cst_95 : f32 to vector<1x128xf32>
    %191 = arith.addf %189, %190 : vector<1x128xf32>
    %cst_96 = arith.constant 5.000000e-01 : f32
    %192 = vector.broadcast %cst_96 : f32 to vector<1x128xf32>
    %193 = arith.subf %191, %192 : vector<1x128xf32>
    %cst_97 = arith.constant 2.000000e+00 : f32
    %194 = vector.broadcast %cst_97 : f32 to vector<1x128xf32>
    %195 = arith.mulf %193, %194 : vector<1x128xf32>
    %196 = vector.broadcast %187 : vector<1x128xf32> to vector<10x128xf32>
    %197 = arith.subf %7, %196 : vector<10x128xf32>
    %cst_98 = arith.constant 1.000000e+00 : f32
    %198 = vector.broadcast %cst_98 : f32 to vector<10x128xf32>
    %199 = arith.addf %197, %198 : vector<10x128xf32>
    %cst_99 = arith.constant 5.000000e+00 : f32
    %200 = vector.broadcast %cst_99 : f32 to vector<10x128xf32>
    %201 = arith.mulf %199, %200 : vector<10x128xf32>
    %202 = vector.broadcast %195 : vector<1x128xf32> to vector<10x128xf32>
    %203 = arith.subf %7, %202 : vector<10x128xf32>
    %cst_100 = arith.constant 1.000000e+00 : f32
    %204 = vector.broadcast %cst_100 : f32 to vector<10x128xf32>
    %205 = arith.addf %203, %204 : vector<10x128xf32>
    %cst_101 = arith.constant 5.000000e+00 : f32
    %206 = vector.broadcast %cst_101 : f32 to vector<10x128xf32>
    %207 = arith.mulf %205, %206 : vector<10x128xf32>
    %cst_102 = arith.constant 2.000000e+00 : f32
    %208 = vector.broadcast %cst_102 : f32 to vector<10x128xf32>
    %209 = arith.subf %201, %208 : vector<10x128xf32>
    %210 = math.absf %209 : vector<10x128xf32>
    %cst_103 = arith.constant 1.000000e+00 : f32
    %211 = vector.broadcast %cst_103 : f32 to vector<10x128xf32>
    %212 = arith.subf %211, %210 : vector<10x128xf32>
    %cst_104 = arith.constant 0.000000e+00 : f32
    %213 = vector.broadcast %cst_104 : f32 to vector<10x128xf32>
    %214 = arith.maximumf %212, %213 : vector<10x128xf32>
    %cst_105 = arith.constant 3.000000e+00 : f32
    %215 = vector.broadcast %cst_105 : f32 to vector<10x128xf32>
    %216 = arith.subf %201, %215 : vector<10x128xf32>
    %217 = math.absf %216 : vector<10x128xf32>
    %cst_106 = arith.constant 1.000000e+00 : f32
    %218 = vector.broadcast %cst_106 : f32 to vector<10x128xf32>
    %219 = arith.subf %218, %217 : vector<10x128xf32>
    %cst_107 = arith.constant 0.000000e+00 : f32
    %220 = vector.broadcast %cst_107 : f32 to vector<10x128xf32>
    %221 = arith.maximumf %219, %220 : vector<10x128xf32>
    %cst_108 = arith.constant 4.000000e+00 : f32
    %222 = vector.broadcast %cst_108 : f32 to vector<10x128xf32>
    %223 = arith.subf %201, %222 : vector<10x128xf32>
    %224 = math.absf %223 : vector<10x128xf32>
    %cst_109 = arith.constant 1.000000e+00 : f32
    %225 = vector.broadcast %cst_109 : f32 to vector<10x128xf32>
    %226 = arith.subf %225, %224 : vector<10x128xf32>
    %cst_110 = arith.constant 0.000000e+00 : f32
    %227 = vector.broadcast %cst_110 : f32 to vector<10x128xf32>
    %228 = arith.maximumf %226, %227 : vector<10x128xf32>
    %cst_111 = arith.constant 5.000000e+00 : f32
    %229 = vector.broadcast %cst_111 : f32 to vector<10x128xf32>
    %230 = arith.subf %201, %229 : vector<10x128xf32>
    %231 = math.absf %230 : vector<10x128xf32>
    %cst_112 = arith.constant 1.000000e+00 : f32
    %232 = vector.broadcast %cst_112 : f32 to vector<10x128xf32>
    %233 = arith.subf %232, %231 : vector<10x128xf32>
    %cst_113 = arith.constant 0.000000e+00 : f32
    %234 = vector.broadcast %cst_113 : f32 to vector<10x128xf32>
    %235 = arith.maximumf %233, %234 : vector<10x128xf32>
    %cst_114 = arith.constant 6.000000e+00 : f32
    %236 = vector.broadcast %cst_114 : f32 to vector<10x128xf32>
    %237 = arith.subf %201, %236 : vector<10x128xf32>
    %238 = math.absf %237 : vector<10x128xf32>
    %cst_115 = arith.constant 1.000000e+00 : f32
    %239 = vector.broadcast %cst_115 : f32 to vector<10x128xf32>
    %240 = arith.subf %239, %238 : vector<10x128xf32>
    %cst_116 = arith.constant 0.000000e+00 : f32
    %241 = vector.broadcast %cst_116 : f32 to vector<10x128xf32>
    %242 = arith.maximumf %240, %241 : vector<10x128xf32>
    %cst_117 = arith.constant 7.000000e+00 : f32
    %243 = vector.broadcast %cst_117 : f32 to vector<10x128xf32>
    %244 = arith.subf %201, %243 : vector<10x128xf32>
    %245 = math.absf %244 : vector<10x128xf32>
    %cst_118 = arith.constant 1.000000e+00 : f32
    %246 = vector.broadcast %cst_118 : f32 to vector<10x128xf32>
    %247 = arith.subf %246, %245 : vector<10x128xf32>
    %cst_119 = arith.constant 0.000000e+00 : f32
    %248 = vector.broadcast %cst_119 : f32 to vector<10x128xf32>
    %249 = arith.maximumf %247, %248 : vector<10x128xf32>
    %cst_120 = arith.constant 8.000000e+00 : f32
    %250 = vector.broadcast %cst_120 : f32 to vector<10x128xf32>
    %251 = arith.subf %201, %250 : vector<10x128xf32>
    %252 = math.absf %251 : vector<10x128xf32>
    %cst_121 = arith.constant 1.000000e+00 : f32
    %253 = vector.broadcast %cst_121 : f32 to vector<10x128xf32>
    %254 = arith.subf %253, %252 : vector<10x128xf32>
    %cst_122 = arith.constant 0.000000e+00 : f32
    %255 = vector.broadcast %cst_122 : f32 to vector<10x128xf32>
    %256 = arith.maximumf %254, %255 : vector<10x128xf32>
    %cst_123 = arith.constant 2.000000e+00 : f32
    %257 = vector.broadcast %cst_123 : f32 to vector<10x128xf32>
    %258 = arith.subf %207, %257 : vector<10x128xf32>
    %259 = math.absf %258 : vector<10x128xf32>
    %cst_124 = arith.constant 1.000000e+00 : f32
    %260 = vector.broadcast %cst_124 : f32 to vector<10x128xf32>
    %261 = arith.subf %260, %259 : vector<10x128xf32>
    %cst_125 = arith.constant 0.000000e+00 : f32
    %262 = vector.broadcast %cst_125 : f32 to vector<10x128xf32>
    %263 = arith.maximumf %261, %262 : vector<10x128xf32>
    %cst_126 = arith.constant 3.000000e+00 : f32
    %264 = vector.broadcast %cst_126 : f32 to vector<10x128xf32>
    %265 = arith.subf %207, %264 : vector<10x128xf32>
    %266 = math.absf %265 : vector<10x128xf32>
    %cst_127 = arith.constant 1.000000e+00 : f32
    %267 = vector.broadcast %cst_127 : f32 to vector<10x128xf32>
    %268 = arith.subf %267, %266 : vector<10x128xf32>
    %cst_128 = arith.constant 0.000000e+00 : f32
    %269 = vector.broadcast %cst_128 : f32 to vector<10x128xf32>
    %270 = arith.maximumf %268, %269 : vector<10x128xf32>
    %cst_129 = arith.constant 4.000000e+00 : f32
    %271 = vector.broadcast %cst_129 : f32 to vector<10x128xf32>
    %272 = arith.subf %207, %271 : vector<10x128xf32>
    %273 = math.absf %272 : vector<10x128xf32>
    %cst_130 = arith.constant 1.000000e+00 : f32
    %274 = vector.broadcast %cst_130 : f32 to vector<10x128xf32>
    %275 = arith.subf %274, %273 : vector<10x128xf32>
    %cst_131 = arith.constant 0.000000e+00 : f32
    %276 = vector.broadcast %cst_131 : f32 to vector<10x128xf32>
    %277 = arith.maximumf %275, %276 : vector<10x128xf32>
    %cst_132 = arith.constant 5.000000e+00 : f32
    %278 = vector.broadcast %cst_132 : f32 to vector<10x128xf32>
    %279 = arith.subf %207, %278 : vector<10x128xf32>
    %280 = math.absf %279 : vector<10x128xf32>
    %cst_133 = arith.constant 1.000000e+00 : f32
    %281 = vector.broadcast %cst_133 : f32 to vector<10x128xf32>
    %282 = arith.subf %281, %280 : vector<10x128xf32>
    %cst_134 = arith.constant 0.000000e+00 : f32
    %283 = vector.broadcast %cst_134 : f32 to vector<10x128xf32>
    %284 = arith.maximumf %282, %283 : vector<10x128xf32>
    %cst_135 = arith.constant 6.000000e+00 : f32
    %285 = vector.broadcast %cst_135 : f32 to vector<10x128xf32>
    %286 = arith.subf %207, %285 : vector<10x128xf32>
    %287 = math.absf %286 : vector<10x128xf32>
    %cst_136 = arith.constant 1.000000e+00 : f32
    %288 = vector.broadcast %cst_136 : f32 to vector<10x128xf32>
    %289 = arith.subf %288, %287 : vector<10x128xf32>
    %cst_137 = arith.constant 0.000000e+00 : f32
    %290 = vector.broadcast %cst_137 : f32 to vector<10x128xf32>
    %291 = arith.maximumf %289, %290 : vector<10x128xf32>
    %cst_138 = arith.constant 7.000000e+00 : f32
    %292 = vector.broadcast %cst_138 : f32 to vector<10x128xf32>
    %293 = arith.subf %207, %292 : vector<10x128xf32>
    %294 = math.absf %293 : vector<10x128xf32>
    %cst_139 = arith.constant 1.000000e+00 : f32
    %295 = vector.broadcast %cst_139 : f32 to vector<10x128xf32>
    %296 = arith.subf %295, %294 : vector<10x128xf32>
    %cst_140 = arith.constant 0.000000e+00 : f32
    %297 = vector.broadcast %cst_140 : f32 to vector<10x128xf32>
    %298 = arith.maximumf %296, %297 : vector<10x128xf32>
    %cst_141 = arith.constant 8.000000e+00 : f32
    %299 = vector.broadcast %cst_141 : f32 to vector<10x128xf32>
    %300 = arith.subf %207, %299 : vector<10x128xf32>
    %301 = math.absf %300 : vector<10x128xf32>
    %cst_142 = arith.constant 1.000000e+00 : f32
    %302 = vector.broadcast %cst_142 : f32 to vector<10x128xf32>
    %303 = arith.subf %302, %301 : vector<10x128xf32>
    %cst_143 = arith.constant 0.000000e+00 : f32
    %304 = vector.broadcast %cst_143 : f32 to vector<10x128xf32>
    %305 = arith.maximumf %303, %304 : vector<10x128xf32>
    %cst_144 = arith.constant 0.000000e+00 : f32
    %306 = vector.broadcast %cst_144 : f32 to vector<10x10x128xf32>
    %cst_145 = arith.constant 0.000000e+00 : f32
    %307 = vector.broadcast %cst_145 : f32 to vector<7x10x128xf32>
    %308 = vector.extract_strided_slice %30 {offsets = [0, 0], sizes = [7, 128], strides = [1, 1]} : vector<128x128xf32> to vector<7x128xf32>
    %309 = vector.shape_cast %308 : vector<7x128xf32> to vector<7x1x128xf32>
    %310 = vector.shape_cast %67 : vector<10x128xf32> to vector<1x10x128xf32>
    %311 = vector.broadcast %309 : vector<7x1x128xf32> to vector<7x10x128xf32>
    %312 = vector.broadcast %310 : vector<1x10x128xf32> to vector<7x10x128xf32>
    %313 = arith.mulf %311, %312 : vector<7x10x128xf32>
    %314 = arith.addf %307, %313 : vector<7x10x128xf32>
    %315 = vector.extract_strided_slice %30 {offsets = [8, 0], sizes = [7, 128], strides = [1, 1]} : vector<128x128xf32> to vector<7x128xf32>
    %316 = vector.shape_cast %315 : vector<7x128xf32> to vector<7x1x128xf32>
    %317 = vector.shape_cast %74 : vector<10x128xf32> to vector<1x10x128xf32>
    %318 = vector.broadcast %316 : vector<7x1x128xf32> to vector<7x10x128xf32>
    %319 = vector.broadcast %317 : vector<1x10x128xf32> to vector<7x10x128xf32>
    %320 = arith.mulf %318, %319 : vector<7x10x128xf32>
    %321 = arith.addf %314, %320 : vector<7x10x128xf32>
    %322 = vector.extract_strided_slice %30 {offsets = [16, 0], sizes = [7, 128], strides = [1, 1]} : vector<128x128xf32> to vector<7x128xf32>
    %323 = vector.shape_cast %322 : vector<7x128xf32> to vector<7x1x128xf32>
    %324 = vector.shape_cast %81 : vector<10x128xf32> to vector<1x10x128xf32>
    %325 = vector.broadcast %323 : vector<7x1x128xf32> to vector<7x10x128xf32>
    %326 = vector.broadcast %324 : vector<1x10x128xf32> to vector<7x10x128xf32>
    %327 = arith.mulf %325, %326 : vector<7x10x128xf32>
    %328 = arith.addf %321, %327 : vector<7x10x128xf32>
    %329 = vector.extract_strided_slice %30 {offsets = [24, 0], sizes = [7, 128], strides = [1, 1]} : vector<128x128xf32> to vector<7x128xf32>
    %330 = vector.shape_cast %329 : vector<7x128xf32> to vector<7x1x128xf32>
    %331 = vector.shape_cast %88 : vector<10x128xf32> to vector<1x10x128xf32>
    %332 = vector.broadcast %330 : vector<7x1x128xf32> to vector<7x10x128xf32>
    %333 = vector.broadcast %331 : vector<1x10x128xf32> to vector<7x10x128xf32>
    %334 = arith.mulf %332, %333 : vector<7x10x128xf32>
    %335 = arith.addf %328, %334 : vector<7x10x128xf32>
    %336 = vector.extract_strided_slice %30 {offsets = [32, 0], sizes = [7, 128], strides = [1, 1]} : vector<128x128xf32> to vector<7x128xf32>
    %337 = vector.shape_cast %336 : vector<7x128xf32> to vector<7x1x128xf32>
    %338 = vector.shape_cast %95 : vector<10x128xf32> to vector<1x10x128xf32>
    %339 = vector.broadcast %337 : vector<7x1x128xf32> to vector<7x10x128xf32>
    %340 = vector.broadcast %338 : vector<1x10x128xf32> to vector<7x10x128xf32>
    %341 = arith.mulf %339, %340 : vector<7x10x128xf32>
    %342 = arith.addf %335, %341 : vector<7x10x128xf32>
    %343 = vector.extract_strided_slice %30 {offsets = [40, 0], sizes = [7, 128], strides = [1, 1]} : vector<128x128xf32> to vector<7x128xf32>
    %344 = vector.shape_cast %343 : vector<7x128xf32> to vector<7x1x128xf32>
    %345 = vector.shape_cast %102 : vector<10x128xf32> to vector<1x10x128xf32>
    %346 = vector.broadcast %344 : vector<7x1x128xf32> to vector<7x10x128xf32>
    %347 = vector.broadcast %345 : vector<1x10x128xf32> to vector<7x10x128xf32>
    %348 = arith.mulf %346, %347 : vector<7x10x128xf32>
    %349 = arith.addf %342, %348 : vector<7x10x128xf32>
    %350 = vector.extract_strided_slice %30 {offsets = [48, 0], sizes = [7, 128], strides = [1, 1]} : vector<128x128xf32> to vector<7x128xf32>
    %351 = vector.shape_cast %350 : vector<7x128xf32> to vector<7x1x128xf32>
    %352 = vector.shape_cast %109 : vector<10x128xf32> to vector<1x10x128xf32>
    %353 = vector.broadcast %351 : vector<7x1x128xf32> to vector<7x10x128xf32>
    %354 = vector.broadcast %352 : vector<1x10x128xf32> to vector<7x10x128xf32>
    %355 = arith.mulf %353, %354 : vector<7x10x128xf32>
    %356 = arith.addf %349, %355 : vector<7x10x128xf32>
    %357 = vector.extract_strided_slice %356 {offsets = [0, 0, 0], sizes = [1, 10, 128], strides = [1, 1, 1]} : vector<7x10x128xf32> to vector<1x10x128xf32>
    %358 = vector.shape_cast %357 : vector<1x10x128xf32> to vector<10x128xf32>
    %359 = vector.shape_cast %358 : vector<10x128xf32> to vector<10x1x128xf32>
    %360 = vector.shape_cast %116 : vector<10x128xf32> to vector<1x10x128xf32>
    %361 = vector.broadcast %359 : vector<10x1x128xf32> to vector<10x10x128xf32>
    %362 = vector.broadcast %360 : vector<1x10x128xf32> to vector<10x10x128xf32>
    %363 = arith.mulf %361, %362 : vector<10x10x128xf32>
    %364 = arith.addf %306, %363 : vector<10x10x128xf32>
    %365 = vector.extract_strided_slice %356 {offsets = [1, 0, 0], sizes = [1, 10, 128], strides = [1, 1, 1]} : vector<7x10x128xf32> to vector<1x10x128xf32>
    %366 = vector.shape_cast %365 : vector<1x10x128xf32> to vector<10x128xf32>
    %367 = vector.shape_cast %366 : vector<10x128xf32> to vector<10x1x128xf32>
    %368 = vector.shape_cast %123 : vector<10x128xf32> to vector<1x10x128xf32>
    %369 = vector.broadcast %367 : vector<10x1x128xf32> to vector<10x10x128xf32>
    %370 = vector.broadcast %368 : vector<1x10x128xf32> to vector<10x10x128xf32>
    %371 = arith.mulf %369, %370 : vector<10x10x128xf32>
    %372 = arith.addf %364, %371 : vector<10x10x128xf32>
    %373 = vector.extract_strided_slice %356 {offsets = [2, 0, 0], sizes = [1, 10, 128], strides = [1, 1, 1]} : vector<7x10x128xf32> to vector<1x10x128xf32>
    %374 = vector.shape_cast %373 : vector<1x10x128xf32> to vector<10x128xf32>
    %375 = vector.shape_cast %374 : vector<10x128xf32> to vector<10x1x128xf32>
    %376 = vector.shape_cast %130 : vector<10x128xf32> to vector<1x10x128xf32>
    %377 = vector.broadcast %375 : vector<10x1x128xf32> to vector<10x10x128xf32>
    %378 = vector.broadcast %376 : vector<1x10x128xf32> to vector<10x10x128xf32>
    %379 = arith.mulf %377, %378 : vector<10x10x128xf32>
    %380 = arith.addf %372, %379 : vector<10x10x128xf32>
    %381 = vector.extract_strided_slice %356 {offsets = [3, 0, 0], sizes = [1, 10, 128], strides = [1, 1, 1]} : vector<7x10x128xf32> to vector<1x10x128xf32>
    %382 = vector.shape_cast %381 : vector<1x10x128xf32> to vector<10x128xf32>
    %383 = vector.shape_cast %382 : vector<10x128xf32> to vector<10x1x128xf32>
    %384 = vector.shape_cast %137 : vector<10x128xf32> to vector<1x10x128xf32>
    %385 = vector.broadcast %383 : vector<10x1x128xf32> to vector<10x10x128xf32>
    %386 = vector.broadcast %384 : vector<1x10x128xf32> to vector<10x10x128xf32>
    %387 = arith.mulf %385, %386 : vector<10x10x128xf32>
    %388 = arith.addf %380, %387 : vector<10x10x128xf32>
    %389 = vector.extract_strided_slice %356 {offsets = [4, 0, 0], sizes = [1, 10, 128], strides = [1, 1, 1]} : vector<7x10x128xf32> to vector<1x10x128xf32>
    %390 = vector.shape_cast %389 : vector<1x10x128xf32> to vector<10x128xf32>
    %391 = vector.shape_cast %390 : vector<10x128xf32> to vector<10x1x128xf32>
    %392 = vector.shape_cast %144 : vector<10x128xf32> to vector<1x10x128xf32>
    %393 = vector.broadcast %391 : vector<10x1x128xf32> to vector<10x10x128xf32>
    %394 = vector.broadcast %392 : vector<1x10x128xf32> to vector<10x10x128xf32>
    %395 = arith.mulf %393, %394 : vector<10x10x128xf32>
    %396 = arith.addf %388, %395 : vector<10x10x128xf32>
    %397 = vector.extract_strided_slice %356 {offsets = [5, 0, 0], sizes = [1, 10, 128], strides = [1, 1, 1]} : vector<7x10x128xf32> to vector<1x10x128xf32>
    %398 = vector.shape_cast %397 : vector<1x10x128xf32> to vector<10x128xf32>
    %399 = vector.shape_cast %398 : vector<10x128xf32> to vector<10x1x128xf32>
    %400 = vector.shape_cast %151 : vector<10x128xf32> to vector<1x10x128xf32>
    %401 = vector.broadcast %399 : vector<10x1x128xf32> to vector<10x10x128xf32>
    %402 = vector.broadcast %400 : vector<1x10x128xf32> to vector<10x10x128xf32>
    %403 = arith.mulf %401, %402 : vector<10x10x128xf32>
    %404 = arith.addf %396, %403 : vector<10x10x128xf32>
    %405 = vector.extract_strided_slice %356 {offsets = [6, 0, 0], sizes = [1, 10, 128], strides = [1, 1, 1]} : vector<7x10x128xf32> to vector<1x10x128xf32>
    %406 = vector.shape_cast %405 : vector<1x10x128xf32> to vector<10x128xf32>
    %407 = vector.shape_cast %406 : vector<10x128xf32> to vector<10x1x128xf32>
    %408 = vector.shape_cast %158 : vector<10x128xf32> to vector<1x10x128xf32>
    %409 = vector.broadcast %407 : vector<10x1x128xf32> to vector<10x10x128xf32>
    %410 = vector.broadcast %408 : vector<1x10x128xf32> to vector<10x10x128xf32>
    %411 = arith.mulf %409, %410 : vector<10x10x128xf32>
    %412 = arith.addf %404, %411 : vector<10x10x128xf32>
    %cst_146 = arith.constant 0.000000e+00 : f32
    %413 = vector.broadcast %cst_146 : f32 to vector<7x10x128xf32>
    %414 = vector.extract_strided_slice %177 {offsets = [0, 0], sizes = [7, 128], strides = [1, 1]} : vector<128x128xf32> to vector<7x128xf32>
    %415 = vector.shape_cast %414 : vector<7x128xf32> to vector<7x1x128xf32>
    %416 = vector.shape_cast %214 : vector<10x128xf32> to vector<1x10x128xf32>
    %417 = vector.broadcast %415 : vector<7x1x128xf32> to vector<7x10x128xf32>
    %418 = vector.broadcast %416 : vector<1x10x128xf32> to vector<7x10x128xf32>
    %419 = arith.mulf %417, %418 : vector<7x10x128xf32>
    %420 = arith.addf %413, %419 : vector<7x10x128xf32>
    %421 = vector.extract_strided_slice %177 {offsets = [8, 0], sizes = [7, 128], strides = [1, 1]} : vector<128x128xf32> to vector<7x128xf32>
    %422 = vector.shape_cast %421 : vector<7x128xf32> to vector<7x1x128xf32>
    %423 = vector.shape_cast %221 : vector<10x128xf32> to vector<1x10x128xf32>
    %424 = vector.broadcast %422 : vector<7x1x128xf32> to vector<7x10x128xf32>
    %425 = vector.broadcast %423 : vector<1x10x128xf32> to vector<7x10x128xf32>
    %426 = arith.mulf %424, %425 : vector<7x10x128xf32>
    %427 = arith.addf %420, %426 : vector<7x10x128xf32>
    %428 = vector.extract_strided_slice %177 {offsets = [16, 0], sizes = [7, 128], strides = [1, 1]} : vector<128x128xf32> to vector<7x128xf32>
    %429 = vector.shape_cast %428 : vector<7x128xf32> to vector<7x1x128xf32>
    %430 = vector.shape_cast %228 : vector<10x128xf32> to vector<1x10x128xf32>
    %431 = vector.broadcast %429 : vector<7x1x128xf32> to vector<7x10x128xf32>
    %432 = vector.broadcast %430 : vector<1x10x128xf32> to vector<7x10x128xf32>
    %433 = arith.mulf %431, %432 : vector<7x10x128xf32>
    %434 = arith.addf %427, %433 : vector<7x10x128xf32>
    %435 = vector.extract_strided_slice %177 {offsets = [24, 0], sizes = [7, 128], strides = [1, 1]} : vector<128x128xf32> to vector<7x128xf32>
    %436 = vector.shape_cast %435 : vector<7x128xf32> to vector<7x1x128xf32>
    %437 = vector.shape_cast %235 : vector<10x128xf32> to vector<1x10x128xf32>
    %438 = vector.broadcast %436 : vector<7x1x128xf32> to vector<7x10x128xf32>
    %439 = vector.broadcast %437 : vector<1x10x128xf32> to vector<7x10x128xf32>
    %440 = arith.mulf %438, %439 : vector<7x10x128xf32>
    %441 = arith.addf %434, %440 : vector<7x10x128xf32>
    %442 = vector.extract_strided_slice %177 {offsets = [32, 0], sizes = [7, 128], strides = [1, 1]} : vector<128x128xf32> to vector<7x128xf32>
    %443 = vector.shape_cast %442 : vector<7x128xf32> to vector<7x1x128xf32>
    %444 = vector.shape_cast %242 : vector<10x128xf32> to vector<1x10x128xf32>
    %445 = vector.broadcast %443 : vector<7x1x128xf32> to vector<7x10x128xf32>
    %446 = vector.broadcast %444 : vector<1x10x128xf32> to vector<7x10x128xf32>
    %447 = arith.mulf %445, %446 : vector<7x10x128xf32>
    %448 = arith.addf %441, %447 : vector<7x10x128xf32>
    %449 = vector.extract_strided_slice %177 {offsets = [40, 0], sizes = [7, 128], strides = [1, 1]} : vector<128x128xf32> to vector<7x128xf32>
    %450 = vector.shape_cast %449 : vector<7x128xf32> to vector<7x1x128xf32>
    %451 = vector.shape_cast %249 : vector<10x128xf32> to vector<1x10x128xf32>
    %452 = vector.broadcast %450 : vector<7x1x128xf32> to vector<7x10x128xf32>
    %453 = vector.broadcast %451 : vector<1x10x128xf32> to vector<7x10x128xf32>
    %454 = arith.mulf %452, %453 : vector<7x10x128xf32>
    %455 = arith.addf %448, %454 : vector<7x10x128xf32>
    %456 = vector.extract_strided_slice %177 {offsets = [48, 0], sizes = [7, 128], strides = [1, 1]} : vector<128x128xf32> to vector<7x128xf32>
    %457 = vector.shape_cast %456 : vector<7x128xf32> to vector<7x1x128xf32>
    %458 = vector.shape_cast %256 : vector<10x128xf32> to vector<1x10x128xf32>
    %459 = vector.broadcast %457 : vector<7x1x128xf32> to vector<7x10x128xf32>
    %460 = vector.broadcast %458 : vector<1x10x128xf32> to vector<7x10x128xf32>
    %461 = arith.mulf %459, %460 : vector<7x10x128xf32>
    %462 = arith.addf %455, %461 : vector<7x10x128xf32>
    %463 = vector.extract_strided_slice %462 {offsets = [0, 0, 0], sizes = [1, 10, 128], strides = [1, 1, 1]} : vector<7x10x128xf32> to vector<1x10x128xf32>
    %464 = vector.shape_cast %463 : vector<1x10x128xf32> to vector<10x128xf32>
    %465 = vector.shape_cast %464 : vector<10x128xf32> to vector<10x1x128xf32>
    %466 = vector.shape_cast %263 : vector<10x128xf32> to vector<1x10x128xf32>
    %467 = vector.broadcast %465 : vector<10x1x128xf32> to vector<10x10x128xf32>
    %468 = vector.broadcast %466 : vector<1x10x128xf32> to vector<10x10x128xf32>
    %469 = arith.mulf %467, %468 : vector<10x10x128xf32>
    %470 = arith.addf %412, %469 : vector<10x10x128xf32>
    %471 = vector.extract_strided_slice %462 {offsets = [1, 0, 0], sizes = [1, 10, 128], strides = [1, 1, 1]} : vector<7x10x128xf32> to vector<1x10x128xf32>
    %472 = vector.shape_cast %471 : vector<1x10x128xf32> to vector<10x128xf32>
    %473 = vector.shape_cast %472 : vector<10x128xf32> to vector<10x1x128xf32>
    %474 = vector.shape_cast %270 : vector<10x128xf32> to vector<1x10x128xf32>
    %475 = vector.broadcast %473 : vector<10x1x128xf32> to vector<10x10x128xf32>
    %476 = vector.broadcast %474 : vector<1x10x128xf32> to vector<10x10x128xf32>
    %477 = arith.mulf %475, %476 : vector<10x10x128xf32>
    %478 = arith.addf %470, %477 : vector<10x10x128xf32>
    %479 = vector.extract_strided_slice %462 {offsets = [2, 0, 0], sizes = [1, 10, 128], strides = [1, 1, 1]} : vector<7x10x128xf32> to vector<1x10x128xf32>
    %480 = vector.shape_cast %479 : vector<1x10x128xf32> to vector<10x128xf32>
    %481 = vector.shape_cast %480 : vector<10x128xf32> to vector<10x1x128xf32>
    %482 = vector.shape_cast %277 : vector<10x128xf32> to vector<1x10x128xf32>
    %483 = vector.broadcast %481 : vector<10x1x128xf32> to vector<10x10x128xf32>
    %484 = vector.broadcast %482 : vector<1x10x128xf32> to vector<10x10x128xf32>
    %485 = arith.mulf %483, %484 : vector<10x10x128xf32>
    %486 = arith.addf %478, %485 : vector<10x10x128xf32>
    %487 = vector.extract_strided_slice %462 {offsets = [3, 0, 0], sizes = [1, 10, 128], strides = [1, 1, 1]} : vector<7x10x128xf32> to vector<1x10x128xf32>
    %488 = vector.shape_cast %487 : vector<1x10x128xf32> to vector<10x128xf32>
    %489 = vector.shape_cast %488 : vector<10x128xf32> to vector<10x1x128xf32>
    %490 = vector.shape_cast %284 : vector<10x128xf32> to vector<1x10x128xf32>
    %491 = vector.broadcast %489 : vector<10x1x128xf32> to vector<10x10x128xf32>
    %492 = vector.broadcast %490 : vector<1x10x128xf32> to vector<10x10x128xf32>
    %493 = arith.mulf %491, %492 : vector<10x10x128xf32>
    %494 = arith.addf %486, %493 : vector<10x10x128xf32>
    %495 = vector.extract_strided_slice %462 {offsets = [4, 0, 0], sizes = [1, 10, 128], strides = [1, 1, 1]} : vector<7x10x128xf32> to vector<1x10x128xf32>
    %496 = vector.shape_cast %495 : vector<1x10x128xf32> to vector<10x128xf32>
    %497 = vector.shape_cast %496 : vector<10x128xf32> to vector<10x1x128xf32>
    %498 = vector.shape_cast %291 : vector<10x128xf32> to vector<1x10x128xf32>
    %499 = vector.broadcast %497 : vector<10x1x128xf32> to vector<10x10x128xf32>
    %500 = vector.broadcast %498 : vector<1x10x128xf32> to vector<10x10x128xf32>
    %501 = arith.mulf %499, %500 : vector<10x10x128xf32>
    %502 = arith.addf %494, %501 : vector<10x10x128xf32>
    %503 = vector.extract_strided_slice %462 {offsets = [5, 0, 0], sizes = [1, 10, 128], strides = [1, 1, 1]} : vector<7x10x128xf32> to vector<1x10x128xf32>
    %504 = vector.shape_cast %503 : vector<1x10x128xf32> to vector<10x128xf32>
    %505 = vector.shape_cast %504 : vector<10x128xf32> to vector<10x1x128xf32>
    %506 = vector.shape_cast %298 : vector<10x128xf32> to vector<1x10x128xf32>
    %507 = vector.broadcast %505 : vector<10x1x128xf32> to vector<10x10x128xf32>
    %508 = vector.broadcast %506 : vector<1x10x128xf32> to vector<10x10x128xf32>
    %509 = arith.mulf %507, %508 : vector<10x10x128xf32>
    %510 = arith.addf %502, %509 : vector<10x10x128xf32>
    %511 = vector.extract_strided_slice %462 {offsets = [6, 0, 0], sizes = [1, 10, 128], strides = [1, 1, 1]} : vector<7x10x128xf32> to vector<1x10x128xf32>
    %512 = vector.shape_cast %511 : vector<1x10x128xf32> to vector<10x128xf32>
    %513 = vector.shape_cast %512 : vector<10x128xf32> to vector<10x1x128xf32>
    %514 = vector.shape_cast %305 : vector<10x128xf32> to vector<1x10x128xf32>
    %515 = vector.broadcast %513 : vector<10x1x128xf32> to vector<10x10x128xf32>
    %516 = vector.broadcast %514 : vector<1x10x128xf32> to vector<10x10x128xf32>
    %517 = arith.mulf %515, %516 : vector<10x10x128xf32>
    %518 = arith.addf %510, %517 : vector<10x10x128xf32>
    %c0_147 = arith.constant 0 : index
    %c0_148 = arith.constant 0 : index
    %c0_149 = arith.constant 0 : index
    %c0_150 = arith.constant 0 : index
    %519 = vector.load %arg8[%c0_147, %c0_148, %c0_149, %c0_150] : memref<2x10x10x128xf32, #tpu.memory_space<vmem>>, vector<1x10x10x128xf32>
    %520 = vector.shape_cast %519 : vector<1x10x10x128xf32> to vector<10x10x128xf32>
    %521 = vector.shape_cast %518 : vector<10x10x128xf32> to vector<1x10x10x128xf32>
    tpu.vector_store %arg8[%c0_147, %c0_148, %c0_149, %c0_150], %521 {strides = array<i32>} : memref<2x10x10x128xf32, #tpu.memory_space<vmem>>, vector<1x10x10x128xf32>,
    %cst_151 = arith.constant 0.000000e+00 : f32
    %522 = vector.broadcast %cst_151 : f32 to vector<10x10x128xf32>
    %cst_152 = arith.constant 0.000000e+00 : f32
    %523 = vector.broadcast %cst_152 : f32 to vector<7x10x128xf32>
    %524 = vector.extract_strided_slice %30 {offsets = [64, 0], sizes = [7, 128], strides = [1, 1]} : vector<128x128xf32> to vector<7x128xf32>
    %525 = vector.shape_cast %524 : vector<7x128xf32> to vector<7x1x128xf32>
    %526 = vector.shape_cast %67 : vector<10x128xf32> to vector<1x10x128xf32>
    %527 = vector.broadcast %525 : vector<7x1x128xf32> to vector<7x10x128xf32>
    %528 = vector.broadcast %526 : vector<1x10x128xf32> to vector<7x10x128xf32>
    %529 = arith.mulf %527, %528 : vector<7x10x128xf32>
    %530 = arith.addf %523, %529 : vector<7x10x128xf32>
    %531 = vector.extract_strided_slice %30 {offsets = [72, 0], sizes = [7, 128], strides = [1, 1]} : vector<128x128xf32> to vector<7x128xf32>
    %532 = vector.shape_cast %531 : vector<7x128xf32> to vector<7x1x128xf32>
    %533 = vector.shape_cast %74 : vector<10x128xf32> to vector<1x10x128xf32>
    %534 = vector.broadcast %532 : vector<7x1x128xf32> to vector<7x10x128xf32>
    %535 = vector.broadcast %533 : vector<1x10x128xf32> to vector<7x10x128xf32>
    %536 = arith.mulf %534, %535 : vector<7x10x128xf32>
    %537 = arith.addf %530, %536 : vector<7x10x128xf32>
    %538 = vector.extract_strided_slice %30 {offsets = [80, 0], sizes = [7, 128], strides = [1, 1]} : vector<128x128xf32> to vector<7x128xf32>
    %539 = vector.shape_cast %538 : vector<7x128xf32> to vector<7x1x128xf32>
    %540 = vector.shape_cast %81 : vector<10x128xf32> to vector<1x10x128xf32>
    %541 = vector.broadcast %539 : vector<7x1x128xf32> to vector<7x10x128xf32>
    %542 = vector.broadcast %540 : vector<1x10x128xf32> to vector<7x10x128xf32>
    %543 = arith.mulf %541, %542 : vector<7x10x128xf32>
    %544 = arith.addf %537, %543 : vector<7x10x128xf32>
    %545 = vector.extract_strided_slice %30 {offsets = [88, 0], sizes = [7, 128], strides = [1, 1]} : vector<128x128xf32> to vector<7x128xf32>
    %546 = vector.shape_cast %545 : vector<7x128xf32> to vector<7x1x128xf32>
    %547 = vector.shape_cast %88 : vector<10x128xf32> to vector<1x10x128xf32>
    %548 = vector.broadcast %546 : vector<7x1x128xf32> to vector<7x10x128xf32>
    %549 = vector.broadcast %547 : vector<1x10x128xf32> to vector<7x10x128xf32>
    %550 = arith.mulf %548, %549 : vector<7x10x128xf32>
    %551 = arith.addf %544, %550 : vector<7x10x128xf32>
    %552 = vector.extract_strided_slice %30 {offsets = [96, 0], sizes = [7, 128], strides = [1, 1]} : vector<128x128xf32> to vector<7x128xf32>
    %553 = vector.shape_cast %552 : vector<7x128xf32> to vector<7x1x128xf32>
    %554 = vector.shape_cast %95 : vector<10x128xf32> to vector<1x10x128xf32>
    %555 = vector.broadcast %553 : vector<7x1x128xf32> to vector<7x10x128xf32>
    %556 = vector.broadcast %554 : vector<1x10x128xf32> to vector<7x10x128xf32>
    %557 = arith.mulf %555, %556 : vector<7x10x128xf32>
    %558 = arith.addf %551, %557 : vector<7x10x128xf32>
    %559 = vector.extract_strided_slice %30 {offsets = [104, 0], sizes = [7, 128], strides = [1, 1]} : vector<128x128xf32> to vector<7x128xf32>
    %560 = vector.shape_cast %559 : vector<7x128xf32> to vector<7x1x128xf32>
    %561 = vector.shape_cast %102 : vector<10x128xf32> to vector<1x10x128xf32>
    %562 = vector.broadcast %560 : vector<7x1x128xf32> to vector<7x10x128xf32>
    %563 = vector.broadcast %561 : vector<1x10x128xf32> to vector<7x10x128xf32>
    %564 = arith.mulf %562, %563 : vector<7x10x128xf32>
    %565 = arith.addf %558, %564 : vector<7x10x128xf32>
    %566 = vector.extract_strided_slice %30 {offsets = [112, 0], sizes = [7, 128], strides = [1, 1]} : vector<128x128xf32> to vector<7x128xf32>
    %567 = vector.shape_cast %566 : vector<7x128xf32> to vector<7x1x128xf32>
    %568 = vector.shape_cast %109 : vector<10x128xf32> to vector<1x10x128xf32>
    %569 = vector.broadcast %567 : vector<7x1x128xf32> to vector<7x10x128xf32>
    %570 = vector.broadcast %568 : vector<1x10x128xf32> to vector<7x10x128xf32>
    %571 = arith.mulf %569, %570 : vector<7x10x128xf32>
    %572 = arith.addf %565, %571 : vector<7x10x128xf32>
    %573 = vector.extract_strided_slice %572 {offsets = [0, 0, 0], sizes = [1, 10, 128], strides = [1, 1, 1]} : vector<7x10x128xf32> to vector<1x10x128xf32>
    %574 = vector.shape_cast %573 : vector<1x10x128xf32> to vector<10x128xf32>
    %575 = vector.shape_cast %574 : vector<10x128xf32> to vector<10x1x128xf32>
    %576 = vector.shape_cast %116 : vector<10x128xf32> to vector<1x10x128xf32>
    %577 = vector.broadcast %575 : vector<10x1x128xf32> to vector<10x10x128xf32>
    %578 = vector.broadcast %576 : vector<1x10x128xf32> to vector<10x10x128xf32>
    %579 = arith.mulf %577, %578 : vector<10x10x128xf32>
    %580 = arith.addf %522, %579 : vector<10x10x128xf32>
    %581 = vector.extract_strided_slice %572 {offsets = [1, 0, 0], sizes = [1, 10, 128], strides = [1, 1, 1]} : vector<7x10x128xf32> to vector<1x10x128xf32>
    %582 = vector.shape_cast %581 : vector<1x10x128xf32> to vector<10x128xf32>
    %583 = vector.shape_cast %582 : vector<10x128xf32> to vector<10x1x128xf32>
    %584 = vector.shape_cast %123 : vector<10x128xf32> to vector<1x10x128xf32>
    %585 = vector.broadcast %583 : vector<10x1x128xf32> to vector<10x10x128xf32>
    %586 = vector.broadcast %584 : vector<1x10x128xf32> to vector<10x10x128xf32>
    %587 = arith.mulf %585, %586 : vector<10x10x128xf32>
    %588 = arith.addf %580, %587 : vector<10x10x128xf32>
    %589 = vector.extract_strided_slice %572 {offsets = [2, 0, 0], sizes = [1, 10, 128], strides = [1, 1, 1]} : vector<7x10x128xf32> to vector<1x10x128xf32>
    %590 = vector.shape_cast %589 : vector<1x10x128xf32> to vector<10x128xf32>
    %591 = vector.shape_cast %590 : vector<10x128xf32> to vector<10x1x128xf32>
    %592 = vector.shape_cast %130 : vector<10x128xf32> to vector<1x10x128xf32>
    %593 = vector.broadcast %591 : vector<10x1x128xf32> to vector<10x10x128xf32>
    %594 = vector.broadcast %592 : vector<1x10x128xf32> to vector<10x10x128xf32>
    %595 = arith.mulf %593, %594 : vector<10x10x128xf32>
    %596 = arith.addf %588, %595 : vector<10x10x128xf32>
    %597 = vector.extract_strided_slice %572 {offsets = [3, 0, 0], sizes = [1, 10, 128], strides = [1, 1, 1]} : vector<7x10x128xf32> to vector<1x10x128xf32>
    %598 = vector.shape_cast %597 : vector<1x10x128xf32> to vector<10x128xf32>
    %599 = vector.shape_cast %598 : vector<10x128xf32> to vector<10x1x128xf32>
    %600 = vector.shape_cast %137 : vector<10x128xf32> to vector<1x10x128xf32>
    %601 = vector.broadcast %599 : vector<10x1x128xf32> to vector<10x10x128xf32>
    %602 = vector.broadcast %600 : vector<1x10x128xf32> to vector<10x10x128xf32>
    %603 = arith.mulf %601, %602 : vector<10x10x128xf32>
    %604 = arith.addf %596, %603 : vector<10x10x128xf32>
    %605 = vector.extract_strided_slice %572 {offsets = [4, 0, 0], sizes = [1, 10, 128], strides = [1, 1, 1]} : vector<7x10x128xf32> to vector<1x10x128xf32>
    %606 = vector.shape_cast %605 : vector<1x10x128xf32> to vector<10x128xf32>
    %607 = vector.shape_cast %606 : vector<10x128xf32> to vector<10x1x128xf32>
    %608 = vector.shape_cast %144 : vector<10x128xf32> to vector<1x10x128xf32>
    %609 = vector.broadcast %607 : vector<10x1x128xf32> to vector<10x10x128xf32>
    %610 = vector.broadcast %608 : vector<1x10x128xf32> to vector<10x10x128xf32>
    %611 = arith.mulf %609, %610 : vector<10x10x128xf32>
    %612 = arith.addf %604, %611 : vector<10x10x128xf32>
    %613 = vector.extract_strided_slice %572 {offsets = [5, 0, 0], sizes = [1, 10, 128], strides = [1, 1, 1]} : vector<7x10x128xf32> to vector<1x10x128xf32>
    %614 = vector.shape_cast %613 : vector<1x10x128xf32> to vector<10x128xf32>
    %615 = vector.shape_cast %614 : vector<10x128xf32> to vector<10x1x128xf32>
    %616 = vector.shape_cast %151 : vector<10x128xf32> to vector<1x10x128xf32>
    %617 = vector.broadcast %615 : vector<10x1x128xf32> to vector<10x10x128xf32>
    %618 = vector.broadcast %616 : vector<1x10x128xf32> to vector<10x10x128xf32>
    %619 = arith.mulf %617, %618 : vector<10x10x128xf32>
    %620 = arith.addf %612, %619 : vector<10x10x128xf32>
    %621 = vector.extract_strided_slice %572 {offsets = [6, 0, 0], sizes = [1, 10, 128], strides = [1, 1, 1]} : vector<7x10x128xf32> to vector<1x10x128xf32>
    %622 = vector.shape_cast %621 : vector<1x10x128xf32> to vector<10x128xf32>
    %623 = vector.shape_cast %622 : vector<10x128xf32> to vector<10x1x128xf32>
    %624 = vector.shape_cast %158 : vector<10x128xf32> to vector<1x10x128xf32>
    %625 = vector.broadcast %623 : vector<10x1x128xf32> to vector<10x10x128xf32>
    %626 = vector.broadcast %624 : vector<1x10x128xf32> to vector<10x10x128xf32>
    %627 = arith.mulf %625, %626 : vector<10x10x128xf32>
    %628 = arith.addf %620, %627 : vector<10x10x128xf32>
    %cst_153 = arith.constant 0.000000e+00 : f32
    %629 = vector.broadcast %cst_153 : f32 to vector<7x10x128xf32>
    %630 = vector.extract_strided_slice %177 {offsets = [64, 0], sizes = [7, 128], strides = [1, 1]} : vector<128x128xf32> to vector<7x128xf32>
    %631 = vector.shape_cast %630 : vector<7x128xf32> to vector<7x1x128xf32>
    %632 = vector.shape_cast %214 : vector<10x128xf32> to vector<1x10x128xf32>
    %633 = vector.broadcast %631 : vector<7x1x128xf32> to vector<7x10x128xf32>
    %634 = vector.broadcast %632 : vector<1x10x128xf32> to vector<7x10x128xf32>
    %635 = arith.mulf %633, %634 : vector<7x10x128xf32>
    %636 = arith.addf %629, %635 : vector<7x10x128xf32>
    %637 = vector.extract_strided_slice %177 {offsets = [72, 0], sizes = [7, 128], strides = [1, 1]} : vector<128x128xf32> to vector<7x128xf32>
    %638 = vector.shape_cast %637 : vector<7x128xf32> to vector<7x1x128xf32>
    %639 = vector.shape_cast %221 : vector<10x128xf32> to vector<1x10x128xf32>
    %640 = vector.broadcast %638 : vector<7x1x128xf32> to vector<7x10x128xf32>
    %641 = vector.broadcast %639 : vector<1x10x128xf32> to vector<7x10x128xf32>
    %642 = arith.mulf %640, %641 : vector<7x10x128xf32>
    %643 = arith.addf %636, %642 : vector<7x10x128xf32>
    %644 = vector.extract_strided_slice %177 {offsets = [80, 0], sizes = [7, 128], strides = [1, 1]} : vector<128x128xf32> to vector<7x128xf32>
    %645 = vector.shape_cast %644 : vector<7x128xf32> to vector<7x1x128xf32>
    %646 = vector.shape_cast %228 : vector<10x128xf32> to vector<1x10x128xf32>
    %647 = vector.broadcast %645 : vector<7x1x128xf32> to vector<7x10x128xf32>
    %648 = vector.broadcast %646 : vector<1x10x128xf32> to vector<7x10x128xf32>
    %649 = arith.mulf %647, %648 : vector<7x10x128xf32>
    %650 = arith.addf %643, %649 : vector<7x10x128xf32>
    %651 = vector.extract_strided_slice %177 {offsets = [88, 0], sizes = [7, 128], strides = [1, 1]} : vector<128x128xf32> to vector<7x128xf32>
    %652 = vector.shape_cast %651 : vector<7x128xf32> to vector<7x1x128xf32>
    %653 = vector.shape_cast %235 : vector<10x128xf32> to vector<1x10x128xf32>
    %654 = vector.broadcast %652 : vector<7x1x128xf32> to vector<7x10x128xf32>
    %655 = vector.broadcast %653 : vector<1x10x128xf32> to vector<7x10x128xf32>
    %656 = arith.mulf %654, %655 : vector<7x10x128xf32>
    %657 = arith.addf %650, %656 : vector<7x10x128xf32>
    %658 = vector.extract_strided_slice %177 {offsets = [96, 0], sizes = [7, 128], strides = [1, 1]} : vector<128x128xf32> to vector<7x128xf32>
    %659 = vector.shape_cast %658 : vector<7x128xf32> to vector<7x1x128xf32>
    %660 = vector.shape_cast %242 : vector<10x128xf32> to vector<1x10x128xf32>
    %661 = vector.broadcast %659 : vector<7x1x128xf32> to vector<7x10x128xf32>
    %662 = vector.broadcast %660 : vector<1x10x128xf32> to vector<7x10x128xf32>
    %663 = arith.mulf %661, %662 : vector<7x10x128xf32>
    %664 = arith.addf %657, %663 : vector<7x10x128xf32>
    %665 = vector.extract_strided_slice %177 {offsets = [104, 0], sizes = [7, 128], strides = [1, 1]} : vector<128x128xf32> to vector<7x128xf32>
    %666 = vector.shape_cast %665 : vector<7x128xf32> to vector<7x1x128xf32>
    %667 = vector.shape_cast %249 : vector<10x128xf32> to vector<1x10x128xf32>
    %668 = vector.broadcast %666 : vector<7x1x128xf32> to vector<7x10x128xf32>
    %669 = vector.broadcast %667 : vector<1x10x128xf32> to vector<7x10x128xf32>
    %670 = arith.mulf %668, %669 : vector<7x10x128xf32>
    %671 = arith.addf %664, %670 : vector<7x10x128xf32>
    %672 = vector.extract_strided_slice %177 {offsets = [112, 0], sizes = [7, 128], strides = [1, 1]} : vector<128x128xf32> to vector<7x128xf32>
    %673 = vector.shape_cast %672 : vector<7x128xf32> to vector<7x1x128xf32>
    %674 = vector.shape_cast %256 : vector<10x128xf32> to vector<1x10x128xf32>
    %675 = vector.broadcast %673 : vector<7x1x128xf32> to vector<7x10x128xf32>
    %676 = vector.broadcast %674 : vector<1x10x128xf32> to vector<7x10x128xf32>
    %677 = arith.mulf %675, %676 : vector<7x10x128xf32>
    %678 = arith.addf %671, %677 : vector<7x10x128xf32>
    %679 = vector.extract_strided_slice %678 {offsets = [0, 0, 0], sizes = [1, 10, 128], strides = [1, 1, 1]} : vector<7x10x128xf32> to vector<1x10x128xf32>
    %680 = vector.shape_cast %679 : vector<1x10x128xf32> to vector<10x128xf32>
    %681 = vector.shape_cast %680 : vector<10x128xf32> to vector<10x1x128xf32>
    %682 = vector.shape_cast %263 : vector<10x128xf32> to vector<1x10x128xf32>
    %683 = vector.broadcast %681 : vector<10x1x128xf32> to vector<10x10x128xf32>
    %684 = vector.broadcast %682 : vector<1x10x128xf32> to vector<10x10x128xf32>
    %685 = arith.mulf %683, %684 : vector<10x10x128xf32>
    %686 = arith.addf %628, %685 : vector<10x10x128xf32>
    %687 = vector.extract_strided_slice %678 {offsets = [1, 0, 0], sizes = [1, 10, 128], strides = [1, 1, 1]} : vector<7x10x128xf32> to vector<1x10x128xf32>
    %688 = vector.shape_cast %687 : vector<1x10x128xf32> to vector<10x128xf32>
    %689 = vector.shape_cast %688 : vector<10x128xf32> to vector<10x1x128xf32>
    %690 = vector.shape_cast %270 : vector<10x128xf32> to vector<1x10x128xf32>
    %691 = vector.broadcast %689 : vector<10x1x128xf32> to vector<10x10x128xf32>
    %692 = vector.broadcast %690 : vector<1x10x128xf32> to vector<10x10x128xf32>
    %693 = arith.mulf %691, %692 : vector<10x10x128xf32>
    %694 = arith.addf %686, %693 : vector<10x10x128xf32>
    %695 = vector.extract_strided_slice %678 {offsets = [2, 0, 0], sizes = [1, 10, 128], strides = [1, 1, 1]} : vector<7x10x128xf32> to vector<1x10x128xf32>
    %696 = vector.shape_cast %695 : vector<1x10x128xf32> to vector<10x128xf32>
    %697 = vector.shape_cast %696 : vector<10x128xf32> to vector<10x1x128xf32>
    %698 = vector.shape_cast %277 : vector<10x128xf32> to vector<1x10x128xf32>
    %699 = vector.broadcast %697 : vector<10x1x128xf32> to vector<10x10x128xf32>
    %700 = vector.broadcast %698 : vector<1x10x128xf32> to vector<10x10x128xf32>
    %701 = arith.mulf %699, %700 : vector<10x10x128xf32>
    %702 = arith.addf %694, %701 : vector<10x10x128xf32>
    %703 = vector.extract_strided_slice %678 {offsets = [3, 0, 0], sizes = [1, 10, 128], strides = [1, 1, 1]} : vector<7x10x128xf32> to vector<1x10x128xf32>
    %704 = vector.shape_cast %703 : vector<1x10x128xf32> to vector<10x128xf32>
    %705 = vector.shape_cast %704 : vector<10x128xf32> to vector<10x1x128xf32>
    %706 = vector.shape_cast %284 : vector<10x128xf32> to vector<1x10x128xf32>
    %707 = vector.broadcast %705 : vector<10x1x128xf32> to vector<10x10x128xf32>
    %708 = vector.broadcast %706 : vector<1x10x128xf32> to vector<10x10x128xf32>
    %709 = arith.mulf %707, %708 : vector<10x10x128xf32>
    %710 = arith.addf %702, %709 : vector<10x10x128xf32>
    %711 = vector.extract_strided_slice %678 {offsets = [4, 0, 0], sizes = [1, 10, 128], strides = [1, 1, 1]} : vector<7x10x128xf32> to vector<1x10x128xf32>
    %712 = vector.shape_cast %711 : vector<1x10x128xf32> to vector<10x128xf32>
    %713 = vector.shape_cast %712 : vector<10x128xf32> to vector<10x1x128xf32>
    %714 = vector.shape_cast %291 : vector<10x128xf32> to vector<1x10x128xf32>
    %715 = vector.broadcast %713 : vector<10x1x128xf32> to vector<10x10x128xf32>
    %716 = vector.broadcast %714 : vector<1x10x128xf32> to vector<10x10x128xf32>
    %717 = arith.mulf %715, %716 : vector<10x10x128xf32>
    %718 = arith.addf %710, %717 : vector<10x10x128xf32>
    %719 = vector.extract_strided_slice %678 {offsets = [5, 0, 0], sizes = [1, 10, 128], strides = [1, 1, 1]} : vector<7x10x128xf32> to vector<1x10x128xf32>
    %720 = vector.shape_cast %719 : vector<1x10x128xf32> to vector<10x128xf32>
    %721 = vector.shape_cast %720 : vector<10x128xf32> to vector<10x1x128xf32>
    %722 = vector.shape_cast %298 : vector<10x128xf32> to vector<1x10x128xf32>
    %723 = vector.broadcast %721 : vector<10x1x128xf32> to vector<10x10x128xf32>
    %724 = vector.broadcast %722 : vector<1x10x128xf32> to vector<10x10x128xf32>
    %725 = arith.mulf %723, %724 : vector<10x10x128xf32>
    %726 = arith.addf %718, %725 : vector<10x10x128xf32>
    %727 = vector.extract_strided_slice %678 {offsets = [6, 0, 0], sizes = [1, 10, 128], strides = [1, 1, 1]} : vector<7x10x128xf32> to vector<1x10x128xf32>
    %728 = vector.shape_cast %727 : vector<1x10x128xf32> to vector<10x128xf32>
    %729 = vector.shape_cast %728 : vector<10x128xf32> to vector<10x1x128xf32>
    %730 = vector.shape_cast %305 : vector<10x128xf32> to vector<1x10x128xf32>
    %731 = vector.broadcast %729 : vector<10x1x128xf32> to vector<10x10x128xf32>
    %732 = vector.broadcast %730 : vector<1x10x128xf32> to vector<10x10x128xf32>
    %733 = arith.mulf %731, %732 : vector<10x10x128xf32>
    %734 = arith.addf %726, %733 : vector<10x10x128xf32>
    %c1_154 = arith.constant 1 : index
    %c0_155 = arith.constant 0 : index
    %c0_156 = arith.constant 0 : index
    %c0_157 = arith.constant 0 : index
    %735 = vector.load %arg8[%c1_154, %c0_155, %c0_156, %c0_157] : memref<2x10x10x128xf32, #tpu.memory_space<vmem>>, vector<1x10x10x128xf32>
    %736 = vector.shape_cast %735 : vector<1x10x10x128xf32> to vector<10x10x128xf32>
    %737 = vector.shape_cast %734 : vector<10x10x128xf32> to vector<1x10x10x128xf32>
    tpu.vector_store %arg8[%c1_154, %c0_155, %c0_156, %c0_157], %737 {strides = array<i32>} : memref<2x10x10x128xf32, #tpu.memory_space<vmem>>, vector<1x10x10x128xf32>,
    return
  }
  func.func @transform_0(%arg0: i32) -> (i32, i32, i32) {
    %c0_i32 = arith.constant 0 : i32
    %c0_i32_0 = arith.constant 0 : i32
    %c0_i32_1 = arith.constant 0 : i32
    return %c0_i32, %c0_i32_0, %arg0 : i32, i32, i32
  }
  func.func @transform_1(%arg0: i32) -> (i32, i32) {
    %c0_i32 = arith.constant 0 : i32
    %c0_i32_0 = arith.constant 0 : i32
    return %c0_i32, %arg0 : i32, i32
  }
  func.func @transform_2(%arg0: i32) -> (i32, i32) {
    %c0_i32 = arith.constant 0 : i32
    %c0_i32_0 = arith.constant 0 : i32
    return %c0_i32, %arg0 : i32, i32
  }
  func.func @transform_3(%arg0: i32) -> (i32, i32) {
    %c0_i32 = arith.constant 0 : i32
    %c0_i32_0 = arith.constant 0 : i32
    %c0_i32_1 = arith.constant 0 : i32
    return %c0_i32, %c0_i32_0 : i32, i32
  }
  func.func @transform_4(%arg0: i32) -> (i32, i32) {
    %c0_i32 = arith.constant 0 : i32
    %c0_i32_0 = arith.constant 0 : i32
    %c0_i32_1 = arith.constant 0 : i32
    return %c0_i32, %c0_i32_0 : i32, i32
  }
  func.func @transform_5(%arg0: i32) -> (i32, i32) {
    %c0_i32 = arith.constant 0 : i32
    %c0_i32_0 = arith.constant 0 : i32
    %c0_i32_1 = arith.constant 0 : i32
    return %c0_i32, %c0_i32_0 : i32, i32
  }
  func.func @transform_6(%arg0: i32) -> (i32, i32) {
    %c0_i32 = arith.constant 0 : i32
    %c0_i32_0 = arith.constant 0 : i32
    %c0_i32_1 = arith.constant 0 : i32
    return %c0_i32, %c0_i32_0 : i32, i32
  }
  func.func @transform_7(%arg0: i32) -> (i32, i32, i32, i32) {
    %c0_i32 = arith.constant 0 : i32
    %c0_i32_0 = arith.constant 0 : i32
    %c0_i32_1 = arith.constant 0 : i32
    %c0_i32_2 = arith.constant 0 : i32
    return %c0_i32, %c0_i32_0, %c0_i32_1, %arg0 : i32, i32, i32, i32
  }
}

</mosaic_0001>

<bundles_post_ra>
// kernel: galaxy_tile_decoder_forward.1
= control target key start
LH: loop header
LB: loop body
LE: loop exit
PB: predicated region body
PF: predicated region fallthrough
CT: control target
= control target key end

     0   :  { %s9773_s24 = smov 0   ;;  %s9775_s25 = smov 0   ;;  %s15320_s0 = inlined_call_operand.vmem [shape: f32[2,8,256], index: 0, kind: input, shape index: {}]   ;;  %s15321_s1 = inlined_call_operand.vmem [shape: f32[4,256], index: 1, kind: input, shape index: {}]   ;;  %s15322_s2 = inlined_call_operand.vmem [shape: f32[2,256], index: 2, kind: input, shape index: {}]   ;;  %s15323_s3 = inlined_call_operand.vmem [shape: f32[32,8], index: 3, kind: input, shape index: {}]   ;;  %s15324_s4 = inlined_call_operand.vmem [shape: f32[32,1], index: 4, kind: input, shape index: {}]   ;;  %s15325_s5 = inlined_call_operand.vmem [shape: f32[128,32], index: 5, kind: input, shape index: {}]   ;;  %s15326_s6 = inlined_call_operand.vmem [shape: f32[128,1], index: 6, kind: input, shape index: {}]   ;;  %s15327_s7 = inlined_call_operand.vmem [shape: f32[2,10,10,256], index: 7, kind: output, shape index: {}]  }
   0x1   :  { %s9777_s26 = smov 0  }
   0x2 LB: > { %s9786_s27 = sadd.s32 4294967295, %s9729_s26   ;;  %s9788_s28 = sadd.s32 1, %s9729_s26   ;;  %s9729_s26 = sphi %s9777_s26, %s15995_s26   ;;  %s9725_s25 = sphi %s9775_s25, %s15994_s25   ;;  %s9721_s24 = sphi %s9773_s24, %s15993_s24  }
   0x3   : > { %s21_s29 = ssub.s32 %s9729_s26, %s9788_s28  ;;  %s24_s30 = sadd.s32 1, %s9725_s25 }
   0x4   : > { %p22_p0 = scmp.eq.s32.totalorder %s21_s29, 0  ;;  %p31_p1 = scmp.ne.s32.totalorder %s9725_s25, %s9721_s24 }
   0x5   : > { %p32_p2 = scmp.eq.s32.totalorder %s9729_s26, 0  ;;  %p197_p3 = scmp.eq.s32.totalorder %s9786_s27, 1 }
   0x6   : > { %s9796_s8 = scalar_select %p22_p0, %s9725_s25, %s24_s30  }
   0x7   : > { %p33_p4 = por %p32_p2, %p31_p1  ;;  %p9798_p5 = por %p197_p3, %p31_p1 }
   0x8   : > { %p9399_p6 = scmp.ge.s32.totalorder %s9729_s26, 2 }
   0xa   : > { %231 = sbr.rel (%p9399_p6) target bundleno = 24 (0x18), region = 32 }
  0x11   : > { %234 = sbr.rel (!%p33_p4) target bundleno = 24 (0x18), region = 36  ;;  %s236_s10 = sand.u32 (%p33_p4), 1, %s9725_s25  }
  0x12   : > { %s9401_s11 = sshll.u32 (%p33_p4), %s9729_s26, 3  ;;  %s9400_s12 = sshll.u32 (%p33_p4), %s236_s10, 4 }
  0x13   : > { %s240_s15 = scalar_lea.vmem (%p33_p4), %s15320_s0, %s9401_s11  ;;  %s238_s16 = scalar_lea.vmem (%p33_p4), [#allocation2], %s9400_s12 }
  0x14   : > { %v270_v0 = vld [vmem:[%s240_s15] sm:$0xff] (%p33_p4)  ;;  %v272_v1 = vld [vmem:[%s240_s15 + $0x10] sm:$0xff] (%p33_p4) }
  0x15   : > { %271 = vst [vmem:[%s238_s16] sm:$0xff] (%p33_p4), %v270_v0  ;;  %273 = vst [vmem:[%s238_s16 + $0x8] sm:$0xff] (%p33_p4), %v272_v1 }
  0x18 PF: > { %p9402_p7 = scmp.ge.s32.totalorder %s9729_s26, 1  ;;  %p292_p8 = scmp.lt.s32.totalorder %s9729_s26, 3 }
  0x1a   : > { %p293_p9 = pnand %p9402_p7, %p292_p8 }
  0x1c   : > { %296 = sbr.rel (%p293_p9) target bundleno = 1336 (0x538), region = 82 }
  0x23   : > { %s299_s17 = sand.u32 1, %s9721_s24   ;;  %v357_v2 = vld [vmem:[%s15323_s3] sm:$0xff]  ;;  %vm418_vm0 = vcmask 64512   ;;  %v363_v4 = vld [vmem:[%s15324_s4 + $0x10] sm:$0xff]  ;;  %v9731_v5 = vmov 0   ;;  %v358_v8 = vld [vmem:[%s15323_s3 + $0x8] sm:$0xff] }
  0x24   : > { %s9403_s20 = sshll.u32 %s299_s17, 4  ;;  %9584 = vmatprep.mubr.msk.f32.mxu1 %vm418_vm0, %v357_v2  ;;  %9624 = vmatprep.mubr.msk.f32.mxu0 %vm418_vm0, %v357_v2  ;;  %v361_v3 = vld [vmem:[%s15324_s4] sm:$0xff]  ;;  %v359_v9 = vld [vmem:[%s15323_s3 + $0x10] sm:$0xff]  ;;  %v362_v10 = vld [vmem:[%s15324_s4 + $0x8] sm:$0xff]  ;;  %vm598_vm1 = vcmask 261120   ;;  %p337_p10 = scmp.lt.s32.totalorder %s9786_s27, 1 }
  0x25   : > { %9705 = vset.pattern.permute.xlu0 %v9731_v5  ;;  %9706 = vset.pattern.permute.xlu1 %v9731_v5  ;;  %s301_s29 = scalar_lea.vmem [#allocation2], %s9403_s20  ;;  %v364_v11 = vld [vmem:[%s15324_s4 + $0x18] sm:$0xff]  ;;  %v381_v13 = vld [vmem:[%s15326_s6] sm:$0xff]  ;;  %v382_v14 = vld [vmem:[%s15326_s6 + $0x8] sm:$0xff] }
  0x26   : > { %v397_v6 = vld [vmem:[%s301_s29] sm:$0xff]  ;;  %v9458_v7 = vld [vmem:[%s301_s29 + $0x8] sm:$0xff]  ;;  %400 = vperm.xlu0 %9705, %v361_v3   ;;  %410 = vperm.xlu1 %9706, %v363_v4   ;;  %s9965_s15 = scalar_select %p337_p10, %s9786_s27, 1 }
  0x27   : > { %9582 = vmatprep.subr.mxu1 %v397_v6  ;;  %9622 = vmatprep.subr.mxu0 %v9458_v7  ;;  %v360_v12 = vld [vmem:[%s15323_s3 + $0x18] sm:$0xff]  ;;  %v389_v15 = vld [vmem:[%s15326_s6 + $0x40] sm:$0xff]  ;;  %v390_v16 = vld [vmem:[%s15326_s6 + $0x48] sm:$0xff]  ;;  %s12708_s29 = smul.u32 320, %s299_s17  ;;  %s9529_s17 = sshll.u32 (%p9798_p5), %s9786_s27, 3 }
  0x28   : > { %9583 = vmatpush3.msra.mxu1 %v397_v6  ;;  %9623 = vmatpush3.msra.mxu0 %v9458_v7  ;;  %v383_v17 = vld [vmem:[%s15326_s6 + $0x10] sm:$0xff]  ;;  %v384_v19 = vld [vmem:[%s15326_s6 + $0x18] sm:$0xff]  ;;  %v385_v21 = vld [vmem:[%s15326_s6 + $0x20] sm:$0xff]  ;;  %s9404_s16 = sshll.u32 %s9965_s15, 2  ;;  %s9405_s21 = sshll.u32 %s9965_s15, 1 }
  0x29   : > { %9585 = vmatmul.mubr.msk.f32.vlgmr.msra.gmra.mrb[0].mxu1 %vm418_vm0, %v358_v8  ;;  %9625 = vmatmul.mubr.msk.f32.vlgmr.msra.gmra.mrb[0].mxu0 %vm418_vm0, %v358_v8  ;;  %v391_v18 = vld [vmem:[%s15326_s6 + $0x50] sm:$0xff]  ;;  %v392_v20 = vld [vmem:[%s15326_s6 + $0x58] sm:$0xff]  ;;  %v393_v22 = vld [vmem:[%s15326_s6 + $0x60] sm:$0xff]  ;;  %s340_s20 = scalar_lea.vmem %s15321_s1, %s9404_s16  ;;  %s344_s26 = scalar_lea.vmem %s15322_s2, %s9405_s21 }
  0x2a   : > { %9587 = vmatprep.mubr.msk.f32.mxu1 %vm418_vm0, %v359_v9  ;;  %9627 = vmatprep.mubr.msk.f32.mxu0 %vm418_vm0, %v359_v9  ;;  %v386_v23 = vld [vmem:[%s15326_s6 + $0x28] sm:$0xff]  ;;  %v387_v25 = vld [vmem:[%s15326_s6 + $0x30] sm:$0xff]  ;;  %v365_v27 = vld [vmem:[%s15325_s5] sm:$0xff]  ;;  %s12745_s24 = scalar_lea.vmem [#allocation3], %s12708_s29  ;;  %s15231_s11 = scalar_lea.vmem (%p9798_p5), %s15327_s7, %s9529_s17 }
  0x2b   : > { %405 = vperm.xlu0 %9705, %v362_v10   ;;  %415 = vperm.xlu1 %9706, %v364_v11   ;;  %v394_v24 = vld [vmem:[%s15326_s6 + $0x68] sm:$0xff]  ;;  %v395_v26 = vld [vmem:[%s15326_s6 + $0x70] sm:$0xff]  ;;  %v368_v62 = vld [vmem:[%s15325_s5 + $0x18] sm:$0xff]  ;;  %v345_v11 = vlaneseq }
  0x2c   : > { %v366_v60 = vld [vmem:[%s15325_s5 + $0x8] sm:$0xff]  ;;  %v367_v61 = vld [vmem:[%s15325_s5 + $0x10] sm:$0xff]  ;;  %v369_v63 = vld [vmem:[%s15325_s5 + $0x20] sm:$0xff] }
  0x2d   : > { %9588 = vmatmul.mubr.msk.f32.gmra.mrb[2].mxu1 %vm418_vm0, %v360_v12  ;;  %9628 = vmatmul.mubr.msk.f32.gmra.mrb[2].mxu0 %vm418_vm0, %v360_v12  ;;  %v370_v0 = vld [vmem:[%s15325_s5 + $0x28] sm:$0xff]  ;;  %v371_v1 = vld [vmem:[%s15325_s5 + $0x30] sm:$0xff]  ;;  %v372_v2 = vld [vmem:[%s15325_s5 + $0x38] sm:$0xff]  ;;  %v9971_v12 = vshrl.u32 %v345_v11, 7 }
  0x2e   : > { %9598 = vmatprep.mubr.msk.f32.mxu1 %vm598_vm1, %v365_v27  ;;  %9638 = vmatprep.mubr.msk.f32.mxu0 %vm598_vm1, %v365_v27  ;;  %v373_v3 = vld [vmem:[%s15325_s5 + $0x40] sm:$0xff]  ;;  %v374_v4 = vld [vmem:[%s15325_s5 + $0x48] sm:$0xff]  ;;  %v375_v5 = vld [vmem:[%s15325_s5 + $0x50] sm:$0xff] }
  0x2f   : > { %522 = vperm.xlu0 %9705, %v381_v13   ;;  %527 = vperm.xlu1 %9706, %v382_v14   ;;  %v376_v6 = vld [vmem:[%s15325_s5 + $0x58] sm:$0xff]  ;;  %v377_v7 = vld [vmem:[%s15325_s5 + $0x60] sm:$0xff]  ;;  %v378_v8 = vld [vmem:[%s15325_s5 + $0x68] sm:$0xff] }
  0x30   : > { %v379_v9 = vld [vmem:[%s15325_s5 + $0x70] sm:$0xff]  ;;  %v380_v10 = vld [vmem:[%s15325_s5 + $0x78] sm:$0xff]  ;;  %v825_v13 = vld [vmem:[%s340_s20] sm:$0x1] }
  0x31   : > { %v1236_v14 = vld [vmem:[%s340_s20 + $0x2] sm:$0x1] }
  0x33   : > { %561 = vperm.xlu0 %9705, %v389_v15   ;;  %566 = vperm.xlu1 %9706, %v390_v16   ;;  %v347_v15 = vadd.s32 8, %v9971_v12  ;;  %v827_v16 = vmul.f32 0.2, %v825_v13 }
  0x37   : > { %532 = vperm.xlu0 %9705, %v383_v17   ;;  %571 = vperm.xlu1 %9706, %v391_v18   ;;  %v1238_v17 = vmul.f32 0.2, %v1236_v14  ;;  %v348_v18 = vcvt.s32.f32 %v9971_v12 }
  0x3b   : > { %537 = vperm.xlu0 %9705, %v384_v19   ;;  %576 = vperm.xlu1 %9706, %v392_v20   ;;  %v349_v19 = vcvt.s32.f32 %v347_v15  ;;  %v826_v20 = vld [vmem:[%s340_s20 + $0x1] sm:$0x1] }
  0x3f   : > { %542 = vperm.xlu0 %9705, %v385_v21   ;;  %581 = vperm.xlu1 %9706, %v393_v22   ;;  %v828_v21 = vadd.f32 0.4, %v827_v16  ;;  %v1239_v22 = vadd.f32 0.4, %v1238_v17 }
  0x41   : > { %v9479_v27 = vadd.f32 -0.5, %v1239_v22 }
  0x43   : > { %547 = vperm.xlu0 %9705, %v386_v23   ;;  %586 = vperm.xlu1 %9706, %v394_v24   ;;  %v831_v23 = vmul.f32 0.2, %v826_v20  ;;  %v9406_v24 = vadd.f32 -4.5, %v348_v18 }
  0x47   : > { %552 = vperm.xlu0 %9705, %v387_v25   ;;  %591 = vperm.xlu1 %9706, %v395_v26   ;;  %v9407_v25 = vadd.f32 -4.5, %v349_v19  ;;  %v9428_v26 = vadd.f32 -0.5, %v828_v21 }
  0xa5   : > { %v401_v28 = vpop.permute.xlu0 %400  ;;  %v411_v29 = vpop.permute.xlu1 %410 }
  0xaa   : > { %v406_v30 = vpop.permute.xlu0 %405  ;;  %v416_v39 = vpop.permute.xlu1 %415 }
  0xfc   : > { %v9586_v31 = vpop.f32.mrb[0].mxu1  ;;  %v9626_v32 = vpop.f32.mrb[0].mxu0 }
  0xfd   : > { %v503_v33 = vadd.f32 %v9586_v31, %v406_v30  ;;  %v1041_v34 = vadd.f32 %v9626_v32, %v406_v30  ;;  %v497_v35 = vpop.f32.mrb[1].mxu1  ;;  %v1035_v36 = vpop.f32.mrb[1].mxu0  ;;  %v354_v30 = vmul.f32 0.22222222, %v9407_v25  ;;  %v9976_v31 = vsub.s32 0, %v9971_v12 }
  0xfe   : > { %v498_v37 = vadd.f32 %v497_v35, %v401_v28  ;;  %v1036_v38 = vadd.f32 %v1035_v36, %v401_v28  ;;  %v832_v28 = vadd.f32 0.4, %v831_v23  ;;  %v830_v32 = vmul.f32 2.0, %v9428_v26  ;;  %v1237_v35 = vld [vmem:[%s340_s20 + $0x3] sm:$0x1] }
  0xff   : > { %v517_v40 = vmax.f32 %v503_v33, 0.0  ;;  %v1055_v41 = vmax.f32 %v1041_v34, 0.0  ;;  %15468 = vst [vmem:[#allocation4_spill] sm:$0xff] %v9976_v31  ;;  %v1241_v33 = vmul.f32 2.0, %v9479_v27 }
 0x100   : > { %v516_v42 = vmax.f32 %v498_v37, 0.0  ;;  %v1054_v43 = vmax.f32 %v1036_v38, 0.0  ;;  %v9589_v44 = vpop.f32.mrb[2].mxu1  ;;  %v9629_v45 = vpop.f32.mrb[2].mxu0  ;;  %v9429_v34 = vadd.f32 -0.5, %v832_v28  ;;  %v838_v38 = vrot.slane %v830_v32, %v9976_v31 }
 0x101   : > { %v513_v46 = vadd.f32 %v9589_v44, %v416_v39  ;;  %v1051_v47 = vadd.f32 %v9629_v45, %v416_v39  ;;  %v507_v48 = vpop.f32.mrb[3].mxu1  ;;  %v1045_v49 = vpop.f32.mrb[3].mxu0  ;;  %v9980_v37 = vmul.f32 0.9, %v354_v30  ;;  %v1249_v39 = vrot.slane %v1241_v33, %v9976_v31 }
 0x102   : > { %v9662_v50 = vpack.c.bf16 %v517_v40, %v516_v42  ;;  %v9670_v51 = vpack.c.bf16 %v1055_v41, %v1054_v43  ;;  %v508_v52 = vadd.f32 %v507_v48, %v411_v29  ;;  %v1046_v53 = vadd.f32 %v1045_v49, %v411_v29 }
 0x103   : > { %v519_v54 = vmax.f32 %v513_v46, 0.0  ;;  %v1057_v55 = vmax.f32 %v1051_v47, 0.0  ;;  %v353_v29 = vmul.f32 0.22222222, %v9406_v24  ;;  %v1242_v40 = vmul.f32 0.2, %v1237_v35 }
 0x104   : > { %v518_v56 = vmax.f32 %v508_v52, 0.0  ;;  %v1056_v57 = vmax.f32 %v1046_v53, 0.0  ;;  %9663 = vmatprep.subr.bf16.mxu1 %v9662_v50  ;;  %9671 = vmatprep.subr.bf16.mxu0 %v9670_v51  ;;  %v834_v41 = vmul.f32 2.0, %v9429_v34  ;;  %v840_v43 = vsub.f32 %v9980_v37, %v838_v38 }
 0x105   : > { %9665 = vmatpush3.bf16.msra.mxu1 %v9662_v50  ;;  %9673 = vmatpush3.bf16.msra.mxu0 %v9670_v51  ;;  %v9978_v36 = vmul.f32 0.9, %v353_v29  ;;  %v1251_v45 = vsub.f32 %v9980_v37, %v1249_v39  ;;  %v1243_v46 = vadd.f32 0.4, %v1242_v40 }
 0x106   : > { %v9666_v58 = vpack.c.bf16 %v519_v54, %v518_v56  ;;  %v9674_v59 = vpack.c.bf16 %v1057_v55, %v1056_v57  ;;  %v848_v47 = vrot.slane %v834_v41, %v9976_v31  ;;  %v842_v49 = vadd.f32 1.0, %v840_v43  ;;  %v804_v55 = vld [vmem:[%s344_s26] sm:$0x1] }
 0x107   : > { %v839_v42 = vsub.f32 %v9978_v36, %v838_v38  ;;  %v1250_v44 = vsub.f32 %v9978_v36, %v1249_v39  ;;  %v1253_v51 = vadd.f32 1.0, %v1251_v45  ;;  %v9480_v52 = vadd.f32 -0.5, %v1243_v46 }
 0x108   : > { %9667 = vmatprep.subr.bf16.mxu1 %v9666_v58  ;;  %9675 = vmatprep.subr.bf16.mxu0 %v9674_v59  ;;  %v849_v53 = vsub.f32 %v9978_v36, %v848_v47  ;;  %v850_v54 = vsub.f32 %v9980_v37, %v848_v47  ;;  %v9997_v57 = vmul.f32 5.0, %v842_v49  ;;  %vm805_vm2 = vcmp.eq.f32.partialorder %v804_v55, 1.0 }
 0x109   : > { %9669 = vmatpush3.bf16.msra.mxu1 %v9666_v58  ;;  %9677 = vmatpush3.bf16.msra.mxu0 %v9674_v59  ;;  %v841_v48 = vadd.f32 1.0, %v839_v42  ;;  %v1252_v50 = vadd.f32 1.0, %v1250_v44  ;;  %v10001_v59 = vmul.f32 5.0, %v1253_v51 }
 0x10a   : > { %15470 = vst [vmem:[#allocation6_spill] sm:$0xff] %v9997_v57  ;;  %v9431_v19 = vadd.f32 -2.0, %v9997_v57  ;;  %v9441_v22 = vadd.f32 -7.0, %v9997_v57 }
 0x10b   : > { %v9995_v56 = vmul.f32 5.0, %v841_v48  ;;  %v9999_v58 = vmul.f32 5.0, %v1252_v50  ;;  %15472 = vst [vmem:[#allocation8_spill] sm:$0xff] %v10001_v59 }
 0x10c   : > { %9599 = vmatmul.mubr.msk.f32.vlgmr.msra.gmra.mrb[4].mxu1 %vm598_vm1, %v366_v60  ;;  %9639 = vmatmul.mubr.msk.f32.vlgmr.msra.gmra.mrb[4].mxu0 %vm598_vm1, %v366_v60  ;;  %v1245_v60 = vmul.f32 2.0, %v9480_v52 }
 0x10d   : > { %9601 = vmatprep.mubr.msk.f32.mxu1 %vm598_vm1, %v367_v61  ;;  %9641 = vmatprep.mubr.msk.f32.mxu0 %vm598_vm1, %v367_v61  ;;  %15469 = vst [vmem:[#allocation5_spill] sm:$0xff] %v9995_v56  ;;  %15471 = vst [vmem:[#allocation7_spill] sm:$0xff] %v9999_v58  ;;  %v851_v61 = vadd.f32 1.0, %v849_v53  ;;  %v9430_v18 = vadd.f32 -2.0, %v9995_v56 }
 0x10f   : > { %v857_v35 = vand.u32 2147483647, %v9430_v18 }
 0x110   : > { %9602 = vmatmul.mubr.msk.f32.gmra.mrb[6].mxu1 %vm598_vm1, %v368_v62  ;;  %9642 = vmatmul.mubr.msk.f32.gmra.mrb[6].mxu0 %vm598_vm1, %v368_v62  ;;  %v852_v62 = vadd.f32 1.0, %v850_v54 }
 0x111   : > { %9604 = vmatprep.mubr.msk.f32.mxu1 %vm598_vm1, %v369_v63  ;;  %9644 = vmatprep.mubr.msk.f32.mxu0 %vm598_vm1, %v369_v63  ;;  %v9432_v63 = vadd.f32 -3.0, %v9995_v56  ;;  %v859_v51 = vsub.f32 1.0, %v857_v35 }
 0x114   : > { %9605 = vmatmul.mubr.msk.f32.gmra.mrb[8].mxu1 %vm598_vm1, %v370_v0  ;;  %9645 = vmatmul.mubr.msk.f32.gmra.mrb[8].mxu0 %vm598_vm1, %v370_v0  ;;  %v9433_v0 = vadd.f32 -3.0, %v9997_v57 }
 0x115   : > { %9607 = vmatprep.mubr.msk.f32.mxu1 %vm598_vm1, %v371_v1  ;;  %9647 = vmatprep.mubr.msk.f32.mxu0 %vm598_vm1, %v371_v1  ;;  %v1215_v1 = vld [vmem:[%s344_s26 + $0x1] sm:$0x1] }
 0x116   : > { %v866_v11 = vand.u32 2147483647, %v9433_v0  ;;  %vm1216_vm3 = vcmp.eq.f32.partialorder %v1215_v1, 1.0 }
 0x117   : > { %v10018_v23 = vsel %vm1216_vm3, %v1215_v1, 0.0 }
 0x118   : > { %9608 = vmatmul.mubr.msk.f32.gmra.mrb[10].mxu1 %vm598_vm1, %v372_v2  ;;  %9648 = vmatmul.mubr.msk.f32.gmra.mrb[10].mxu0 %vm598_vm1, %v372_v2  ;;  %v9483_v2 = vadd.f32 -3.0, %v9999_v58  ;;  %v868_v25 = vsub.f32 1.0, %v866_v11 }
 0x119   : > { %9610 = vmatprep.mubr.msk.f32.mxu1 %vm598_vm1, %v373_v3  ;;  %9650 = vmatprep.mubr.msk.f32.mxu0 %vm598_vm1, %v373_v3  ;;  %v9484_v3 = vadd.f32 -3.0, %v10001_v59 }
 0x11a   : > { %v1276_v14 = vand.u32 2147483647, %v9483_v2  ;;  %v10022_v42 = vmax.f32 %v868_v25, 0.0 }
 0x11b   : > { %v1277_v15 = vand.u32 2147483647, %v9484_v3 }
 0x11c   : > { %9611 = vmatmul.mubr.msk.f32.gmra.mrb[12].mxu1 %vm598_vm1, %v374_v4  ;;  %9651 = vmatmul.mubr.msk.f32.gmra.mrb[12].mxu0 %vm598_vm1, %v374_v4  ;;  %v806_v4 = vsel %vm805_vm2, %v804_v55, 0.0  ;;  %v1278_v30 = vsub.f32 1.0, %v1276_v14  ;;  %15475 = vst [vmem:[#allocation11_spill] sm:$0xff] %v10022_v42 }
 0x11d   : > { %9613 = vmatprep.mubr.msk.f32.mxu1 %vm598_vm1, %v375_v5  ;;  %9653 = vmatprep.mubr.msk.f32.mxu0 %vm598_vm1, %v375_v5  ;;  %v1259_v5 = vrot.slane %v1245_v60, %v9976_v31  ;;  %v10011_v13 = vrot.slane %v806_v4, %v9976_v31  ;;  %v1279_v32 = vsub.f32 1.0, %v1277_v15 }
 0x11e   : > { %v10024_v47 = vmax.f32 %v1278_v30, 0.0 }
 0x11f   : > { %15473 = vst [vmem:[#allocation9_spill] sm:$0xff] %v10011_v13  ;;  %v1260_v16 = vsub.f32 %v9978_v36, %v1259_v5  ;;  %v1261_v17 = vsub.f32 %v9980_v37, %v1259_v5  ;;  %v858_v36 = vand.u32 2147483647, %v9431_v19  ;;  %v10026_v48 = vmax.f32 %v1279_v32, 0.0 }
 0x120   : > { %9614 = vmatmul.mubr.msk.f32.gmra.mrb[14].mxu1 %vm598_vm1, %v376_v6  ;;  %9654 = vmatmul.mubr.msk.f32.gmra.mrb[14].mxu0 %vm598_vm1, %v376_v6  ;;  %v853_v6 = vmul.f32 5.0, %v851_v61  ;;  %15476 = vst [vmem:[#allocation12_spill] sm:$0xff] %v10024_v47 }
 0x121   : > { %9616 = vmatprep.mubr.msk.f32.mxu1 %vm598_vm1, %v377_v7  ;;  %9656 = vmatprep.mubr.msk.f32.mxu0 %vm598_vm1, %v377_v7  ;;  %v854_v7 = vmul.f32 5.0, %v852_v62  ;;  %v1262_v33 = vadd.f32 1.0, %v1260_v16  ;;  %v1263_v34 = vadd.f32 1.0, %v1261_v17  ;;  %15477 = vst [vmem:[#allocation13_spill] sm:$0xff] %v10026_v48  ;;  %v860_v52 = vsub.f32 1.0, %v858_v36 }
 0x122   : > { %v9444_v20 = vadd.f32 -2.0, %v853_v6  ;;  %v9446_v26 = vadd.f32 -3.0, %v853_v6  ;;  %v9448_v28 = vadd.f32 -4.0, %v853_v6  ;;  %v9450_v39 = vadd.f32 -5.0, %v853_v6 }
 0x123   : > { %v9445_v21 = vadd.f32 -2.0, %v854_v7  ;;  %v9447_v27 = vadd.f32 -3.0, %v854_v7  ;;  %v9449_v29 = vadd.f32 -4.0, %v854_v7  ;;  %v9451_v40 = vadd.f32 -5.0, %v854_v7 }
 0x124   : > { %9617 = vmatmul.mubr.msk.f32.gmra.mrb[16].mxu1 %vm598_vm1, %v378_v8  ;;  %9657 = vmatmul.mubr.msk.f32.gmra.mrb[16].mxu0 %vm598_vm1, %v378_v8  ;;  %v9732_v8 = vmov 1966171168   ;;  %v913_v37 = vand.u32 2147483647, %v9444_v20  ;;  %v921_v43 = vand.u32 2147483647, %v9446_v26 }
 0x125   : > { %9619 = vmatprep.mubr.msk.f32.mxu1 %vm598_vm1, %v379_v9  ;;  %9659 = vmatprep.mubr.msk.f32.mxu0 %vm598_vm1, %v379_v9  ;;  %v10008_v9 = vunpack.c.l.s4 %v9732_v8  ;;  %v914_v38 = vand.u32 2147483647, %v9445_v21  ;;  %v922_v44 = vand.u32 2147483647, %v9447_v27  ;;  %v929_v45 = vand.u32 2147483647, %v9448_v28 }
 0x126   : > { %v930_v46 = vand.u32 2147483647, %v9449_v29  ;;  %v10028_v49 = vmul.f32 5.0, %v1262_v33  ;;  %v10030_v50 = vmul.f32 5.0, %v1263_v34  ;;  %v915_v53 = vsub.f32 1.0, %v913_v37 }
 0x127   : > { %v916_v54 = vsub.f32 1.0, %v914_v38  ;;  %v937_v55 = vand.u32 2147483647, %v9450_v39  ;;  %v938_v60 = vand.u32 2147483647, %v9451_v40  ;;  %v923_v61 = vsub.f32 1.0, %v921_v43 }
 0x128   : > { %9620 = vmatmul.mubr.msk.f32.gmra.mrb[18].mxu1 %vm598_vm1, %v380_v10  ;;  %9660 = vmatmul.mubr.msk.f32.gmra.mrb[18].mxu0 %vm598_vm1, %v380_v10  ;;  %v865_v10 = vand.u32 2147483647, %v9432_v63  ;;  %v924_v62 = vsub.f32 1.0, %v922_v44  ;;  %v9452_v63 = vadd.f32 -6.0, %v853_v6  ;;  %v9453_v0 = vadd.f32 -6.0, %v854_v7 }
 0x129   : > { %v931_v1 = vsub.f32 1.0, %v929_v45  ;;  %v932_v2 = vsub.f32 1.0, %v930_v46  ;;  %v9454_v3 = vadd.f32 -7.0, %v853_v6  ;;  %v9455_v4 = vadd.f32 -7.0, %v854_v7 }
 0x12a   : > { %v867_v24 = vsub.f32 1.0, %v865_v10  ;;  %v9456_v5 = vadd.f32 -8.0, %v853_v6  ;;  %v9457_v8 = vadd.f32 -8.0, %v854_v7  ;;  %v10032_v10 = vmax.f32 %v859_v51, 0.0 }
 0x12b   : > { %v10034_v11 = vmax.f32 %v860_v52, 0.0  ;;  %v10036_v14 = vmax.f32 %v915_v53, 0.0  ;;  %v10038_v15 = vmax.f32 %v916_v54, 0.0  ;;  %v939_v16 = vsub.f32 1.0, %v937_v55 }
 0x12c   : > { %v10020_v41 = vmax.f32 %v867_v24, 0.0  ;;  %15478 = vst [vmem:[#allocation14_spill] sm:$0xff] %v10032_v10  ;;  %v940_v17 = vsub.f32 1.0, %v938_v60  ;;  %v10040_v18 = vmax.f32 %v923_v61, 0.0  ;;  %v10042_v19 = vmax.f32 %v924_v62, 0.0 }
 0x12d   : > { %15479 = vst [vmem:[#allocation15_spill] sm:$0xff] %v10034_v11  ;;  %15480 = vst [vmem:[#allocation16_spill] sm:$0xff] %v10036_v14  ;;  %v945_v20 = vand.u32 2147483647, %v9452_v63  ;;  %v946_v21 = vand.u32 2147483647, %v9453_v0 }
 0x12e   : > { %15474 = vst [vmem:[#allocation10_spill] sm:$0xff] %v10020_v41  ;;  %15481 = vst [vmem:[#allocation17_spill] sm:$0xff] %v10038_v15  ;;  %v10044_v24 = vmax.f32 %v931_v1, 0.0  ;;  %v10046_v6 = vmax.f32 %v932_v2, 0.0  ;;  %v953_v7 = vand.u32 2147483647, %v9454_v3 }
 0x12f   : > { %15482 = vst [vmem:[#allocation18_spill] sm:$0xff] %v10040_v18  ;;  %15483 = vst [vmem:[#allocation19_spill] sm:$0xff] %v10042_v19  ;;  %v954_v25 = vand.u32 2147483647, %v9455_v4  ;;  %v961_v26 = vand.u32 2147483647, %v9456_v5 }
 0x130   : > { %15484 = vst [vmem:[#allocation20_spill] sm:$0xff] %v10044_v24  ;;  %15485 = vst [vmem:[#allocation21_spill] sm:$0xff] %v10046_v6  ;;  %v962_v27 = vand.u32 2147483647, %v9457_v8  ;;  %v9495_v28 = vadd.f32 -2.0, %v10028_v49  ;;  %v9496_v29 = vadd.f32 -2.0, %v10030_v50 }
 0x131   : > { %v10050_v30 = vmax.f32 %v939_v16, 0.0  ;;  %v10052_v32 = vmax.f32 %v940_v17, 0.0  ;;  %v9497_v33 = vadd.f32 -3.0, %v10028_v49  ;;  %v9498_v34 = vadd.f32 -3.0, %v10030_v50 }
 0x132   : > { %v947_v35 = vsub.f32 1.0, %v945_v20  ;;  %v948_v36 = vsub.f32 1.0, %v946_v21  ;;  %v9499_v37 = vadd.f32 -4.0, %v10028_v49  ;;  %v9500_v38 = vadd.f32 -4.0, %v10030_v50 }
 0x133   : > { %15486 = vst [vmem:[#allocation22_spill] sm:$0xff] %v10050_v30  ;;  %15487 = vst [vmem:[#allocation23_spill] sm:$0xff] %v10052_v32  ;;  %v955_v39 = vsub.f32 1.0, %v953_v7  ;;  %v956_v40 = vsub.f32 1.0, %v954_v25  ;;  %v9501_v43 = vadd.f32 -5.0, %v10028_v49  ;;  %v9502_v44 = vadd.f32 -5.0, %v10030_v50 }
 0x134   : > { %v963_v45 = vsub.f32 1.0, %v961_v26  ;;  %v964_v46 = vsub.f32 1.0, %v962_v27  ;;  %v1324_v51 = vand.u32 2147483647, %v9495_v28  ;;  %v1325_v52 = vand.u32 2147483647, %v9496_v29 }
 0x135   : > { %v1332_v53 = vand.u32 2147483647, %v9497_v33  ;;  %v1333_v54 = vand.u32 2147483647, %v9498_v34  ;;  %v9503_v55 = vadd.f32 -6.0, %v10028_v49  ;;  %v9504_v60 = vadd.f32 -6.0, %v10030_v50 }
 0x136   : > { %v10062_v61 = vmax.f32 %v947_v35, 0.0  ;;  %v10064_v62 = vmax.f32 %v948_v36, 0.0  ;;  %v1340_v63 = vand.u32 2147483647, %v9499_v37  ;;  %v1341_v0 = vand.u32 2147483647, %v9500_v38 }
 0x137   : > { %v10066_v1 = vmax.f32 %v955_v39, 0.0  ;;  %v10068_v2 = vmax.f32 %v956_v40, 0.0  ;;  %v1348_v3 = vand.u32 2147483647, %v9501_v43  ;;  %v1349_v4 = vand.u32 2147483647, %v9502_v44 }
 0x138   : > { %15488 = vst [vmem:[#allocation24_spill] sm:$0xff] %v10062_v61  ;;  %15489 = vst [vmem:[#allocation25_spill] sm:$0xff] %v10064_v62  ;;  %v10070_v5 = vmax.f32 %v963_v45, 0.0  ;;  %v10072_v8 = vmax.f32 %v964_v46, 0.0  ;;  %v1326_v16 = vsub.f32 1.0, %v1324_v51  ;;  %v1327_v17 = vsub.f32 1.0, %v1325_v52 }
 0x139   : > { %15490 = vst [vmem:[#allocation26_spill] sm:$0xff] %v10066_v1  ;;  %15491 = vst [vmem:[#allocation27_spill] sm:$0xff] %v10068_v2  ;;  %v1334_v20 = vsub.f32 1.0, %v1332_v53  ;;  %v1335_v21 = vsub.f32 1.0, %v1333_v54  ;;  %v1356_v7 = vand.u32 2147483647, %v9503_v55 }
 0x13a   : > { %15492 = vst [vmem:[#allocation28_spill] sm:$0xff] %v10070_v5  ;;  %15493 = vst [vmem:[#allocation29_spill] sm:$0xff] %v10072_v8  ;;  %v1357_v25 = vand.u32 2147483647, %v9504_v60  ;;  %v1342_v26 = vsub.f32 1.0, %v1340_v63  ;;  %v1343_v27 = vsub.f32 1.0, %v1341_v0 }
 0x13b   : > { %v9505_v28 = vadd.f32 -7.0, %v10028_v49  ;;  %v9506_v29 = vadd.f32 -7.0, %v10030_v50  ;;  %v1350_v33 = vsub.f32 1.0, %v1348_v3  ;;  %v1351_v34 = vsub.f32 1.0, %v1349_v4 }
 0x13c   : > { %v9507_v35 = vadd.f32 -8.0, %v10028_v49  ;;  %v9508_v36 = vadd.f32 -8.0, %v10030_v50  ;;  %v10078_v37 = vmax.f32 %v1326_v16, 0.0  ;;  %v10080_v38 = vmax.f32 %v1327_v17, 0.0  ;;  %v10098_v16 = vpop.permute.xlu0 %522 }
 0x13d   : > { %v9481_v39 = vadd.f32 -2.0, %v9999_v58  ;;  %v9482_v40 = vadd.f32 -2.0, %v10001_v59  ;;  %v10084_v43 = vmax.f32 %v1334_v20, 0.0  ;;  %v10086_v44 = vmax.f32 %v1335_v21, 0.0 }
 0x13e   : > { %15494 = vst [vmem:[#allocation30_spill] sm:$0xff] %v10078_v37  ;;  %15495 = vst [vmem:[#allocation31_spill] sm:$0xff] %v10080_v38  ;;  %v1358_v45 = vsub.f32 1.0, %v1356_v7  ;;  %v1359_v46 = vsub.f32 1.0, %v1357_v25  ;;  %v10088_v51 = vmax.f32 %v1342_v26, 0.0  ;;  %v10090_v52 = vmax.f32 %v1343_v27, 0.0 }
 0x13f   : > { %15496 = vst [vmem:[#allocation32_spill] sm:$0xff] %v10084_v43  ;;  %15497 = vst [vmem:[#allocation33_spill] sm:$0xff] %v10086_v44  ;;  %v1364_v49 = vand.u32 2147483647, %v9505_v28  ;;  %v1365_v50 = vand.u32 2147483647, %v9506_v29 }
 0x140   : > { %15498 = vst [vmem:[#allocation34_spill] sm:$0xff] %v10088_v51  ;;  %15499 = vst [vmem:[#allocation35_spill] sm:$0xff] %v10090_v52  ;;  %v10092_v53 = vmax.f32 %v1350_v33, 0.0  ;;  %v10094_v54 = vmax.f32 %v1351_v34, 0.0  ;;  %v1372_v55 = vand.u32 2147483647, %v9507_v35 }
 0x141   : > { %v1373_v60 = vand.u32 2147483647, %v9508_v36  ;;  %v1268_v63 = vand.u32 2147483647, %v9481_v39  ;;  %v1269_v0 = vand.u32 2147483647, %v9482_v40 }
 0x142   : > { %15500 = vst [vmem:[#allocation36_spill] sm:$0xff] %v10092_v53  ;;  %15501 = vst [vmem:[#allocation37_spill] sm:$0xff] %v10094_v54  ;;  %v9436_v3 = vadd.f32 -5.0, %v9995_v56  ;;  %v9437_v4 = vadd.f32 -5.0, %v9997_v57  ;;  %v10100_v17 = vmax.f32 %v1358_v45, 0.0  ;;  %v10102_v20 = vmax.f32 %v1359_v46, 0.0  ;;  %v10122_v54 = vpop.permute.xlu0 %561 }
 0x143   : > { %v9487_v21 = vadd.f32 -5.0, %v9999_v58  ;;  %v9488_v7 = vadd.f32 -5.0, %v10001_v59  ;;  %v10106_v25 = vsub.f32 1.0, %v1364_v49  ;;  %v10108_v26 = vsub.f32 1.0, %v1365_v50  ;;  %15508 = vst [vmem:[#allocation44_spill] sm:$0xff] %v10122_v54 }
 0x144   : > { %15502 = vst [vmem:[#allocation38_spill] sm:$0xff] %v10100_v17  ;;  %15503 = vst [vmem:[#allocation39_spill] sm:$0xff] %v10102_v20  ;;  %v9434_v27 = vadd.f32 -4.0, %v9995_v56  ;;  %v9435_v28 = vadd.f32 -4.0, %v9997_v57  ;;  %v10112_v29 = vsub.f32 1.0, %v1372_v55  ;;  %v10114_v33 = vsub.f32 1.0, %v1373_v60 }
 0x145   : > { %15504 = vst [vmem:[#allocation40_spill] sm:$0xff] %v10106_v25  ;;  %15505 = vst [vmem:[#allocation41_spill] sm:$0xff] %v10108_v26  ;;  %v9485_v34 = vadd.f32 -4.0, %v9999_v58  ;;  %v9486_v35 = vadd.f32 -4.0, %v10001_v59  ;;  %v1270_v36 = vsub.f32 1.0, %v1268_v63  ;;  %v1271_v39 = vsub.f32 1.0, %v1269_v0 }
 0x146   : > { %15506 = vst [vmem:[#allocation42_spill] sm:$0xff] %v10112_v29  ;;  %15507 = vst [vmem:[#allocation43_spill] sm:$0xff] %v10114_v33  ;;  %v881_v40 = vand.u32 2147483647, %v9436_v3  ;;  %v882_v45 = vand.u32 2147483647, %v9437_v4 }
 0x147   : > { %v1292_v46 = vand.u32 2147483647, %v9487_v21  ;;  %v1293_v49 = vand.u32 2147483647, %v9488_v7  ;;  %v9440_v50 = vadd.f32 -7.0, %v9995_v56  ;;  %v9491_v55 = vadd.f32 -7.0, %v9999_v58 }
 0x148   : > { %v873_v20 = vand.u32 2147483647, %v9434_v27  ;;  %v874_v17 = vand.u32 2147483647, %v9435_v28  ;;  %v9492_v60 = vadd.f32 -7.0, %v10001_v59  ;;  %v9438_v63 = vadd.f32 -6.0, %v9995_v56 }
 0x149   : > { %v1284_v53 = vand.u32 2147483647, %v9485_v34  ;;  %v1285_v52 = vand.u32 2147483647, %v9486_v35  ;;  %v9439_v0 = vadd.f32 -6.0, %v9997_v57  ;;  %v10126_v3 = vmax.f32 %v1270_v36, 0.0 }
 0x14a   : > { %v10128_v4 = vmax.f32 %v1271_v39, 0.0  ;;  %v883_v21 = vsub.f32 1.0, %v881_v40  ;;  %v884_v7 = vsub.f32 1.0, %v882_v45  ;;  %v1294_v27 = vsub.f32 1.0, %v1292_v46  ;;  %v533_v45 = vpop.permute.xlu0 %532 }
 0x14b   : > { %15509 = vst [vmem:[#allocation45_spill] sm:$0xff] %v10126_v3  ;;  %v1295_v28 = vsub.f32 1.0, %v1293_v49  ;;  %v897_v51 = vand.u32 2147483647, %v9440_v50  ;;  %v898_v44 = vand.u32 2147483647, %v9441_v22 }
 0x14c   : > { %15510 = vst [vmem:[#allocation46_spill] sm:$0xff] %v10128_v4  ;;  %v875_v43 = vsub.f32 1.0, %v873_v20  ;;  %v876_v38 = vsub.f32 1.0, %v874_v17  ;;  %v1308_v37 = vand.u32 2147483647, %v9491_v55  ;;  %v1286_v34 = vsub.f32 1.0, %v1284_v53  ;;  %v528_v55 = vpop.permute.xlu1 %527 }
 0x14d   : > { %v1309_v54 = vand.u32 2147483647, %v9492_v60  ;;  %v1287_v35 = vsub.f32 1.0, %v1285_v52  ;;  %v889_v33 = vand.u32 2147483647, %v9438_v63  ;;  %v10130_v26 = vmax.f32 %v883_v21, 0.0 }
 0x14e   : > { %v890_v29 = vand.u32 2147483647, %v9439_v0  ;;  %v10132_v36 = vmax.f32 %v884_v7, 0.0  ;;  %v9489_v39 = vadd.f32 -6.0, %v9999_v58  ;;  %v9490_v40 = vadd.f32 -6.0, %v10001_v59 }
 0x14f   : > { %15511 = vst [vmem:[#allocation47_spill] sm:$0xff] %v10130_v26  ;;  %v10136_v46 = vmax.f32 %v1294_v27, 0.0  ;;  %v10138_v22 = vmax.f32 %v1295_v28, 0.0  ;;  %v899_v17 = vsub.f32 1.0, %v897_v51  ;;  %v900_v20 = vsub.f32 1.0, %v898_v44 }
 0x150   : > { %15512 = vst [vmem:[#allocation48_spill] sm:$0xff] %v10132_v36  ;;  %v10140_v49 = vmax.f32 %v875_v43, 0.0  ;;  %v10142_v52 = vmax.f32 %v876_v38, 0.0  ;;  %v1310_v53 = vsub.f32 1.0, %v1308_v37  ;;  %v1311_v50 = vsub.f32 1.0, %v1309_v54 }
 0x151   : > { %15513 = vst [vmem:[#allocation49_spill] sm:$0xff] %v10136_v46  ;;  %15514 = vst [vmem:[#allocation50_spill] sm:$0xff] %v10138_v22  ;;  %v10144_v60 = vmax.f32 %v1286_v34, 0.0  ;;  %v10146_v63 = vmax.f32 %v1287_v35, 0.0  ;;  %v891_v0 = vsub.f32 1.0, %v889_v33  ;;  %v892_v21 = vsub.f32 1.0, %v890_v29 }
 0x152   : > { %15515 = vst [vmem:[#allocation51_spill] sm:$0xff] %v10140_v49  ;;  %15516 = vst [vmem:[#allocation52_spill] sm:$0xff] %v10142_v52  ;;  %v15519_v27 = vunpack.c.0.s8 %v10008_v9  ;;  %v10155_v38 = vrot.slane %v10018_v23, %v9976_v31  ;;  %v1300_v37 = vand.u32 2147483647, %v9489_v39  ;;  %v1301_v43 = vand.u32 2147483647, %v9490_v40  ;;  %v538_v23 = vpop.permute.xlu0 %537 }
 0x153   : > { %15517 = vst [vmem:[#allocation53_spill] sm:$0xff] %v10144_v60  ;;  %15518 = vst [vmem:[#allocation54_spill] sm:$0xff] %v10146_v63  ;;  %v10157_v25 = vmax.f32 %v899_v17, 0.0  ;;  %v10159_v29 = vmax.f32 %v900_v20, 0.0  ;;  %v10163_v9 = vmax.f32 %v1310_v53, 0.0  ;;  %v10167_v40 = vmax.f32 %v891_v0, 0.0 }
 0x154   : > { %v10151_v28 = vsub.s32 %v15519_v27, %v9971_v12  ;;  %15521 = vst [vmem:[#allocation56_spill] sm:$0xff] %v10155_v38  ;;  %v10165_v27 = vmax.f32 %v1311_v50, 0.0  ;;  %v10171_v5 = vsub.f32 1.0, %v1300_v37 }
 0x155   : > { %15522 = vst [vmem:[#allocation57_spill] sm:$0xff] %v10157_v25  ;;  %15523 = vst [vmem:[#allocation58_spill] sm:$0xff] %v10159_v29 }
 0x156   : > { %15520 = vst [vmem:[#allocation55_spill] sm:$0xff] %v10151_v28  ;;  %15524 = vst [vmem:[#allocation59_spill] sm:$0xff] %v10163_v9 }
 0x157   : > { %15525 = vst [vmem:[#allocation60_spill] sm:$0xff] %v10165_v27  ;;  %15526 = vst [vmem:[#allocation61_spill] sm:$0xff] %v10167_v40 }
 0x158   : > { %15528 = vst [vmem:[#allocation63_spill] sm:$0xff] %v10171_v5 }
 0x1df   : > { %v9600_v7 = vpop.f32.mrb[4].mxu1  ;;  %v9640_v44 = vpop.f32.mrb[4].mxu0 }
 0x1e0   : > { %v719_v51 = vadd.f32 %v9600_v7, %v528_v55  ;;  %v1130_v54 = vadd.f32 %v9640_v44, %v528_v55  ;;  %v713_v34 = vpop.f32.mrb[5].mxu1  ;;  %v1124_v35 = vpop.f32.mrb[5].mxu0  ;;  %v10169_v55 = vmax.f32 %v892_v21, 0.0 }
 0x1e1   : > { %v714_v33 = vadd.f32 %v713_v34, %v10098_v16  ;;  %v1125_v12 = vadd.f32 %v1124_v35, %v10098_v16  ;;  %v10173_v34 = vsub.f32 1.0, %v1301_v43 }
 0x1e2   : > { %v791_v8 = vmax.f32 %v719_v51, 0.0  ;;  %v1202_v39 = vmax.f32 %v1130_v54, 0.0  ;;  %15527 = vst [vmem:[#allocation62_spill] sm:$0xff] %v10169_v55 }
 0x1e3   : > { %v790_v7 = vmax.f32 %v714_v33, 0.0  ;;  %v1201_v17 = vmax.f32 %v1125_v12, 0.0  ;;  %v9603_v44 = vpop.f32.mrb[6].mxu1  ;;  %v9643_v20 = vpop.f32.mrb[6].mxu0  ;;  %15529 = vst [vmem:[#allocation64_spill] sm:$0xff] %v10173_v34 }
 0x1e4   : > { %v812_v16 = vmul.f32 %v10011_v13, %v791_v8  ;;  %v1223_v53 = vmul.f32 %v10155_v38, %v1202_v39  ;;  %v10177_v50 = vadd.f32 %v9603_v44, %v538_v23  ;;  %v10179_v51 = vadd.f32 %v9643_v20, %v538_v23  ;;  %v723_v0 = vpop.f32.mrb[7].mxu1  ;;  %v1134_v54 = vpop.f32.mrb[7].mxu0 }
 0x1e5   : > { %v811_v21 = vmul.f32 %v10011_v13, %v790_v7  ;;  %v10183_v35 = vmul.f32 %v10155_v38, %v1201_v17  ;;  %v10185_v33 = vadd.f32 %v723_v0, %v533_v45  ;;  %v10187_v37 = vadd.f32 %v1134_v54, %v533_v45 }
 0x1e6   : > { %v1491_v43 = vcombine.high %v812_v16, %v812_v16  ;;  %v1498_v8 = vrot.slane %v812_v16, %v10151_v28  ;;  %v3416_v12 = vcombine.high %v1223_v53, %v1223_v53  ;;  %v3423_v39 = vrot.slane %v1223_v53, %v10151_v28 }
 0x1e7   : > { %15530 = vst [vmem:[#allocation65_spill] sm:$0xff] %v10187_v37  ;;  %v1379_v44 = vcombine.high %v811_v21, %v811_v21  ;;  %v10192_v23 = vrot.slane %v811_v21, %v10151_v28  ;;  %v10198_v17 = vrot.slane %v10183_v35, %v10151_v28  ;;  %v10200_v20 = vpop.f32.mrb[8].mxu1  ;;  %v10202_v45 = vpop.f32.mrb[8].mxu0 }
 0x1e8   : > { %15531 = vst [vmem:[#allocation66_spill] sm:$0xff] %v10200_v20  ;;  %15532 = vst [vmem:[#allocation67_spill] sm:$0xff] %v10202_v45  ;;  %v1505_v16 = vrot.slane %v1491_v43, %v10151_v28  ;;  %v1506_v0 = vcombine.high %v1498_v8, %v1498_v8  ;;  %v1514_v53 = vrot.slane %v1498_v8, %v10151_v28  ;;  %v10207_v21 = vpop.f32.mrb[9].mxu1  ;;  %v10209_v2 = vpop.f32.mrb[9].mxu0 }
 0x1e9   : > { %v3430_v54 = vrot.slane %v3416_v12, %v10151_v28  ;;  %15533 = vst [vmem:[#allocation68_spill] sm:$0xff] %v10207_v21  ;;  %15534 = vst [vmem:[#allocation69_spill] sm:$0xff] %v10209_v2  ;;  %v3431_v7 = vcombine.high %v3423_v39, %v3423_v39  ;;  %v3439_v1 = vrot.slane %v3423_v39, %v10151_v28 }
 0x1ea   : > { %v10213_v62 = vrot.slane %v1379_v44, %v10151_v28  ;;  %v1507_v32 = vcombine.high %v1505_v16, %v1505_v16  ;;  %v1521_v43 = vrot.slane %v1505_v16, %v10151_v28  ;;  %v1528_v8 = vrot.slane %v1506_v0, %v10151_v28 }
 0x1eb   : > { %v1536_v30 = vcombine.high %v1514_v53, %v1514_v53  ;;  %v1542_v12 = vrot.slane %v1514_v53, %v9976_v31  ;;  %v3432_v6 = vcombine.high %v3430_v54, %v3430_v54  ;;  %v3446_v24 = vrot.slane %v3430_v54, %v10151_v28  ;;  %v9609_v39 = vpop.f32.mrb[10].mxu1  ;;  %v9649_v18 = vpop.f32.mrb[10].mxu0 }
 0x1ec   : > { %v3453_v19 = vrot.slane %v3431_v7, %v10151_v28  ;;  %v1535_v44 = vrot.slane %v1507_v32, %v10151_v28  ;;  %v1537_v15 = vcombine.high %v1521_v43, %v1521_v43  ;;  %v1538_v14 = vcombine.high %v1528_v8, %v1528_v8  ;;  %v10224_v59 = vpop.f32.mrb[11].mxu1 }
 0x1ed   : > { %v1546_v61 = vrot.slane %v1528_v8, %v9976_v31  ;;  %15535 = vst [vmem:[#allocation70_spill] sm:$0xff] %v10224_v59  ;;  %v1550_v16 = vrot.slane %v1536_v30, %v9976_v31  ;;  %v1558_v0 = vrot.slane %v1521_v43, %v9976_v31  ;;  %v10229_v53 = vmul.f32 %v1542_v12, %v10020_v41 }
 0x1ee   : > { %v10232_v54 = vmul.f32 %v1542_v12, %v10022_v42  ;;  %v1554_v18 = vrot.slane %v1538_v14, %v9976_v31  ;;  %v1562_v32 = vrot.slane %v1535_v44, %v9976_v31  ;;  %v1566_v7 = vrot.slane %v1537_v15, %v9976_v31 }
 0x1ef   : > { %v10238_v8 = vmul.f32 %v1546_v61, %v10020_v41  ;;  %v10241_v39 = vmul.f32 %v1546_v61, %v10022_v42  ;;  %v10244_v30 = vmul.f32 %v1550_v16, %v10020_v41  ;;  %v10247_v43 = vmul.f32 %v1550_v16, %v10022_v42 }
 0x1f0   : > { %v10250_v12 = vmul.f32 %v1558_v0, %v10020_v41  ;;  %v10253_v14 = vmul.f32 %v1554_v18, %v10020_v41  ;;  %v10256_v15 = vmul.f32 %v1554_v18, %v10022_v42  ;;  %v10259_v44 = vmul.f32 %v1558_v0, %v10022_v42 }
 0x1f1   : > { %v10262_v61 = vmul.f32 %v1562_v32, %v10020_v41  ;;  %v10265_v58 = vmul.f32 %v1562_v32, %v10022_v42  ;;  %v10268_v16 = vmul.f32 %v1566_v7, %v10020_v41  ;;  %v10271_v57 = vmul.f32 %v1566_v7, %v10022_v42 }
 0x1f2   : > { %v3460_v56 = vrot.slane %v3432_v6, %v10151_v28  ;;  %v3461_v59 = vcombine.high %v3439_v1, %v3439_v1  ;;  %v3462_v18 = vcombine.high %v3446_v24, %v3446_v24  ;;  %v3463_v55 = vcombine.high %v3453_v19, %v3453_v19 }
 0x1f3   : > { %v3467_v0 = vrot.slane %v3439_v1, %v9976_v31  ;;  %v3471_v40 = vrot.slane %v3453_v19, %v9976_v31  ;;  %v3483_v2 = vrot.slane %v3446_v24, %v9976_v31  ;;  %v1395_v41 = vcombine.high %v10213_v62, %v10213_v62 }
 0x1f4   : > { %v3487_v32 = vrot.slane %v3460_v56, %v9976_v31  ;;  %v3475_v27 = vrot.slane %v3461_v59, %v9976_v31  ;;  %v3479_v7 = vrot.slane %v3463_v55, %v9976_v31  ;;  %v3491_v6 = vrot.slane %v3462_v18, %v9976_v31 }
 0x1f5   : > { %v10284_v42 = vmul.f32 %v3467_v0, %v10024_v47  ;;  %v10287_v1 = vmul.f32 %v3467_v0, %v10026_v48  ;;  %v10290_v19 = vmul.f32 %v3471_v40, %v10024_v47  ;;  %v10293_v56 = vmul.f32 %v3471_v40, %v10026_v48 }
 0x1f6   : > { %v10296_v24 = vmul.f32 %v3483_v2, %v10024_v47  ;;  %v10299_v59 = vmul.f32 %v3475_v27, %v10024_v47  ;;  %v10302_v55 = vmul.f32 %v3475_v27, %v10026_v48  ;;  %v10305_v18 = vmul.f32 %v3479_v7, %v10024_v47 }
 0x1f7   : > { %v10308_v0 = vmul.f32 %v3479_v7, %v10026_v48  ;;  %v10311_v9 = vmul.f32 %v3483_v2, %v10026_v48  ;;  %v10314_v40 = vmul.f32 %v3487_v32, %v10024_v47  ;;  %v10317_v29 = vmul.f32 %v3487_v32, %v10026_v48 }
 0x1f8   : > { %v10320_v25 = vmul.f32 %v3491_v6, %v10024_v47  ;;  %v10323_v27 = vmul.f32 %v3491_v6, %v10026_v48  ;;  %v1402_v21 = vrot.slane %v10192_v23, %v10151_v28  ;;  %v1409_v7 = vrot.slane %v10213_v62, %v10151_v28 }
 0x1f9   : > { %v15536_v2 = vcombine.high %v10192_v23, %v10192_v23  ;;  %v1423_v32 = vrot.slane %v1395_v41, %v10151_v28  ;;  %v15537_v47 = vcombine.high %v10183_v35, %v10183_v35  ;;  %v3319_v6 = vcombine.high %v10198_v17, %v10198_v17 }
 0x1fa   : > { %v3327_v48 = vrot.slane %v10198_v17, %v10151_v28  ;;  %v1424_v52 = vcombine.high %v1402_v21, %v1402_v21  ;;  %v1425_v62 = vcombine.high %v1409_v7, %v1409_v7  ;;  %v1430_v22 = vrot.slane %v1402_v21, %v9976_v31 }
 0x1fb   : > { %v1416_v63 = vrot.slane %v15536_v2, %v10151_v28  ;;  %v3318_v60 = vrot.slane %v15537_v47, %v10151_v28  ;;  %v1446_v41 = vrot.slane %v1409_v7, %v9976_v31  ;;  %v1450_v2 = vrot.slane %v1423_v32, %v9976_v31 }
 0x1fc   : > { %v1438_v47 = vrot.slane %v1424_v52, %v9976_v31  ;;  %v1454_v36 = vrot.slane %v1425_v62, %v9976_v31  ;;  %v1462_v17 = vmul.f32 %v1430_v22, %v10032_v10  ;;  %v1463_v26 = vmul.f32 %v1430_v22, %v10034_v11 }
 0x1fd   : > { %v1426_v49 = vcombine.high %v1416_v63, %v1416_v63  ;;  %v1434_v23 = vrot.slane %v1416_v63, %v9976_v31  ;;  %v3320_v46 = vcombine.high %v3318_v60, %v3318_v60  ;;  %v1470_v63 = vmul.f32 %v1446_v41, %v10032_v10 }
 0x1fe   : > { %v1466_v7 = vmul.f32 %v1438_v47, %v10032_v10  ;;  %v1467_v32 = vmul.f32 %v1438_v47, %v10034_v11  ;;  %v1471_v62 = vmul.f32 %v1446_v41, %v10034_v11  ;;  %v1472_v5 = vmul.f32 %v1450_v2, %v10032_v10 }
 0x1ff   : > { %v1442_v35 = vrot.slane %v1426_v49, %v9976_v31  ;;  %v1464_v34 = vmul.f32 %v1434_v23, %v10032_v10  ;;  %v1465_v21 = vmul.f32 %v1434_v23, %v10034_v11  ;;  %v1473_v22 = vmul.f32 %v1450_v2, %v10034_v11 }
 0x200   : > { %v1474_v45 = vmul.f32 %v1454_v36, %v10032_v10  ;;  %v1475_v23 = vmul.f32 %v1454_v36, %v10034_v11  ;;  %v10364_v20 = vadd.f32 %v10229_v53, %v1462_v17  ;;  %v10367_v37 = vadd.f32 %v10232_v54, %v1463_v26 }
 0x201   : > { %v1468_v52 = vmul.f32 %v1442_v35, %v10032_v10  ;;  %v1469_v49 = vmul.f32 %v1442_v35, %v10034_v11  ;;  %v10370_v47 = vadd.f32 %v10238_v8, %v1464_v34  ;;  %v10373_v35 = vadd.f32 %v10241_v39, %v1465_v21 }
 0x202   : > { %v10376_v41 = vadd.f32 %v10244_v30, %v1466_v7  ;;  %v10379_v2 = vadd.f32 %v10247_v43, %v1467_v32  ;;  %v10388_v26 = vadd.f32 %v10250_v12, %v1470_v63  ;;  %v10391_v34 = vadd.f32 %v10259_v44, %v1471_v62  ;;  %v10419_v63 = vpop.permute.xlu0 %542 }
 0x203   : > { %v10382_v36 = vadd.f32 %v10253_v14, %v1468_v52  ;;  %v10385_v53 = vadd.f32 %v10256_v15, %v1469_v49  ;;  %v10394_v54 = vadd.f32 %v10262_v61, %v1472_v5  ;;  %v10397_v8 = vadd.f32 %v10265_v58, %v1473_v22  ;;  %15538 = vst [vmem:[#allocation71_spill] sm:$0xff] %v10419_v63 }
 0x204   : > { %v10400_v39 = vadd.f32 %v10268_v16, %v1474_v45  ;;  %v10403_v30 = vadd.f32 %v10271_v57, %v1475_v23  ;;  %v3334_v43 = vrot.slane %v3318_v60, %v10151_v28  ;;  %v3341_v12 = vrot.slane %v3319_v6, %v10151_v28 }
 0x205   : > { %v3348_v14 = vrot.slane %v3320_v46, %v10151_v28  ;;  %v3349_v15 = vcombine.high %v3327_v48, %v3327_v48  ;;  %v3355_v44 = vrot.slane %v3327_v48, %v9976_v31  ;;  %v793_v58 = vmax.f32 %v10177_v50, 0.0 }
 0x206   : > { %v3350_v5 = vcombine.high %v3334_v43, %v3334_v43  ;;  %v3371_v61 = vrot.slane %v3334_v43, %v9976_v31  ;;  %v1204_v45 = vmax.f32 %v10179_v51, 0.0  ;;  %v3351_v16 = vcombine.high %v3341_v12, %v3341_v12 }
 0x207   : > { %v3359_v57 = vrot.slane %v3341_v12, %v9976_v31  ;;  %v3363_v17 = vrot.slane %v3349_v15, %v9976_v31  ;;  %v3375_v60 = vrot.slane %v3348_v14, %v9976_v31  ;;  %v3387_v46 = vmul.f32 %v3355_v44, %v10126_v3 }
 0x208   : > { %v3379_v6 = vrot.slane %v3350_v5, %v9976_v31  ;;  %v3388_v48 = vmul.f32 %v3355_v44, %v10128_v4  ;;  %v3395_v21 = vmul.f32 %v3371_v61, %v10126_v3  ;;  %v3367_v50 = vrot.slane %v3351_v16, %v9976_v31 }
 0x209   : > { %v3389_v51 = vmul.f32 %v3359_v57, %v10126_v3  ;;  %v3390_v7 = vmul.f32 %v3359_v57, %v10128_v4  ;;  %v3391_v32 = vmul.f32 %v3363_v17, %v10126_v3  ;;  %v3392_v52 = vmul.f32 %v3363_v17, %v10128_v4 }
 0x20a   : > { %v3396_v49 = vmul.f32 %v3371_v61, %v10128_v4  ;;  %v3397_v62 = vmul.f32 %v3375_v60, %v10126_v3  ;;  %v3398_v22 = vmul.f32 %v3375_v60, %v10128_v4  ;;  %v3393_v23 = vmul.f32 %v3367_v50, %v10126_v3 }
 0x20b   : > { %v3394_v43 = vmul.f32 %v3367_v50, %v10128_v4  ;;  %v3399_v12 = vmul.f32 %v3379_v6, %v10126_v3  ;;  %v3400_v14 = vmul.f32 %v3379_v6, %v10128_v4  ;;  %v10434_v15 = vadd.f32 %v10284_v42, %v3387_v46  ;;  %v15539_v6 = vld [vmem:[#allocation65_spill] sm:$0xff]  ;;  %v15546_v4 = vld [vmem:[#allocation47_spill] sm:$0xff] }
 0x20c   : > { %v10437_v44 = vadd.f32 %v10287_v1, %v3388_v48  ;;  %v10440_v5 = vadd.f32 %v10290_v19, %v3389_v51  ;;  %v10443_v61 = vadd.f32 %v10293_v56, %v3390_v7  ;;  %v10446_v16 = vadd.f32 %v10299_v59, %v3391_v32  ;;  %v15544_v32 = vld [vmem:[#allocation64_spill] sm:$0xff] }
 0x20d   : > { %v10449_v57 = vadd.f32 %v10302_v55, %v3392_v52  ;;  %v10452_v17 = vadd.f32 %v10305_v18, %v3393_v23  ;;  %v10455_v42 = vadd.f32 %v10308_v0, %v3394_v43  ;;  %v10458_v1 = vadd.f32 %v10296_v24, %v3395_v21  ;;  %v548_v55 = vpop.permute.xlu0 %547 }
 0x20e   : > { %v10461_v19 = vadd.f32 %v10311_v9, %v3396_v49  ;;  %v10464_v56 = vadd.f32 %v10314_v40, %v3397_v62  ;;  %v10467_v59 = vadd.f32 %v10317_v29, %v3398_v22  ;;  %v10470_v60 = vadd.f32 %v10320_v25, %v3399_v12  ;;  %v15540_v40 = vld [vmem:[#allocation66_spill] sm:$0xff]  ;;  %v15541_v29 = vld [vmem:[#allocation67_spill] sm:$0xff] }
 0x20f   : > { %v10473_v18 = vadd.f32 %v10323_v27, %v3400_v14  ;;  %v814_v0 = vmul.f32 %v10011_v13, %v793_v58  ;;  %v1225_v24 = vmul.f32 %v10155_v38, %v1204_v45  ;;  %v792_v9 = vmax.f32 %v10185_v33, 0.0  ;;  %v15542_v33 = vld [vmem:[#allocation63_spill] sm:$0xff] }
 0x210   : > { %v1203_v46 = vmax.f32 %v15539_v6, 0.0  ;;  %v10480_v48 = vadd.f32 %v15540_v40, %v548_v55  ;;  %v10483_v21 = vadd.f32 %v15541_v29, %v548_v55  ;;  %v10492_v7 = vmax.f32 %v15542_v33, 0.0 }
 0x211   : > { %v1715_v50 = vcombine.high %v814_v0, %v814_v0  ;;  %v1722_v25 = vrot.slane %v814_v0, %v10151_v28  ;;  %v3640_v51 = vcombine.high %v1225_v24, %v1225_v24  ;;  %v3647_v27 = vrot.slane %v1225_v24, %v10151_v28 }
 0x212   : > { %v813_v58 = vmul.f32 %v10011_v13, %v792_v9  ;;  %v10489_v45 = vmul.f32 %v10155_v38, %v1203_v46  ;;  %15543 = vst [vmem:[#allocation65_spill] sm:$0xff] %v10492_v7  ;;  %v10495_v52 = vmax.f32 %v15544_v32, 0.0 }
 0x213   : > { %v1729_v49 = vrot.slane %v1715_v50, %v10151_v28  ;;  %v1730_v62 = vcombine.high %v1722_v25, %v1722_v25  ;;  %v1738_v22 = vrot.slane %v1722_v25, %v10151_v28  ;;  %v3654_v23 = vrot.slane %v3640_v51, %v10151_v28 }
 0x214   : > { %15545 = vst [vmem:[#allocation66_spill] sm:$0xff] %v10495_v52  ;;  %v3655_v43 = vcombine.high %v3647_v27, %v3647_v27  ;;  %v3663_v12 = vrot.slane %v3647_v27, %v10151_v28  ;;  %v1603_v29 = vcombine.high %v813_v58, %v813_v58  ;;  %v1610_v50 = vrot.slane %v813_v58, %v10151_v28 }
 0x215   : > { %v1731_v0 = vcombine.high %v1729_v49, %v1729_v49  ;;  %v1745_v24 = vrot.slane %v1729_v49, %v10151_v28  ;;  %v1752_v9 = vrot.slane %v1730_v62, %v10151_v28  ;;  %v1760_v6 = vcombine.high %v1738_v22, %v1738_v22 }
 0x216   : > { %v1766_v46 = vrot.slane %v1738_v22, %v9976_v31  ;;  %v3656_v40 = vcombine.high %v3654_v23, %v3654_v23  ;;  %v3670_v49 = vrot.slane %v3654_v23, %v10151_v28  ;;  %v3677_v62 = vrot.slane %v3655_v43, %v10151_v28 }
 0x217   : > { %v1759_v25 = vrot.slane %v1731_v0, %v10151_v28  ;;  %v1761_v51 = vcombine.high %v1745_v24, %v1745_v24  ;;  %v1762_v27 = vcombine.high %v1752_v9, %v1752_v9  ;;  %v1770_v33 = vrot.slane %v1752_v9, %v9976_v31  ;;  %v15547_v0 = vld [vmem:[#allocation48_spill] sm:$0xff] }
 0x218   : > { %v1774_v32 = vrot.slane %v1760_v6, %v9976_v31  ;;  %v1782_v55 = vrot.slane %v1745_v24, %v9976_v31  ;;  %v10516_v58 = vmul.f32 %v1766_v46, %v15546_v4  ;;  %v10519_v3 = vmul.f32 %v1766_v46, %v15547_v0 }
 0x219   : > { %v1778_v22 = vrot.slane %v1762_v27, %v9976_v31  ;;  %v1786_v14 = vrot.slane %v1759_v25, %v9976_v31  ;;  %v1790_v9 = vrot.slane %v1761_v51, %v9976_v31  ;;  %v10523_v6 = vmul.f32 %v1770_v33, %v15546_v4 }
 0x21a   : > { %v10526_v24 = vmul.f32 %v1770_v33, %v15547_v0  ;;  %v10529_v23 = vmul.f32 %v1774_v32, %v15546_v4  ;;  %v10532_v43 = vmul.f32 %v1774_v32, %v15547_v0  ;;  %v10541_v51 = vmul.f32 %v1782_v55, %v15546_v4 }
 0x21b   : > { %15548 = vst [vmem:[#allocation67_spill] sm:$0xff] %v10523_v6  ;;  %v10535_v25 = vmul.f32 %v1778_v22, %v15546_v4  ;;  %v10538_v46 = vmul.f32 %v1778_v22, %v15547_v0  ;;  %v10544_v27 = vmul.f32 %v1782_v55, %v15547_v0  ;;  %v10547_v33 = vmul.f32 %v1786_v14, %v15546_v4 }
 0x21c   : > { %15549 = vst [vmem:[#allocation63_spill] sm:$0xff] %v10526_v24  ;;  %15550 = vst [vmem:[#allocation64_spill] sm:$0xff] %v10529_v23  ;;  %v10550_v11 = vmul.f32 %v1786_v14, %v15547_v0  ;;  %v3684_v32 = vrot.slane %v3656_v40, %v10151_v28  ;;  %v3685_v10 = vcombine.high %v3663_v12, %v3663_v12 }
 0x21d   : > { %15551 = vst [vmem:[#allocation72_spill] sm:$0xff] %v10532_v43  ;;  %15552 = vst [vmem:[#allocation73_spill] sm:$0xff] %v10535_v25  ;;  %v3686_v52 = vcombine.high %v3670_v49, %v3670_v49  ;;  %v3687_v7 = vcombine.high %v3677_v62, %v3677_v62  ;;  %v3691_v22 = vrot.slane %v3663_v12, %v9976_v31 }
 0x21e   : > { %15553 = vst [vmem:[#allocation74_spill] sm:$0xff] %v10538_v46  ;;  %15554 = vst [vmem:[#allocation75_spill] sm:$0xff] %v10541_v51  ;;  %v10555_v46 = vmul.f32 %v1790_v9, %v15546_v4  ;;  %v3695_v51 = vrot.slane %v3677_v62, %v9976_v31  ;;  %v3707_v55 = vrot.slane %v3670_v49, %v9976_v31  ;;  %v15560_v4 = vld [vmem:[#allocation49_spill] sm:$0xff]  ;;  %v15562_v62 = vld [vmem:[#allocation50_spill] sm:$0xff] }
 0x21f   : > { %15555 = vst [vmem:[#allocation76_spill] sm:$0xff] %v10544_v27  ;;  %15556 = vst [vmem:[#allocation77_spill] sm:$0xff] %v10547_v33  ;;  %v3711_v27 = vrot.slane %v3684_v32, %v9976_v31  ;;  %v10561_v33 = vmul.f32 %v1790_v9, %v15547_v0  ;;  %v3699_v14 = vrot.slane %v3685_v10, %v9976_v31 }
 0x220   : > { %15557 = vst [vmem:[#allocation78_spill] sm:$0xff] %v10550_v11  ;;  %15558 = vst [vmem:[#allocation79_spill] sm:$0xff] %v10555_v46  ;;  %v3703_v40 = vrot.slane %v3687_v7, %v9976_v31  ;;  %v1617_v11 = vrot.slane %v1603_v29, %v10151_v28  ;;  %v10567_v12 = vrot.slane %v3686_v52, %v9976_v31 }
 0x221   : > { %15559 = vst [vmem:[#allocation80_spill] sm:$0xff] %v10561_v33  ;;  %v10570_v46 = vmul.f32 %v3691_v22, %v15560_v4  ;;  %v10573_v25 = vmul.f32 %v3691_v22, %v15562_v62  ;;  %v10576_v49 = vmul.f32 %v3695_v51, %v15560_v4  ;;  %v10579_v9 = vmul.f32 %v3695_v51, %v15562_v62  ;;  %v15576_v33 = vld [vmem:[#allocation52_spill] sm:$0xff] }
 0x222   : > { %v10582_v10 = vmul.f32 %v3699_v14, %v15560_v4  ;;  %v10585_v7 = vmul.f32 %v3699_v14, %v15562_v62  ;;  %v10588_v52 = vmul.f32 %v3707_v55, %v15560_v4  ;;  %v10591_v29 = vmul.f32 %v3703_v40, %v15560_v4 }
 0x223   : > { %15561 = vst [vmem:[#allocation81_spill] sm:$0xff] %v10570_v46  ;;  %15563 = vst [vmem:[#allocation82_spill] sm:$0xff] %v10573_v25  ;;  %v10594_v32 = vmul.f32 %v3703_v40, %v15562_v62  ;;  %v10597_v22 = vmul.f32 %v3707_v55, %v15562_v62  ;;  %v10600_v51 = vmul.f32 %v3711_v27, %v15560_v4  ;;  %v15574_v55 = vmax.f32 %v10480_v48, 0.0  ;;  %v15575_v46 = vld [vmem:[#allocation51_spill] sm:$0xff] }
 0x224   : > { %15564 = vst [vmem:[#allocation83_spill] sm:$0xff] %v10576_v49  ;;  %15565 = vst [vmem:[#allocation84_spill] sm:$0xff] %v10579_v9  ;;  %v10603_v0 = vmul.f32 %v3711_v27, %v15562_v62  ;;  %v1618_v14 = vcombine.high %v1610_v50, %v1610_v50  ;;  %v3535_v40 = vrot.slane %v10489_v45, %v10151_v28 }
 0x225   : > { %15566 = vst [vmem:[#allocation85_spill] sm:$0xff] %v10582_v10  ;;  %15567 = vst [vmem:[#allocation86_spill] sm:$0xff] %v10585_v7  ;;  %v1619_v7 = vcombine.high %v1617_v11, %v1617_v11  ;;  %v1626_v10 = vrot.slane %v1610_v50, %v10151_v28 }
 0x226   : > { %15568 = vst [vmem:[#allocation87_spill] sm:$0xff] %v10588_v52  ;;  %15569 = vst [vmem:[#allocation88_spill] sm:$0xff] %v10591_v29  ;;  %v1633_v52 = vrot.slane %v1617_v11, %v10151_v28  ;;  %v3528_v29 = vcombine.high %v10489_v45, %v10489_v45  ;;  %v1640_v27 = vrot.slane %v1618_v14, %v10151_v28 }
 0x227   : > { %15570 = vst [vmem:[#allocation89_spill] sm:$0xff] %v10594_v32  ;;  %15571 = vst [vmem:[#allocation90_spill] sm:$0xff] %v10597_v22  ;;  %v10614_v22 = vmul.f32 %v10011_v13, %v15574_v55  ;;  %v1654_v50 = vrot.slane %v1626_v10, %v9976_v31  ;;  %v3543_v49 = vcombine.high %v3535_v40, %v3535_v40 }
 0x228   : > { %15572 = vst [vmem:[#allocation91_spill] sm:$0xff] %v10600_v51  ;;  %15573 = vst [vmem:[#allocation92_spill] sm:$0xff] %v10603_v0  ;;  %v1647_v0 = vrot.slane %v1619_v7, %v10151_v28  ;;  %v1648_v51 = vcombine.high %v1626_v10, %v1626_v10  ;;  %v1649_v32 = vcombine.high %v1633_v52, %v1633_v52 }
 0x229   : > { %v1670_v11 = vrot.slane %v1633_v52, %v9976_v31  ;;  %v3542_v9 = vrot.slane %v3528_v29, %v10151_v28  ;;  %v1650_v25 = vcombine.high %v1640_v27, %v1640_v27  ;;  %v1658_v45 = vrot.slane %v1640_v27, %v9976_v31 }
 0x22a   : > { %v1662_v48 = vrot.slane %v1648_v51, %v9976_v31  ;;  %v1674_v55 = vrot.slane %v1647_v0, %v9976_v31  ;;  %v1678_v14 = vrot.slane %v1649_v32, %v9976_v31  ;;  %v1686_v7 = vmul.f32 %v1654_v50, %v15575_v46 }
 0x22b   : > { %v1687_v43 = vmul.f32 %v1654_v50, %v15576_v33  ;;  %v1694_v10 = vmul.f32 %v1670_v11, %v15575_v46  ;;  %v1666_v52 = vrot.slane %v1650_v25, %v9976_v31  ;;  %v1688_v29 = vmul.f32 %v1658_v45, %v15575_v46 }
 0x22c   : > { %v1689_v23 = vmul.f32 %v1658_v45, %v15576_v33  ;;  %v1690_v27 = vmul.f32 %v1662_v48, %v15575_v46  ;;  %v1691_v51 = vmul.f32 %v1662_v48, %v15576_v33  ;;  %v1695_v0 = vmul.f32 %v1670_v11, %v15576_v33 }
 0x22d   : > { %v1696_v32 = vmul.f32 %v1674_v55, %v15575_v46  ;;  %v1697_v13 = vmul.f32 %v1674_v55, %v15576_v33  ;;  %v1692_v50 = vmul.f32 %v1666_v52, %v15575_v46  ;;  %v1693_v24 = vmul.f32 %v1666_v52, %v15576_v33 }
 0x22e   : > { %v1698_v25 = vmul.f32 %v1678_v14, %v15575_v46  ;;  %v1699_v6 = vmul.f32 %v1678_v14, %v15576_v33  ;;  %v10641_v45 = vadd.f32 %v1686_v7, %v10364_v20  ;;  %v10644_v63 = vadd.f32 %v1687_v43, %v10367_v37  ;;  %v15593_v46 = vld [vmem:[#allocation67_spill] sm:$0xff] }
 0x22f   : > { %v10647_v11 = vadd.f32 %v1688_v29, %v10370_v47  ;;  %v10650_v48 = vadd.f32 %v1689_v23, %v10373_v35  ;;  %v10653_v55 = vadd.f32 %v1690_v27, %v10376_v41  ;;  %v10656_v52 = vadd.f32 %v1691_v51, %v10379_v2  ;;  %v15579_v27 = vld [vmem:[#allocation54_spill] sm:$0xff] }
 0x230   : > { %v10659_v14 = vadd.f32 %v1692_v50, %v10382_v36  ;;  %v10662_v20 = vadd.f32 %v1693_v24, %v10385_v53  ;;  %v10665_v37 = vadd.f32 %v1694_v10, %v10388_v26  ;;  %v10668_v47 = vadd.f32 %v1695_v0, %v10391_v34 }
 0x231   : > { %v10671_v35 = vadd.f32 %v1696_v32, %v10394_v54  ;;  %v10674_v41 = vadd.f32 %v1697_v13, %v10397_v8  ;;  %v10677_v2 = vadd.f32 %v1698_v25, %v10400_v39  ;;  %v10680_v36 = vadd.f32 %v1699_v6, %v10403_v30 }
 0x232   : > { %v3544_v53 = vcombine.high %v3542_v9, %v3542_v9  ;;  %v3551_v24 = vrot.slane %v3535_v40, %v10151_v28  ;;  %v3558_v26 = vrot.slane %v3542_v9, %v10151_v28  ;;  %v3565_v34 = vrot.slane %v3543_v49, %v10151_v28 }
 0x233   : > { %v1939_v54 = vcombine.high %v10614_v22, %v10614_v22  ;;  %v1946_v13 = vrot.slane %v10614_v22, %v10151_v28  ;;  %v15577_v30 = vmax.f32 %v10483_v21, 0.0  ;;  %v15578_v22 = vld [vmem:[#allocation53_spill] sm:$0xff] }
 0x234   : > { %v3572_v8 = vrot.slane %v3544_v53, %v10151_v28  ;;  %v3573_v39 = vcombine.high %v3551_v24, %v3551_v24  ;;  %v3579_v23 = vrot.slane %v3551_v24, %v9976_v31  ;;  %v3574_v43 = vcombine.high %v3558_v26, %v3558_v26 }
 0x235   : > { %v1227_v6 = vmul.f32 %v10155_v38, %v15577_v30  ;;  %v3575_v40 = vcombine.high %v3565_v34, %v3565_v34  ;;  %v3583_v9 = vrot.slane %v3565_v34, %v9976_v31  ;;  %v3595_v49 = vrot.slane %v3558_v26, %v9976_v31 }
 0x236   : > { %v3587_v7 = vrot.slane %v3573_v39, %v9976_v31  ;;  %v3599_v10 = vrot.slane %v3572_v8, %v9976_v31  ;;  %v3611_v29 = vmul.f32 %v3579_v23, %v15578_v22  ;;  %v3612_v51 = vmul.f32 %v3579_v23, %v15579_v27 }
 0x237   : > { %v3591_v0 = vrot.slane %v3575_v40, %v9976_v31  ;;  %v3603_v21 = vrot.slane %v3574_v43, %v9976_v31  ;;  %v3613_v32 = vmul.f32 %v3583_v9, %v15578_v22  ;;  %v3614_v50 = vmul.f32 %v3583_v9, %v15579_v27 }
 0x238   : > { %v3615_v25 = vmul.f32 %v3587_v7, %v15578_v22  ;;  %v3616_v53 = vmul.f32 %v3587_v7, %v15579_v27  ;;  %v3619_v24 = vmul.f32 %v3595_v49, %v15578_v22  ;;  %v3620_v26 = vmul.f32 %v3595_v49, %v15579_v27 }
 0x239   : > { %v3617_v34 = vmul.f32 %v3591_v0, %v15578_v22  ;;  %v3618_v8 = vmul.f32 %v3591_v0, %v15579_v27  ;;  %v3621_v39 = vmul.f32 %v3599_v10, %v15578_v22  ;;  %v3622_v23 = vmul.f32 %v3599_v10, %v15579_v27 }
 0x23a   : > { %v3623_v30 = vmul.f32 %v3603_v21, %v15578_v22  ;;  %v3624_v43 = vmul.f32 %v3603_v21, %v15579_v27  ;;  %v10715_v40 = vadd.f32 %v3611_v29, %v10434_v15  ;;  %v10718_v9 = vadd.f32 %v3612_v51, %v10437_v44 }
 0x23b   : > { %v10721_v49 = vadd.f32 %v3613_v32, %v10440_v5  ;;  %v10724_v7 = vadd.f32 %v3614_v50, %v10443_v61  ;;  %v10727_v0 = vadd.f32 %v3615_v25, %v10446_v16  ;;  %v10730_v10 = vadd.f32 %v3616_v53, %v10449_v57 }
 0x23c   : > { %v10733_v21 = vadd.f32 %v3617_v34, %v10452_v17  ;;  %v10736_v15 = vadd.f32 %v3618_v8, %v10455_v42  ;;  %v10739_v44 = vadd.f32 %v3619_v24, %v10458_v1  ;;  %v10742_v5 = vadd.f32 %v3620_v26, %v10461_v19 }
 0x23d   : > { %v10745_v61 = vadd.f32 %v3621_v39, %v10464_v56  ;;  %v10748_v16 = vadd.f32 %v3622_v23, %v10467_v59  ;;  %v10751_v57 = vadd.f32 %v3623_v30, %v10470_v60  ;;  %v10754_v17 = vadd.f32 %v3624_v43, %v10473_v18  ;;  %v15582_v43 = vld [vmem:[#allocation57_spill] sm:$0xff] }
 0x23e   : > { %v1953_v42 = vrot.slane %v1939_v54, %v10151_v28  ;;  %v1954_v29 = vcombine.high %v1946_v13, %v1946_v13  ;;  %v1962_v1 = vrot.slane %v1946_v13, %v10151_v28  ;;  %v3864_v51 = vcombine.high %v1227_v6, %v1227_v6 }
 0x23f   : > { %v10760_v19 = vmul.f32 %v10567_v12, %v15560_v4  ;;  %v3871_v56 = vrot.slane %v1227_v6, %v10151_v28  ;;  %v10765_v59 = vadd.f32 %v10516_v58, %v10641_v45  ;;  %v10769_v60 = vadd.f32 %v10519_v3, %v10644_v63  ;;  %v15580_v58 = vld [vmem:[#allocation71_spill] sm:$0xff]  ;;  %v15581_v45 = vld [vmem:[#allocation68_spill] sm:$0xff] }
 0x240   : > { %v1955_v18 = vcombine.high %v1953_v42, %v1953_v42  ;;  %v1969_v54 = vrot.slane %v1953_v42, %v10151_v28  ;;  %v1976_v13 = vrot.slane %v1954_v29, %v10151_v28  ;;  %v1984_v32 = vcombine.high %v1962_v1, %v1962_v1  ;;  %v15583_v29 = vld [vmem:[#allocation58_spill] sm:$0xff] }
 0x241   : > { %v10775_v50 = vmul.f32 %v10567_v12, %v15562_v62  ;;  %v1990_v6 = vrot.slane %v1962_v1, %v9976_v31  ;;  %v3878_v25 = vrot.slane %v3864_v51, %v10151_v28  ;;  %v734_v53 = vadd.f32 %v15581_v45, %v15580_v58 }
 0x242   : > { %v1983_v3 = vrot.slane %v1955_v18, %v10151_v28  ;;  %v1985_v63 = vcombine.high %v1969_v54, %v1969_v54  ;;  %v1986_v24 = vcombine.high %v1976_v13, %v1976_v13  ;;  %v1994_v26 = vrot.slane %v1976_v13, %v9976_v31 }
 0x243   : > { %v1998_v34 = vrot.slane %v1984_v32, %v9976_v31  ;;  %v2006_v8 = vrot.slane %v1969_v54, %v9976_v31  ;;  %v3879_v39 = vcombine.high %v3871_v56, %v3871_v56  ;;  %v3887_v12 = vrot.slane %v3871_v56, %v10151_v28 }
 0x244   : > { %v2002_v23 = vrot.slane %v1986_v24, %v9976_v31  ;;  %v2010_v30 = vrot.slane %v1983_v3, %v9976_v31  ;;  %v10789_v42 = vmul.f32 %v1990_v6, %v15582_v43  ;;  %v10792_v1 = vmul.f32 %v1990_v6, %v15583_v29 }
 0x245   : > { %v2014_v51 = vrot.slane %v1985_v63, %v9976_v31  ;;  %v10796_v18 = vmul.f32 %v1994_v26, %v15582_v43  ;;  %v10799_v54 = vmul.f32 %v1994_v26, %v15583_v29  ;;  %v10802_v56 = vmul.f32 %v1998_v34, %v15582_v43 }
 0x246   : > { %v10805_v13 = vmul.f32 %v1998_v34, %v15583_v29  ;;  %v10808_v32 = vmul.f32 %v2002_v23, %v15582_v43  ;;  %v10811_v6 = vmul.f32 %v2002_v23, %v15583_v29  ;;  %v10814_v45 = vmul.f32 %v2006_v8, %v15582_v43 }
 0x247   : > { %15584 = vst [vmem:[#allocation71_spill] sm:$0xff] %v10802_v56  ;;  %v10817_v3 = vmul.f32 %v2006_v8, %v15583_v29  ;;  %v10820_v63 = vmul.f32 %v2010_v30, %v15582_v43  ;;  %v10823_v24 = vmul.f32 %v2010_v30, %v15583_v29  ;;  %v3880_v26 = vcombine.high %v3878_v25, %v3878_v25  ;;  %v15594_v30 = vld [vmem:[#allocation63_spill] sm:$0xff] }
 0x248   : > { %15585 = vst [vmem:[#allocation68_spill] sm:$0xff] %v10805_v13  ;;  %15586 = vst [vmem:[#allocation93_spill] sm:$0xff] %v10808_v32  ;;  %v3894_v34 = vrot.slane %v3878_v25, %v10151_v28  ;;  %v3901_v27 = vrot.slane %v3879_v39, %v10151_v28  ;;  %v3909_v22 = vcombine.high %v3887_v12, %v3887_v12 }
 0x249   : > { %15587 = vst [vmem:[#allocation94_spill] sm:$0xff] %v10811_v6  ;;  %15588 = vst [vmem:[#allocation95_spill] sm:$0xff] %v10814_v45  ;;  %v3915_v23 = vrot.slane %v3887_v12, %v9976_v31  ;;  %v10829_v33 = vmul.f32 %v2014_v51, %v15582_v43  ;;  %v3908_v8 = vrot.slane %v3880_v26, %v10151_v28 }
 0x24a   : > { %15589 = vst [vmem:[#allocation96_spill] sm:$0xff] %v10817_v3  ;;  %15590 = vst [vmem:[#allocation97_spill] sm:$0xff] %v10820_v63  ;;  %v10834_v62 = vadd.f32 %v15593_v46, %v10647_v11  ;;  %v10838_v4 = vadd.f32 %v15594_v30, %v10650_v48  ;;  %v3911_v25 = vcombine.high %v3901_v27, %v3901_v27  ;;  %v15596_v48 = vld [vmem:[#allocation59_spill] sm:$0xff]  ;;  %v15598_v3 = vld [vmem:[#allocation60_spill] sm:$0xff] }
 0x24b   : > { %15591 = vst [vmem:[#allocation98_spill] sm:$0xff] %v10823_v24  ;;  %15592 = vst [vmem:[#allocation99_spill] sm:$0xff] %v10829_v33  ;;  %v3910_v24 = vcombine.high %v3894_v34, %v3894_v34  ;;  %v3919_v39 = vrot.slane %v3901_v27, %v9976_v31  ;;  %v3923_v63 = vrot.slane %v3909_v22, %v9976_v31  ;;  %v794_v33 = vmax.f32 %v734_v53, 0.0 }
 0x24c   : > { %v10843_v12 = vmul.f32 %v2014_v51, %v15583_v29  ;;  %v3931_v43 = vrot.slane %v3894_v34, %v9976_v31  ;;  %v3935_v26 = vrot.slane %v3908_v8, %v9976_v31  ;;  %v3927_v46 = vrot.slane %v3911_v25, %v9976_v31 }
 0x24d   : > { %v10849_v11 = vrot.slane %v3910_v24, %v9976_v31  ;;  %v10852_v30 = vmul.f32 %v3915_v23, %v15596_v48  ;;  %v10855_v27 = vmul.f32 %v3915_v23, %v15598_v3  ;;  %v10858_v22 = vmul.f32 %v3919_v39, %v15596_v48 }
 0x24e   : > { %15595 = vst [vmem:[#allocation67_spill] sm:$0xff] %v10843_v12  ;;  %v10861_v51 = vmul.f32 %v3919_v39, %v15598_v3  ;;  %v10864_v34 = vmul.f32 %v3923_v63, %v15596_v48  ;;  %v10867_v53 = vmul.f32 %v3923_v63, %v15598_v3  ;;  %v10870_v24 = vmul.f32 %v3927_v46, %v15596_v48  ;;  %v10881_v39 = vpop.f32.mrb[11].mxu0  ;;  %v15636_v12 = vld [vmem:[#allocation61_spill] sm:$0xff] }
 0x24f   : > { %15597 = vst [vmem:[#allocation63_spill] sm:$0xff] %v10852_v30  ;;  %15599 = vst [vmem:[#allocation100_spill] sm:$0xff] %v10855_v27  ;;  %v10873_v8 = vmul.f32 %v3927_v46, %v15598_v3  ;;  %v10876_v23 = vmul.f32 %v3931_v43, %v15596_v48  ;;  %v10879_v25 = vmul.f32 %v3931_v43, %v15598_v3  ;;  %v15616_v27 = vld [vmem:[#allocation75_spill] sm:$0xff] }
 0x250   : > { %15600 = vst [vmem:[#allocation101_spill] sm:$0xff] %v10858_v22  ;;  %15601 = vst [vmem:[#allocation102_spill] sm:$0xff] %v10861_v51  ;;  %v10884_v29 = vmul.f32 %v3935_v26, %v15596_v48  ;;  %v10887_v63 = vmul.f32 %v3935_v26, %v15598_v3  ;;  %v15617_v26 = vld [vmem:[#allocation76_spill] sm:$0xff] }
 0x251   : > { %15602 = vst [vmem:[#allocation103_spill] sm:$0xff] %v10864_v34  ;;  %15603 = vst [vmem:[#allocation104_spill] sm:$0xff] %v10867_v53  ;;  %v15611_v53 = vld [vmem:[#allocation9_spill] sm:$0xff] }
 0x252   : > { %15604 = vst [vmem:[#allocation105_spill] sm:$0xff] %v10870_v24  ;;  %15605 = vst [vmem:[#allocation106_spill] sm:$0xff] %v10873_v8  ;;  %v815_v34 = vmul.f32 %v15611_v53, %v794_v33  ;;  %v15612_v24 = vld [vmem:[#allocation64_spill] sm:$0xff]  ;;  %v15618_v33 = vld [vmem:[#allocation77_spill] sm:$0xff] }
 0x253   : > { %15606 = vst [vmem:[#allocation107_spill] sm:$0xff] %v10876_v23  ;;  %15607 = vst [vmem:[#allocation108_spill] sm:$0xff] %v10879_v25  ;;  %v1816_v46 = vadd.f32 %v15612_v24, %v10653_v55  ;;  %v15613_v8 = vld [vmem:[#allocation72_spill] sm:$0xff]  ;;  %v15614_v23 = vld [vmem:[#allocation73_spill] sm:$0xff]  ;;  %v1822_v30 = vadd.f32 %v15618_v33, %v10671_v35 }
 0x254   : > { %15608 = vst [vmem:[#allocation109_spill] sm:$0xff] %v10881_v39  ;;  %15609 = vst [vmem:[#allocation110_spill] sm:$0xff] %v10884_v29  ;;  %v1817_v51 = vadd.f32 %v15613_v8, %v10656_v52  ;;  %v1818_v43 = vadd.f32 %v15614_v23, %v10659_v14  ;;  %v15615_v25 = vld [vmem:[#allocation74_spill] sm:$0xff]  ;;  %v1820_v29 = vadd.f32 %v15616_v27, %v10665_v37  ;;  %v15620_v52 = vld [vmem:[#allocation79_spill] sm:$0xff] }
 0x255   : > { %15610 = vst [vmem:[#allocation111_spill] sm:$0xff] %v10887_v63  ;;  %v1819_v22 = vadd.f32 %v15615_v25, %v10662_v20  ;;  %v1821_v63 = vadd.f32 %v15617_v26, %v10668_v47  ;;  %v15619_v55 = vld [vmem:[#allocation78_spill] sm:$0xff]  ;;  %v1824_v8 = vadd.f32 %v15620_v52, %v10677_v2  ;;  %v15621_v14 = vld [vmem:[#allocation80_spill] sm:$0xff]  ;;  %v1827_v39 = vcombine.high %v815_v34, %v815_v34  ;;  %v15622_v37 = vld [vmem:[#allocation69_spill] sm:$0xff] }
 0x256   : > { %v1823_v24 = vadd.f32 %v15619_v55, %v10674_v41  ;;  %v1825_v23 = vadd.f32 %v15621_v14, %v10680_v36  ;;  %v1834_v20 = vrot.slane %v815_v34, %v10151_v28  ;;  %v1145_v27 = vadd.f32 %v15622_v37, %v15580_v58  ;;  %v15623_v47 = vld [vmem:[#allocation81_spill] sm:$0xff]  ;;  %v15624_v35 = vld [vmem:[#allocation82_spill] sm:$0xff]  ;;  %v15625_v41 = vld [vmem:[#allocation83_spill] sm:$0xff] }
 0x257   : > { %v10915_v25 = vadd.f32 %v15623_v47, %v10715_v40  ;;  %v10919_v26 = vadd.f32 %v15624_v35, %v10718_v9  ;;  %v10923_v2 = vadd.f32 %v15625_v41, %v10721_v49  ;;  %v15626_v36 = vld [vmem:[#allocation84_spill] sm:$0xff]  ;;  %v1841_v34 = vrot.slane %v1827_v39, %v10151_v28  ;;  %v15627_v40 = vld [vmem:[#allocation85_spill] sm:$0xff]  ;;  %v15628_v9 = vld [vmem:[#allocation86_spill] sm:$0xff] }
 0x258   : > { %v10927_v33 = vadd.f32 %v15626_v36, %v10724_v7  ;;  %v1842_v55 = vcombine.high %v1834_v20, %v1834_v20  ;;  %v1850_v58 = vrot.slane %v1834_v20, %v10151_v28  ;;  %v1205_v52 = vmax.f32 %v1145_v27, 0.0  ;;  %v15629_v49 = vld [vmem:[#allocation88_spill] sm:$0xff]  ;;  %v15630_v7 = vld [vmem:[#allocation89_spill] sm:$0xff] }
 0x259   : > { %v10933_v14 = vadd.f32 %v15627_v40, %v10727_v0  ;;  %v10937_v37 = vadd.f32 %v15628_v9, %v10730_v10  ;;  %v10941_v47 = vadd.f32 %v15629_v49, %v10733_v21  ;;  %v10945_v35 = vadd.f32 %v15630_v7, %v10736_v15  ;;  %v15632_v10 = vld [vmem:[#allocation87_spill] sm:$0xff]  ;;  %v15634_v21 = vld [vmem:[#allocation90_spill] sm:$0xff] }
 0x25a   : > { %v1843_v39 = vcombine.high %v1841_v34, %v1841_v34  ;;  %v1857_v20 = vrot.slane %v1841_v34, %v10151_v28  ;;  %v1864_v27 = vrot.slane %v1842_v55, %v10151_v28  ;;  %v1872_v41 = vcombine.high %v1850_v58, %v1850_v58 }
 0x25b   : > { %15631 = vst [vmem:[#allocation64_spill] sm:$0xff] %v10945_v35  ;;  %v1878_v0 = vrot.slane %v1850_v58, %v9976_v31  ;;  %v1226_v36 = vmul.f32 %v10155_v38, %v1205_v52  ;;  %v10953_v40 = vadd.f32 %v15632_v10, %v10739_v44  ;;  %v10957_v9 = vadd.f32 %v15634_v21, %v10742_v5  ;;  %v15637_v38 = vld [vmem:[#allocation62_spill] sm:$0xff] }
 0x25c   : > { %v1871_v15 = vrot.slane %v1843_v39, %v10151_v28  ;;  %v1873_v49 = vcombine.high %v1857_v20, %v1857_v20  ;;  %v1874_v7 = vcombine.high %v1864_v27, %v1864_v27  ;;  %v1882_v34 = vrot.slane %v1864_v27, %v9976_v31 }
 0x25d   : > { %15633 = vst [vmem:[#allocation72_spill] sm:$0xff] %v10953_v40  ;;  %15635 = vst [vmem:[#allocation73_spill] sm:$0xff] %v10957_v9  ;;  %v1886_v55 = vrot.slane %v1872_v41, %v9976_v31  ;;  %v1894_v58 = vrot.slane %v1857_v20, %v9976_v31  ;;  %v1910_v52 = vmul.f32 %v1878_v0, %v15636_v12 }
 0x25e   : > { %v1911_v45 = vmul.f32 %v1878_v0, %v15637_v38  ;;  %v1890_v44 = vrot.slane %v1874_v7, %v9976_v31  ;;  %v1898_v10 = vrot.slane %v1871_v15, %v9976_v31  ;;  %v1902_v5 = vrot.slane %v1873_v49, %v9976_v31 }
 0x25f   : > { %v1912_v39 = vmul.f32 %v1882_v34, %v15636_v12  ;;  %v1913_v21 = vmul.f32 %v1882_v34, %v15637_v38  ;;  %v1914_v27 = vmul.f32 %v1886_v55, %v15636_v12  ;;  %v1915_v41 = vmul.f32 %v1886_v55, %v15637_v38 }
 0x260   : > { %v1918_v20 = vmul.f32 %v1894_v58, %v15636_v12  ;;  %v1916_v6 = vmul.f32 %v1890_v44, %v15636_v12  ;;  %v1917_v0 = vmul.f32 %v1890_v44, %v15637_v38  ;;  %v1919_v7 = vmul.f32 %v1894_v58, %v15637_v38 }
 0x261   : > { %v1920_v15 = vmul.f32 %v1898_v10, %v15636_v12  ;;  %v1921_v49 = vmul.f32 %v1898_v10, %v15637_v38  ;;  %v1922_v32 = vmul.f32 %v1902_v5, %v15636_v12  ;;  %v1923_v34 = vmul.f32 %v1902_v5, %v15637_v38 }
 0x262   : > { %v1924_v13 = vadd.f32 %v1910_v52, %v10765_v59  ;;  %v1925_v55 = vadd.f32 %v1911_v45, %v10769_v60  ;;  %v1926_v56 = vadd.f32 %v1912_v39, %v10834_v62  ;;  %v1927_v9 = vadd.f32 %v1913_v21, %v10838_v4  ;;  %v11002_v62 = vpop.permute.xlu0 %552  ;;  %v15638_v45 = vld [vmem:[#allocation91_spill] sm:$0xff] }
 0x263   : > { %v10984_v40 = vadd.f32 %v1914_v27, %v1816_v46  ;;  %v10986_v44 = vadd.f32 %v1915_v41, %v1817_v51  ;;  %v10988_v58 = vadd.f32 %v1916_v6, %v1818_v43  ;;  %v10990_v35 = vadd.f32 %v1917_v0, %v1819_v22  ;;  %v15639_v22 = vld [vmem:[#allocation92_spill] sm:$0xff]  ;;  %v15640_v46 = vld [vmem:[#allocation70_spill] sm:$0xff] }
 0x264   : > { %v10992_v10 = vadd.f32 %v1918_v20, %v1820_v29  ;;  %v10994_v12 = vadd.f32 %v1919_v7, %v1821_v63  ;;  %v10996_v5 = vadd.f32 %v1920_v15, %v1822_v30  ;;  %v10998_v59 = vadd.f32 %v1921_v49, %v1823_v24  ;;  %v15641_v24 = vld [vmem:[#allocation5_spill] sm:$0xff] }
 0x265   : > { %v11000_v60 = vadd.f32 %v1922_v32, %v1824_v8  ;;  %v11004_v4 = vadd.f32 %v1923_v34, %v1825_v23  ;;  %v3747_v6 = vadd.f32 %v15638_v45, %v10745_v61  ;;  %v3748_v51 = vadd.f32 %v15639_v22, %v10748_v16  ;;  %v15642_v23 = vld [vmem:[#allocation6_spill] sm:$0xff]  ;;  %v15645_v34 = vld [vmem:[#allocation65_spill] sm:$0xff] }
 0x266   : > { %v3749_v29 = vadd.f32 %v10760_v19, %v10751_v57  ;;  %v3750_v30 = vadd.f32 %v10775_v50, %v10754_v17  ;;  %v3752_v63 = vcombine.high %v1226_v36, %v1226_v36  ;;  %v3759_v32 = vrot.slane %v1226_v36, %v10151_v28  ;;  %v15646_v45 = vld [vmem:[#allocation66_spill] sm:$0xff] }
 0x267   : > { %v744_v43 = vadd.f32 %v15640_v46, %v11002_v62  ;;  %v9442_v8 = vadd.f32 -8.0, %v15641_v24  ;;  %v9443_v52 = vadd.f32 -8.0, %v15642_v23  ;;  %v11020_v61 = vadd.f32 %v10789_v42, %v1924_v13 }
 0x268   : > { %v11023_v16 = vadd.f32 %v10792_v1, %v1925_v55  ;;  %v3766_v57 = vrot.slane %v3752_v63, %v10151_v28  ;;  %v3767_v19 = vcombine.high %v3759_v32, %v3759_v32  ;;  %v3775_v17 = vrot.slane %v3759_v32, %v10151_v28 }
 0x269   : > { %v796_v50 = vmax.f32 %v744_v43, 0.0  ;;  %v11029_v36 = vmul.f32 %v10849_v11, %v15596_v48  ;;  %v11033_v39 = vmul.f32 %v10849_v11, %v15598_v3  ;;  %v11036_v42 = vadd.f32 %v10796_v18, %v1926_v56 }
 0x26a   : > { %v11039_v1 = vadd.f32 %v10799_v54, %v1927_v9  ;;  %v3768_v13 = vcombine.high %v3766_v57, %v3766_v57  ;;  %v3782_v21 = vrot.slane %v3766_v57, %v10151_v28  ;;  %v3789_v27 = vrot.slane %v3767_v19, %v10151_v28 }
 0x26b   : > { %15643 = vst [vmem:[#allocation74_spill] sm:$0xff] %v11029_v36  ;;  %15644 = vst [vmem:[#allocation75_spill] sm:$0xff] %v11033_v39  ;;  %v3797_v41 = vcombine.high %v3775_v17, %v3775_v17  ;;  %v3803_v20 = vrot.slane %v3775_v17, %v9976_v31  ;;  %v817_v0 = vmul.f32 %v15611_v53, %v796_v50  ;;  %v905_v7 = vand.u32 2147483647, %v9442_v8 }
 0x26c   : > { %v906_v15 = vand.u32 2147483647, %v9443_v52  ;;  %v3796_v11 = vrot.slane %v3768_v13, %v10151_v28  ;;  %v3798_v49 = vcombine.high %v3782_v21, %v3782_v21  ;;  %v3799_v18 = vcombine.high %v3789_v27, %v3789_v27 }
 0x26d   : > { %v3807_v56 = vrot.slane %v3789_v27, %v9976_v31  ;;  %v3811_v54 = vrot.slane %v3797_v41, %v9976_v31  ;;  %v3819_v9 = vrot.slane %v3782_v21, %v9976_v31  ;;  %v3835_v55 = vmul.f32 %v3803_v20, %v15645_v34 }
 0x26e   : > { %v3836_v22 = vmul.f32 %v3803_v20, %v15646_v45  ;;  %v3815_v63 = vrot.slane %v3799_v18, %v9976_v31  ;;  %v3823_v32 = vrot.slane %v3796_v11, %v9976_v31  ;;  %v3827_v46 = vrot.slane %v3798_v49, %v9976_v31 }
 0x26f   : > { %v3837_v43 = vmul.f32 %v3807_v56, %v15645_v34  ;;  %v3838_v24 = vmul.f32 %v3807_v56, %v15646_v45  ;;  %v3839_v8 = vmul.f32 %v3811_v54, %v15645_v34  ;;  %v3840_v23 = vmul.f32 %v3811_v54, %v15646_v45 }
 0x270   : > { %v3843_v52 = vmul.f32 %v3819_v9, %v15645_v34  ;;  %v3841_v57 = vmul.f32 %v3815_v63, %v15645_v34  ;;  %v3842_v19 = vmul.f32 %v3815_v63, %v15646_v45  ;;  %v3844_v17 = vmul.f32 %v3819_v9, %v15646_v45  ;;  %v15650_v9 = vld [vmem:[#allocation64_spill] sm:$0xff] }
 0x271   : > { %v3845_v50 = vmul.f32 %v3823_v32, %v15645_v34  ;;  %v3846_v13 = vmul.f32 %v3823_v32, %v15646_v45  ;;  %v3847_v21 = vmul.f32 %v3827_v46, %v15645_v34  ;;  %v3848_v27 = vmul.f32 %v3827_v46, %v15646_v45  ;;  %v15652_v32 = vld [vmem:[#allocation72_spill] sm:$0xff]  ;;  %v15660_v46 = vld [vmem:[#allocation71_spill] sm:$0xff] }
 0x272   : > { %v3849_v41 = vadd.f32 %v3835_v55, %v10915_v25  ;;  %v3850_v20 = vadd.f32 %v3836_v22, %v10919_v26  ;;  %v3851_v11 = vadd.f32 %v3837_v43, %v10923_v2  ;;  %v3852_v49 = vadd.f32 %v3838_v24, %v10927_v33  ;;  %v15654_v26 = vld [vmem:[#allocation73_spill] sm:$0xff]  ;;  %v15661_v24 = vld [vmem:[#allocation68_spill] sm:$0xff] }
 0x273   : > { %v11071_v18 = vadd.f32 %v3839_v8, %v10933_v14  ;;  %v11074_v56 = vadd.f32 %v3840_v23, %v10937_v37  ;;  %v11077_v54 = vadd.f32 %v3841_v57, %v10941_v47  ;;  %v11080_v63 = vadd.f32 %v3842_v19, %v15650_v9  ;;  %v15662_v23 = vld [vmem:[#allocation93_spill] sm:$0xff]  ;;  %v15671_v9 = vld [vmem:[#allocation7_spill] sm:$0xff] }
 0x274   : > { %v11083_v25 = vadd.f32 %v3843_v52, %v15652_v32  ;;  %v11086_v55 = vadd.f32 %v3844_v17, %v15654_v26  ;;  %v11088_v2 = vadd.f32 %v3845_v50, %v3747_v6  ;;  %v11090_v33 = vadd.f32 %v3846_v13, %v3748_v51  ;;  %v15663_v6 = vld [vmem:[#allocation94_spill] sm:$0xff]  ;;  %v15664_v51 = vld [vmem:[#allocation95_spill] sm:$0xff]  ;;  %v15672_v32 = vld [vmem:[#allocation8_spill] sm:$0xff] }
 0x275   : > { %15647 = vst [vmem:[#allocation76_spill] sm:$0xff] %v11071_v18  ;;  %15648 = vst [vmem:[#allocation77_spill] sm:$0xff] %v11074_v56  ;;  %v11092_v14 = vadd.f32 %v3847_v21, %v3749_v29  ;;  %v11094_v37 = vadd.f32 %v3848_v27, %v3750_v30  ;;  %v907_v22 = vsub.f32 1.0, %v905_v7  ;;  %v908_v47 = vsub.f32 1.0, %v906_v15  ;;  %v15665_v30 = vld [vmem:[#allocation96_spill] sm:$0xff]  ;;  %v15666_v7 = vld [vmem:[#allocation97_spill] sm:$0xff] }
 0x276   : > { %15649 = vst [vmem:[#allocation78_spill] sm:$0xff] %v11077_v54  ;;  %15651 = vst [vmem:[#allocation79_spill] sm:$0xff] %v11080_v63  ;;  %v2040_v43 = vadd.f32 %v15660_v46, %v10984_v40  ;;  %v2041_v8 = vadd.f32 %v15661_v24, %v10986_v44  ;;  %v2042_v52 = vadd.f32 %v15662_v23, %v10988_v58  ;;  %v15667_v40 = vld [vmem:[#allocation98_spill] sm:$0xff]  ;;  %v15668_v44 = vld [vmem:[#allocation99_spill] sm:$0xff] }
 0x277   : > { %15653 = vst [vmem:[#allocation80_spill] sm:$0xff] %v11083_v25  ;;  %15655 = vst [vmem:[#allocation69_spill] sm:$0xff] %v11086_v55  ;;  %v2043_v57 = vadd.f32 %v15663_v6, %v10990_v35  ;;  %v2044_v29 = vadd.f32 %v15664_v51, %v10992_v10  ;;  %v2045_v19 = vadd.f32 %v15665_v30, %v10994_v12  ;;  %v15669_v58 = vld [vmem:[#allocation67_spill] sm:$0xff]  ;;  %v15670_v10 = vld [vmem:[#allocation109_spill] sm:$0xff]  ;;  %v11120_v12 = vadd.f32 -8.0, %v15671_v9 }
 0x278   : > { %15656 = vst [vmem:[#allocation81_spill] sm:$0xff] %v11088_v2  ;;  %15657 = vst [vmem:[#allocation82_spill] sm:$0xff] %v11090_v33  ;;  %v2046_v15 = vadd.f32 %v15666_v7, %v10996_v5  ;;  %v2047_v17 = vadd.f32 %v15667_v40, %v10998_v59  ;;  %v2048_v50 = vadd.f32 %v15668_v44, %v11000_v60  ;;  %v11123_v5 = vadd.f32 -8.0, %v15672_v32  ;;  %v15673_v26 = vld [vmem:[#allocation63_spill] sm:$0xff]  ;;  %v15675_v46 = vld [vmem:[#allocation100_spill] sm:$0xff] }
 0x279   : > { %15658 = vst [vmem:[#allocation83_spill] sm:$0xff] %v11092_v14  ;;  %15659 = vst [vmem:[#allocation84_spill] sm:$0xff] %v11094_v37  ;;  %v2049_v13 = vadd.f32 %v15669_v58, %v11004_v4  ;;  %v2051_v21 = vcombine.high %v817_v0, %v817_v0  ;;  %v2058_v35 = vrot.slane %v817_v0, %v10151_v28  ;;  %v11133_v6 = vmax.f32 %v907_v22, 0.0  ;;  %v15679_v51 = vld [vmem:[#allocation101_spill] sm:$0xff]  ;;  %v15681_v7 = vld [vmem:[#allocation102_spill] sm:$0xff] }
 0x27a   : > { %v1155_v27 = vadd.f32 %v15670_v10, %v11002_v62  ;;  %v11126_v59 = vadd.f32 %v15673_v26, %v3849_v41  ;;  %v11129_v60 = vadd.f32 %v15675_v46, %v3850_v20  ;;  %v11135_v62 = vmax.f32 %v908_v47, 0.0  ;;  %v15689_v14 = vld [vmem:[#allocation18_spill] sm:$0xff]  ;;  %v15690_v33 = vld [vmem:[#allocation19_spill] sm:$0xff] }
 0x27b   : > { %v2065_v4 = vrot.slane %v2051_v21, %v10151_v28  ;;  %v2066_v24 = vcombine.high %v2058_v35, %v2058_v35  ;;  %v2074_v0 = vrot.slane %v2058_v35, %v10151_v28  ;;  %15677 = vst [vmem:[#allocation88_spill] sm:$0xff] %v11133_v6  ;;  %v11138_v30 = vadd.f32 %v15679_v51, %v3851_v11  ;;  %v15683_v35 = vld [vmem:[#allocation56_spill] sm:$0xff] }
 0x27c   : > { %15674 = vst [vmem:[#allocation85_spill] sm:$0xff] %v11126_v59  ;;  %15676 = vst [vmem:[#allocation86_spill] sm:$0xff] %v11129_v60  ;;  %v1207_v23 = vmax.f32 %v1155_v27, 0.0  ;;  %v11141_v40 = vadd.f32 %v15681_v7, %v3852_v49 }
 0x27d   : > { %15678 = vst [vmem:[#allocation89_spill] sm:$0xff] %v11135_v62  ;;  %15680 = vst [vmem:[#allocation87_spill] sm:$0xff] %v11138_v30  ;;  %v2067_v41 = vcombine.high %v2065_v4, %v2065_v4  ;;  %v2081_v20 = vrot.slane %v2065_v4, %v10151_v28  ;;  %v2088_v44 = vrot.slane %v2066_v24, %v10151_v28 }
 0x27e   : > { %15682 = vst [vmem:[#allocation90_spill] sm:$0xff] %v11141_v40  ;;  %v2096_v58 = vcombine.high %v2074_v0, %v2074_v0  ;;  %v2102_v21 = vrot.slane %v2074_v0, %v9976_v31  ;;  %v11147_v10 = vmul.f32 %v15683_v35, %v1207_v23 }
 0x27f   : > { %v2095_v11 = vrot.slane %v2067_v41, %v10151_v28  ;;  %v2097_v27 = vcombine.high %v2081_v20, %v2081_v20  ;;  %v2098_v49 = vcombine.high %v2088_v44, %v2088_v44  ;;  %v2106_v9 = vrot.slane %v2088_v44, %v9976_v31 }
 0x280   : > { %15684 = vst [vmem:[#allocation91_spill] sm:$0xff] %v11147_v10  ;;  %v2110_v32 = vrot.slane %v2096_v58, %v9976_v31  ;;  %v2118_v26 = vrot.slane %v2081_v20, %v9976_v31  ;;  %v2134_v46 = vmul.f32 %v2102_v21, %v11133_v6  ;;  %v2135_v4 = vmul.f32 %v2102_v21, %v11135_v62 }
 0x281   : > { %v2114_v24 = vrot.slane %v2098_v49, %v9976_v31  ;;  %v2122_v0 = vrot.slane %v2095_v11, %v9976_v31  ;;  %v2126_v23 = vrot.slane %v2097_v27, %v9976_v31  ;;  %v2136_v51 = vmul.f32 %v2106_v9, %v11133_v6 }
 0x282   : > { %v2137_v7 = vmul.f32 %v2106_v9, %v11135_v62  ;;  %v2138_v41 = vmul.f32 %v2110_v32, %v11133_v6  ;;  %v2139_v44 = vmul.f32 %v2110_v32, %v11135_v62  ;;  %v2142_v20 = vmul.f32 %v2118_v26, %v11133_v6 }
 0x283   : > { %v2140_v58 = vmul.f32 %v2114_v24, %v11133_v6  ;;  %v2141_v21 = vmul.f32 %v2114_v24, %v11135_v62  ;;  %v2143_v49 = vmul.f32 %v2118_v26, %v11135_v62  ;;  %v2144_v11 = vmul.f32 %v2122_v0, %v11133_v6 }
 0x284   : > { %v2145_v27 = vmul.f32 %v2122_v0, %v11135_v62  ;;  %v2146_v47 = vmul.f32 %v2126_v23, %v11133_v6  ;;  %v2147_v9 = vmul.f32 %v2126_v23, %v11135_v62  ;;  %v2148_v22 = vadd.f32 %v2134_v46, %v11020_v61 }
 0x285   : > { %v2149_v32 = vadd.f32 %v2135_v4, %v11023_v16  ;;  %v2150_v45 = vadd.f32 %v2136_v51, %v11036_v42  ;;  %v2151_v34 = vadd.f32 %v2137_v7, %v11039_v1  ;;  %v11176_v38 = vadd.f32 %v2138_v41, %v2040_v43 }
 0x286   : > { %v11178_v24 = vadd.f32 %v2139_v44, %v2041_v8  ;;  %v11180_v26 = vadd.f32 %v2140_v58, %v2042_v52  ;;  %v11182_v3 = vadd.f32 %v2141_v21, %v2043_v57  ;;  %v11184_v0 = vadd.f32 %v2142_v20, %v2044_v29 }
 0x287   : > { %v11186_v6 = vadd.f32 %v2143_v49, %v2045_v19  ;;  %v11188_v23 = vadd.f32 %v2144_v11, %v2046_v15  ;;  %v11190_v61 = vadd.f32 %v2145_v27, %v2047_v17  ;;  %v11192_v16 = vadd.f32 %v2146_v47, %v2048_v50 }
 0x288   : > { %v11194_v42 = vadd.f32 %v2147_v9, %v2049_v13  ;;  %v2164_v1 = vcombine.high %v2148_v22, %v2148_v22  ;;  %v2171_v43 = vrot.slane %v2148_v22, %v10151_v28  ;;  %v2219_v8 = vrot.slane %v2149_v32, %v10151_v28 }
 0x289   : > { %15685 = vst [vmem:[#allocation92_spill] sm:$0xff] %v11192_v16  ;;  %v2327_v52 = vcombine.high %v2150_v45, %v2150_v45  ;;  %v2334_v57 = vrot.slane %v2150_v45, %v10151_v28  ;;  %v11200_v29 = vrot.slane %v2151_v34, %v10151_v28 }
 0x28a   : > { %15686 = vst [vmem:[#allocation70_spill] sm:$0xff] %v11194_v42  ;;  %v2178_v15 = vrot.slane %v2164_v1, %v10151_v28  ;;  %v2179_v17 = vcombine.high %v2171_v43, %v2171_v43  ;;  %v2187_v50 = vrot.slane %v2171_v43, %v10151_v28  ;;  %v2220_v13 = vcombine.high %v2219_v8, %v2219_v8  ;;  %v15687_v43 = vld [vmem:[#allocation16_spill] sm:$0xff] }
 0x28b   : > { %v2227_v47 = vrot.slane %v2219_v8, %v10151_v28  ;;  %v2341_v22 = vrot.slane %v2327_v52, %v10151_v28  ;;  %v2342_v46 = vcombine.high %v2334_v57, %v2334_v57  ;;  %v2350_v4 = vrot.slane %v2334_v57, %v10151_v28 }
 0x28c   : > { %v2180_v45 = vcombine.high %v2178_v15, %v2178_v15  ;;  %v2194_v34 = vrot.slane %v2178_v15, %v10151_v28  ;;  %v2201_v51 = vrot.slane %v2179_v17, %v10151_v28  ;;  %v2209_v7 = vcombine.high %v2187_v50, %v2187_v50 }
 0x28d   : > { %v2234_v41 = vrot.slane %v2220_v13, %v10151_v28  ;;  %v2238_v44 = vrot.slane %v2187_v50, %v9976_v31  ;;  %v2270_v20 = vrot.slane %v2227_v47, %v9976_v31  ;;  %v2343_v58 = vcombine.high %v2341_v22, %v2341_v22  ;;  %v15688_v50 = vld [vmem:[#allocation17_spill] sm:$0xff] }
 0x28e   : > { %v2208_v21 = vrot.slane %v2180_v45, %v10151_v28  ;;  %v2210_v49 = vcombine.high %v2194_v34, %v2194_v34  ;;  %v2211_v11 = vcombine.high %v2201_v51, %v2201_v51  ;;  %v2242_v27 = vrot.slane %v2201_v51, %v9976_v31 }
 0x28f   : > { %v2246_v9 = vrot.slane %v2209_v7, %v9976_v31  ;;  %v2254_v32 = vrot.slane %v2194_v34, %v9976_v31  ;;  %v2274_v1 = vrot.slane %v2234_v41, %v9976_v31  ;;  %v11220_v8 = vmul.f32 %v2238_v44, %v15687_v43 }
 0x290   : > { %v2212_v52 = vcombine.high %v2208_v21, %v2208_v21  ;;  %v2250_v57 = vrot.slane %v2211_v11, %v9976_v31  ;;  %v2258_v15 = vrot.slane %v2208_v21, %v9976_v31  ;;  %v2262_v17 = vrot.slane %v2210_v49, %v9976_v31 }
 0x291   : > { %v2286_v13 = vmul.f32 %v2238_v44, %v15688_v50  ;;  %v2287_v47 = vmul.f32 %v2242_v27, %v15687_v43  ;;  %v2288_v45 = vmul.f32 %v2242_v27, %v15688_v50  ;;  %v2289_v34 = vmul.f32 %v2246_v9, %v15687_v43 }
 0x292   : > { %v2266_v51 = vrot.slane %v2212_v52, %v9976_v31  ;;  %v2290_v7 = vmul.f32 %v2246_v9, %v15688_v50  ;;  %v2291_v41 = vmul.f32 %v2250_v57, %v15687_v43  ;;  %v2292_v11 = vmul.f32 %v2250_v57, %v15688_v50 }
 0x293   : > { %v2293_v21 = vmul.f32 %v2254_v32, %v15687_v43  ;;  %v2294_v49 = vmul.f32 %v2254_v32, %v15688_v50  ;;  %v2295_v44 = vmul.f32 %v2258_v15, %v15687_v43  ;;  %v2296_v19 = vmul.f32 %v2258_v15, %v15688_v50 }
 0x294   : > { %v2297_v27 = vmul.f32 %v2262_v17, %v15687_v43  ;;  %v2298_v62 = vmul.f32 %v2262_v17, %v15688_v50  ;;  %v2299_v52 = vmul.f32 %v2266_v51, %v15687_v43  ;;  %v2300_v9 = vmul.f32 %v2266_v51, %v15688_v50 }
 0x295   : > { %v2301_v48 = vmul.f32 %v2270_v20, %v15687_v43  ;;  %v2302_v57 = vmul.f32 %v2270_v20, %v15688_v50  ;;  %v2303_v40 = vmul.f32 %v2274_v1, %v15687_v43  ;;  %v2304_v32 = vmul.f32 %v2274_v1, %v15688_v50 }
 0x296   : > { %v2357_v30 = vrot.slane %v2341_v22, %v10151_v28  ;;  %v2364_v15 = vrot.slane %v2342_v46, %v10151_v28  ;;  %v2371_v60 = vrot.slane %v2343_v58, %v10151_v28  ;;  %v2372_v59 = vcombine.high %v2350_v4, %v2350_v4 }
 0x297   : > { %v2383_v17 = vcombine.high %v11200_v29, %v11200_v29  ;;  %v2390_v51 = vrot.slane %v11200_v29, %v10151_v28  ;;  %v2401_v35 = vrot.slane %v2350_v4, %v9976_v31  ;;  %v11255_v20 = vrot.slane %v11176_v38, %v10151_v28 }
 0x298   : > { %v2373_v1 = vcombine.high %v2357_v30, %v2357_v30  ;;  %v2374_v50 = vcombine.high %v2364_v15, %v2364_v15  ;;  %v2375_v22 = vcombine.high %v2371_v60, %v2371_v60  ;;  %v2405_v46 = vrot.slane %v2364_v15, %v9976_v31 }
 0x299   : > { %v2397_v58 = vrot.slane %v2383_v17, %v10151_v28  ;;  %v2409_v43 = vrot.slane %v2372_v59, %v9976_v31  ;;  %v2417_v53 = vrot.slane %v2357_v30, %v9976_v31  ;;  %v2421_v10 = vrot.slane %v2371_v60, %v9976_v31 }
 0x29a   : > { %v2413_v29 = vrot.slane %v2374_v50, %v9976_v31  ;;  %v2425_v4 = vrot.slane %v2373_v1, %v9976_v31  ;;  %v2429_v39 = vrot.slane %v2375_v22, %v9976_v31  ;;  %v2433_v37 = vrot.slane %v2390_v51, %v9976_v31 }
 0x29b   : > { %v2437_v36 = vrot.slane %v2397_v58, %v9976_v31  ;;  %v2448_v15 = vmul.f32 %v2401_v35, %v15689_v14  ;;  %v2449_v17 = vmul.f32 %v2401_v35, %v15690_v33  ;;  %v2450_v59 = vmul.f32 %v2405_v46, %v15689_v14 }
 0x29c   : > { %v2451_v30 = vmul.f32 %v2405_v46, %v15690_v33  ;;  %v2452_v60 = vmul.f32 %v2409_v43, %v15689_v14  ;;  %v2453_v50 = vmul.f32 %v2409_v43, %v15690_v33  ;;  %v2454_v1 = vmul.f32 %v2413_v29, %v15689_v14 }
 0x29d   : > { %v2455_v22 = vmul.f32 %v2413_v29, %v15690_v33  ;;  %v2456_v51 = vmul.f32 %v2417_v53, %v15689_v14  ;;  %v2457_v58 = vmul.f32 %v2417_v53, %v15690_v33  ;;  %v2458_v2 = vmul.f32 %v2421_v10, %v15689_v14 }
 0x29e   : > { %v2459_v35 = vmul.f32 %v2421_v10, %v15690_v33  ;;  %v2460_v55 = vmul.f32 %v2425_v4, %v15689_v14  ;;  %v2461_v46 = vmul.f32 %v2425_v4, %v15690_v33  ;;  %v2462_v25 = vmul.f32 %v2429_v39, %v15689_v14 }
 0x29f   : > { %v2463_v43 = vmul.f32 %v2429_v39, %v15690_v33  ;;  %v2464_v63 = vmul.f32 %v2433_v37, %v15689_v14  ;;  %v2465_v29 = vmul.f32 %v2433_v37, %v15690_v33  ;;  %v2466_v54 = vmul.f32 %v2437_v36, %v15689_v14 }
 0x2a0   : > { %v2467_v53 = vmul.f32 %v2437_v36, %v15690_v33  ;;  %v11288_v56 = vadd.f32 %v2448_v15, %v11220_v8  ;;  %v11290_v10 = vadd.f32 %v2449_v17, %v2286_v13  ;;  %v11292_v18 = vadd.f32 %v2450_v59, %v2287_v47 }
 0x2a1   : > { %v11294_v4 = vadd.f32 %v2451_v30, %v2288_v45  ;;  %v11296_v42 = vadd.f32 %v2452_v60, %v2289_v34  ;;  %v11298_v39 = vadd.f32 %v2453_v50, %v2290_v7  ;;  %v11300_v16 = vadd.f32 %v2454_v1, %v2291_v41 }
 0x2a2   : > { %v11302_v37 = vadd.f32 %v2455_v22, %v2292_v11  ;;  %v11304_v14 = vadd.f32 %v2456_v51, %v2293_v21  ;;  %v11306_v36 = vadd.f32 %v2457_v58, %v2294_v49  ;;  %v11308_v8 = vadd.f32 %v2458_v2, %v2295_v44  ;;  %v15692_v58 = vld [vmem:[#allocation20_spill] sm:$0xff] }
 0x2a3   : > { %v11310_v13 = vadd.f32 %v2459_v35, %v2296_v19  ;;  %v11312_v47 = vadd.f32 %v2460_v55, %v2297_v27  ;;  %v11314_v45 = vadd.f32 %v2461_v46, %v2298_v62  ;;  %v11316_v34 = vadd.f32 %v2462_v25, %v2299_v52  ;;  %v15693_v46 = vld [vmem:[#allocation21_spill] sm:$0xff] }
 0x2a4   : > { %v11318_v7 = vadd.f32 %v2463_v43, %v2300_v9  ;;  %v11320_v41 = vadd.f32 %v2464_v63, %v2301_v48  ;;  %v11322_v11 = vadd.f32 %v2465_v29, %v2302_v57  ;;  %v11324_v21 = vadd.f32 %v2466_v54, %v2303_v40 }
 0x2a5   : > { %v11326_v49 = vadd.f32 %v2467_v53, %v2304_v32  ;;  %v15691_v2 = vcombine.high %v11176_v38, %v11176_v38  ;;  %v2505_v62 = vcombine.high %v11255_v20, %v11255_v20  ;;  %v2513_v25 = vrot.slane %v11255_v20, %v10151_v28 }
 0x2a6   : > { %v2545_v48 = vrot.slane %v11178_v24, %v10151_v28  ;;  %v2653_v54 = vcombine.high %v11180_v26, %v11180_v26  ;;  %v11342_v63 = vrot.slane %v11180_v26, %v10151_v28  ;;  %v11346_v38 = vrot.slane %v11182_v3, %v10151_v28 }
 0x2a7   : > { %v2504_v55 = vrot.slane %v15691_v2, %v10151_v28  ;;  %v2527_v44 = vrot.slane %v2505_v62, %v10151_v28  ;;  %v2535_v27 = vcombine.high %v2513_v25, %v2513_v25  ;;  %v2564_v9 = vrot.slane %v2513_v25, %v9976_v31 }
 0x2a8   : > { %v2546_v52 = vcombine.high %v2545_v48, %v2545_v48  ;;  %v2553_v24 = vrot.slane %v2545_v48, %v10151_v28  ;;  %v11353_v57 = vrot.slane %v2653_v54, %v10151_v28 }
 0x2a9   : > { %v2506_v40 = vcombine.high %v2504_v55, %v2504_v55  ;;  %v2520_v19 = vrot.slane %v2504_v55, %v10151_v28  ;;  %v2537_v20 = vcombine.high %v2527_v44, %v2527_v44  ;;  %v2568_v3 = vrot.slane %v2527_v44, %v9976_v31 }
 0x2aa   : > { %v2560_v15 = vrot.slane %v2546_v52, %v10151_v28  ;;  %v2572_v17 = vrot.slane %v2535_v27, %v9976_v31  ;;  %v2596_v30 = vrot.slane %v2553_v24, %v9976_v31  ;;  %v2611_v35 = vmul.f32 %v2564_v9, %v15692_v58 }
 0x2ab   : > { %v2534_v26 = vrot.slane %v2506_v40, %v10151_v28  ;;  %v2536_v32 = vcombine.high %v2520_v19, %v2520_v19  ;;  %v2580_v59 = vrot.slane %v2520_v19, %v9976_v31  ;;  %v2576_v50 = vrot.slane %v2537_v20, %v9976_v31 }
 0x2ac   : > { %v2600_v51 = vrot.slane %v2560_v15, %v9976_v31  ;;  %v2612_v43 = vmul.f32 %v2564_v9, %v15693_v46  ;;  %v2613_v29 = vmul.f32 %v2568_v3, %v15692_v58  ;;  %v2614_v2 = vmul.f32 %v2568_v3, %v15693_v46 }
 0x2ad   : > { %v2538_v60 = vcombine.high %v2534_v26, %v2534_v26  ;;  %v2584_v1 = vrot.slane %v2534_v26, %v9976_v31  ;;  %v2588_v22 = vrot.slane %v2536_v32, %v9976_v31  ;;  %v2615_v55 = vmul.f32 %v2572_v17, %v15692_v58 }
 0x2ae   : > { %v2616_v62 = vmul.f32 %v2572_v17, %v15693_v46  ;;  %v2617_v25 = vmul.f32 %v2576_v50, %v15692_v58  ;;  %v2618_v48 = vmul.f32 %v2576_v50, %v15693_v46  ;;  %v2619_v54 = vmul.f32 %v2580_v59, %v15692_v58 }
 0x2af   : > { %v2592_v53 = vrot.slane %v2538_v60, %v9976_v31  ;;  %v2620_v40 = vmul.f32 %v2580_v59, %v15693_v46  ;;  %v2621_v19 = vmul.f32 %v2584_v1, %v15692_v58  ;;  %v2622_v44 = vmul.f32 %v2584_v1, %v15693_v46 }
 0x2b0   : > { %v2623_v27 = vmul.f32 %v2588_v22, %v15692_v58  ;;  %v2624_v52 = vmul.f32 %v2588_v22, %v15693_v46  ;;  %v2627_v26 = vmul.f32 %v2596_v30, %v15692_v58  ;;  %v2628_v32 = vmul.f32 %v2596_v30, %v15693_v46 }
 0x2b1   : > { %v2625_v24 = vmul.f32 %v2592_v53, %v15692_v58  ;;  %v2626_v9 = vmul.f32 %v2592_v53, %v15693_v46  ;;  %v2629_v20 = vmul.f32 %v2600_v51, %v15692_v58  ;;  %v2630_v3 = vmul.f32 %v2600_v51, %v15693_v46 }
 0x2b2   : > { %v11387_v15 = vadd.f32 %v2611_v35, %v11288_v56  ;;  %v11390_v17 = vadd.f32 %v2612_v43, %v11290_v10  ;;  %v11393_v59 = vadd.f32 %v2613_v29, %v11292_v18  ;;  %v11396_v60 = vadd.f32 %v2614_v2, %v11294_v4 }
 0x2b3   : > { %v11399_v50 = vadd.f32 %v2615_v55, %v11296_v42  ;;  %v11402_v30 = vadd.f32 %v2616_v62, %v11298_v39  ;;  %v11405_v1 = vadd.f32 %v2617_v25, %v11300_v16  ;;  %v11408_v56 = vadd.f32 %v2618_v48, %v11302_v37 }
 0x2b4   : > { %v11411_v10 = vadd.f32 %v2619_v54, %v11304_v14  ;;  %v11414_v18 = vadd.f32 %v2620_v40, %v11306_v36  ;;  %v11417_v4 = vadd.f32 %v2621_v19, %v11308_v8  ;;  %v11420_v42 = vadd.f32 %v2622_v44, %v11310_v13  ;;  %v15694_v44 = vld [vmem:[#allocation22_spill] sm:$0xff] }
 0x2b5   : > { %v11423_v39 = vadd.f32 %v2623_v27, %v11312_v47  ;;  %v11426_v16 = vadd.f32 %v2624_v52, %v11314_v45  ;;  %v11429_v37 = vadd.f32 %v2625_v24, %v11316_v34  ;;  %v11432_v14 = vadd.f32 %v2626_v9, %v11318_v7  ;;  %v15695_v52 = vld [vmem:[#allocation23_spill] sm:$0xff] }
 0x2b6   : > { %v11435_v36 = vadd.f32 %v2627_v26, %v11320_v41  ;;  %v11438_v8 = vadd.f32 %v2628_v32, %v11322_v11  ;;  %v11441_v13 = vadd.f32 %v2629_v20, %v11324_v21  ;;  %v11444_v47 = vadd.f32 %v2630_v3, %v11326_v49 }
 0x2b7   : > { %v2668_v45 = vcombine.high %v11342_v63, %v11342_v63  ;;  %v2669_v34 = vcombine.high %v11353_v57, %v11353_v57  ;;  %v2676_v7 = vrot.slane %v11342_v63, %v10151_v28  ;;  %v2683_v41 = vrot.slane %v11353_v57, %v10151_v28 }
 0x2b8   : > { %v2709_v11 = vcombine.high %v11346_v38, %v11346_v38  ;;  %v2716_v21 = vrot.slane %v11346_v38, %v10151_v28  ;;  %v2816_v51 = vcombine.high %v11184_v0, %v11184_v0  ;;  %v11464_v35 = vrot.slane %v11184_v0, %v10151_v28 }
 0x2b9   : > { %v2690_v49 = vrot.slane %v2668_v45, %v10151_v28  ;;  %v2697_v22 = vrot.slane %v2669_v34, %v10151_v28  ;;  %v2698_v63 = vcombine.high %v2676_v7, %v2676_v7  ;;  %v2699_v43 = vcombine.high %v2683_v41, %v2683_v41 }
 0x2ba   : > { %v2723_v57 = vrot.slane %v2709_v11, %v10151_v28  ;;  %v2727_v29 = vrot.slane %v2676_v7, %v9976_v31  ;;  %v2743_v55 = vrot.slane %v2683_v41, %v9976_v31  ;;  %v2759_v0 = vrot.slane %v2716_v21, %v9976_v31 }
 0x2bb   : > { %v2700_v53 = vcombine.high %v2690_v49, %v2690_v49  ;;  %v2701_v2 = vcombine.high %v2697_v22, %v2697_v22  ;;  %v2731_v38 = vrot.slane %v2690_v49, %v9976_v31  ;;  %v2735_v62 = vrot.slane %v2698_v63, %v9976_v31 }
 0x2bc   : > { %v2747_v25 = vrot.slane %v2697_v22, %v9976_v31  ;;  %v2751_v48 = vrot.slane %v2699_v43, %v9976_v31  ;;  %v2763_v19 = vrot.slane %v2723_v57, %v9976_v31  ;;  %v2774_v27 = vmul.f32 %v2727_v29, %v15694_v44 }
 0x2bd   : > { %v2739_v54 = vrot.slane %v2700_v53, %v9976_v31  ;;  %v2755_v40 = vrot.slane %v2701_v2, %v9976_v31  ;;  %v2775_v24 = vmul.f32 %v2727_v29, %v15695_v52  ;;  %v2776_v9 = vmul.f32 %v2731_v38, %v15694_v44 }
 0x2be   : > { %v2777_v26 = vmul.f32 %v2731_v38, %v15695_v52  ;;  %v2778_v32 = vmul.f32 %v2735_v62, %v15694_v44  ;;  %v2779_v20 = vmul.f32 %v2735_v62, %v15695_v52  ;;  %v2782_v34 = vmul.f32 %v2743_v55, %v15694_v44 }
 0x2bf   : > { %v2780_v3 = vmul.f32 %v2739_v54, %v15694_v44  ;;  %v2781_v45 = vmul.f32 %v2739_v54, %v15695_v52  ;;  %v2783_v7 = vmul.f32 %v2743_v55, %v15695_v52  ;;  %v2784_v41 = vmul.f32 %v2747_v25, %v15694_v44 }
 0x2c0   : > { %v2785_v11 = vmul.f32 %v2747_v25, %v15695_v52  ;;  %v2786_v21 = vmul.f32 %v2751_v48, %v15694_v44  ;;  %v2787_v49 = vmul.f32 %v2751_v48, %v15695_v52  ;;  %v2788_v22 = vmul.f32 %v2755_v40, %v15694_v44 }
 0x2c1   : > { %v2789_v63 = vmul.f32 %v2755_v40, %v15695_v52  ;;  %v2790_v43 = vmul.f32 %v2759_v0, %v15694_v44  ;;  %v2791_v57 = vmul.f32 %v2759_v0, %v15695_v52  ;;  %v2792_v29 = vmul.f32 %v2763_v19, %v15694_v44 }
 0x2c2   : > { %v2793_v53 = vmul.f32 %v2763_v19, %v15695_v52  ;;  %v11498_v2 = vadd.f32 %v2774_v27, %v11387_v15  ;;  %v11501_v38 = vadd.f32 %v2775_v24, %v11390_v17  ;;  %v11504_v55 = vadd.f32 %v2776_v9, %v11393_v59 }
 0x2c3   : > { %v11507_v62 = vadd.f32 %v2777_v26, %v11396_v60  ;;  %v11510_v25 = vadd.f32 %v2778_v32, %v11399_v50  ;;  %v11513_v48 = vadd.f32 %v2779_v20, %v11402_v30  ;;  %v11516_v0 = vadd.f32 %v2780_v3, %v11405_v1 }
 0x2c4   : > { %v11519_v15 = vadd.f32 %v2781_v45, %v11408_v56  ;;  %v11522_v17 = vadd.f32 %v2782_v34, %v11411_v10  ;;  %v11525_v59 = vadd.f32 %v2783_v7, %v11414_v18  ;;  %v11528_v60 = vadd.f32 %v2784_v41, %v11417_v4 }
 0x2c5   : > { %v11531_v50 = vadd.f32 %v2785_v11, %v11420_v42  ;;  %v11534_v30 = vadd.f32 %v2786_v21, %v11423_v39  ;;  %v11537_v1 = vadd.f32 %v2787_v49, %v11426_v16  ;;  %v11540_v56 = vadd.f32 %v2788_v22, %v11429_v37  ;;  %v15696_v49 = vld [vmem:[#allocation24_spill] sm:$0xff] }
 0x2c6   : > { %v11543_v10 = vadd.f32 %v2789_v63, %v11432_v14  ;;  %v11546_v18 = vadd.f32 %v2790_v43, %v11435_v36  ;;  %v11549_v4 = vadd.f32 %v2791_v57, %v11438_v8  ;;  %v11552_v42 = vadd.f32 %v2792_v29, %v11441_v13  ;;  %v15697_v63 = vld [vmem:[#allocation25_spill] sm:$0xff] }
 0x2c7   : > { %v11555_v39 = vadd.f32 %v2793_v53, %v11444_v47  ;;  %v2830_v16 = vrot.slane %v2816_v51, %v10151_v28  ;;  %v2831_v37 = vcombine.high %v11464_v35, %v11464_v35  ;;  %v2839_v14 = vrot.slane %v11464_v35, %v10151_v28 }
 0x2c8   : > { %v2871_v36 = vrot.slane %v11186_v6, %v10151_v28  ;;  %v2979_v8 = vcombine.high %v11188_v23, %v11188_v23  ;;  %v11569_v47 = vrot.slane %v11188_v23, %v10151_v28  ;;  %v11573_v51 = vrot.slane %v11190_v61, %v10151_v28 }
 0x2c9   : > { %v2832_v54 = vcombine.high %v2830_v16, %v2830_v16  ;;  %v2846_v13 = vrot.slane %v2830_v16, %v10151_v28  ;;  %v2853_v40 = vrot.slane %v2831_v37, %v10151_v28  ;;  %v2861_v35 = vcombine.high %v2839_v14, %v2839_v14 }
 0x2ca   : > { %v2872_v19 = vcombine.high %v2871_v36, %v2871_v36  ;;  %v2879_v6 = vrot.slane %v2871_v36, %v10151_v28  ;;  %v2890_v9 = vrot.slane %v2839_v14, %v9976_v31  ;;  %v3042_v23 = vrot.slane %v11573_v51, %v10151_v28 }
 0x2cb   : > { %v2860_v27 = vrot.slane %v2832_v54, %v10151_v28  ;;  %v2862_v24 = vcombine.high %v2846_v13, %v2846_v13  ;;  %v2906_v26 = vrot.slane %v2846_v13, %v9976_v31  ;;  %v2863_v32 = vcombine.high %v2853_v40, %v2853_v40 }
 0x2cc   : > { %v2886_v20 = vrot.slane %v2872_v19, %v10151_v28  ;;  %v2894_v3 = vrot.slane %v2853_v40, %v9976_v31  ;;  %v2898_v61 = vrot.slane %v2861_v35, %v9976_v31  ;;  %v2922_v41 = vrot.slane %v2879_v6, %v9976_v31 }
 0x2cd   : > { %v2864_v45 = vcombine.high %v2860_v27, %v2860_v27  ;;  %v2910_v34 = vrot.slane %v2860_v27, %v9976_v31  ;;  %v2914_v7 = vrot.slane %v2862_v24, %v9976_v31  ;;  %v2902_v11 = vrot.slane %v2863_v32, %v9976_v31 }
 0x2ce   : > { %v2926_v21 = vrot.slane %v2886_v20, %v9976_v31  ;;  %v2937_v22 = vmul.f32 %v2890_v9, %v15696_v49  ;;  %v2938_v43 = vmul.f32 %v2890_v9, %v15697_v63  ;;  %v2939_v29 = vmul.f32 %v2894_v3, %v15696_v49 }
 0x2cf   : > { %v2918_v57 = vrot.slane %v2864_v45, %v9976_v31  ;;  %v2940_v53 = vmul.f32 %v2894_v3, %v15697_v63  ;;  %v2941_v16 = vmul.f32 %v2898_v61, %v15696_v49  ;;  %v2942_v37 = vmul.f32 %v2898_v61, %v15697_v63 }
 0x2d0   : > { %v2943_v14 = vmul.f32 %v2902_v11, %v15696_v49  ;;  %v2944_v36 = vmul.f32 %v2902_v11, %v15697_v63  ;;  %v2945_v54 = vmul.f32 %v2906_v26, %v15696_v49  ;;  %v2946_v13 = vmul.f32 %v2906_v26, %v15697_v63 }
 0x2d1   : > { %v2947_v40 = vmul.f32 %v2910_v34, %v15696_v49  ;;  %v2948_v35 = vmul.f32 %v2910_v34, %v15697_v63  ;;  %v2949_v19 = vmul.f32 %v2914_v7, %v15696_v49  ;;  %v2950_v6 = vmul.f32 %v2914_v7, %v15697_v63 }
 0x2d2   : > { %v2951_v27 = vmul.f32 %v2918_v57, %v15696_v49  ;;  %v2952_v24 = vmul.f32 %v2918_v57, %v15697_v63  ;;  %v2953_v9 = vmul.f32 %v2922_v41, %v15696_v49  ;;  %v2954_v32 = vmul.f32 %v2922_v41, %v15697_v63 }
 0x2d3   : > { %v2955_v20 = vmul.f32 %v2926_v21, %v15696_v49  ;;  %v2956_v26 = vmul.f32 %v2926_v21, %v15697_v63  ;;  %v11610_v3 = vadd.f32 %v2937_v22, %v11498_v2  ;;  %v11613_v61 = vadd.f32 %v2938_v43, %v11501_v38 }
 0x2d4   : > { %v11616_v45 = vadd.f32 %v2939_v29, %v11504_v55  ;;  %v11619_v34 = vadd.f32 %v2940_v53, %v11507_v62  ;;  %v11622_v7 = vadd.f32 %v2941_v16, %v11510_v25  ;;  %v11625_v41 = vadd.f32 %v2942_v37, %v11513_v48  ;;  %v15704_v16 = vld [vmem:[#allocation92_spill] sm:$0xff] }
 0x2d5   : > { %v11628_v11 = vadd.f32 %v2943_v14, %v11516_v0  ;;  %v11631_v2 = vadd.f32 %v2944_v36, %v11519_v15  ;;  %v11634_v38 = vadd.f32 %v2945_v54, %v11522_v17  ;;  %v11637_v55 = vadd.f32 %v2946_v13, %v11525_v59 }
 0x2d6   : > { %v11640_v62 = vadd.f32 %v2947_v40, %v11528_v60  ;;  %v11643_v25 = vadd.f32 %v2948_v35, %v11531_v50  ;;  %v11646_v48 = vadd.f32 %v2949_v19, %v11534_v30  ;;  %v11649_v0 = vadd.f32 %v2950_v6, %v11537_v1 }
 0x2d7   : > { %v11652_v15 = vadd.f32 %v2951_v27, %v11540_v56  ;;  %v11655_v17 = vadd.f32 %v2952_v24, %v11543_v10  ;;  %v11658_v59 = vadd.f32 %v2953_v9, %v11546_v18  ;;  %v11661_v60 = vadd.f32 %v2954_v32, %v11549_v4  ;;  %v15705_v24 = vld [vmem:[#allocation26_spill] sm:$0xff]  ;;  %v15706_v32 = vld [vmem:[#allocation27_spill] sm:$0xff] }
 0x2d8   : > { %v11664_v50 = vadd.f32 %v2955_v20, %v11552_v42  ;;  %v11667_v30 = vadd.f32 %v2956_v26, %v11555_v39  ;;  %v2993_v1 = vrot.slane %v2979_v8, %v10151_v28  ;;  %v2994_v56 = vcombine.high %v11569_v47, %v11569_v47 }
 0x2d9   : > { %v3002_v10 = vrot.slane %v11569_v47, %v10151_v28  ;;  %v3035_v18 = vcombine.high %v11573_v51, %v11573_v51  ;;  %v15700_v4 = vand.u32 2147483647, %v11120_v12  ;;  %v15702_v8 = vand.u32 2147483647, %v11123_v5 }
 0x2da   : > { %15698 = vst [vmem:[#allocation5_spill] sm:$0xff] %v11664_v50  ;;  %15699 = vst [vmem:[#allocation6_spill] sm:$0xff] %v11667_v30  ;;  %v2995_v39 = vcombine.high %v2993_v1, %v2993_v1  ;;  %v3009_v21 = vrot.slane %v2993_v1, %v10151_v28  ;;  %v3016_v43 = vrot.slane %v2994_v56, %v10151_v28 }
 0x2db   : > { %v11681_v42 = vsub.f32 1.0, %v15700_v4  ;;  %v11688_v22 = vsub.f32 1.0, %v15702_v8  ;;  %v3024_v47 = vcombine.high %v3002_v10, %v3002_v10  ;;  %v3049_v57 = vrot.slane %v3035_v18, %v10151_v28 }
 0x2dc   : > { %v3053_v29 = vrot.slane %v3002_v10, %v9976_v31  ;;  %v3023_v12 = vrot.slane %v2995_v39, %v10151_v28  ;;  %v3025_v53 = vcombine.high %v3009_v21, %v3009_v21  ;;  %v3142_v37 = vcombine.high %v15704_v16, %v15704_v16 }
 0x2dd   : > { %15701 = vst [vmem:[#allocation64_spill] sm:$0xff] %v11681_v42  ;;  %15703 = vst [vmem:[#allocation72_spill] sm:$0xff] %v11688_v22  ;;  %v3149_v51 = vrot.slane %v15704_v16, %v10151_v28  ;;  %v3026_v14 = vcombine.high %v3016_v43, %v3016_v43  ;;  %v3057_v5 = vrot.slane %v3016_v43, %v9976_v31  ;;  %v11754_v16 = vpop.f32.mrb[12].mxu1 }
 0x2de   : > { %v3061_v36 = vrot.slane %v3024_v47, %v9976_v31  ;;  %v3069_v54 = vrot.slane %v3009_v21, %v9976_v31  ;;  %v3027_v13 = vcombine.high %v3023_v12, %v3023_v12  ;;  %v3073_v40 = vrot.slane %v3023_v12, %v9976_v31  ;;  %15707 = vst [vmem:[#allocation73_spill] sm:$0xff] %v11754_v16 }
 0x2df   : > { %v3077_v35 = vrot.slane %v3025_v53, %v9976_v31  ;;  %v3085_v19 = vrot.slane %v3042_v23, %v9976_v31  ;;  %v3065_v6 = vrot.slane %v3026_v14, %v9976_v31  ;;  %v3089_v27 = vrot.slane %v3049_v57, %v9976_v31 }
 0x2e0   : > { %v3100_v9 = vmul.f32 %v3053_v29, %v15705_v24  ;;  %v3101_v20 = vmul.f32 %v3053_v29, %v15706_v32  ;;  %v3081_v26 = vrot.slane %v3027_v13, %v9976_v31  ;;  %v11710_v1 = vmul.f32 %v3057_v5, %v15705_v24 }
 0x2e1   : > { %v11713_v56 = vmul.f32 %v3057_v5, %v15706_v32  ;;  %v11716_v10 = vmul.f32 %v3061_v36, %v15705_v24  ;;  %v11719_v18 = vmul.f32 %v3061_v36, %v15706_v32  ;;  %v11722_v4 = vmul.f32 %v3065_v6, %v15705_v24 }
 0x2e2   : > { %v11725_v39 = vmul.f32 %v3065_v6, %v15706_v32  ;;  %v11728_v21 = vmul.f32 %v3069_v54, %v15705_v24  ;;  %v11731_v23 = vmul.f32 %v3069_v54, %v15706_v32  ;;  %v11734_v8 = vmul.f32 %v3073_v40, %v15705_v24 }
 0x2e3   : > { %v11737_v43 = vmul.f32 %v3073_v40, %v15706_v32  ;;  %v11740_v47 = vmul.f32 %v3077_v35, %v15705_v24  ;;  %v11743_v57 = vmul.f32 %v3077_v35, %v15706_v32  ;;  %v11746_v29 = vmul.f32 %v3081_v26, %v15705_v24  ;;  %v15709_v35 = vld [vmem:[#allocation70_spill] sm:$0xff] }
 0x2e4   : > { %v11749_v12 = vmul.f32 %v3081_v26, %v15706_v32  ;;  %v11752_v53 = vmul.f32 %v3085_v19, %v15705_v24  ;;  %v11757_v14 = vmul.f32 %v3085_v19, %v15706_v32  ;;  %v3156_v5 = vrot.slane %v3142_v37, %v10151_v28 }
 0x2e5   : > { %v3157_v36 = vcombine.high %v3149_v51, %v3149_v51  ;;  %v3165_v54 = vrot.slane %v3149_v51, %v10151_v28  ;;  %v3118_v13 = vmul.f32 %v3089_v27, %v15705_v24  ;;  %v3119_v40 = vmul.f32 %v3089_v27, %v15706_v32 }
 0x2e6   : > { %15708 = vst [vmem:[#allocation71_spill] sm:$0xff] %v11757_v14  ;;  %v3197_v6 = vrot.slane %v15709_v35, %v10151_v28  ;;  %v3120_v26 = vadd.f32 %v3100_v9, %v11610_v3  ;;  %v3158_v63 = vcombine.high %v3156_v5, %v3156_v5  ;;  %v3172_v49 = vrot.slane %v3156_v5, %v10151_v28 }
 0x2e7   : > { %v3179_v19 = vrot.slane %v3157_v36, %v10151_v28  ;;  %v3187_v52 = vcombine.high %v3165_v54, %v3165_v54  ;;  %v3216_v51 = vrot.slane %v3165_v54, %v9976_v31  ;;  %v3121_v24 = vadd.f32 %v3101_v20, %v11613_v61  ;;  %v15710_v20 = vld [vmem:[#allocation28_spill] sm:$0xff] }
 0x2e8   : > { %v3198_v44 = vcombine.high %v3197_v6, %v3197_v6  ;;  %v3205_v37 = vrot.slane %v3197_v6, %v10151_v28  ;;  %v3186_v27 = vrot.slane %v3158_v63, %v10151_v28  ;;  %v3188_v32 = vcombine.high %v3172_v49, %v3172_v49 }
 0x2e9   : > { %v3189_v46 = vcombine.high %v3179_v19, %v3179_v19  ;;  %v3220_v35 = vrot.slane %v3179_v19, %v9976_v31  ;;  %v3224_v9 = vrot.slane %v3187_v52, %v9976_v31  ;;  %v3232_v5 = vrot.slane %v3172_v49, %v9976_v31  ;;  %v15711_v19 = vld [vmem:[#allocation29_spill] sm:$0xff] }
 0x2ea   : > { %v3212_v3 = vrot.slane %v3198_v44, %v10151_v28  ;;  %v3248_v36 = vrot.slane %v3205_v37, %v9976_v31  ;;  %v3190_v58 = vcombine.high %v3186_v27, %v3186_v27  ;;  %v3236_v54 = vrot.slane %v3186_v27, %v9976_v31 }
 0x2eb   : > { %v3228_v6 = vrot.slane %v3189_v46, %v9976_v31  ;;  %v3240_v61 = vrot.slane %v3188_v32, %v9976_v31  ;;  %v3263_v33 = vmul.f32 %v3216_v51, %v15710_v20  ;;  %v3264_v22 = vmul.f32 %v3216_v51, %v15711_v19 }
 0x2ec   : > { %v3252_v63 = vrot.slane %v3212_v3, %v9976_v31  ;;  %v3265_v44 = vmul.f32 %v3220_v35, %v15710_v20  ;;  %v3244_v52 = vrot.slane %v3190_v58, %v9976_v31  ;;  %v3266_v49 = vmul.f32 %v3220_v35, %v15711_v19 }
 0x2ed   : > { %v3267_v37 = vmul.f32 %v3224_v9, %v15710_v20  ;;  %v3268_v46 = vmul.f32 %v3224_v9, %v15711_v19  ;;  %v3269_v27 = vmul.f32 %v3228_v6, %v15710_v20  ;;  %v3270_v32 = vmul.f32 %v3228_v6, %v15711_v19 }
 0x2ee   : > { %v3271_v3 = vmul.f32 %v3232_v5, %v15710_v20  ;;  %v3272_v42 = vmul.f32 %v3232_v5, %v15711_v19  ;;  %v3273_v51 = vmul.f32 %v3236_v54, %v15710_v20  ;;  %v3274_v16 = vmul.f32 %v3236_v54, %v15711_v19 }
 0x2ef   : > { %v3275_v58 = vmul.f32 %v3240_v61, %v15710_v20  ;;  %v3276_v35 = vmul.f32 %v3240_v61, %v15711_v19  ;;  %v3277_v31 = vmul.f32 %v3244_v52, %v15710_v20  ;;  %v3278_v9 = vmul.f32 %v3244_v52, %v15711_v19 }
 0x2f0   : > { %v3279_v28 = vmul.f32 %v3248_v36, %v15710_v20  ;;  %v3280_v6 = vmul.f32 %v3248_v36, %v15711_v19  ;;  %v3281_v30 = vmul.f32 %v3252_v63, %v15710_v20  ;;  %v3282_v5 = vmul.f32 %v3252_v63, %v15711_v19  ;;  %v15756_v19 = vld [vmem:[#allocation85_spill] sm:$0xff] }
 0x2f1   : > { %v3122_v50 = vadd.f32 %v11710_v1, %v11616_v45  ;;  %v3123_v54 = vadd.f32 %v11713_v56, %v11619_v34  ;;  %v3124_v61 = vadd.f32 %v11716_v10, %v11622_v7  ;;  %v3125_v52 = vadd.f32 %v11719_v18, %v11625_v41  ;;  %v15713_v56 = vld [vmem:[#allocation5_spill] sm:$0xff]  ;;  %v15714_v10 = vld [vmem:[#allocation6_spill] sm:$0xff] }
 0x2f2   : > { %v3126_v14 = vadd.f32 %v11722_v4, %v11628_v11  ;;  %v3127_v36 = vadd.f32 %v11725_v39, %v11631_v2  ;;  %v3128_v63 = vadd.f32 %v11728_v21, %v11634_v38  ;;  %v3129_v45 = vadd.f32 %v11731_v23, %v11637_v55 }
 0x2f3   : > { %v3130_v34 = vadd.f32 %v11734_v8, %v11640_v62  ;;  %v3131_v7 = vadd.f32 %v11737_v43, %v11643_v25  ;;  %v3132_v41 = vadd.f32 %v11740_v47, %v11646_v48  ;;  %v3133_v11 = vadd.f32 %v11743_v57, %v11649_v0  ;;  %v15712_v62 = vld [vmem:[#allocation71_spill] sm:$0xff] }
 0x2f4   : > { %v3134_v2 = vadd.f32 %v11746_v29, %v11652_v15  ;;  %v3135_v38 = vadd.f32 %v11749_v12, %v11655_v17  ;;  %v3136_v55 = vadd.f32 %v11752_v53, %v11658_v59  ;;  %v3137_v1 = vadd.f32 %v15712_v62, %v11661_v60  ;;  %v9652_v12 = vpop.f32.mrb[12].mxu0  ;;  %v15715_v53 = vld [vmem:[#allocation76_spill] sm:$0xff] }
 0x2f5   : > { %v3138_v25 = vadd.f32 %v3118_v13, %v15713_v56  ;;  %v3139_v18 = vadd.f32 %v3119_v40, %v15714_v10  ;;  %v11836_v48 = vadd.f32 %v3263_v33, %v3120_v26  ;;  %v11838_v4 = vadd.f32 %v3264_v22, %v3121_v24  ;;  %v15717_v13 = vld [vmem:[#allocation77_spill] sm:$0xff]  ;;  %v15718_v40 = vld [vmem:[#allocation104_spill] sm:$0xff] }
 0x2f6   : > { %v11840_v0 = vadd.f32 %v3265_v44, %v3122_v50  ;;  %v11842_v15 = vadd.f32 %v3266_v49, %v3123_v54  ;;  %v11844_v39 = vadd.f32 %v3267_v37, %v3124_v61  ;;  %v11846_v17 = vadd.f32 %v3268_v46, %v3125_v52  ;;  %v15719_v44 = vld [vmem:[#allocation78_spill] sm:$0xff]  ;;  %v15721_v37 = vld [vmem:[#allocation79_spill] sm:$0xff]  ;;  %v567_v52 = vpop.permute.xlu1 %566  ;;  %v15737_v62 = vld [vmem:[#allocation40_spill] sm:$0xff] }
 0x2f7   : > { %v11848_v59 = vadd.f32 %v3269_v27, %v3126_v14  ;;  %v11850_v21 = vadd.f32 %v3270_v32, %v3127_v36  ;;  %v11852_v60 = vadd.f32 %v3271_v3, %v3128_v63  ;;  %v11854_v23 = vadd.f32 %v3272_v42, %v3129_v45  ;;  %v15722_v46 = vld [vmem:[#allocation106_spill] sm:$0xff]  ;;  %v15723_v27 = vld [vmem:[#allocation80_spill] sm:$0xff]  ;;  %v15724_v32 = vld [vmem:[#allocation107_spill] sm:$0xff] }
 0x2f8   : > { %v11856_v33 = vadd.f32 %v3273_v51, %v3130_v34  ;;  %v11858_v22 = vadd.f32 %v3274_v16, %v3131_v7  ;;  %v11860_v50 = vadd.f32 %v3275_v58, %v3132_v41  ;;  %v11862_v24 = vadd.f32 %v3276_v35, %v3133_v11  ;;  %v15716_v16 = vld [vmem:[#allocation103_spill] sm:$0xff]  ;;  %v15726_v51 = vld [vmem:[#allocation108_spill] sm:$0xff]  ;;  %v15727_v35 = vld [vmem:[#allocation81_spill] sm:$0xff] }
 0x2f9   : > { %v11864_v8 = vadd.f32 %v3277_v31, %v3134_v2  ;;  %v11866_v43 = vadd.f32 %v3278_v9, %v3135_v38  ;;  %v11868_v47 = vadd.f32 %v3279_v28, %v3136_v55  ;;  %v11870_v57 = vadd.f32 %v3280_v6, %v3137_v1  ;;  %v15720_v31 = vld [vmem:[#allocation105_spill] sm:$0xff]  ;;  %v15728_v9 = vld [vmem:[#allocation110_spill] sm:$0xff]  ;;  %v15730_v54 = vld [vmem:[#allocation111_spill] sm:$0xff] }
 0x2fa   : > { %v11872_v29 = vadd.f32 %v3281_v30, %v3138_v25  ;;  %v11874_v42 = vadd.f32 %v3282_v5, %v3139_v18  ;;  %v3965_v14 = vadd.f32 %v15716_v16, %v15715_v53  ;;  %v3966_v26 = vadd.f32 %v15718_v40, %v15717_v13  ;;  %v15725_v30 = vld [vmem:[#allocation69_spill] sm:$0xff]  ;;  %v15729_v5 = vld [vmem:[#allocation82_spill] sm:$0xff]  ;;  %v15731_v36 = vld [vmem:[#allocation83_spill] sm:$0xff] }
 0x2fb   : > { %v3967_v49 = vadd.f32 %v15720_v31, %v15719_v44  ;;  %v3968_v28 = vadd.f32 %v15722_v46, %v15721_v37  ;;  %v3969_v3 = vadd.f32 %v15724_v32, %v15723_v27  ;;  %v3970_v58 = vadd.f32 %v15726_v51, %v15725_v30  ;;  %v15732_v63 = vld [vmem:[#allocation74_spill] sm:$0xff]  ;;  %v15733_v34 = vld [vmem:[#allocation84_spill] sm:$0xff]  ;;  %v15734_v7 = vld [vmem:[#allocation75_spill] sm:$0xff] }
 0x2fc   : > { %v3971_v6 = vadd.f32 %v15728_v9, %v15727_v35  ;;  %v3972_v61 = vadd.f32 %v15730_v54, %v15729_v5  ;;  %v3973_v45 = vadd.f32 %v15732_v63, %v15731_v36  ;;  %v3974_v41 = vadd.f32 %v15734_v7, %v15733_v34  ;;  %v15735_v11 = vld [vmem:[#allocation91_spill] sm:$0xff]  ;;  %v15739_v56 = vld [vmem:[#allocation41_spill] sm:$0xff]  ;;  %v15742_v16 = vld [vmem:[#allocation42_spill] sm:$0xff] }
 0x2fd   : > { %v3976_v2 = vcombine.high %v15735_v11, %v15735_v11  ;;  %v15736_v38 = vld [vmem:[#allocation55_spill] sm:$0xff]  ;;  %v11901_v1 = vmax.f32 %v15737_v62, 0.0  ;;  %v11904_v25 = vmax.f32 %v15739_v56, 0.0  ;;  %v15741_v10 = vld [vmem:[#allocation73_spill] sm:$0xff]  ;;  %v1169_v53 = vadd.f32 %v9652_v12, %v567_v52  ;;  %v15744_v37 = vld [vmem:[#allocation64_spill] sm:$0xff] }
 0x2fe   : > { %v3983_v55 = vrot.slane %v15735_v11, %v15736_v38  ;;  %v758_v18 = vadd.f32 %v15741_v10, %v567_v52  ;;  %v11908_v13 = vmax.f32 %v15742_v16, 0.0  ;;  %v11913_v46 = vmax.f32 %v15744_v37, 0.0  ;;  %v15746_v27 = vld [vmem:[#allocation72_spill] sm:$0xff]  ;;  %v15748_v54 = vld [vmem:[#allocation43_spill] sm:$0xff]  ;;  %v15751_v34 = vld [vmem:[#allocation9_spill] sm:$0xff] }
 0x2ff   : > { %15738 = vst [vmem:[#allocation68_spill] sm:$0xff] %v11901_v1  ;;  %15740 = vst [vmem:[#allocation93_spill] sm:$0xff] %v11904_v25  ;;  %v3990_v40 = vrot.slane %v3976_v2, %v15736_v38  ;;  %v11916_v32 = vmax.f32 %v15746_v27, 0.0  ;;  %v1209_v51 = vmax.f32 %v1169_v53, 0.0  ;;  %v11921_v52 = vmax.f32 %v15748_v54, 0.0  ;;  %v15750_v36 = vld [vmem:[#allocation4_spill] sm:$0xff] }
 0x300   : > { %15743 = vst [vmem:[#allocation94_spill] sm:$0xff] %v11908_v13  ;;  %v3991_v44 = vcombine.high %v3983_v55, %v3983_v55  ;;  %v3999_v31 = vrot.slane %v3983_v55, %v15736_v38  ;;  %15745 = vst [vmem:[#allocation95_spill] sm:$0xff] %v11913_v46  ;;  %v798_v30 = vmax.f32 %v758_v18, 0.0  ;;  %v15753_v11 = vld [vmem:[#allocation56_spill] sm:$0xff] }
 0x301   : > { %15747 = vst [vmem:[#allocation96_spill] sm:$0xff] %v11916_v32  ;;  %v3992_v35 = vcombine.high %v3990_v40, %v3990_v40  ;;  %v4006_v9 = vrot.slane %v3990_v40, %v15736_v38  ;;  %15749 = vst [vmem:[#allocation97_spill] sm:$0xff] %v11921_v52  ;;  %v11928_v2 = vmul.f32 %v15753_v11, %v1209_v51  ;;  %v15757_v11 = vld [vmem:[#allocation86_spill] sm:$0xff] }
 0x302   : > { %v4013_v12 = vrot.slane %v3991_v44, %v15736_v38  ;;  %v4021_v5 = vcombine.high %v3999_v31, %v3999_v31  ;;  %v4027_v63 = vrot.slane %v3999_v31, %v15750_v36  ;;  %v11925_v7 = vmul.f32 %v15751_v34, %v798_v30  ;;  %v11936_v44 = vpop.f32.mrb[13].mxu1  ;;  %v15758_v34 = vld [vmem:[#allocation87_spill] sm:$0xff]  ;;  %v15759_v52 = vld [vmem:[#allocation90_spill] sm:$0xff] }
 0x303   : > { %15754 = vst [vmem:[#allocation99_spill] sm:$0xff] %v11928_v2  ;;  %v4020_v55 = vrot.slane %v3992_v35, %v15736_v38  ;;  %v4022_v62 = vcombine.high %v4006_v9, %v4006_v9  ;;  %v4043_v53 = vrot.slane %v4006_v9, %v15750_v36  ;;  %15755 = vst [vmem:[#allocation67_spill] sm:$0xff] %v11936_v44 }
 0x304   : > { %15752 = vst [vmem:[#allocation98_spill] sm:$0xff] %v11925_v7  ;;  %v4023_v56 = vcombine.high %v4013_v12, %v4013_v12  ;;  %v4031_v10 = vrot.slane %v4013_v12, %v15750_v36  ;;  %v4035_v18 = vrot.slane %v4021_v5, %v15750_v36  ;;  %v4059_v16 = vmul.f32 %v4027_v63, %v11913_v46 }
 0x305   : > { %v4060_v40 = vmul.f32 %v4027_v63, %v11916_v32  ;;  %v4047_v37 = vrot.slane %v4020_v55, %v15750_v36  ;;  %v4051_v27 = vrot.slane %v4022_v62, %v15750_v36  ;;  %v4067_v12 = vmul.f32 %v4043_v53, %v11913_v46 }
 0x306   : > { %v4039_v31 = vrot.slane %v4023_v56, %v15750_v36  ;;  %v4061_v30 = vmul.f32 %v4031_v10, %v11913_v46  ;;  %v4062_v51 = vmul.f32 %v4031_v10, %v11916_v32  ;;  %v4063_v35 = vmul.f32 %v4035_v18, %v11913_v46 }
 0x307   : > { %v4064_v9 = vmul.f32 %v4035_v18, %v11916_v32  ;;  %v4068_v63 = vmul.f32 %v4043_v53, %v11916_v32  ;;  %v4069_v55 = vmul.f32 %v4047_v37, %v11913_v46  ;;  %v4070_v62 = vmul.f32 %v4047_v37, %v11916_v32 }
 0x308   : > { %v4065_v5 = vmul.f32 %v4039_v31, %v11913_v46  ;;  %v4066_v54 = vmul.f32 %v4039_v31, %v11916_v32  ;;  %v4071_v56 = vmul.f32 %v4051_v27, %v11913_v46  ;;  %v4072_v10 = vmul.f32 %v4051_v27, %v11916_v32 }
 0x309   : > { %v4073_v20 = vadd.f32 %v4059_v16, %v15756_v19  ;;  %v4074_v18 = vadd.f32 %v4060_v40, %v15757_v11  ;;  %v4075_v44 = vadd.f32 %v4061_v30, %v15758_v34  ;;  %v4076_v13 = vadd.f32 %v4062_v51, %v15759_v52 }
 0x30a   : > { %v11957_v2 = vadd.f32 %v4063_v35, %v3965_v14  ;;  %v11959_v31 = vadd.f32 %v4064_v9, %v3966_v26  ;;  %v11961_v53 = vadd.f32 %v4065_v5, %v3967_v49  ;;  %v11963_v7 = vadd.f32 %v4066_v54, %v3968_v28  ;;  %v12001_v9 = vpop.f32.mrb[13].mxu0 }
 0x30b   : > { %v11965_v37 = vadd.f32 %v4067_v12, %v3969_v3  ;;  %v11967_v46 = vadd.f32 %v4068_v63, %v3970_v58  ;;  %v11969_v27 = vadd.f32 %v4069_v55, %v3971_v6  ;;  %v11971_v19 = vadd.f32 %v4070_v62, %v3972_v61  ;;  %15762 = vst [vmem:[#allocation8_spill] sm:$0xff] %v12001_v9 }
 0x30c   : > { %v11973_v11 = vadd.f32 %v4071_v56, %v3973_v45  ;;  %v11975_v34 = vadd.f32 %v4072_v10, %v3974_v41  ;;  %v4089_v14 = vcombine.high %v4073_v20, %v4073_v20  ;;  %v4096_v26 = vrot.slane %v4073_v20, %v15736_v38 }
 0x30d   : > { %v4144_v49 = vrot.slane %v4074_v18, %v15736_v38  ;;  %v4252_v52 = vcombine.high %v4075_v44, %v4075_v44  ;;  %v11980_v28 = vrot.slane %v4075_v44, %v15736_v38  ;;  %v11983_v3 = vrot.slane %v4076_v13, %v15736_v38 }
 0x30e   : > { %15760 = vst [vmem:[#allocation109_spill] sm:$0xff] %v11973_v11  ;;  %15761 = vst [vmem:[#allocation7_spill] sm:$0xff] %v11975_v34  ;;  %v4103_v6 = vrot.slane %v4089_v14, %v15736_v38  ;;  %v4104_v61 = vcombine.high %v4096_v26, %v4096_v26  ;;  %v4112_v45 = vrot.slane %v4096_v26, %v15736_v38 }
 0x30f   : > { %v4145_v41 = vcombine.high %v4144_v49, %v4144_v49  ;;  %v4152_v20 = vrot.slane %v4144_v49, %v15736_v38  ;;  %v11991_v16 = vrot.slane %v4252_v52, %v15736_v38  ;;  %v11997_v13 = vrot.slane %v11980_v28, %v15736_v38  ;;  %v15763_v49 = vld [vmem:[#allocation30_spill] sm:$0xff] }
 0x310   : > { %v4105_v44 = vcombine.high %v4103_v6, %v4103_v6  ;;  %v4119_v30 = vrot.slane %v4103_v6, %v15736_v38  ;;  %v4126_v51 = vrot.slane %v4104_v61, %v15736_v38  ;;  %v4134_v35 = vcombine.high %v4112_v45, %v4112_v45 }
 0x311   : > { %v4159_v12 = vrot.slane %v4145_v41, %v15736_v38  ;;  %v4163_v5 = vrot.slane %v4112_v45, %v15750_v36  ;;  %v4195_v54 = vrot.slane %v4152_v20, %v15750_v36  ;;  %v4268_v63 = vcombine.high %v11991_v16, %v11991_v16  ;;  %v15764_v20 = vld [vmem:[#allocation31_spill] sm:$0xff] }
 0x312   : > { %v4133_v55 = vrot.slane %v4105_v44, %v15736_v38  ;;  %v4135_v62 = vcombine.high %v4119_v30, %v4119_v30  ;;  %v4136_v56 = vcombine.high %v4126_v51, %v4126_v51  ;;  %v4167_v10 = vrot.slane %v4126_v51, %v15750_v36 }
 0x313   : > { %v4171_v18 = vrot.slane %v4134_v35, %v15750_v36  ;;  %v4179_v14 = vrot.slane %v4119_v30, %v15750_v36  ;;  %v4199_v26 = vrot.slane %v4159_v12, %v15750_v36  ;;  %v4210_v52 = vmul.f32 %v4163_v5, %v15763_v49 }
 0x314   : > { %v4137_v6 = vcombine.high %v4133_v55, %v4133_v55  ;;  %v4175_v61 = vrot.slane %v4136_v56, %v15750_v36  ;;  %v4183_v45 = vrot.slane %v4133_v55, %v15750_v36  ;;  %v4187_v41 = vrot.slane %v4135_v62, %v15750_v36 }
 0x315   : > { %v4211_v44 = vmul.f32 %v4163_v5, %v15764_v20  ;;  %v4212_v58 = vmul.f32 %v4167_v10, %v15763_v49  ;;  %v4213_v51 = vmul.f32 %v4167_v10, %v15764_v20  ;;  %v4214_v35 = vmul.f32 %v4171_v18, %v15763_v49 }
 0x316   : > { %v4191_v30 = vrot.slane %v4137_v6, %v15750_v36  ;;  %v4215_v12 = vmul.f32 %v4171_v18, %v15764_v20  ;;  %v4216_v40 = vmul.f32 %v4175_v61, %v15763_v49  ;;  %v4217_v56 = vmul.f32 %v4175_v61, %v15764_v20 }
 0x317   : > { %v4218_v55 = vmul.f32 %v4179_v14, %v15763_v49  ;;  %v4219_v62 = vmul.f32 %v4179_v14, %v15764_v20  ;;  %v4220_v5 = vmul.f32 %v4183_v45, %v15763_v49  ;;  %v4221_v32 = vmul.f32 %v4183_v45, %v15764_v20 }
 0x318   : > { %v4222_v10 = vmul.f32 %v4187_v41, %v15763_v49  ;;  %v4223_v9 = vmul.f32 %v4187_v41, %v15764_v20  ;;  %v4224_v6 = vmul.f32 %v4191_v30, %v15763_v49  ;;  %v4225_v18 = vmul.f32 %v4191_v30, %v15764_v20 }
 0x319   : > { %v4226_v34 = vmul.f32 %v4195_v54, %v15763_v49  ;;  %v4227_v61 = vmul.f32 %v4195_v54, %v15764_v20  ;;  %v4228_v25 = vmul.f32 %v4199_v26, %v15763_v49  ;;  %v4229_v14 = vmul.f32 %v4199_v26, %v15764_v20 }
 0x31a   : > { %v12038_v1 = vadd.f32 %v4210_v52, %v11836_v48  ;;  %v12041_v45 = vadd.f32 %v4211_v44, %v11838_v4  ;;  %v12044_v41 = vadd.f32 %v4212_v58, %v11840_v0  ;;  %v12047_v11 = vadd.f32 %v4213_v51, %v11842_v15 }
 0x31b   : > { %v12050_v30 = vadd.f32 %v4214_v35, %v11844_v39  ;;  %v12053_v54 = vadd.f32 %v4215_v12, %v11846_v17  ;;  %v12056_v26 = vadd.f32 %v4216_v40, %v11848_v59  ;;  %v12059_v48 = vadd.f32 %v4217_v56, %v11850_v21  ;;  %v15766_v56 = vld [vmem:[#allocation32_spill] sm:$0xff] }
 0x31c   : > { %v12062_v4 = vadd.f32 %v4218_v55, %v11852_v60  ;;  %v12065_v0 = vadd.f32 %v4219_v62, %v11854_v23  ;;  %v12068_v15 = vadd.f32 %v4220_v5, %v11856_v33  ;;  %v12071_v39 = vadd.f32 %v4221_v32, %v11858_v22  ;;  %v15767_v62 = vld [vmem:[#allocation33_spill] sm:$0xff] }
 0x31d   : > { %v12074_v17 = vadd.f32 %v4222_v10, %v11860_v50  ;;  %v12077_v59 = vadd.f32 %v4223_v9, %v11862_v24  ;;  %v12080_v21 = vadd.f32 %v4224_v6, %v11864_v8  ;;  %v12083_v60 = vadd.f32 %v4225_v18, %v11866_v43  ;;  %v12097_v24 = vpop.f32.mrb[14].mxu1 }
 0x31e   : > { %v12086_v23 = vadd.f32 %v4226_v34, %v11868_v47  ;;  %v12089_v33 = vadd.f32 %v4227_v61, %v11870_v57  ;;  %v12092_v22 = vadd.f32 %v4228_v25, %v11872_v29  ;;  %v12095_v50 = vadd.f32 %v4229_v14, %v11874_v42 }
 0x31f   : > { %v4282_v8 = vrot.slane %v11991_v16, %v15736_v38  ;;  %v15765_v43 = vcombine.high %v11980_v28, %v11980_v28  ;;  %v4296_v32 = vrot.slane %v4268_v63, %v15736_v38  ;;  %v4297_v57 = vcombine.high %v11997_v13, %v11997_v13 }
 0x320   : > { %v4308_v29 = vcombine.high %v11983_v3, %v11983_v3  ;;  %v4315_v42 = vrot.slane %v11983_v3, %v15736_v38  ;;  %v4326_v25 = vrot.slane %v11997_v13, %v15750_v36  ;;  %v12116_v34 = vrot.slane %v11957_v2, %v15736_v38 }
 0x321   : > { %v4289_v47 = vrot.slane %v15765_v43, %v15736_v38  ;;  %v4298_v28 = vcombine.high %v4282_v8, %v4282_v8  ;;  %v4300_v16 = vcombine.high %v4296_v32, %v4296_v32  ;;  %v4334_v63 = vrot.slane %v4297_v57, %v15750_v36  ;;  %v12139_v57 = vpop.f32.mrb[14].mxu0 }
 0x322   : > { %v4322_v9 = vrot.slane %v4308_v29, %v15736_v38  ;;  %v4342_v52 = vrot.slane %v4282_v8, %v15750_v36  ;;  %v4346_v3 = vrot.slane %v4296_v32, %v15750_v36  ;;  %v4358_v35 = vrot.slane %v4315_v42, %v15750_v36 }
 0x323   : > { %v4299_v58 = vcombine.high %v4289_v47, %v4289_v47  ;;  %v4330_v40 = vrot.slane %v4289_v47, %v15750_v36  ;;  %v4350_v13 = vrot.slane %v4298_v28, %v15750_v36  ;;  %v4354_v51 = vrot.slane %v4300_v16, %v15750_v36 }
 0x324   : > { %v4362_v12 = vrot.slane %v4322_v9, %v15750_v36  ;;  %v4373_v55 = vmul.f32 %v4326_v25, %v15766_v56  ;;  %v4374_v5 = vmul.f32 %v4326_v25, %v15767_v62  ;;  %v4377_v18 = vmul.f32 %v4334_v63, %v15766_v56 }
 0x325   : > { %v4338_v44 = vrot.slane %v4299_v58, %v15750_v36  ;;  %v4375_v10 = vmul.f32 %v4330_v40, %v15766_v56  ;;  %v4376_v6 = vmul.f32 %v4330_v40, %v15767_v62  ;;  %v4378_v61 = vmul.f32 %v4334_v63, %v15767_v62 }
 0x326   : > { %v4381_v43 = vmul.f32 %v4342_v52, %v15766_v56  ;;  %v4382_v47 = vmul.f32 %v4342_v52, %v15767_v62  ;;  %v4383_v32 = vmul.f32 %v4346_v3, %v15766_v56  ;;  %v4384_v29 = vmul.f32 %v4346_v3, %v15767_v62 }
 0x327   : > { %v4379_v14 = vmul.f32 %v4338_v44, %v15766_v56  ;;  %v4380_v8 = vmul.f32 %v4338_v44, %v15767_v62  ;;  %v4385_v42 = vmul.f32 %v4350_v13, %v15766_v56  ;;  %v4386_v25 = vmul.f32 %v4350_v13, %v15767_v62 }
 0x328   : > { %v4387_v28 = vmul.f32 %v4354_v51, %v15766_v56  ;;  %v4388_v58 = vmul.f32 %v4354_v51, %v15767_v62  ;;  %v4389_v16 = vmul.f32 %v4358_v35, %v15766_v56  ;;  %v4390_v40 = vmul.f32 %v4358_v35, %v15767_v62 }
 0x329   : > { %v4391_v9 = vmul.f32 %v4362_v12, %v15766_v56  ;;  %v4392_v63 = vmul.f32 %v4362_v12, %v15767_v62  ;;  %v12151_v52 = vadd.f32 %v4373_v55, %v12038_v1  ;;  %v12154_v3 = vadd.f32 %v4374_v5, %v12041_v45 }
 0x32a   : > { %v12157_v44 = vadd.f32 %v4375_v10, %v12044_v41  ;;  %v12160_v13 = vadd.f32 %v4376_v6, %v12047_v11  ;;  %v12163_v51 = vadd.f32 %v4377_v18, %v12050_v30  ;;  %v12166_v35 = vadd.f32 %v4378_v61, %v12053_v54  ;;  %v12232_v6 = vpop.f32.mrb[15].mxu1 }
 0x32b   : > { %v12169_v12 = vadd.f32 %v4379_v14, %v12056_v26  ;;  %v12172_v1 = vadd.f32 %v4380_v8, %v12059_v48  ;;  %v12175_v45 = vadd.f32 %v4381_v43, %v12062_v4  ;;  %v12178_v41 = vadd.f32 %v4382_v47, %v12065_v0 }
 0x32c   : > { %v12181_v11 = vadd.f32 %v4383_v32, %v12068_v15  ;;  %v12184_v30 = vadd.f32 %v4384_v29, %v12071_v39  ;;  %v12187_v54 = vadd.f32 %v4385_v42, %v12074_v17  ;;  %v12190_v26 = vadd.f32 %v4386_v25, %v12077_v59 }
 0x32d   : > { %v12193_v48 = vadd.f32 %v4387_v28, %v12080_v21  ;;  %v12196_v4 = vadd.f32 %v4388_v58, %v12083_v60  ;;  %v12199_v0 = vadd.f32 %v4389_v16, %v12086_v23  ;;  %v12202_v15 = vadd.f32 %v4390_v40, %v12089_v33 }
 0x32e   : > { %v12205_v39 = vadd.f32 %v4391_v9, %v12092_v22  ;;  %v12208_v17 = vadd.f32 %v4392_v63, %v12095_v50  ;;  %v15768_v59 = vcombine.high %v11957_v2, %v11957_v2  ;;  %v4430_v60 = vcombine.high %v12116_v34, %v12116_v34  ;;  %v15769_v9 = vld [vmem:[#allocation34_spill] sm:$0xff] }
 0x32f   : > { %v4438_v23 = vrot.slane %v12116_v34, %v15736_v38  ;;  %v4470_v33 = vrot.slane %v11959_v31, %v15736_v38  ;;  %v4578_v22 = vcombine.high %v11961_v53, %v11961_v53  ;;  %v12224_v50 = vrot.slane %v11961_v53, %v15736_v38 }
 0x330   : > { %v4429_v21 = vrot.slane %v15768_v59, %v15736_v38  ;;  %v12228_v2 = vrot.slane %v11963_v7, %v15736_v38  ;;  %v4452_v10 = vrot.slane %v4430_v60, %v15736_v38  ;;  %v15770_v59 = vld [vmem:[#allocation35_spill] sm:$0xff] }
 0x331   : > { %v4460_v34 = vcombine.high %v4438_v23, %v4438_v23  ;;  %v4471_v31 = vcombine.high %v4470_v33, %v4470_v33  ;;  %v4478_v18 = vrot.slane %v4470_v33, %v15736_v38  ;;  %v4489_v61 = vrot.slane %v4438_v23, %v15750_v36 }
 0x332   : > { %v4431_v55 = vcombine.high %v4429_v21, %v4429_v21  ;;  %v4445_v5 = vrot.slane %v4429_v21, %v15736_v38  ;;  %v12237_v53 = vrot.slane %v4578_v22, %v15736_v38  ;;  %v4462_v8 = vcombine.high %v4452_v10, %v4452_v10 }
 0x333   : > { %v4493_v43 = vrot.slane %v4452_v10, %v15750_v36  ;;  %v4485_v47 = vrot.slane %v4471_v31, %v15736_v38  ;;  %v4497_v32 = vrot.slane %v4460_v34, %v15750_v36  ;;  %v4521_v42 = vrot.slane %v4478_v18, %v15750_v36 }
 0x334   : > { %v4459_v14 = vrot.slane %v4431_v55, %v15736_v38  ;;  %v4461_v7 = vcombine.high %v4445_v5, %v4445_v5  ;;  %v4505_v29 = vrot.slane %v4445_v5, %v15750_v36  ;;  %v4501_v28 = vrot.slane %v4462_v8, %v15750_v36 }
 0x335   : > { %v4525_v40 = vrot.slane %v4485_v47, %v15750_v36  ;;  %v4536_v63 = vmul.f32 %v4489_v61, %v15769_v9  ;;  %v4537_v21 = vmul.f32 %v4489_v61, %v15770_v59  ;;  %v4538_v60 = vmul.f32 %v4493_v43, %v15769_v9 }
 0x336   : > { %v4463_v25 = vcombine.high %v4459_v14, %v4459_v14  ;;  %v4509_v58 = vrot.slane %v4459_v14, %v15750_v36  ;;  %v4513_v16 = vrot.slane %v4461_v7, %v15750_v36  ;;  %v4539_v33 = vmul.f32 %v4493_v43, %v15770_v59 }
 0x337   : > { %v4540_v22 = vmul.f32 %v4497_v32, %v15769_v9  ;;  %v4541_v55 = vmul.f32 %v4497_v32, %v15770_v59  ;;  %v4542_v5 = vmul.f32 %v4501_v28, %v15769_v9  ;;  %v4543_v10 = vmul.f32 %v4501_v28, %v15770_v59 }
 0x338   : > { %v4517_v23 = vrot.slane %v4463_v25, %v15750_v36  ;;  %v4544_v34 = vmul.f32 %v4505_v29, %v15769_v9  ;;  %v4545_v31 = vmul.f32 %v4505_v29, %v15770_v59  ;;  %v4546_v18 = vmul.f32 %v4509_v58, %v15769_v9  ;;  %v12268_v25 = vpop.f32.mrb[15].mxu0 }
 0x339   : > { %v4547_v61 = vmul.f32 %v4509_v58, %v15770_v59  ;;  %v4548_v14 = vmul.f32 %v4513_v16, %v15769_v9  ;;  %v4549_v7 = vmul.f32 %v4513_v16, %v15770_v59  ;;  %v4552_v47 = vmul.f32 %v4521_v42, %v15769_v9 }
 0x33a   : > { %v4550_v8 = vmul.f32 %v4517_v23, %v15769_v9  ;;  %v4551_v43 = vmul.f32 %v4517_v23, %v15770_v59  ;;  %v4553_v32 = vmul.f32 %v4521_v42, %v15770_v59  ;;  %v4554_v29 = vmul.f32 %v4525_v40, %v15769_v9 }
 0x33b   : > { %v4555_v28 = vmul.f32 %v4525_v40, %v15770_v59  ;;  %v12273_v58 = vadd.f32 %v4536_v63, %v12151_v52  ;;  %v12276_v62 = vadd.f32 %v4537_v21, %v12154_v3  ;;  %v12279_v16 = vadd.f32 %v4538_v60, %v12157_v44 }
 0x33c   : > { %v12282_v23 = vadd.f32 %v4539_v33, %v12160_v13  ;;  %v12285_v42 = vadd.f32 %v4540_v22, %v12163_v51  ;;  %v12288_v56 = vadd.f32 %v4541_v55, %v12166_v35  ;;  %v12291_v40 = vadd.f32 %v4542_v5, %v12169_v12 }
 0x33d   : > { %v12294_v52 = vadd.f32 %v4543_v10, %v12172_v1  ;;  %v12297_v3 = vadd.f32 %v4544_v34, %v12175_v45  ;;  %v12300_v44 = vadd.f32 %v4545_v31, %v12178_v41  ;;  %v12303_v13 = vadd.f32 %v4546_v18, %v12181_v11 }
 0x33e   : > { %v12306_v51 = vadd.f32 %v4547_v61, %v12184_v30  ;;  %v12309_v35 = vadd.f32 %v4548_v14, %v12187_v54  ;;  %v12312_v12 = vadd.f32 %v4549_v7, %v12190_v26  ;;  %v12315_v1 = vadd.f32 %v4550_v8, %v12193_v48  ;;  %v15771_v8 = vld [vmem:[#allocation36_spill] sm:$0xff] }
 0x33f   : > { %v12318_v45 = vadd.f32 %v4551_v43, %v12196_v4  ;;  %v12321_v41 = vadd.f32 %v4552_v47, %v12199_v0  ;;  %v12324_v11 = vadd.f32 %v4553_v32, %v12202_v15  ;;  %v12327_v30 = vadd.f32 %v4554_v29, %v12205_v39  ;;  %v15772_v47 = vld [vmem:[#allocation37_spill] sm:$0xff] }
 0x340   : > { %v12330_v54 = vadd.f32 %v4555_v28, %v12208_v17  ;;  %v4593_v26 = vcombine.high %v12224_v50, %v12224_v50  ;;  %v4594_v48 = vcombine.high %v12237_v53, %v12237_v53  ;;  %v4601_v4 = vrot.slane %v12224_v50, %v15736_v38 }
 0x341   : > { %v4608_v0 = vrot.slane %v12237_v53, %v15736_v38  ;;  %v4634_v15 = vcombine.high %v12228_v2, %v12228_v2  ;;  %v4641_v39 = vrot.slane %v12228_v2, %v15736_v38  ;;  %v4741_v21 = vcombine.high %v11965_v37, %v11965_v37 }
 0x342   : > { %v4615_v17 = vrot.slane %v4593_v26, %v15736_v38  ;;  %v4622_v63 = vrot.slane %v4594_v48, %v15736_v38  ;;  %v12350_v60 = vrot.slane %v11965_v37, %v15736_v38  ;;  %v4623_v50 = vcombine.high %v4601_v4, %v4601_v4 }
 0x343   : > { %v4624_v33 = vcombine.high %v4608_v0, %v4608_v0  ;;  %v4648_v53 = vrot.slane %v4634_v15, %v15736_v38  ;;  %v4652_v22 = vrot.slane %v4601_v4, %v15750_v36  ;;  %v4668_v10 = vrot.slane %v4608_v0, %v15750_v36 }
 0x344   : > { %v4625_v55 = vcombine.high %v4615_v17, %v4615_v17  ;;  %v4626_v5 = vcombine.high %v4622_v63, %v4622_v63  ;;  %v4656_v2 = vrot.slane %v4615_v17, %v15750_v36  ;;  %v4660_v34 = vrot.slane %v4623_v50, %v15750_v36 }
 0x345   : > { %v4672_v31 = vrot.slane %v4622_v63, %v15750_v36  ;;  %v4676_v18 = vrot.slane %v4624_v33, %v15750_v36  ;;  %v4684_v37 = vrot.slane %v4641_v39, %v15750_v36  ;;  %v4688_v7 = vrot.slane %v4648_v53, %v15750_v36 }
 0x346   : > { %v4664_v61 = vrot.slane %v4625_v55, %v15750_v36  ;;  %v4680_v14 = vrot.slane %v4626_v5, %v15750_v36  ;;  %v4699_v43 = vmul.f32 %v4652_v22, %v15771_v8  ;;  %v4700_v32 = vmul.f32 %v4652_v22, %v15772_v47  ;;  %v12380_v5 = vpop.f32.mrb[16].mxu1 }
 0x347   : > { %v4701_v29 = vmul.f32 %v4656_v2, %v15771_v8  ;;  %v4702_v28 = vmul.f32 %v4656_v2, %v15772_v47  ;;  %v4703_v26 = vmul.f32 %v4660_v34, %v15771_v8  ;;  %v4704_v48 = vmul.f32 %v4660_v34, %v15772_v47 }
 0x348   : > { %v4705_v4 = vmul.f32 %v4664_v61, %v15771_v8  ;;  %v4706_v0 = vmul.f32 %v4664_v61, %v15772_v47  ;;  %v4707_v15 = vmul.f32 %v4668_v10, %v15771_v8  ;;  %v4708_v39 = vmul.f32 %v4668_v10, %v15772_v47 }
 0x349   : > { %v4709_v17 = vmul.f32 %v4672_v31, %v15771_v8  ;;  %v4710_v63 = vmul.f32 %v4672_v31, %v15772_v47  ;;  %v4711_v50 = vmul.f32 %v4676_v18, %v15771_v8  ;;  %v4712_v33 = vmul.f32 %v4676_v18, %v15772_v47 }
 0x34a   : > { %v4713_v53 = vmul.f32 %v4680_v14, %v15771_v8  ;;  %v4714_v22 = vmul.f32 %v4680_v14, %v15772_v47  ;;  %v4715_v55 = vmul.f32 %v4684_v37, %v15771_v8  ;;  %v4716_v2 = vmul.f32 %v4684_v37, %v15772_v47 }
 0x34b   : > { %v4717_v10 = vmul.f32 %v4688_v7, %v15771_v8  ;;  %v4718_v34 = vmul.f32 %v4688_v7, %v15772_v47  ;;  %v12386_v31 = vadd.f32 %v4699_v43, %v12273_v58  ;;  %v12389_v61 = vadd.f32 %v4700_v32, %v12276_v62  ;;  %v12446_v43 = vpop.f32.mrb[16].mxu0 }
 0x34c   : > { %v12392_v18 = vadd.f32 %v4701_v29, %v12279_v16  ;;  %v12395_v14 = vadd.f32 %v4702_v28, %v12282_v23  ;;  %v12398_v59 = vadd.f32 %v4703_v26, %v12285_v42  ;;  %v12401_v37 = vadd.f32 %v4704_v48, %v12288_v56 }
 0x34d   : > { %v12404_v7 = vadd.f32 %v4705_v4, %v12291_v40  ;;  %v12407_v58 = vadd.f32 %v4706_v0, %v12294_v52  ;;  %v12410_v62 = vadd.f32 %v4707_v15, %v12297_v3  ;;  %v12413_v16 = vadd.f32 %v4708_v39, %v12300_v44 }
 0x34e   : > { %v12416_v23 = vadd.f32 %v4709_v17, %v12303_v13  ;;  %v12419_v42 = vadd.f32 %v4710_v63, %v12306_v51  ;;  %v12422_v56 = vadd.f32 %v4711_v50, %v12309_v35  ;;  %v12425_v40 = vadd.f32 %v4712_v33, %v12312_v12 }
 0x34f   : > { %v12428_v52 = vadd.f32 %v4713_v53, %v12315_v1  ;;  %v12431_v3 = vadd.f32 %v4714_v22, %v12318_v45  ;;  %v12434_v44 = vadd.f32 %v4715_v55, %v12321_v41  ;;  %v12437_v13 = vadd.f32 %v4716_v2, %v12324_v11  ;;  %v15773_v2 = vld [vmem:[#allocation38_spill] sm:$0xff] }
 0x350   : > { %v12440_v51 = vadd.f32 %v4717_v10, %v12327_v30  ;;  %v12443_v35 = vadd.f32 %v4718_v34, %v12330_v54  ;;  %v4755_v12 = vrot.slane %v4741_v21, %v15736_v38  ;;  %v4756_v1 = vcombine.high %v12350_v60, %v12350_v60  ;;  %v15774_v34 = vld [vmem:[#allocation39_spill] sm:$0xff] }
 0x351   : > { %v4764_v45 = vrot.slane %v12350_v60, %v15736_v38  ;;  %v4796_v41 = vrot.slane %v11967_v46, %v15736_v38  ;;  %v12459_v21 = vrot.slane %v11969_v27, %v15736_v38  ;;  %v12463_v32 = vrot.slane %v11971_v19, %v15736_v38 }
 0x352   : > { %v4757_v30 = vcombine.high %v4755_v12, %v4755_v12  ;;  %v4771_v54 = vrot.slane %v4755_v12, %v15736_v38  ;;  %v4778_v29 = vrot.slane %v4756_v1, %v15736_v38 }
 0x353   : > { %v4786_v60 = vcombine.high %v4764_v45, %v4764_v45  ;;  %v4797_v28 = vcombine.high %v4796_v41, %v4796_v41  ;;  %v4804_v46 = vrot.slane %v4796_v41, %v15736_v38  ;;  %v4815_v4 = vrot.slane %v4764_v45, %v15750_v36 }
 0x354   : > { %v4785_v26 = vrot.slane %v4757_v30, %v15736_v38  ;;  %v4787_v48 = vcombine.high %v4771_v54, %v4771_v54  ;;  %v4831_v0 = vrot.slane %v4771_v54, %v15750_v36  ;;  %v4788_v15 = vcombine.high %v4778_v29, %v4778_v29 }
 0x355   : > { %v4811_v39 = vrot.slane %v4797_v28, %v15736_v38  ;;  %v4819_v17 = vrot.slane %v4778_v29, %v15750_v36  ;;  %v4823_v19 = vrot.slane %v4786_v60, %v15750_v36  ;;  %v4847_v53 = vrot.slane %v4804_v46, %v15750_v36 }
 0x356   : > { %v4789_v63 = vcombine.high %v4785_v26, %v4785_v26  ;;  %v4835_v50 = vrot.slane %v4785_v26, %v15750_v36  ;;  %v4839_v33 = vrot.slane %v4787_v48, %v15750_v36  ;;  %v4827_v22 = vrot.slane %v4788_v15, %v15750_v36 }
 0x357   : > { %v4851_v55 = vrot.slane %v4811_v39, %v15750_v36  ;;  %v4862_v10 = vmul.f32 %v4815_v4, %v15773_v2  ;;  %v4863_v12 = vmul.f32 %v4815_v4, %v15774_v34  ;;  %v4864_v45 = vmul.f32 %v4819_v17, %v15773_v2 }
 0x358   : > { %v4843_v1 = vrot.slane %v4789_v63, %v15750_v36  ;;  %v4865_v41 = vmul.f32 %v4819_v17, %v15774_v34  ;;  %v4866_v30 = vmul.f32 %v4823_v19, %v15773_v2  ;;  %v4867_v54 = vmul.f32 %v4823_v19, %v15774_v34 }
 0x359   : > { %v4868_v29 = vmul.f32 %v4827_v22, %v15773_v2  ;;  %v4869_v60 = vmul.f32 %v4827_v22, %v15774_v34  ;;  %v4870_v28 = vmul.f32 %v4831_v0, %v15773_v2  ;;  %v4871_v46 = vmul.f32 %v4831_v0, %v15774_v34 }
 0x35a   : > { %v4872_v26 = vmul.f32 %v4835_v50, %v15773_v2  ;;  %v4873_v48 = vmul.f32 %v4835_v50, %v15774_v34  ;;  %v4874_v4 = vmul.f32 %v4839_v33, %v15773_v2  ;;  %v4875_v15 = vmul.f32 %v4839_v33, %v15774_v34 }
 0x35b   : > { %v4876_v39 = vmul.f32 %v4843_v1, %v15773_v2  ;;  %v4877_v17 = vmul.f32 %v4843_v1, %v15774_v34  ;;  %v4878_v19 = vmul.f32 %v4847_v53, %v15773_v2  ;;  %v4879_v63 = vmul.f32 %v4847_v53, %v15774_v34  ;;  %v12514_v53 = vpop.f32.mrb[17].mxu1 }
 0x35c   : > { %v4880_v22 = vmul.f32 %v4851_v55, %v15773_v2  ;;  %v4881_v0 = vmul.f32 %v4851_v55, %v15774_v34  ;;  %v12500_v11 = vadd.f32 %v4862_v10, %v12386_v31  ;;  %v12503_v50 = vadd.f32 %v4863_v12, %v12389_v61  ;;  %15775 = vst [vmem:[#allocation63_spill] sm:$0xff] %v12514_v53  ;;  %v9621_v55 = vpop.f32.mrb[18].mxu1 }
 0x35d   : > { %v12506_v33 = vadd.f32 %v4864_v45, %v12392_v18  ;;  %v12509_v47 = vadd.f32 %v4865_v41, %v12395_v14  ;;  %v12512_v1 = vadd.f32 %v4866_v30, %v12398_v59  ;;  %v12517_v2 = vadd.f32 %v4867_v54, %v12401_v37  ;;  %v15777_v45 = vld [vmem:[#allocation109_spill] sm:$0xff]  ;;  %v12734_v9 = vpop.f32.mrb[19].mxu1 }
 0x35e   : > { %v12520_v31 = vadd.f32 %v4868_v29, %v12404_v7  ;;  %v12523_v61 = vadd.f32 %v4869_v60, %v12407_v58  ;;  %v12526_v18 = vadd.f32 %v4870_v28, %v12410_v62  ;;  %v12529_v14 = vadd.f32 %v4871_v46, %v12413_v16  ;;  %v15779_v55 = vld [vmem:[#allocation93_spill] sm:$0xff]  ;;  %15786 = vst [vmem:[#allocation101_spill] sm:$0xff] %v12734_v9 }
 0x35f   : > { %v12532_v59 = vadd.f32 %v4872_v26, %v12416_v23  ;;  %v12535_v10 = vadd.f32 %v4873_v48, %v12419_v42  ;;  %v12538_v37 = vadd.f32 %v4874_v4, %v12422_v56  ;;  %v12541_v7 = vadd.f32 %v4875_v15, %v12425_v40 }
 0x360   : > { %v12544_v58 = vadd.f32 %v4876_v39, %v12428_v52  ;;  %v12547_v62 = vadd.f32 %v4877_v17, %v12431_v3  ;;  %v12550_v16 = vadd.f32 %v4878_v19, %v12434_v44  ;;  %v12553_v23 = vadd.f32 %v4879_v63, %v12437_v13  ;;  %v15778_v63 = vld [vmem:[#allocation68_spill] sm:$0xff] }
 0x361   : > { %v12556_v42 = vadd.f32 %v4880_v22, %v12440_v51  ;;  %v12559_v56 = vadd.f32 %v4881_v0, %v12443_v35  ;;  %v15776_v40 = vcombine.high %v11969_v27, %v11969_v27  ;;  %v4919_v3 = vcombine.high %v12459_v21, %v12459_v21 }
 0x362   : > { %v4927_v44 = vrot.slane %v12459_v21, %v15736_v38  ;;  %v4960_v13 = vcombine.high %v12463_v32, %v12463_v32  ;;  %v4967_v51 = vrot.slane %v12463_v32, %v15736_v38  ;;  %v5067_v41 = vcombine.high %v15777_v45, %v15777_v45 }
 0x363   : > { %v4918_v52 = vrot.slane %v15776_v40, %v15736_v38  ;;  %v12578_v27 = vrot.slane %v15777_v45, %v15736_v38  ;;  %v4941_v30 = vrot.slane %v4919_v3, %v15736_v38 }
 0x364   : > { %v4949_v54 = vcombine.high %v4927_v44, %v4927_v44  ;;  %v4974_v21 = vrot.slane %v4960_v13, %v15736_v38  ;;  %v4978_v29 = vrot.slane %v4927_v44, %v15750_v36  ;;  %v5010_v46 = vrot.slane %v4967_v51, %v15750_v36 }
 0x365   : > { %v4920_v12 = vcombine.high %v4918_v52, %v4918_v52  ;;  %v4934_v35 = vrot.slane %v4918_v52, %v15736_v38  ;;  %v4951_v26 = vcombine.high %v4941_v30, %v4941_v30  ;;  %v4982_v48 = vrot.slane %v4941_v30, %v15750_v36 }
 0x366   : > { %v4986_v4 = vrot.slane %v4949_v54, %v15750_v36  ;;  %v5014_v15 = vrot.slane %v4974_v21, %v15750_v36  ;;  %v5025_v22 = vmul.f32 %v4978_v29, %v15778_v63  ;;  %v5026_v40 = vmul.f32 %v4978_v29, %v15779_v55  ;;  %v12604_v21 = vpop.f32.mrb[17].mxu0 }
 0x367   : > { %v4948_v60 = vrot.slane %v4920_v12, %v15736_v38  ;;  %v4950_v32 = vcombine.high %v4934_v35, %v4934_v35  ;;  %v4994_v28 = vrot.slane %v4934_v35, %v15750_v36  ;;  %v4990_v0 = vrot.slane %v4951_v26, %v15750_v36  ;;  %15780 = vst [vmem:[#allocation100_spill] sm:$0xff] %v12604_v21 }
 0x368   : > { %v5027_v52 = vmul.f32 %v4982_v48, %v15778_v63  ;;  %v5028_v3 = vmul.f32 %v4982_v48, %v15779_v55  ;;  %v5029_v13 = vmul.f32 %v4986_v4, %v15778_v63  ;;  %v5030_v51 = vmul.f32 %v4986_v4, %v15779_v55  ;;  %v9661_v48 = vpop.f32.mrb[18].mxu0 }
 0x369   : > { %v4952_v39 = vcombine.high %v4948_v60, %v4948_v60  ;;  %v4998_v17 = vrot.slane %v4948_v60, %v15750_v36  ;;  %v5002_v19 = vrot.slane %v4950_v32, %v15750_v36  ;;  %v5033_v12 = vmul.f32 %v4994_v28, %v15778_v63 }
 0x36a   : > { %v5031_v35 = vmul.f32 %v4990_v0, %v15778_v63  ;;  %v5032_v45 = vmul.f32 %v4990_v0, %v15779_v55  ;;  %v5034_v30 = vmul.f32 %v4994_v28, %v15779_v55  ;;  %v5042_v0 = vmul.f32 %v5010_v46, %v15779_v55 }
 0x36b   : > { %v5006_v44 = vrot.slane %v4952_v39, %v15750_v36  ;;  %v5035_v54 = vmul.f32 %v4998_v17, %v15778_v63  ;;  %v5036_v29 = vmul.f32 %v4998_v17, %v15779_v55  ;;  %v5037_v60 = vmul.f32 %v5002_v19, %v15778_v63 }
 0x36c   : > { %v5038_v32 = vmul.f32 %v5002_v19, %v15779_v55  ;;  %v5041_v39 = vmul.f32 %v5010_v46, %v15778_v63  ;;  %v5043_v28 = vmul.f32 %v5014_v15, %v15778_v63  ;;  %v5044_v34 = vmul.f32 %v5014_v15, %v15779_v55 }
 0x36d   : > { %v5039_v26 = vmul.f32 %v5006_v44, %v15778_v63  ;;  %v5040_v4 = vmul.f32 %v5006_v44, %v15779_v55  ;;  %v12616_v8 = vadd.f32 %v5025_v22, %v12500_v11  ;;  %v12619_v17 = vadd.f32 %v5026_v40, %v12503_v50  ;;  %v15782_v40 = vld [vmem:[#allocation98_spill] sm:$0xff] }
 0x36e   : > { %v12622_v19 = vadd.f32 %v5027_v52, %v12506_v33  ;;  %v12625_v48 = vadd.f32 %v5028_v3, %v12509_v47  ;;  %v12628_v44 = vadd.f32 %v5029_v13, %v12512_v1  ;;  %v12631_v46 = vadd.f32 %v5030_v51, %v12517_v2 }
 0x36f   : > { %v12634_v15 = vadd.f32 %v5031_v35, %v12520_v31  ;;  %v12637_v11 = vadd.f32 %v5032_v45, %v12523_v61  ;;  %v12640_v50 = vadd.f32 %v5033_v12, %v12526_v18  ;;  %v12643_v33 = vadd.f32 %v5034_v30, %v12529_v14 }
 0x370   : > { %v12646_v47 = vadd.f32 %v5035_v54, %v12532_v59  ;;  %v12649_v1 = vadd.f32 %v5036_v29, %v12535_v10  ;;  %v12652_v2 = vadd.f32 %v5037_v60, %v12538_v37  ;;  %v12655_v31 = vadd.f32 %v5038_v32, %v12541_v7 }
 0x371   : > { %v12658_v61 = vadd.f32 %v5039_v26, %v12544_v58  ;;  %v12661_v18 = vadd.f32 %v5040_v4, %v12547_v62  ;;  %v12664_v14 = vadd.f32 %v5041_v39, %v12550_v16  ;;  %v12667_v59 = vadd.f32 %v5042_v0, %v12553_v23  ;;  %v15781_v16 = vld [vmem:[#allocation7_spill] sm:$0xff] }
 0x372   : > { %v12670_v10 = vadd.f32 %v5043_v28, %v12556_v42  ;;  %v12673_v37 = vadd.f32 %v5044_v34, %v12559_v56  ;;  %v5081_v7 = vrot.slane %v5067_v41, %v15736_v38  ;;  %v5082_v58 = vcombine.high %v12578_v27, %v12578_v27  ;;  %v15783_v34 = vld [vmem:[#allocation99_spill] sm:$0xff] }
 0x373   : > { %v5090_v62 = vrot.slane %v12578_v27, %v15736_v38  ;;  %v5122_v22 = vrot.slane %v15781_v16, %v15736_v38  ;;  %v5361_v23 = vcombine.high %v15782_v40, %v15782_v40  ;;  %v12686_v42 = vrot.slane %v15782_v40, %v15736_v38 }
 0x374   : > { %v5083_v41 = vcombine.high %v5081_v7, %v5081_v7  ;;  %v5097_v52 = vrot.slane %v5081_v7, %v15736_v38  ;;  %v5104_v3 = vrot.slane %v5082_v58, %v15736_v38 }
 0x375   : > { %v5112_v13 = vcombine.high %v5090_v62, %v5090_v62  ;;  %v5123_v27 = vcombine.high %v5122_v22, %v5122_v22  ;;  %v5130_v51 = vrot.slane %v5122_v22, %v15736_v38  ;;  %v5141_v12 = vrot.slane %v5090_v62, %v15750_v36  ;;  %v15784_v62 = vld [vmem:[#allocation94_spill] sm:$0xff]  ;;  %v15785_v22 = vld [vmem:[#allocation97_spill] sm:$0xff] }
 0x376   : > { %v12695_v35 = vrot.slane %v5361_v23, %v15736_v38  ;;  %v5111_v45 = vrot.slane %v5083_v41, %v15736_v38  ;;  %v5113_v30 = vcombine.high %v5097_v52, %v5097_v52  ;;  %v5114_v54 = vcombine.high %v5104_v3, %v5104_v3 }
 0x377   : > { %v5145_v29 = vrot.slane %v5104_v3, %v15750_v36  ;;  %v5137_v60 = vrot.slane %v5123_v27, %v15736_v38  ;;  %v5149_v32 = vrot.slane %v5112_v13, %v15750_v36  ;;  %v5157_v26 = vrot.slane %v5097_v52, %v15750_v36 }
 0x378   : > { %v5173_v4 = vrot.slane %v5130_v51, %v15750_v36  ;;  %v5115_v39 = vcombine.high %v5111_v45, %v5111_v45  ;;  %v5153_v0 = vrot.slane %v5114_v54, %v15750_v36  ;;  %v5161_v28 = vrot.slane %v5111_v45, %v15750_v36 }
 0x379   : > { %v5165_v7 = vrot.slane %v5113_v30, %v15750_v36  ;;  %v5177_v58 = vrot.slane %v5137_v60, %v15750_v36  ;;  %v5188_v16 = vmul.f32 %v5141_v12, %v15784_v62  ;;  %v5189_v40 = vmul.f32 %v5141_v12, %v15785_v22 }
 0x37a   : > { %v5190_v23 = vmul.f32 %v5145_v29, %v15784_v62  ;;  %v5169_v41 = vrot.slane %v5115_v39, %v15750_v36  ;;  %v5191_v52 = vmul.f32 %v5145_v29, %v15785_v22  ;;  %v5192_v3 = vmul.f32 %v5149_v32, %v15784_v62 }
 0x37b   : > { %v5193_v13 = vmul.f32 %v5149_v32, %v15785_v22  ;;  %v5194_v27 = vmul.f32 %v5153_v0, %v15784_v62  ;;  %v5195_v51 = vmul.f32 %v5153_v0, %v15785_v22  ;;  %v5196_v45 = vmul.f32 %v5157_v26, %v15784_v62 }
 0x37c   : > { %v5197_v30 = vmul.f32 %v5157_v26, %v15785_v22  ;;  %v5198_v12 = vmul.f32 %v5161_v28, %v15784_v62  ;;  %v5199_v54 = vmul.f32 %v5161_v28, %v15785_v22  ;;  %v5200_v60 = vmul.f32 %v5165_v7, %v15784_v62 }
 0x37d   : > { %v5201_v29 = vmul.f32 %v5165_v7, %v15785_v22  ;;  %v5202_v39 = vmul.f32 %v5169_v41, %v15784_v62  ;;  %v5203_v32 = vmul.f32 %v5169_v41, %v15785_v22  ;;  %v5204_v56 = vmul.f32 %v5173_v4, %v15784_v62 }
 0x37e   : > { %v5205_v0 = vmul.f32 %v5173_v4, %v15785_v22  ;;  %v5206_v55 = vmul.f32 %v5177_v58, %v15784_v62  ;;  %v5207_v26 = vmul.f32 %v5177_v58, %v15785_v22  ;;  %v5208_v63 = vadd.f32 %v5188_v16, %v12616_v8 }
 0x37f   : > { %v5209_v28 = vadd.f32 %v5189_v40, %v12619_v17  ;;  %v5210_v7 = vadd.f32 %v5190_v23, %v12622_v19  ;;  %v5211_v20 = vadd.f32 %v5191_v52, %v12625_v48  ;;  %v5212_v41 = vadd.f32 %v5192_v3, %v12628_v44 }
 0x380   : > { %v5213_v49 = vadd.f32 %v5193_v13, %v12631_v46  ;;  %v5214_v4 = vadd.f32 %v5194_v27, %v12634_v15  ;;  %v5215_v62 = vadd.f32 %v5195_v51, %v12637_v11  ;;  %v5216_v58 = vadd.f32 %v5196_v45, %v12640_v50  ;;  %5228 = vst [vmem:[%s12745_s24] sm:$0xff] %v5208_v63  ;;  %v15791_v51 = vld [vmem:[#allocation10_spill] sm:$0xff] }
 0x381   : > { %v5217_v8 = vadd.f32 %v5197_v30, %v12643_v33  ;;  %5229 = vst [vmem:[%s12745_s24 + $0x8] sm:$0x3] %v5209_v28  ;;  %v5218_v17 = vadd.f32 %v5198_v12, %v12646_v47  ;;  %v5219_v19 = vadd.f32 %v5199_v54, %v12649_v1  ;;  %v5220_v48 = vadd.f32 %v5200_v60, %v12652_v2  ;;  %v15792_v30 = vld [vmem:[#allocation11_spill] sm:$0xff] }
 0x382   : > { %v5221_v44 = vadd.f32 %v5201_v29, %v12655_v31  ;;  %5230 = vst [vmem:[%s12745_s24 + $0x10] sm:$0xff] %v5210_v7  ;;  %5231 = vst [vmem:[%s12745_s24 + $0x18] sm:$0x3] %v5211_v20  ;;  %v5222_v63 = vadd.f32 %v5202_v39, %v12658_v61  ;;  %v5223_v46 = vadd.f32 %v5203_v32, %v12661_v18 }
 0x383   : > { %5232 = vst [vmem:[%s12745_s24 + $0x20] sm:$0xff] %v5212_v41  ;;  %5233 = vst [vmem:[%s12745_s24 + $0x28] sm:$0x3] %v5213_v49  ;;  %v5224_v15 = vadd.f32 %v5204_v56, %v12664_v14  ;;  %v5225_v11 = vadd.f32 %v5205_v0, %v12667_v59  ;;  %v5226_v20 = vadd.f32 %v5206_v55, %v12670_v10  ;;  %v15788_v14 = vld [vmem:[#allocation44_spill] sm:$0xff]  ;;  %v15789_v59 = vld [vmem:[#allocation67_spill] sm:$0xff]  ;;  %v12799_v56 = vpop.permute.xlu1 %571 }
 0x384   : > { %5234 = vst [vmem:[%s12745_s24 + $0x30] sm:$0xff] %v5214_v4  ;;  %5235 = vst [vmem:[%s12745_s24 + $0x38] sm:$0x3] %v5215_v62  ;;  %v5227_v49 = vadd.f32 %v5207_v26, %v12673_v37  ;;  %v5376_v50 = vcombine.high %v12686_v42, %v12686_v42  ;;  %v5377_v33 = vcombine.high %v12695_v35, %v12695_v35  ;;  %v15790_v37 = vld [vmem:[#allocation8_spill] sm:$0xff] }
 0x385   : > { %5236 = vst [vmem:[%s12745_s24 + $0x40] sm:$0xff] %v5216_v58  ;;  %5237 = vst [vmem:[%s12745_s24 + $0x48] sm:$0x3] %v5217_v8  ;;  %v5384_v55 = vrot.slane %v12686_v42, %v15736_v38  ;;  %v5391_v47 = vrot.slane %v12695_v35, %v15736_v38  ;;  %v7293_v1 = vrot.slane %v15783_v34, %v15736_v38 }
 0x386   : > { %5238 = vst [vmem:[%s12745_s24 + $0x50] sm:$0xff] %v5218_v17  ;;  %5239 = vst [vmem:[%s12745_s24 + $0x58] sm:$0x3] %v5219_v19  ;;  %v15787_v2 = vcombine.high %v15783_v34, %v15783_v34  ;;  %v5398_v61 = vrot.slane %v5376_v50, %v15736_v38  ;;  %v5405_v18 = vrot.slane %v5377_v33, %v15736_v38 }
 0x387   : > { %5240 = vst [vmem:[%s12745_s24 + $0x60] sm:$0xff] %v5220_v48  ;;  %5241 = vst [vmem:[%s12745_s24 + $0x68] sm:$0x3] %v5221_v44  ;;  %v753_v10 = vadd.f32 %v15789_v59, %v15788_v14  ;;  %v12797_v42 = vadd.f32 %v15790_v37, %v15788_v14  ;;  %v5406_v35 = vcombine.high %v5384_v55, %v5384_v55  ;;  %v577_v8 = vpop.permute.xlu1 %576  ;;  %v15795_v37 = vld [vmem:[#allocation13_spill] sm:$0xff] }
 0x388   : > { %5242 = vst [vmem:[%s12745_s24 + $0x70] sm:$0xff] %v5222_v63  ;;  %5243 = vst [vmem:[%s12745_s24 + $0x78] sm:$0x3] %v5223_v46  ;;  %v7300_v31 = vrot.slane %v15787_v2, %v15736_v38  ;;  %v5407_v62 = vcombine.high %v5391_v47, %v5391_v47  ;;  %v5412_v34 = vrot.slane %v5384_v55, %v15750_v36  ;;  %v15793_v2 = vld [vmem:[#allocation9_spill] sm:$0xff] }
 0x389   : > { %5244 = vst [vmem:[%s12745_s24 + $0x80] sm:$0xff] %v5224_v15  ;;  %5245 = vst [vmem:[%s12745_s24 + $0x88] sm:$0x3] %v5225_v11  ;;  %v5428_v16 = vrot.slane %v5391_v47, %v15750_v36  ;;  %v5408_v40 = vcombine.high %v5398_v61, %v5398_v61  ;;  %v5416_v23 = vrot.slane %v5398_v61, %v15750_v36  ;;  %v797_v46 = vmax.f32 %v753_v10, 0.0 }
 0x38a   : > { %5246 = vst [vmem:[%s12745_s24 + $0x90] sm:$0xff] %v5226_v20  ;;  %5247 = vst [vmem:[%s12745_s24 + $0x98] sm:$0x3] %v5227_v49  ;;  %v5432_v52 = vrot.slane %v5405_v18, %v15750_v36  ;;  %v7301_v3 = vcombine.high %v7293_v1, %v7293_v1  ;;  %v5420_v13 = vrot.slane %v5406_v35, %v15750_v36  ;;  %v1208_v15 = vmax.f32 %v12797_v42, 0.0 }
 0x38b   : > { %v5436_v27 = vrot.slane %v5407_v62, %v15750_v36  ;;  %v12808_v45 = vmul.f32 %v5412_v34, %v15791_v51  ;;  %v12811_v12 = vmul.f32 %v5412_v34, %v15792_v30  ;;  %v5424_v54 = vrot.slane %v5408_v40, %v15750_v36 }
 0x38c   : > { %v12815_v60 = vmul.f32 %v5416_v23, %v15791_v51  ;;  %v12818_v29 = vmul.f32 %v5416_v23, %v15792_v30  ;;  %v12821_v39 = vmul.f32 %v5428_v16, %v15791_v51  ;;  %v12824_v32 = vmul.f32 %v5420_v13, %v15791_v51 }
 0x38d   : > { %v12827_v0 = vmul.f32 %v5420_v13, %v15792_v30  ;;  %v12830_v26 = vmul.f32 %v5428_v16, %v15792_v30  ;;  %v12833_v28 = vmul.f32 %v5432_v52, %v15791_v51  ;;  %v12836_v7 = vmul.f32 %v5424_v54, %v15791_v51 }
 0x38e   : > { %v12839_v41 = vmul.f32 %v5424_v54, %v15792_v30  ;;  %v12842_v4 = vmul.f32 %v5432_v52, %v15792_v30  ;;  %v12845_v58 = vmul.f32 %v5436_v27, %v15791_v51  ;;  %v12848_v17 = vmul.f32 %v5436_v27, %v15792_v30 }
 0x38f   : > { %v7302_v19 = vcombine.high %v7300_v31, %v7300_v31  ;;  %v7309_v48 = vrot.slane %v7293_v1, %v15736_v38  ;;  %v7316_v44 = vrot.slane %v7300_v31, %v15736_v38  ;;  %v7323_v63 = vrot.slane %v7301_v3, %v15736_v38 }
 0x390   : > { %v768_v11 = vadd.f32 %v12097_v24, %v577_v8  ;;  %v818_v31 = vmul.f32 %v15793_v2, %v797_v46  ;;  %v15794_v24 = vld [vmem:[#allocation12_spill] sm:$0xff]  ;;  %v12909_v46 = vadd.f32 %v12139_v57, %v577_v8 }
 0x391   : > { %v7330_v20 = vrot.slane %v7302_v19, %v15736_v38  ;;  %v7331_v49 = vcombine.high %v7309_v48, %v7309_v48  ;;  %v7332_v50 = vcombine.high %v7316_v44, %v7316_v44  ;;  %v7337_v33 = vrot.slane %v7309_v48, %v15750_v36  ;;  %v15796_v48 = vld [vmem:[#allocation56_spill] sm:$0xff] }
 0x392   : > { %v7333_v55 = vcombine.high %v7323_v63, %v7323_v63  ;;  %v7341_v47 = vrot.slane %v7323_v63, %v15750_v36  ;;  %v7353_v1 = vrot.slane %v7316_v44, %v15750_v36  ;;  %v5249_v54 = vcombine.high %v818_v31, %v818_v31 }
 0x393   : > { %v7345_v61 = vrot.slane %v7331_v49, %v15750_v36  ;;  %v7357_v18 = vrot.slane %v7330_v20, %v15750_v36  ;;  %v7361_v14 = vrot.slane %v7332_v50, %v15750_v36  ;;  %v12864_v59 = vmul.f32 %v7337_v33, %v15794_v24 }
 0x394   : > { %v7349_v10 = vrot.slane %v7333_v55, %v15750_v36  ;;  %v12868_v42 = vmul.f32 %v7337_v33, %v15795_v37  ;;  %v12871_v35 = vmul.f32 %v7341_v47, %v15794_v24  ;;  %v12874_v62 = vmul.f32 %v7341_v47, %v15795_v37 }
 0x395   : > { %v12877_v34 = vmul.f32 %v7345_v61, %v15794_v24  ;;  %v12880_v16 = vmul.f32 %v7345_v61, %v15795_v37  ;;  %v12883_v40 = vmul.f32 %v7353_v1, %v15794_v24  ;;  %v12886_v23 = vmul.f32 %v7353_v1, %v15795_v37 }
 0x396   : > { %v12889_v52 = vmul.f32 %v7349_v10, %v15794_v24  ;;  %v12892_v3 = vmul.f32 %v7349_v10, %v15795_v37  ;;  %v12895_v13 = vmul.f32 %v7357_v18, %v15794_v24  ;;  %v12898_v27 = vmul.f32 %v7357_v18, %v15795_v37 }
 0x397   : > { %v12901_v51 = vmul.f32 %v7361_v14, %v15794_v24  ;;  %v12904_v30 = vmul.f32 %v7361_v14, %v15795_v37  ;;  %v5256_v19 = vrot.slane %v818_v31, %v15736_v38  ;;  %v1229_v44 = vmul.f32 %v15796_v48, %v1208_v15 }
 0x398   : > { %v800_v63 = vmax.f32 %v768_v11, 0.0  ;;  %v12913_v20 = vadd.f32 %v12232_v6, %v12799_v56  ;;  %v5263_v49 = vrot.slane %v5249_v54, %v15736_v38  ;;  %v12919_v55 = vadd.f32 %v12268_v25, %v12799_v56 }
 0x399   : > { %v5264_v50 = vcombine.high %v5256_v19, %v5256_v19  ;;  %v5272_v33 = vrot.slane %v5256_v19, %v15736_v38  ;;  %v7174_v47 = vcombine.high %v1229_v44, %v1229_v44  ;;  %v7181_v15 = vrot.slane %v1229_v44, %v15736_v38  ;;  %v15797_v44 = vld [vmem:[#allocation14_spill] sm:$0xff] }
 0x39a   : > { %v12923_v11 = vmul.f32 %v15793_v2, %v800_v63  ;;  %v5265_v8 = vcombine.high %v5263_v49, %v5263_v49  ;;  %v5279_v6 = vrot.slane %v5263_v49, %v15736_v38  ;;  %v15798_v49 = vld [vmem:[#allocation15_spill] sm:$0xff] }
 0x39b   : > { %v5286_v1 = vrot.slane %v5264_v50, %v15736_v38  ;;  %v5294_v31 = vcombine.high %v5272_v33, %v5272_v33  ;;  %v5300_v61 = vrot.slane %v5272_v33, %v15750_v36  ;;  %v7188_v18 = vrot.slane %v7174_v47, %v15736_v38 }
 0x39c   : > { %v7189_v25 = vcombine.high %v7181_v15, %v7181_v15  ;;  %v7197_v56 = vrot.slane %v7181_v15, %v15736_v38  ;;  %v5293_v14 = vrot.slane %v5265_v8, %v15736_v38  ;;  %v5295_v24 = vcombine.high %v5279_v6, %v5279_v6 }
 0x39d   : > { %v5296_v10 = vcombine.high %v5286_v1, %v5286_v1  ;;  %v5304_v37 = vrot.slane %v5286_v1, %v15750_v36  ;;  %v5308_v54 = vrot.slane %v5294_v31, %v15750_v36  ;;  %v5316_v19 = vrot.slane %v5279_v6, %v15750_v36 }
 0x39e   : > { %v5332_v63 = vmul.f32 %v5300_v61, %v15797_v44  ;;  %v5333_v50 = vmul.f32 %v5300_v61, %v15798_v49  ;;  %v5320_v47 = vrot.slane %v5293_v14, %v15750_v36  ;;  %v5324_v15 = vrot.slane %v5295_v24, %v15750_v36 }
 0x39f   : > { %v5312_v33 = vrot.slane %v5296_v10, %v15750_v36  ;;  %v5334_v8 = vmul.f32 %v5304_v37, %v15797_v44  ;;  %v5335_v57 = vmul.f32 %v5304_v37, %v15798_v49  ;;  %v5336_v1 = vmul.f32 %v5308_v54, %v15797_v44 }
 0x3a0   : > { %v5337_v31 = vmul.f32 %v5308_v54, %v15798_v49  ;;  %v5340_v6 = vmul.f32 %v5316_v19, %v15797_v44  ;;  %v5341_v10 = vmul.f32 %v5316_v19, %v15798_v49  ;;  %v5342_v14 = vmul.f32 %v5320_v47, %v15797_v44 }
 0x3a1   : > { %v5338_v22 = vmul.f32 %v5312_v33, %v15797_v44  ;;  %v5339_v61 = vmul.f32 %v5312_v33, %v15798_v49  ;;  %v5343_v24 = vmul.f32 %v5320_v47, %v15798_v49  ;;  %v5344_v9 = vmul.f32 %v5324_v15, %v15797_v44 }
 0x3a2   : > { %v5345_v37 = vmul.f32 %v5324_v15, %v15798_v49  ;;  %v12953_v21 = vadd.f32 %v12808_v45, %v5332_v63  ;;  %v12956_v54 = vadd.f32 %v12811_v12, %v5333_v50  ;;  %v12959_v53 = vadd.f32 %v12815_v60, %v5334_v8  ;;  %v15800_v15 = vld [vmem:[#allocation46_spill] sm:$0xff] }
 0x3a3   : > { %v12962_v33 = vadd.f32 %v12818_v29, %v5335_v57  ;;  %v12965_v19 = vadd.f32 %v12824_v32, %v5336_v1  ;;  %v12968_v47 = vadd.f32 %v12827_v0, %v5337_v31  ;;  %v12971_v44 = vadd.f32 %v12836_v7, %v5338_v22 }
 0x3a4   : > { %v12974_v45 = vadd.f32 %v12839_v41, %v5339_v61  ;;  %v12977_v12 = vadd.f32 %v12821_v39, %v5340_v6  ;;  %v12980_v60 = vadd.f32 %v12830_v26, %v5341_v10  ;;  %v12983_v29 = vadd.f32 %v12833_v28, %v5342_v14  ;;  %v13011_v6 = vpop.permute.xlu1 %581 }
 0x3a5   : > { %v12986_v32 = vadd.f32 %v12842_v4, %v5343_v24  ;;  %v12989_v0 = vadd.f32 %v12845_v58, %v5344_v9  ;;  %v12992_v22 = vadd.f32 %v12848_v17, %v5345_v37  ;;  %v7190_v7 = vcombine.high %v7188_v18, %v7188_v18  ;;  %15801 = vst [vmem:[#allocation102_spill] sm:$0xff] %v13011_v6 }
 0x3a6   : > { %v7204_v41 = vrot.slane %v7188_v18, %v15736_v38  ;;  %v7211_v39 = vrot.slane %v7189_v25, %v15736_v38  ;;  %v7219_v57 = vcombine.high %v7197_v56, %v7197_v56  ;;  %v7225_v26 = vrot.slane %v7197_v56, %v15750_v36  ;;  %v15799_v25 = vld [vmem:[#allocation45_spill] sm:$0xff] }
 0x3a7   : > { %v5585_v28 = vcombine.high %v12923_v11, %v12923_v11  ;;  %v5592_v4 = vrot.slane %v12923_v11, %v15736_v38  ;;  %v7218_v9 = vrot.slane %v7190_v7, %v15736_v38 }
 0x3a8   : > { %v7220_v58 = vcombine.high %v7204_v41, %v7204_v41  ;;  %v7221_v63 = vcombine.high %v7211_v39, %v7211_v39  ;;  %v7229_v17 = vrot.slane %v7211_v39, %v15750_v36  ;;  %v7233_v49 = vrot.slane %v7219_v57, %v15750_v36 }
 0x3a9   : > { %v7241_v18 = vrot.slane %v7204_v41, %v15750_v36  ;;  %v7257_v50 = vmul.f32 %v7225_v26, %v15799_v25  ;;  %v7258_v56 = vmul.f32 %v7225_v26, %v15800_v15  ;;  %v7245_v1 = vrot.slane %v7218_v9, %v15750_v36 }
 0x3aa   : > { %v7237_v8 = vrot.slane %v7221_v63, %v15750_v36  ;;  %v7249_v11 = vrot.slane %v7220_v58, %v15750_v36  ;;  %v7259_v31 = vmul.f32 %v7229_v17, %v15799_v25  ;;  %v7260_v61 = vmul.f32 %v7229_v17, %v15800_v15 }
 0x3ab   : > { %v7261_v10 = vmul.f32 %v7233_v49, %v15799_v25  ;;  %v7262_v14 = vmul.f32 %v7233_v49, %v15800_v15  ;;  %v7265_v24 = vmul.f32 %v7241_v18, %v15799_v25  ;;  %v7266_v41 = vmul.f32 %v7241_v18, %v15800_v15 }
 0x3ac   : > { %v7263_v37 = vmul.f32 %v7237_v8, %v15799_v25  ;;  %v7264_v7 = vmul.f32 %v7237_v8, %v15800_v15  ;;  %v7267_v39 = vmul.f32 %v7245_v1, %v15799_v25  ;;  %v7268_v57 = vmul.f32 %v7245_v1, %v15800_v15 }
 0x3ad   : > { %v7269_v26 = vmul.f32 %v7249_v11, %v15799_v25  ;;  %v7270_v9 = vmul.f32 %v7249_v11, %v15800_v15  ;;  %v13025_v58 = vadd.f32 %v12864_v59, %v7257_v50  ;;  %v13028_v63 = vadd.f32 %v12868_v42, %v7258_v56 }
 0x3ae   : > { %v13031_v17 = vadd.f32 %v12871_v35, %v7259_v31  ;;  %v13034_v49 = vadd.f32 %v12874_v62, %v7260_v61  ;;  %v13037_v18 = vadd.f32 %v12877_v34, %v7261_v10  ;;  %v13040_v8 = vadd.f32 %v12880_v16, %v7262_v14 }
 0x3af   : > { %v13043_v25 = vadd.f32 %v12889_v52, %v7263_v37  ;;  %v13046_v59 = vadd.f32 %v12892_v3, %v7264_v7  ;;  %v13049_v42 = vadd.f32 %v12883_v40, %v7265_v24  ;;  %v13052_v35 = vadd.f32 %v12886_v23, %v7266_v41  ;;  %v13063_v52 = vpop.permute.xlu1 %586  ;;  %v15803_v37 = vld [vmem:[#allocation47_spill] sm:$0xff]  ;;  %v15804_v41 = vld [vmem:[#allocation48_spill] sm:$0xff] }
 0x3b0   : > { %v13055_v62 = vadd.f32 %v12895_v13, %v7267_v39  ;;  %v13058_v34 = vadd.f32 %v12898_v27, %v7268_v57  ;;  %v13061_v16 = vadd.f32 %v12901_v51, %v7269_v26  ;;  %v13066_v3 = vadd.f32 %v12904_v30, %v7270_v9 }
 0x3b1   : > { %v5599_v40 = vrot.slane %v5585_v28, %v15736_v38  ;;  %v5600_v50 = vcombine.high %v5592_v4, %v5592_v4  ;;  %v5608_v23 = vrot.slane %v5592_v4, %v15736_v38  ;;  %v15802_v15 = vmax.f32 %v12909_v46, 0.0 }
 0x3b2   : > { %v799_v27 = vmax.f32 %v12913_v20, 0.0  ;;  %v1210_v56 = vmax.f32 %v12919_v55, 0.0  ;;  %v13077_v51 = vadd.f32 %v12380_v5, %v13063_v52 }
 0x3b3   : > { %v1232_v13 = vmul.f32 %v15796_v48, %v15802_v15  ;;  %v5601_v1 = vcombine.high %v5599_v40, %v5599_v40  ;;  %v5615_v30 = vrot.slane %v5599_v40, %v15736_v38  ;;  %v5622_v28 = vrot.slane %v5600_v50, %v15736_v38 }
 0x3b4   : > { %v5630_v11 = vcombine.high %v5608_v23, %v5608_v23  ;;  %v5636_v4 = vrot.slane %v5608_v23, %v15750_v36  ;;  %v820_v61 = vmul.f32 %v15793_v2, %v799_v27 }
 0x3b5   : > { %v7510_v31 = vcombine.high %v1232_v13, %v1232_v13  ;;  %v7517_v46 = vrot.slane %v1232_v13, %v15736_v38  ;;  %v5629_v20 = vrot.slane %v5601_v1, %v15736_v38  ;;  %v5631_v55 = vcombine.high %v5615_v30, %v5615_v30 }
 0x3b6   : > { %v5632_v10 = vcombine.high %v5622_v28, %v5622_v28  ;;  %v5640_v5 = vrot.slane %v5622_v28, %v15750_v36  ;;  %v5644_v14 = vrot.slane %v5630_v11, %v15750_v36  ;;  %v5652_v24 = vrot.slane %v5615_v30, %v15750_v36 }
 0x3b7   : > { %v13089_v7 = vmul.f32 %v5636_v4, %v15803_v37  ;;  %v13092_v39 = vmul.f32 %v5636_v4, %v15804_v41  ;;  %v5656_v26 = vrot.slane %v5629_v20, %v15750_v36  ;;  %v5660_v9 = vrot.slane %v5631_v55, %v15750_v36 }
 0x3b8   : > { %v5648_v57 = vrot.slane %v5632_v10, %v15750_v36  ;;  %v13098_v40 = vmul.f32 %v5640_v5, %v15803_v37  ;;  %v13101_v50 = vmul.f32 %v5640_v5, %v15804_v41  ;;  %v13104_v23 = vmul.f32 %v5644_v14, %v15803_v37 }
 0x3b9   : > { %v13107_v15 = vmul.f32 %v5644_v14, %v15804_v41  ;;  %v13110_v13 = vmul.f32 %v5652_v24, %v15803_v37  ;;  %v13119_v30 = vmul.f32 %v5652_v24, %v15804_v41  ;;  %v13122_v28 = vmul.f32 %v5656_v26, %v15803_v37 }
 0x3ba   : > { %15805 = vst [vmem:[#allocation92_spill] sm:$0xff] %v13104_v23  ;;  %v13113_v27 = vmul.f32 %v5648_v57, %v15803_v37  ;;  %v13116_v1 = vmul.f32 %v5648_v57, %v15804_v41  ;;  %v13125_v11 = vmul.f32 %v5656_v26, %v15804_v41  ;;  %v13128_v4 = vmul.f32 %v5660_v9, %v15803_v37 }
 0x3bb   : > { %15806 = vst [vmem:[#allocation70_spill] sm:$0xff] %v13107_v15  ;;  %15807 = vst [vmem:[#allocation71_spill] sm:$0xff] %v13110_v13  ;;  %v13131_v20 = vmul.f32 %v5660_v9, %v15804_v41  ;;  %v7524_v55 = vrot.slane %v7510_v31, %v15736_v38  ;;  %v7525_v10 = vcombine.high %v7517_v46, %v7517_v46  ;;  %v15815_v13 = vld [vmem:[#allocation49_spill] sm:$0xff] }
 0x3bc   : > { %15808 = vst [vmem:[#allocation5_spill] sm:$0xff] %v13113_v27  ;;  %15809 = vst [vmem:[#allocation6_spill] sm:$0xff] %v13116_v1  ;;  %v7533_v5 = vrot.slane %v7517_v46, %v15736_v38  ;;  %v5473_v14 = vcombine.high %v820_v61, %v820_v61  ;;  %v5480_v24 = vrot.slane %v820_v61, %v15736_v38  ;;  %v15817_v1 = vld [vmem:[#allocation50_spill] sm:$0xff] }
 0x3bd   : > { %15810 = vst [vmem:[#allocation76_spill] sm:$0xff] %v13119_v30  ;;  %15811 = vst [vmem:[#allocation103_spill] sm:$0xff] %v13122_v28  ;;  %v7526_v57 = vcombine.high %v7524_v55, %v7524_v55  ;;  %v7540_v28 = vrot.slane %v7524_v55, %v15736_v38  ;;  %v1231_v26 = vmul.f32 %v15796_v48, %v1210_v56 }
 0x3be   : > { %15812 = vst [vmem:[#allocation77_spill] sm:$0xff] %v13125_v11  ;;  %15813 = vst [vmem:[#allocation104_spill] sm:$0xff] %v13128_v4  ;;  %v802_v11 = vmax.f32 %v13077_v51, 0.0  ;;  %v7547_v37 = vrot.slane %v7525_v10, %v15736_v38  ;;  %v7555_v4 = vcombine.high %v7533_v5, %v7533_v5  ;;  %v7561_v41 = vrot.slane %v7533_v5, %v15750_v36 }
 0x3bf   : > { %15814 = vst [vmem:[#allocation78_spill] sm:$0xff] %v13131_v20  ;;  %v5487_v31 = vrot.slane %v5473_v14, %v15736_v38  ;;  %v7554_v9 = vrot.slane %v7526_v57, %v15736_v38  ;;  %v7556_v46 = vcombine.high %v7540_v28, %v7540_v28  ;;  %v7577_v20 = vrot.slane %v7540_v28, %v15750_v36 }
 0x3c0   : > { %v5488_v61 = vcombine.high %v5480_v24, %v5480_v24  ;;  %v7557_v30 = vcombine.high %v7547_v37, %v7547_v37  ;;  %v7565_v55 = vrot.slane %v7547_v37, %v15750_v36  ;;  %v7569_v56 = vrot.slane %v7555_v4, %v15750_v36 }
 0x3c1   : > { %v13147_v51 = vmul.f32 %v7561_v41, %v15815_v13  ;;  %v7581_v10 = vrot.slane %v7554_v9, %v15750_v36  ;;  %v7585_v5 = vrot.slane %v7556_v46, %v15750_v36  ;;  %v13152_v14 = vmul.f32 %v7561_v41, %v15817_v1 }
 0x3c2   : > { %v13155_v57 = vmul.f32 %v7577_v20, %v15815_v13  ;;  %v7573_v28 = vrot.slane %v7557_v30, %v15750_v36  ;;  %v13159_v27 = vmul.f32 %v7565_v55, %v15815_v13  ;;  %v13162_v4 = vmul.f32 %v7565_v55, %v15817_v1 }
 0x3c3   : > { %15816 = vst [vmem:[#allocation105_spill] sm:$0xff] %v13147_v51  ;;  %15818 = vst [vmem:[#allocation79_spill] sm:$0xff] %v13152_v14  ;;  %v13165_v37 = vmul.f32 %v7569_v56, %v15815_v13  ;;  %v13168_v9 = vmul.f32 %v7569_v56, %v15817_v1  ;;  %v13171_v41 = vmul.f32 %v7577_v20, %v15817_v1 }
 0x3c4   : > { %15819 = vst [vmem:[#allocation106_spill] sm:$0xff] %v13155_v57  ;;  %15820 = vst [vmem:[#allocation80_spill] sm:$0xff] %v13159_v27  ;;  %v13174_v46 = vmul.f32 %v7581_v10, %v15815_v13  ;;  %v13177_v30 = vmul.f32 %v7581_v10, %v15817_v1  ;;  %v13180_v57 = vmul.f32 %v7573_v28, %v15815_v13 }
 0x3c5   : > { %15821 = vst [vmem:[#allocation107_spill] sm:$0xff] %v13162_v4  ;;  %15822 = vst [vmem:[#allocation69_spill] sm:$0xff] %v13165_v37  ;;  %v13183_v55 = vmul.f32 %v7573_v28, %v15817_v1  ;;  %v13186_v37 = vmul.f32 %v7585_v5, %v15815_v13  ;;  %v13189_v56 = vmul.f32 %v7585_v5, %v15817_v1  ;;  %v15832_v4 = vld [vmem:[#allocation52_spill] sm:$0xff] }
 0x3c6   : > { %15823 = vst [vmem:[#allocation108_spill] sm:$0xff] %v13168_v9  ;;  %15824 = vst [vmem:[#allocation81_spill] sm:$0xff] %v13171_v41  ;;  %v5489_v20 = vcombine.high %v5487_v31, %v5487_v31  ;;  %v5496_v41 = vrot.slane %v5480_v24, %v15736_v38  ;;  %v5510_v10 = vrot.slane %v5488_v61, %v15736_v38 }
 0x3c7   : > { %15825 = vst [vmem:[#allocation110_spill] sm:$0xff] %v13174_v46  ;;  %15826 = vst [vmem:[#allocation82_spill] sm:$0xff] %v13177_v30  ;;  %v5503_v46 = vrot.slane %v5487_v31, %v15736_v38  ;;  %v7398_v30 = vcombine.high %v1231_v26, %v1231_v26  ;;  %v7405_v9 = vrot.slane %v1231_v26, %v15736_v38 }
 0x3c8   : > { %15827 = vst [vmem:[#allocation111_spill] sm:$0xff] %v13180_v57  ;;  %15828 = vst [vmem:[#allocation83_spill] sm:$0xff] %v13183_v55  ;;  %v823_v57 = vmul.f32 %v15793_v2, %v802_v11  ;;  %v13198_v28 = vadd.f32 %v12446_v43, %v13063_v52  ;;  %v5517_v13 = vrot.slane %v5489_v20, %v15736_v38  ;;  %v15831_v20 = vld [vmem:[#allocation51_spill] sm:$0xff] }
 0x3c9   : > { %15829 = vst [vmem:[#allocation74_spill] sm:$0xff] %v13186_v37  ;;  %15830 = vst [vmem:[#allocation84_spill] sm:$0xff] %v13189_v56  ;;  %v5518_v1 = vcombine.high %v5496_v41, %v5496_v41  ;;  %v5519_v5 = vcombine.high %v5503_v46, %v5503_v46  ;;  %v5520_v56 = vcombine.high %v5510_v10, %v5510_v10 }
 0x3ca   : > { %v5524_v24 = vrot.slane %v5496_v41, %v15750_v36  ;;  %v5528_v31 = vrot.slane %v5510_v10, %v15750_v36  ;;  %v5540_v61 = vrot.slane %v5503_v46, %v15750_v36  ;;  %v7412_v37 = vrot.slane %v7398_v30, %v15736_v38 }
 0x3cb   : > { %v5532_v26 = vrot.slane %v5518_v1, %v15750_v36  ;;  %v5536_v11 = vrot.slane %v5520_v56, %v15750_v36  ;;  %v5544_v43 = vrot.slane %v5517_v13, %v15750_v36  ;;  %v5548_v52 = vrot.slane %v5519_v5, %v15750_v36 }
 0x3cc   : > { %v5556_v55 = vmul.f32 %v5524_v24, %v15831_v20  ;;  %v5557_v27 = vmul.f32 %v5524_v24, %v15832_v4  ;;  %v5558_v41 = vmul.f32 %v5528_v31, %v15831_v20  ;;  %v5559_v10 = vmul.f32 %v5528_v31, %v15832_v4 }
 0x3cd   : > { %v5560_v46 = vmul.f32 %v5532_v26, %v15831_v20  ;;  %v5561_v30 = vmul.f32 %v5532_v26, %v15832_v4  ;;  %v5562_v1 = vmul.f32 %v5536_v11, %v15831_v20  ;;  %v5563_v56 = vmul.f32 %v5536_v11, %v15832_v4 }
 0x3ce   : > { %v5564_v13 = vmul.f32 %v5540_v61, %v15831_v20  ;;  %v5565_v5 = vmul.f32 %v5540_v61, %v15832_v4  ;;  %v5566_v14 = vmul.f32 %v5544_v43, %v15831_v20  ;;  %v5567_v24 = vmul.f32 %v5544_v43, %v15832_v4 }
 0x3cf   : > { %v5568_v51 = vmul.f32 %v5548_v52, %v15831_v20  ;;  %v5569_v31 = vmul.f32 %v5548_v52, %v15832_v4  ;;  %v13224_v15 = vadd.f32 %v5556_v55, %v12953_v21  ;;  %v13227_v26 = vadd.f32 %v5557_v27, %v12956_v54 }
 0x3d0   : > { %v13230_v11 = vadd.f32 %v5558_v41, %v12959_v53  ;;  %v13233_v23 = vadd.f32 %v5559_v10, %v12962_v33  ;;  %v13236_v61 = vadd.f32 %v5560_v46, %v12965_v19  ;;  %v13239_v43 = vadd.f32 %v5561_v30, %v12968_v47 }
 0x3d1   : > { %v13242_v4 = vadd.f32 %v5562_v1, %v12971_v44  ;;  %v13245_v21 = vadd.f32 %v5563_v56, %v12974_v45  ;;  %v13248_v54 = vadd.f32 %v5564_v13, %v12977_v12  ;;  %v13251_v53 = vadd.f32 %v5565_v5, %v12980_v60  ;;  %v15834_v56 = vld [vmem:[#allocation53_spill] sm:$0xff]  ;;  %v15835_v5 = vld [vmem:[#allocation54_spill] sm:$0xff] }
 0x3d2   : > { %v13254_v33 = vadd.f32 %v5566_v14, %v12983_v29  ;;  %v13257_v19 = vadd.f32 %v5567_v24, %v12986_v32  ;;  %v13260_v47 = vadd.f32 %v5568_v51, %v12989_v0  ;;  %v13263_v44 = vadd.f32 %v5569_v31, %v12992_v22  ;;  %v15833_v32 = vld [vmem:[#allocation63_spill] sm:$0xff] }
 0x3d3   : > { %v7413_v45 = vcombine.high %v7405_v9, %v7405_v9  ;;  %v7414_v27 = vcombine.high %v7412_v37, %v7412_v37  ;;  %v7421_v12 = vrot.slane %v7405_v9, %v15736_v38  ;;  %v7428_v55 = vrot.slane %v7412_v37, %v15736_v38 }
 0x3d4   : > { %v5809_v60 = vcombine.high %v823_v57, %v823_v57  ;;  %v5816_v52 = vrot.slane %v823_v57, %v15736_v38  ;;  %v1213_v29 = vmax.f32 %v13198_v28, 0.0  ;;  %v13271_v14 = vadd.f32 %v15833_v32, %v13011_v6 }
 0x3d5   : > { %v7435_v0 = vrot.slane %v7413_v45, %v15736_v38  ;;  %v7442_v22 = vrot.slane %v7414_v27, %v15736_v38  ;;  %v7443_v51 = vcombine.high %v7421_v12, %v7421_v12  ;;  %v7444_v20 = vcombine.high %v7428_v55, %v7428_v55 }
 0x3d6   : > { %v7449_v41 = vrot.slane %v7421_v12, %v15750_v36  ;;  %v7465_v9 = vrot.slane %v7428_v55, %v15750_v36  ;;  %v5823_v37 = vrot.slane %v5809_v60, %v15736_v38  ;;  %v5824_v10 = vcombine.high %v5816_v52, %v5816_v52 }
 0x3d7   : > { %v7445_v57 = vcombine.high %v7435_v0, %v7435_v0  ;;  %v7453_v28 = vrot.slane %v7435_v0, %v15750_v36  ;;  %v7457_v46 = vrot.slane %v7443_v51, %v15750_v36  ;;  %v7469_v30 = vrot.slane %v7442_v22, %v15750_v36 }
 0x3d8   : > { %v7473_v1 = vrot.slane %v7444_v20, %v15750_v36  ;;  %v7481_v13 = vmul.f32 %v7449_v41, %v15834_v56  ;;  %v7482_v24 = vmul.f32 %v7449_v41, %v15835_v5  ;;  %v7489_v31 = vmul.f32 %v7465_v9, %v15834_v56 }
 0x3d9   : > { %v7461_v45 = vrot.slane %v7445_v57, %v15750_v36  ;;  %v7483_v27 = vmul.f32 %v7453_v28, %v15834_v56  ;;  %v7484_v12 = vmul.f32 %v7453_v28, %v15835_v5  ;;  %v7485_v55 = vmul.f32 %v7457_v46, %v15834_v56 }
 0x3da   : > { %v7486_v60 = vmul.f32 %v7457_v46, %v15835_v5  ;;  %v7490_v32 = vmul.f32 %v7465_v9, %v15835_v5  ;;  %v7491_v0 = vmul.f32 %v7469_v30, %v15834_v56  ;;  %v7492_v22 = vmul.f32 %v7469_v30, %v15835_v5 }
 0x3db   : > { %v7487_v51 = vmul.f32 %v7461_v45, %v15834_v56  ;;  %v7488_v20 = vmul.f32 %v7461_v45, %v15835_v5  ;;  %v7493_v41 = vmul.f32 %v7473_v1, %v15834_v56  ;;  %v7494_v57 = vmul.f32 %v7473_v1, %v15835_v5 }
 0x3dc   : > { %v13298_v28 = vadd.f32 %v7481_v13, %v13025_v58  ;;  %v13301_v6 = vadd.f32 %v7482_v24, %v13028_v63  ;;  %v13304_v9 = vadd.f32 %v7483_v27, %v13031_v17  ;;  %v13307_v46 = vadd.f32 %v7484_v12, %v13034_v49  ;;  %v15837_v12 = vld [vmem:[#allocation58_spill] sm:$0xff] }
 0x3dd   : > { %v13310_v30 = vadd.f32 %v7485_v55, %v13037_v18  ;;  %v13313_v45 = vadd.f32 %v7486_v60, %v13040_v8  ;;  %v13316_v1 = vadd.f32 %v7487_v51, %v13043_v25  ;;  %v13319_v58 = vadd.f32 %v7488_v20, %v13046_v59 }
 0x3de   : > { %v13322_v63 = vadd.f32 %v7489_v31, %v13049_v42  ;;  %v13325_v17 = vadd.f32 %v7490_v32, %v13052_v35  ;;  %v13328_v49 = vadd.f32 %v7491_v0, %v13055_v62  ;;  %v13331_v18 = vadd.f32 %v7492_v22, %v13058_v34 }
 0x3df   : > { %v13334_v8 = vadd.f32 %v7493_v41, %v13061_v16  ;;  %v13337_v25 = vadd.f32 %v7494_v57, %v13066_v3  ;;  %v5825_v59 = vcombine.high %v5823_v37, %v5823_v37  ;;  %v5832_v56 = vrot.slane %v5816_v52, %v15736_v38 }
 0x3e0   : > { %v5839_v42 = vrot.slane %v5823_v37, %v15736_v38  ;;  %v5846_v35 = vrot.slane %v5824_v10, %v15736_v38  ;;  %v1234_v13 = vmul.f32 %v15796_v48, %v1213_v29  ;;  %v801_v62 = vmax.f32 %v13271_v14, 0.0  ;;  %v15836_v14 = vld [vmem:[#allocation57_spill] sm:$0xff] }
 0x3e1   : > { %v5853_v34 = vrot.slane %v5825_v59, %v15736_v38  ;;  %v5854_v5 = vcombine.high %v5832_v56, %v5832_v56  ;;  %v5860_v16 = vrot.slane %v5832_v56, %v15750_v36  ;;  %v13348_v3 = vadd.f32 %v13089_v7, %v13224_v15 }
 0x3e2   : > { %v5855_v24 = vcombine.high %v5839_v42, %v5839_v42  ;;  %v5856_v31 = vcombine.high %v5846_v35, %v5846_v35  ;;  %v5864_v52 = vrot.slane %v5846_v35, %v15750_v36  ;;  %v5876_v37 = vrot.slane %v5839_v42, %v15750_v36 }
 0x3e3   : > { %v5868_v10 = vrot.slane %v5854_v5, %v15750_v36  ;;  %v5880_v29 = vrot.slane %v5853_v34, %v15750_v36  ;;  %v13355_v27 = vmul.f32 %v5860_v16, %v15836_v14  ;;  %v13358_v55 = vmul.f32 %v5860_v16, %v15837_v12 }
 0x3e4   : > { %v5872_v60 = vrot.slane %v5856_v31, %v15750_v36  ;;  %v5884_v7 = vrot.slane %v5855_v24, %v15750_v36  ;;  %v13363_v15 = vmul.f32 %v5864_v52, %v15836_v14  ;;  %v13366_v32 = vmul.f32 %v5864_v52, %v15837_v12 }
 0x3e5   : > { %v13369_v0 = vmul.f32 %v5868_v10, %v15836_v14  ;;  %v13372_v22 = vmul.f32 %v5868_v10, %v15837_v12  ;;  %v13375_v51 = vmul.f32 %v5876_v37, %v15836_v14  ;;  %v13378_v20 = vmul.f32 %v5876_v37, %v15837_v12 }
 0x3e6   : > { %v13381_v41 = vmul.f32 %v5872_v60, %v15836_v14  ;;  %v13384_v57 = vmul.f32 %v5872_v60, %v15837_v12  ;;  %v13387_v59 = vmul.f32 %v5880_v29, %v15836_v14  ;;  %v13390_v56 = vmul.f32 %v5880_v29, %v15837_v12 }
 0x3e7   : > { %v13393_v42 = vmul.f32 %v5884_v7, %v15836_v14  ;;  %v13396_v35 = vmul.f32 %v5884_v7, %v15837_v12  ;;  %v7734_v34 = vcombine.high %v1234_v13, %v1234_v13  ;;  %v7741_v5 = vrot.slane %v1234_v13, %v15736_v38  ;;  %v15842_v13 = vld [vmem:[#allocation92_spill] sm:$0xff]  ;;  %v15846_v14 = vld [vmem:[#allocation71_spill] sm:$0xff] }
 0x3e8   : > { %15838 = vst [vmem:[#allocation75_spill] sm:$0xff] %v13387_v59  ;;  %15839 = vst [vmem:[#allocation91_spill] sm:$0xff] %v13390_v56  ;;  %v822_v16 = vmul.f32 %v15793_v2, %v801_v62  ;;  %v13402_v24 = vadd.f32 %v13092_v39, %v13227_v26  ;;  %v13406_v31 = vadd.f32 %v13098_v40, %v13230_v11  ;;  %v15843_v39 = vld [vmem:[#allocation70_spill] sm:$0xff]  ;;  %v15844_v40 = vld [vmem:[#allocation5_spill] sm:$0xff] }
 0x3e9   : > { %15840 = vst [vmem:[#allocation40_spill] sm:$0xff] %v13393_v42  ;;  %15841 = vst [vmem:[#allocation41_spill] sm:$0xff] %v13396_v35  ;;  %v13410_v52 = vadd.f32 %v13101_v50, %v13233_v23  ;;  %v7748_v37 = vrot.slane %v7734_v34, %v15736_v38  ;;  %v7749_v10 = vcombine.high %v7741_v5, %v7741_v5  ;;  %v15845_v50 = vld [vmem:[#allocation6_spill] sm:$0xff] }
 0x3ea   : > { %v7757_v29 = vrot.slane %v7741_v5, %v15736_v38  ;;  %v13416_v62 = vadd.f32 %v15842_v13, %v13236_v61  ;;  %v13420_v26 = vadd.f32 %v15843_v39, %v13239_v43  ;;  %v13424_v11 = vadd.f32 %v15844_v40, %v13242_v4  ;;  %v15847_v5 = vld [vmem:[#allocation76_spill] sm:$0xff]  ;;  %v15848_v13 = vld [vmem:[#allocation103_spill] sm:$0xff]  ;;  %v15849_v39 = vld [vmem:[#allocation77_spill] sm:$0xff] }
 0x3eb   : > { %v13428_v23 = vadd.f32 %v15845_v50, %v13245_v21  ;;  %v13432_v12 = vadd.f32 %v15846_v14, %v13248_v54  ;;  %v7750_v60 = vcombine.high %v7748_v37, %v7748_v37  ;;  %v7764_v61 = vrot.slane %v7748_v37, %v15736_v38  ;;  %v13451_v14 = vpop.f32.mrb[19].mxu0 }
 0x3ec   : > { %v7771_v7 = vrot.slane %v7749_v10, %v15736_v38  ;;  %v7779_v34 = vcombine.high %v7757_v29, %v7757_v29  ;;  %v7785_v43 = vrot.slane %v7757_v29, %v15750_v36  ;;  %v13439_v4 = vadd.f32 %v15847_v5, %v13251_v53  ;;  %15850 = vst [vmem:[#allocation73_spill] sm:$0xff] %v13451_v14  ;;  %v15851_v5 = vld [vmem:[#allocation59_spill] sm:$0xff] }
 0x3ed   : > { %v13443_v21 = vadd.f32 %v15848_v13, %v13254_v33  ;;  %v13447_v54 = vadd.f32 %v15849_v39, %v13257_v19  ;;  %v7778_v40 = vrot.slane %v7750_v60, %v15736_v38  ;;  %v7780_v37 = vcombine.high %v7764_v61, %v7764_v61  ;;  %v15853_v33 = vld [vmem:[#allocation60_spill] sm:$0xff] }
 0x3ee   : > { %v7781_v50 = vcombine.high %v7771_v7, %v7771_v7  ;;  %v7789_v10 = vrot.slane %v7771_v7, %v15750_v36  ;;  %v7793_v29 = vrot.slane %v7779_v34, %v15750_v36  ;;  %v7801_v53 = vrot.slane %v7764_v61, %v15750_v36 }
 0x3ef   : > { %v13456_v35 = vmul.f32 %v7785_v43, %v15851_v5  ;;  %v13459_v13 = vmul.f32 %v7785_v43, %v15853_v33  ;;  %v7805_v60 = vrot.slane %v7778_v40, %v15750_v36  ;;  %v7809_v39 = vrot.slane %v7780_v37, %v15750_v36 }
 0x3f0   : > { %v7797_v19 = vrot.slane %v7781_v50, %v15750_v36  ;;  %v13465_v7 = vmul.f32 %v7789_v10, %v15851_v5  ;;  %v13468_v14 = vmul.f32 %v7789_v10, %v15853_v33  ;;  %v13471_v61 = vmul.f32 %v7793_v29, %v15851_v5 }
 0x3f1   : > { %15852 = vst [vmem:[#allocation42_spill] sm:$0xff] %v13456_v35  ;;  %15854 = vst [vmem:[#allocation64_spill] sm:$0xff] %v13459_v13  ;;  %v13474_v34 = vmul.f32 %v7793_v29, %v15853_v33  ;;  %v13477_v43 = vmul.f32 %v7801_v53, %v15851_v5  ;;  %v13486_v37 = vmul.f32 %v7801_v53, %v15853_v33  ;;  %v15884_v13 = vld [vmem:[#allocation61_spill] sm:$0xff] }
 0x3f2   : > { %15855 = vst [vmem:[#allocation72_spill] sm:$0xff] %v13465_v7  ;;  %15856 = vst [vmem:[#allocation43_spill] sm:$0xff] %v13468_v14  ;;  %v13480_v50 = vmul.f32 %v7797_v19, %v15851_v5  ;;  %v13483_v40 = vmul.f32 %v7797_v19, %v15853_v33  ;;  %v13489_v10 = vmul.f32 %v7805_v60, %v15851_v5  ;;  %v15868_v19 = vld [vmem:[#allocation78_spill] sm:$0xff] }
 0x3f3   : > { %15857 = vst [vmem:[#allocation85_spill] sm:$0xff] %v13471_v61  ;;  %15858 = vst [vmem:[#allocation86_spill] sm:$0xff] %v13474_v34  ;;  %v13492_v61 = vmul.f32 %v7805_v60, %v15853_v33  ;;  %v13495_v29 = vmul.f32 %v7809_v39, %v15851_v5  ;;  %v5697_v53 = vcombine.high %v822_v16, %v822_v16  ;;  %v15869_v14 = vld [vmem:[#allocation102_spill] sm:$0xff]  ;;  %v15871_v60 = vld [vmem:[#allocation105_spill] sm:$0xff] }
 0x3f4   : > { %15859 = vst [vmem:[#allocation87_spill] sm:$0xff] %v13477_v43  ;;  %15860 = vst [vmem:[#allocation90_spill] sm:$0xff] %v13480_v50  ;;  %v13498_v43 = vmul.f32 %v7809_v39, %v15853_v33  ;;  %v15867_v50 = vld [vmem:[#allocation104_spill] sm:$0xff]  ;;  %v15872_v5 = vld [vmem:[#allocation79_spill] sm:$0xff] }
 0x3f5   : > { %15861 = vst [vmem:[#allocation109_spill] sm:$0xff] %v13483_v40  ;;  %15862 = vst [vmem:[#allocation7_spill] sm:$0xff] %v13486_v37  ;;  %v5694_v34 = vadd.f32 %v15867_v50, %v13260_v47  ;;  %v5695_v40 = vadd.f32 %v15868_v19, %v13263_v44  ;;  %v5704_v37 = vrot.slane %v822_v16, %v15736_v38  ;;  %v15873_v39 = vld [vmem:[#allocation80_spill] sm:$0xff]  ;;  %v15874_v44 = vld [vmem:[#allocation107_spill] sm:$0xff] }
 0x3f6   : > { %15863 = vst [vmem:[#allocation98_spill] sm:$0xff] %v13489_v10  ;;  %15864 = vst [vmem:[#allocation99_spill] sm:$0xff] %v13492_v61  ;;  %v15870_v10 = vld [vmem:[#allocation100_spill] sm:$0xff]  ;;  %v13509_v61 = vadd.f32 %v15871_v60, %v13298_v28  ;;  %v13513_v33 = vadd.f32 %v15872_v5, %v13301_v6  ;;  %v13517_v47 = vadd.f32 %v15873_v39, %v13304_v9  ;;  %v15875_v28 = vld [vmem:[#allocation69_spill] sm:$0xff] }
 0x3f7   : > { %15865 = vst [vmem:[#allocation44_spill] sm:$0xff] %v13495_v29  ;;  %15866 = vst [vmem:[#allocation67_spill] sm:$0xff] %v13498_v43  ;;  %v1184_v7 = vadd.f32 %v15870_v10, %v15869_v14  ;;  %v13521_v50 = vadd.f32 %v15874_v44, %v13307_v46  ;;  %v5711_v16 = vrot.slane %v5697_v53, %v15736_v38  ;;  %v15876_v6 = vld [vmem:[#allocation108_spill] sm:$0xff]  ;;  %v15877_v9 = vld [vmem:[#allocation111_spill] sm:$0xff] }
 0x3f8   : > { %v5712_v19 = vcombine.high %v5704_v37, %v5704_v37  ;;  %v5720_v14 = vrot.slane %v5704_v37, %v15736_v38  ;;  %v13527_v60 = vadd.f32 %v15875_v28, %v13310_v30  ;;  %v13531_v5 = vadd.f32 %v15876_v6, %v13313_v45  ;;  %v15878_v46 = vld [vmem:[#allocation83_spill] sm:$0xff]  ;;  %v15880_v45 = vld [vmem:[#allocation106_spill] sm:$0xff] }
 0x3f9   : > { %v1212_v10 = vmax.f32 %v1184_v7, 0.0  ;;  %v13535_v39 = vadd.f32 %v15877_v9, %v13316_v1  ;;  %v13539_v44 = vadd.f32 %v15878_v46, %v13319_v58  ;;  %v5713_v53 = vcombine.high %v5711_v16, %v5711_v16  ;;  %v15882_v1 = vld [vmem:[#allocation81_spill] sm:$0xff] }
 0x3fa   : > { %v5727_v37 = vrot.slane %v5711_v16, %v15736_v38  ;;  %v5734_v7 = vrot.slane %v5712_v19, %v15736_v38  ;;  %v5742_v43 = vcombine.high %v5720_v14, %v5720_v14  ;;  %v5748_v30 = vrot.slane %v5720_v14, %v15750_v36 }
 0x3fb   : > { %15879 = vst [vmem:[#allocation8_spill] sm:$0xff] %v13539_v44  ;;  %v1233_v28 = vmul.f32 %v15796_v48, %v1212_v10  ;;  %v13547_v6 = vadd.f32 %v15880_v45, %v13322_v63  ;;  %v13551_v9 = vadd.f32 %v15882_v1, %v13325_v17  ;;  %v5741_v58 = vrot.slane %v5713_v53, %v15736_v38  ;;  %v15885_v48 = vld [vmem:[#allocation62_spill] sm:$0xff] }
 0x3fc   : > { %v5743_v46 = vcombine.high %v5727_v37, %v5727_v37  ;;  %v5744_v29 = vcombine.high %v5734_v7, %v5734_v7  ;;  %v5752_v16 = vrot.slane %v5734_v7, %v15750_v36  ;;  %v5756_v19 = vrot.slane %v5742_v43, %v15750_v36 }
 0x3fd   : > { %15881 = vst [vmem:[#allocation10_spill] sm:$0xff] %v13547_v6  ;;  %15883 = vst [vmem:[#allocation11_spill] sm:$0xff] %v13551_v9  ;;  %v5764_v14 = vrot.slane %v5727_v37, %v15750_v36  ;;  %v5780_v10 = vmul.f32 %v5748_v30, %v15884_v13  ;;  %v5781_v35 = vmul.f32 %v5748_v30, %v15885_v48 }
 0x3fe   : > { %v5760_v63 = vrot.slane %v5744_v29, %v15750_v36  ;;  %v5768_v45 = vrot.slane %v5741_v58, %v15750_v36  ;;  %v5772_v17 = vrot.slane %v5743_v46, %v15750_v36  ;;  %v5782_v53 = vmul.f32 %v5752_v16, %v15884_v13 }
 0x3ff   : > { %v5783_v1 = vmul.f32 %v5752_v16, %v15885_v48  ;;  %v5784_v7 = vmul.f32 %v5756_v19, %v15884_v13  ;;  %v5785_v43 = vmul.f32 %v5756_v19, %v15885_v48  ;;  %v5788_v37 = vmul.f32 %v5764_v14, %v15884_v13 }
 0x400   : > { %v5786_v42 = vmul.f32 %v5760_v63, %v15884_v13  ;;  %v5787_v30 = vmul.f32 %v5760_v63, %v15885_v48  ;;  %v5789_v29 = vmul.f32 %v5764_v14, %v15885_v48  ;;  %v5790_v58 = vmul.f32 %v5768_v45, %v15884_v13 }
 0x401   : > { %v5791_v46 = vmul.f32 %v5768_v45, %v15885_v48  ;;  %v5792_v56 = vmul.f32 %v5772_v17, %v15884_v13  ;;  %v5793_v16 = vmul.f32 %v5772_v17, %v15885_v48  ;;  %v5794_v59 = vadd.f32 %v5780_v10, %v13348_v3 }
 0x402   : > { %v5795_v19 = vadd.f32 %v5781_v35, %v13402_v24  ;;  %v5796_v9 = vadd.f32 %v5782_v53, %v13406_v31  ;;  %v5797_v6 = vadd.f32 %v5783_v1, %v13410_v52  ;;  %v5798_v63 = vadd.f32 %v5784_v7, %v13416_v62  ;;  %v13592_v31 = vpop.permute.xlu1 %591 }
 0x403   : > { %v5799_v14 = vadd.f32 %v5785_v43, %v13420_v26  ;;  %v5800_v44 = vadd.f32 %v5786_v42, %v13424_v11  ;;  %v5801_v45 = vadd.f32 %v5787_v30, %v13428_v23  ;;  %v5802_v13 = vadd.f32 %v5788_v37, %v13432_v12  ;;  %v15886_v42 = vld [vmem:[#allocation110_spill] sm:$0xff] }
 0x404   : > { %v5803_v48 = vadd.f32 %v5789_v29, %v13439_v4  ;;  %v13585_v3 = vadd.f32 %v5790_v58, %v13443_v21  ;;  %v13588_v35 = vadd.f32 %v5791_v46, %v13447_v54  ;;  %v13590_v24 = vadd.f32 %v5792_v56, %v5694_v34  ;;  %v15887_v26 = vld [vmem:[#allocation82_spill] sm:$0xff]  ;;  %v15889_v4 = vld [vmem:[#allocation84_spill] sm:$0xff]  ;;  %v15890_v34 = vld [vmem:[#allocation101_spill] sm:$0xff] }
 0x405   : > { %v13594_v52 = vadd.f32 %v5793_v16, %v5695_v40  ;;  %v7617_v62 = vadd.f32 %v15886_v42, %v13328_v49  ;;  %v7618_v11 = vadd.f32 %v15887_v26, %v13331_v18  ;;  %v15888_v23 = vld [vmem:[#allocation74_spill] sm:$0xff]  ;;  %v7620_v21 = vadd.f32 %v15889_v4, %v13337_v25  ;;  %v15891_v58 = vld [vmem:[#allocation65_spill] sm:$0xff] }
 0x406   : > { %v7619_v12 = vadd.f32 %v15888_v23, %v13334_v8  ;;  %v7622_v54 = vcombine.high %v1233_v28, %v1233_v28  ;;  %v7629_v56 = vrot.slane %v1233_v28, %v15736_v38  ;;  %v783_v10 = vadd.f32 %v15890_v34, %v13592_v31  ;;  %v15892_v16 = vld [vmem:[#allocation66_spill] sm:$0xff] }
 0x407   : > { %v13608_v40 = vadd.f32 %v13355_v27, %v5794_v59  ;;  %v13611_v49 = vadd.f32 %v13358_v55, %v5795_v19  ;;  %v13614_v18 = vadd.f32 %v13363_v15, %v5796_v9  ;;  %v13617_v8 = vadd.f32 %v13366_v32, %v5797_v6 }
 0x408   : > { %v7636_v25 = vrot.slane %v7622_v54, %v15736_v38  ;;  %v7637_v17 = vcombine.high %v7629_v56, %v7629_v56  ;;  %v7645_v28 = vrot.slane %v7629_v56, %v15736_v38  ;;  %v803_v53 = vmax.f32 %v783_v10, 0.0 }
 0x409   : > { %v13622_v1 = vadd.f32 %v13369_v0, %v5798_v63  ;;  %v13625_v27 = vadd.f32 %v13372_v22, %v5799_v14  ;;  %v13628_v55 = vadd.f32 %v13381_v41, %v5800_v44  ;;  %v13631_v15 = vadd.f32 %v13384_v57, %v5801_v45 }
 0x40a   : > { %v7638_v32 = vcombine.high %v7636_v25, %v7636_v25  ;;  %v7652_v59 = vrot.slane %v7636_v25, %v15736_v38  ;;  %v7659_v6 = vrot.slane %v7637_v17, %v15736_v38  ;;  %v7667_v9 = vcombine.high %v7645_v28, %v7645_v28 }
 0x40b   : > { %v7673_v7 = vrot.slane %v7645_v28, %v15750_v36  ;;  %v824_v0 = vmul.f32 %v15793_v2, %v803_v53  ;;  %v13638_v43 = vadd.f32 %v13375_v51, %v5802_v13  ;;  %v13641_v22 = vadd.f32 %v13378_v20, %v5803_v48 }
 0x40c   : > { %v7666_v41 = vrot.slane %v7638_v32, %v15736_v38  ;;  %v7668_v57 = vcombine.high %v7652_v59, %v7652_v59  ;;  %v7669_v44 = vcombine.high %v7659_v6, %v7659_v6  ;;  %v7677_v37 = vrot.slane %v7659_v6, %v15750_v36  ;;  %v15893_v6 = vld [vmem:[#allocation8_spill] sm:$0xff] }
 0x40d   : > { %v7681_v30 = vrot.slane %v7667_v9, %v15750_v36  ;;  %v7689_v29 = vrot.slane %v7652_v59, %v15750_v36  ;;  %v7705_v46 = vmul.f32 %v7673_v7, %v15891_v58  ;;  %v7706_v2 = vmul.f32 %v7673_v7, %v15892_v16  ;;  %v15894_v7 = vld [vmem:[#allocation10_spill] sm:$0xff] }
 0x40e   : > { %v7685_v51 = vrot.slane %v7669_v44, %v15750_v36  ;;  %v7693_v19 = vrot.slane %v7666_v41, %v15750_v36  ;;  %v7697_v20 = vrot.slane %v7668_v57, %v15750_v36  ;;  %v7707_v63 = vmul.f32 %v7677_v37, %v15891_v58  ;;  %v15895_v57 = vld [vmem:[#allocation11_spill] sm:$0xff] }
 0x40f   : > { %v7708_v14 = vmul.f32 %v7677_v37, %v15892_v16  ;;  %v7709_v45 = vmul.f32 %v7681_v30, %v15891_v58  ;;  %v7710_v13 = vmul.f32 %v7681_v30, %v15892_v16  ;;  %v7713_v48 = vmul.f32 %v7689_v29, %v15891_v58  ;;  %v15902_v30 = vld [vmem:[#allocation40_spill] sm:$0xff] }
 0x410   : > { %v7711_v42 = vmul.f32 %v7685_v51, %v15891_v58  ;;  %v7712_v26 = vmul.f32 %v7685_v51, %v15892_v16  ;;  %v7714_v23 = vmul.f32 %v7689_v29, %v15892_v16  ;;  %v7715_v4 = vmul.f32 %v7693_v19, %v15891_v58  ;;  %v15907_v51 = vld [vmem:[#allocation64_spill] sm:$0xff] }
 0x411   : > { %v7716_v54 = vmul.f32 %v7693_v19, %v15892_v16  ;;  %v7717_v56 = vmul.f32 %v7697_v20, %v15891_v58  ;;  %v7718_v34 = vmul.f32 %v7697_v20, %v15892_v16  ;;  %v7719_v10 = vadd.f32 %v7705_v46, %v13509_v61  ;;  %v15903_v58 = vld [vmem:[#allocation41_spill] sm:$0xff]  ;;  %v15909_v19 = vld [vmem:[#allocation72_spill] sm:$0xff]  ;;  %v15911_v20 = vld [vmem:[#allocation43_spill] sm:$0xff] }
 0x412   : > { %v7720_v25 = vadd.f32 %v7706_v2, %v13513_v33  ;;  %v7721_v17 = vadd.f32 %v7707_v63, %v13517_v47  ;;  %v7722_v28 = vadd.f32 %v7708_v14, %v13521_v50  ;;  %v7723_v53 = vadd.f32 %v7709_v45, %v13527_v60  ;;  %v15900_v50 = vld [vmem:[#allocation75_spill] sm:$0xff]  ;;  %v15913_v45 = vld [vmem:[#allocation85_spill] sm:$0xff] }
 0x413   : > { %v7724_v32 = vadd.f32 %v7710_v13, %v13531_v5  ;;  %v7725_v59 = vadd.f32 %v7711_v42, %v13535_v39  ;;  %v7726_v9 = vadd.f32 %v7712_v26, %v15893_v6  ;;  %v7727_v41 = vadd.f32 %v7713_v48, %v15894_v7  ;;  %v15901_v5 = vld [vmem:[#allocation91_spill] sm:$0xff]  ;;  %v15915_v13 = vld [vmem:[#allocation86_spill] sm:$0xff] }
 0x414   : > { %v7728_v44 = vadd.f32 %v7714_v23, %v15895_v57  ;;  %v13674_v37 = vadd.f32 %v7715_v4, %v7617_v62  ;;  %v13676_v61 = vadd.f32 %v7716_v54, %v7618_v11  ;;  %v13678_v33 = vadd.f32 %v7717_v56, %v7619_v12  ;;  %v15904_v12 = vld [vmem:[#allocation73_spill] sm:$0xff]  ;;  %v15917_v42 = vld [vmem:[#allocation90_spill] sm:$0xff]  ;;  %v15925_v6 = vld [vmem:[#allocation7_spill] sm:$0xff] }
 0x415   : > { %v13680_v47 = vadd.f32 %v7718_v34, %v7620_v21  ;;  %v5916_v60 = vadd.f32 %v15900_v50, %v13585_v3  ;;  %v5917_v39 = vadd.f32 %v15901_v5, %v13588_v35  ;;  %v5918_v29 = vadd.f32 %v15902_v30, %v13590_v24  ;;  %v15905_v21 = vld [vmem:[#allocation42_spill] sm:$0xff]  ;;  %v15919_v23 = vld [vmem:[#allocation109_spill] sm:$0xff] }
 0x416   : > { %15896 = vst [vmem:[#allocation9_spill] sm:$0xff] %v13674_v37  ;;  %15897 = vst [vmem:[#allocation12_spill] sm:$0xff] %v13676_v61  ;;  %v5919_v46 = vadd.f32 %v15903_v58, %v13594_v52  ;;  %v5921_v62 = vcombine.high %v824_v0, %v824_v0  ;;  %v5928_v11 = vrot.slane %v824_v0, %v15736_v38  ;;  %v15927_v58 = vld [vmem:[#allocation88_spill] sm:$0xff] }
 0x417   : > { %15898 = vst [vmem:[#allocation13_spill] sm:$0xff] %v13678_v33  ;;  %15899 = vst [vmem:[#allocation14_spill] sm:$0xff] %v13680_v47  ;;  %v1194_v16 = vadd.f32 %v15904_v12, %v13592_v31  ;;  %v13694_v2 = vadd.f32 %v15905_v21, %v7719_v10  ;;  %v13697_v3 = vadd.f32 %v15907_v51, %v7720_v25 }
 0x418   : > { %v13700_v35 = vadd.f32 %v15909_v19, %v7721_v17  ;;  %v13703_v24 = vadd.f32 %v15911_v20, %v7722_v28  ;;  %v5935_v52 = vrot.slane %v5921_v62, %v15736_v38  ;;  %v5936_v63 = vcombine.high %v5928_v11, %v5928_v11  ;;  %v15921_v17 = vld [vmem:[#allocation56_spill] sm:$0xff] }
 0x419   : > { %15906 = vst [vmem:[#allocation15_spill] sm:$0xff] %v13694_v2  ;;  %15908 = vst [vmem:[#allocation45_spill] sm:$0xff] %v13697_v3  ;;  %v5944_v0 = vrot.slane %v5928_v11, %v15736_v38  ;;  %v1214_v14 = vmax.f32 %v1194_v16, 0.0  ;;  %v13708_v31 = vadd.f32 %v15913_v45, %v7723_v53  ;;  %v13711_v48 = vadd.f32 %v15915_v13, %v7724_v32  ;;  %v15923_v53 = vld [vmem:[#allocation87_spill] sm:$0xff]  ;;  %v15928_v11 = vld [vmem:[#allocation89_spill] sm:$0xff] }
 0x41a   : > { %15910 = vst [vmem:[#allocation46_spill] sm:$0xff] %v13700_v35  ;;  %15912 = vst [vmem:[#allocation47_spill] sm:$0xff] %v13703_v24  ;;  %v13714_v26 = vadd.f32 %v15917_v42, %v7725_v59  ;;  %v13717_v4 = vadd.f32 %v15919_v23, %v7726_v9  ;;  %v5937_v54 = vcombine.high %v5935_v52, %v5935_v52 }
 0x41b   : > { %15914 = vst [vmem:[#allocation48_spill] sm:$0xff] %v13708_v31  ;;  %15916 = vst [vmem:[#allocation49_spill] sm:$0xff] %v13711_v48  ;;  %v5951_v56 = vrot.slane %v5935_v52, %v15736_v38  ;;  %v5958_v34 = vrot.slane %v5936_v63, %v15736_v38  ;;  %v5966_v10 = vcombine.high %v5944_v0, %v5944_v0  ;;  %v15931_v48 = vld [vmem:[#allocation18_spill] sm:$0xff]  ;;  %v15932_v31 = vld [vmem:[#allocation19_spill] sm:$0xff] }
 0x41c   : > { %15918 = vst [vmem:[#allocation50_spill] sm:$0xff] %v13714_v26  ;;  %15920 = vst [vmem:[#allocation51_spill] sm:$0xff] %v13717_v4  ;;  %v5972_v25 = vrot.slane %v5944_v0, %v15750_v36  ;;  %v13723_v28 = vmul.f32 %v15921_v17, %v1214_v14  ;;  %v13726_v32 = vadd.f32 %v15923_v53, %v7727_v41 }
 0x41d   : > { %v13729_v59 = vadd.f32 %v15925_v6, %v7728_v44  ;;  %v5965_v9 = vrot.slane %v5937_v54, %v15736_v38  ;;  %v5967_v7 = vcombine.high %v5951_v56, %v5951_v56  ;;  %v5968_v57 = vcombine.high %v5958_v34, %v5958_v34 }
 0x41e   : > { %15922 = vst [vmem:[#allocation52_spill] sm:$0xff] %v13723_v28  ;;  %15924 = vst [vmem:[#allocation63_spill] sm:$0xff] %v13726_v32  ;;  %v5976_v50 = vrot.slane %v5958_v34, %v15750_v36  ;;  %v5980_v5 = vrot.slane %v5966_v10, %v15750_v36  ;;  %v5988_v30 = vrot.slane %v5951_v56, %v15750_v36 }
 0x41f   : > { %15926 = vst [vmem:[#allocation53_spill] sm:$0xff] %v13729_v59  ;;  %v6004_v62 = vmul.f32 %v5972_v25, %v15927_v58  ;;  %v6005_v12 = vmul.f32 %v5972_v25, %v15928_v11  ;;  %v5984_v41 = vrot.slane %v5968_v57, %v15750_v36  ;;  %v5992_v16 = vrot.slane %v5965_v9, %v15750_v36 }
 0x420   : > { %v5996_v44 = vrot.slane %v5967_v7, %v15750_v36  ;;  %v6006_v21 = vmul.f32 %v5976_v50, %v15927_v58  ;;  %v6007_v51 = vmul.f32 %v5976_v50, %v15928_v11  ;;  %v6008_v19 = vmul.f32 %v5980_v5, %v15927_v58 }
 0x421   : > { %v6009_v20 = vmul.f32 %v5980_v5, %v15928_v11  ;;  %v6012_v52 = vmul.f32 %v5988_v30, %v15927_v58  ;;  %v6010_v63 = vmul.f32 %v5984_v41, %v15927_v58  ;;  %v6011_v0 = vmul.f32 %v5984_v41, %v15928_v11 }
 0x422   : > { %v6013_v14 = vmul.f32 %v5988_v30, %v15928_v11  ;;  %v6014_v45 = vmul.f32 %v5992_v16, %v15927_v58  ;;  %v6015_v13 = vmul.f32 %v5992_v16, %v15928_v11  ;;  %v6016_v42 = vmul.f32 %v5996_v44, %v15927_v58 }
 0x423   : > { %v6017_v23 = vmul.f32 %v5996_v44, %v15928_v11  ;;  %v6018_v54 = vadd.f32 %v6004_v62, %v13608_v40  ;;  %v6019_v56 = vadd.f32 %v6005_v12, %v13611_v49  ;;  %v6020_v34 = vadd.f32 %v6006_v21, %v13614_v18 }
 0x424   : > { %v6021_v10 = vadd.f32 %v6007_v51, %v13617_v8  ;;  %v13757_v25 = vadd.f32 %v6008_v19, %v13622_v1  ;;  %v13760_v17 = vadd.f32 %v6009_v20, %v13625_v27  ;;  %v13763_v53 = vadd.f32 %v6010_v63, %v13628_v55 }
 0x425   : > { %v13766_v6 = vadd.f32 %v6011_v0, %v13631_v15  ;;  %v13769_v40 = vadd.f32 %v6012_v52, %v13638_v43  ;;  %v13772_v49 = vadd.f32 %v6013_v14, %v13641_v22  ;;  %v13774_v18 = vadd.f32 %v6014_v45, %v5916_v60 }
 0x426   : > { %v13776_v8 = vadd.f32 %v6015_v13, %v5917_v39  ;;  %v13778_v1 = vadd.f32 %v6016_v42, %v5918_v29  ;;  %v13780_v27 = vadd.f32 %v6017_v23, %v5919_v46  ;;  %v6034_v9 = vcombine.high %v6018_v54, %v6018_v54  ;;  %v15929_v13 = vld [vmem:[#allocation16_spill] sm:$0xff] }
 0x427   : > { %v6041_v55 = vrot.slane %v6018_v54, %v15736_v38  ;;  %v6089_v15 = vrot.slane %v6019_v56, %v15736_v38  ;;  %v6197_v7 = vcombine.high %v6020_v34, %v6020_v34  ;;  %v6204_v43 = vrot.slane %v6020_v34, %v15736_v38 }
 0x428   : > { %v13786_v57 = vrot.slane %v6021_v10, %v15736_v38  ;;  %v6048_v60 = vrot.slane %v6034_v9, %v15736_v38  ;;  %v15930_v10 = vld [vmem:[#allocation17_spill] sm:$0xff] }
 0x429   : > { %v6049_v39 = vcombine.high %v6041_v55, %v6041_v55  ;;  %v6057_v29 = vrot.slane %v6041_v55, %v15736_v38  ;;  %v6090_v46 = vcombine.high %v6089_v15, %v6089_v15  ;;  %v6097_v50 = vrot.slane %v6089_v15, %v15736_v38 }
 0x42a   : > { %v6211_v5 = vrot.slane %v6197_v7, %v15736_v38  ;;  %v6212_v30 = vcombine.high %v6204_v43, %v6204_v43  ;;  %v6220_v58 = vrot.slane %v6204_v43, %v15736_v38  ;;  %v6050_v62 = vcombine.high %v6048_v60, %v6048_v60 }
 0x42b   : > { %v6064_v11 = vrot.slane %v6048_v60, %v15736_v38  ;;  %v6071_v12 = vrot.slane %v6049_v39, %v15736_v38  ;;  %v6079_v41 = vcombine.high %v6057_v29, %v6057_v29  ;;  %v6104_v16 = vrot.slane %v6090_v46, %v15736_v38 }
 0x42c   : > { %v6108_v44 = vrot.slane %v6057_v29, %v15750_v36  ;;  %v6140_v21 = vrot.slane %v6097_v50, %v15750_v36  ;;  %v6213_v51 = vcombine.high %v6211_v5, %v6211_v5  ;;  %v6078_v19 = vrot.slane %v6050_v62, %v15736_v38 }
 0x42d   : > { %v6080_v20 = vcombine.high %v6064_v11, %v6064_v11  ;;  %v6081_v52 = vcombine.high %v6071_v12, %v6071_v12  ;;  %v6112_v63 = vrot.slane %v6071_v12, %v15750_v36  ;;  %v6116_v0 = vrot.slane %v6079_v41, %v15750_v36 }
 0x42e   : > { %v6124_v14 = vrot.slane %v6064_v11, %v15750_v36  ;;  %v6144_v45 = vrot.slane %v6104_v16, %v15750_v36  ;;  %v13806_v42 = vmul.f32 %v6108_v44, %v15929_v13  ;;  %v6082_v23 = vcombine.high %v6078_v19, %v6078_v19 }
 0x42f   : > { %v6120_v54 = vrot.slane %v6081_v52, %v15750_v36  ;;  %v6128_v56 = vrot.slane %v6078_v19, %v15750_v36  ;;  %v6132_v34 = vrot.slane %v6080_v20, %v15750_v36  ;;  %v6156_v9 = vmul.f32 %v6108_v44, %v15930_v10 }
 0x430   : > { %v6157_v55 = vmul.f32 %v6112_v63, %v15929_v13  ;;  %v6158_v15 = vmul.f32 %v6112_v63, %v15930_v10  ;;  %v6159_v7 = vmul.f32 %v6116_v0, %v15929_v13  ;;  %v6136_v43 = vrot.slane %v6082_v23, %v15750_v36 }
 0x431   : > { %v6160_v60 = vmul.f32 %v6116_v0, %v15930_v10  ;;  %v6161_v39 = vmul.f32 %v6120_v54, %v15929_v13  ;;  %v6162_v29 = vmul.f32 %v6120_v54, %v15930_v10  ;;  %v6163_v46 = vmul.f32 %v6124_v14, %v15929_v13 }
 0x432   : > { %v6164_v50 = vmul.f32 %v6124_v14, %v15930_v10  ;;  %v6165_v62 = vmul.f32 %v6128_v56, %v15929_v13  ;;  %v6166_v11 = vmul.f32 %v6128_v56, %v15930_v10  ;;  %v6167_v12 = vmul.f32 %v6132_v34, %v15929_v13 }
 0x433   : > { %v6168_v41 = vmul.f32 %v6132_v34, %v15930_v10  ;;  %v6169_v16 = vmul.f32 %v6136_v43, %v15929_v13  ;;  %v6170_v44 = vmul.f32 %v6136_v43, %v15930_v10  ;;  %v6171_v19 = vmul.f32 %v6140_v21, %v15929_v13 }
 0x434   : > { %v6172_v20 = vmul.f32 %v6140_v21, %v15930_v10  ;;  %v6173_v52 = vmul.f32 %v6144_v45, %v15929_v13  ;;  %v6174_v63 = vmul.f32 %v6144_v45, %v15930_v10  ;;  %v6227_v0 = vrot.slane %v6211_v5, %v15736_v38 }
 0x435   : > { %v6234_v14 = vrot.slane %v6212_v30, %v15736_v38  ;;  %v6241_v23 = vrot.slane %v6213_v51, %v15736_v38  ;;  %v6242_v54 = vcombine.high %v6220_v58, %v6220_v58  ;;  %v6253_v56 = vcombine.high %v13786_v57, %v13786_v57 }
 0x436   : > { %v6260_v34 = vrot.slane %v13786_v57, %v15736_v38  ;;  %v6271_v43 = vrot.slane %v6220_v58, %v15750_v36  ;;  %v13841_v21 = vrot.slane %v13757_v25, %v15736_v38  ;;  %v6243_v45 = vcombine.high %v6227_v0, %v6227_v0 }
 0x437   : > { %v6244_v13 = vcombine.high %v6234_v14, %v6234_v14  ;;  %v6245_v5 = vcombine.high %v6241_v23, %v6241_v23  ;;  %v6275_v30 = vrot.slane %v6234_v14, %v15750_v36  ;;  %v6267_v51 = vrot.slane %v6253_v56, %v15736_v38 }
 0x438   : > { %v6279_v10 = vrot.slane %v6242_v54, %v15750_v36  ;;  %v6287_v22 = vrot.slane %v6227_v0, %v15750_v36  ;;  %v6291_v59 = vrot.slane %v6241_v23, %v15750_v36  ;;  %v6295_v58 = vrot.slane %v6243_v45, %v15750_v36 }
 0x439   : > { %v6283_v57 = vrot.slane %v6244_v13, %v15750_v36  ;;  %v6299_v32 = vrot.slane %v6245_v5, %v15750_v36  ;;  %v6303_v4 = vrot.slane %v6260_v34, %v15750_v36  ;;  %v6307_v26 = vrot.slane %v6267_v51, %v15750_v36 }
 0x43a   : > { %v6318_v14 = vmul.f32 %v6271_v43, %v15931_v48  ;;  %v6319_v56 = vmul.f32 %v6271_v43, %v15932_v31  ;;  %v6320_v54 = vmul.f32 %v6275_v30, %v15931_v48  ;;  %v6321_v0 = vmul.f32 %v6275_v30, %v15932_v31 }
 0x43b   : > { %v6322_v23 = vmul.f32 %v6279_v10, %v15931_v48  ;;  %v6323_v13 = vmul.f32 %v6279_v10, %v15932_v31  ;;  %v6324_v45 = vmul.f32 %v6283_v57, %v15931_v48  ;;  %v6325_v5 = vmul.f32 %v6283_v57, %v15932_v31 }
 0x43c   : > { %v6326_v34 = vmul.f32 %v6287_v22, %v15931_v48  ;;  %v6327_v51 = vmul.f32 %v6287_v22, %v15932_v31  ;;  %v6328_v24 = vmul.f32 %v6291_v59, %v15931_v48  ;;  %v6329_v43 = vmul.f32 %v6291_v59, %v15932_v31 }
 0x43d   : > { %v6330_v35 = vmul.f32 %v6295_v58, %v15931_v48  ;;  %v6331_v30 = vmul.f32 %v6295_v58, %v15932_v31  ;;  %v6332_v3 = vmul.f32 %v6299_v32, %v15931_v48  ;;  %v6333_v10 = vmul.f32 %v6299_v32, %v15932_v31 }
 0x43e   : > { %v6334_v2 = vmul.f32 %v6303_v4, %v15931_v48  ;;  %v6335_v57 = vmul.f32 %v6303_v4, %v15932_v31  ;;  %v6336_v28 = vmul.f32 %v6307_v26, %v15931_v48  ;;  %v6337_v22 = vmul.f32 %v6307_v26, %v15932_v31 }
 0x43f   : > { %v13874_v47 = vadd.f32 %v6318_v14, %v13806_v42  ;;  %v13876_v59 = vadd.f32 %v6319_v56, %v6156_v9  ;;  %v13878_v33 = vadd.f32 %v6320_v54, %v6157_v55  ;;  %v13880_v58 = vadd.f32 %v6321_v0, %v6158_v15 }
 0x440   : > { %v13882_v61 = vadd.f32 %v6322_v23, %v6159_v7  ;;  %v13884_v32 = vadd.f32 %v6323_v13, %v6160_v60  ;;  %v13886_v37 = vadd.f32 %v6324_v45, %v6161_v39  ;;  %v13888_v4 = vadd.f32 %v6325_v5, %v6162_v29 }
 0x441   : > { %v13890_v48 = vadd.f32 %v6326_v34, %v6163_v46  ;;  %v13892_v31 = vadd.f32 %v6327_v51, %v6164_v50  ;;  %v13894_v26 = vadd.f32 %v6328_v24, %v6165_v62  ;;  %v13896_v42 = vadd.f32 %v6329_v43, %v6166_v11  ;;  %v15934_v34 = vld [vmem:[#allocation20_spill] sm:$0xff]  ;;  %v15935_v43 = vld [vmem:[#allocation21_spill] sm:$0xff] }
 0x442   : > { %v13898_v9 = vadd.f32 %v6330_v35, %v6167_v12  ;;  %v13900_v55 = vadd.f32 %v6331_v30, %v6168_v41  ;;  %v13902_v15 = vadd.f32 %v6332_v3, %v6169_v16  ;;  %v13904_v7 = vadd.f32 %v6333_v10, %v6170_v44 }
 0x443   : > { %v13906_v60 = vadd.f32 %v6334_v2, %v6171_v19  ;;  %v13908_v39 = vadd.f32 %v6335_v57, %v6172_v20  ;;  %v13910_v29 = vadd.f32 %v6336_v28, %v6173_v52  ;;  %v13912_v46 = vadd.f32 %v6337_v22, %v6174_v63 }
 0x444   : > { %v15933_v24 = vcombine.high %v13757_v25, %v13757_v25  ;;  %v6375_v50 = vcombine.high %v13841_v21, %v13841_v21  ;;  %v6383_v3 = vrot.slane %v13841_v21, %v15736_v38  ;;  %v6415_v2 = vrot.slane %v13760_v17, %v15736_v38 }
 0x445   : > { %v6523_v28 = vcombine.high %v13763_v53, %v13763_v53  ;;  %v13928_v62 = vrot.slane %v13763_v53, %v15736_v38  ;;  %v13932_v25 = vrot.slane %v13766_v6, %v15736_v38 }
 0x446   : > { %v6374_v35 = vrot.slane %v15933_v24, %v15736_v38  ;;  %v6397_v41 = vrot.slane %v6375_v50, %v15736_v38  ;;  %v6405_v16 = vcombine.high %v6383_v3, %v6383_v3  ;;  %v6416_v44 = vcombine.high %v6415_v2, %v6415_v2 }
 0x447   : > { %v6423_v17 = vrot.slane %v6415_v2, %v15736_v38  ;;  %v6434_v19 = vrot.slane %v6383_v3, %v15750_v36  ;;  %v13939_v20 = vrot.slane %v6523_v28, %v15736_v38 }
 0x448   : > { %v6376_v11 = vcombine.high %v6374_v35, %v6374_v35  ;;  %v6390_v12 = vrot.slane %v6374_v35, %v15736_v38  ;;  %v6407_v63 = vcombine.high %v6397_v41, %v6397_v41  ;;  %v6438_v6 = vrot.slane %v6397_v41, %v15750_v36 }
 0x449   : > { %v6430_v21 = vrot.slane %v6416_v44, %v15736_v38  ;;  %v6442_v14 = vrot.slane %v6405_v16, %v15750_v36  ;;  %v6466_v54 = vrot.slane %v6423_v17, %v15750_v36  ;;  %v6481_v51 = vmul.f32 %v6434_v19, %v15934_v34 }
 0x44a   : > { %v6404_v53 = vrot.slane %v6376_v11, %v15736_v38  ;;  %v6406_v52 = vcombine.high %v6390_v12, %v6390_v12  ;;  %v6450_v56 = vrot.slane %v6390_v12, %v15750_v36  ;;  %v6446_v23 = vrot.slane %v6407_v63, %v15750_v36 }
 0x44b   : > { %v6470_v5 = vrot.slane %v6430_v21, %v15750_v36  ;;  %v6482_v30 = vmul.f32 %v6434_v19, %v15935_v43  ;;  %v6483_v10 = vmul.f32 %v6438_v6, %v15934_v34  ;;  %v6484_v22 = vmul.f32 %v6438_v6, %v15935_v43 }
 0x44c   : > { %v6408_v0 = vcombine.high %v6404_v53, %v6404_v53  ;;  %v6454_v13 = vrot.slane %v6404_v53, %v15750_v36  ;;  %v6458_v45 = vrot.slane %v6406_v52, %v15750_v36  ;;  %v6485_v24 = vmul.f32 %v6442_v14, %v15934_v34 }
 0x44d   : > { %v6486_v35 = vmul.f32 %v6442_v14, %v15935_v43  ;;  %v6487_v50 = vmul.f32 %v6446_v23, %v15934_v34  ;;  %v6488_v3 = vmul.f32 %v6446_v23, %v15935_v43  ;;  %v6489_v2 = vmul.f32 %v6450_v56, %v15934_v34 }
 0x44e   : > { %v6462_v57 = vrot.slane %v6408_v0, %v15750_v36  ;;  %v6490_v28 = vmul.f32 %v6450_v56, %v15935_v43  ;;  %v6491_v11 = vmul.f32 %v6454_v13, %v15934_v34  ;;  %v6492_v12 = vmul.f32 %v6454_v13, %v15935_v43 }
 0x44f   : > { %v6493_v41 = vmul.f32 %v6458_v45, %v15934_v34  ;;  %v6494_v16 = vmul.f32 %v6458_v45, %v15935_v43  ;;  %v6497_v19 = vmul.f32 %v6466_v54, %v15934_v34  ;;  %v6498_v53 = vmul.f32 %v6466_v54, %v15935_v43 }
 0x450   : > { %v6495_v44 = vmul.f32 %v6462_v57, %v15934_v34  ;;  %v6496_v17 = vmul.f32 %v6462_v57, %v15935_v43  ;;  %v6499_v52 = vmul.f32 %v6470_v5, %v15934_v34  ;;  %v6500_v63 = vmul.f32 %v6470_v5, %v15935_v43 }
 0x451   : > { %v13973_v6 = vadd.f32 %v6481_v51, %v13874_v47  ;;  %v13976_v21 = vadd.f32 %v6482_v30, %v13876_v59  ;;  %v13979_v14 = vadd.f32 %v6483_v10, %v13878_v33  ;;  %v13982_v56 = vadd.f32 %v6484_v22, %v13880_v58 }
 0x452   : > { %v13985_v0 = vadd.f32 %v6485_v24, %v13882_v61  ;;  %v13988_v54 = vadd.f32 %v6486_v35, %v13884_v32  ;;  %v13991_v23 = vadd.f32 %v6487_v50, %v13886_v37  ;;  %v13994_v47 = vadd.f32 %v6488_v3, %v13888_v4 }
 0x453   : > { %v13997_v59 = vadd.f32 %v6489_v2, %v13890_v48  ;;  %v14000_v33 = vadd.f32 %v6490_v28, %v13892_v31  ;;  %v14003_v58 = vadd.f32 %v6491_v11, %v13894_v26  ;;  %v14006_v61 = vadd.f32 %v6492_v12, %v13896_v42  ;;  %v15936_v2 = vld [vmem:[#allocation22_spill] sm:$0xff]  ;;  %v15937_v11 = vld [vmem:[#allocation23_spill] sm:$0xff] }
 0x454   : > { %v14009_v32 = vadd.f32 %v6493_v41, %v13898_v9  ;;  %v14012_v37 = vadd.f32 %v6494_v16, %v13900_v55  ;;  %v14015_v4 = vadd.f32 %v6495_v44, %v13902_v15  ;;  %v14018_v48 = vadd.f32 %v6496_v17, %v13904_v7 }
 0x455   : > { %v14021_v31 = vadd.f32 %v6497_v19, %v13906_v60  ;;  %v14024_v26 = vadd.f32 %v6498_v53, %v13908_v39  ;;  %v14027_v42 = vadd.f32 %v6499_v52, %v13910_v29  ;;  %v14030_v9 = vadd.f32 %v6500_v63, %v13912_v46 }
 0x456   : > { %v6538_v55 = vcombine.high %v13928_v62, %v13928_v62  ;;  %v6539_v15 = vcombine.high %v13939_v20, %v13939_v20  ;;  %v6546_v7 = vrot.slane %v13928_v62, %v15736_v38  ;;  %v6553_v60 = vrot.slane %v13939_v20, %v15736_v38 }
 0x457   : > { %v6579_v39 = vcombine.high %v13932_v25, %v13932_v25  ;;  %v6586_v29 = vrot.slane %v13932_v25, %v15736_v38  ;;  %v6686_v45 = vcombine.high %v13769_v40, %v13769_v40  ;;  %v14050_v5 = vrot.slane %v13769_v40, %v15736_v38 }
 0x458   : > { %v6560_v46 = vrot.slane %v6538_v55, %v15736_v38  ;;  %v6567_v13 = vrot.slane %v6539_v15, %v15736_v38  ;;  %v6568_v62 = vcombine.high %v6546_v7, %v6546_v7  ;;  %v6569_v34 = vcombine.high %v6553_v60, %v6553_v60 }
 0x459   : > { %v6593_v20 = vrot.slane %v6579_v39, %v15736_v38  ;;  %v6597_v51 = vrot.slane %v6546_v7, %v15750_v36  ;;  %v6613_v10 = vrot.slane %v6553_v60, %v15750_v36  ;;  %v6629_v40 = vrot.slane %v6586_v29, %v15750_v36 }
 0x45a   : > { %v6570_v43 = vcombine.high %v6560_v46, %v6560_v46  ;;  %v6571_v30 = vcombine.high %v6567_v13, %v6567_v13  ;;  %v6601_v25 = vrot.slane %v6560_v46, %v15750_v36  ;;  %v6605_v57 = vrot.slane %v6568_v62, %v15750_v36 }
 0x45b   : > { %v6617_v22 = vrot.slane %v6567_v13, %v15750_v36  ;;  %v6621_v24 = vrot.slane %v6569_v34, %v15750_v36  ;;  %v6633_v3 = vrot.slane %v6593_v20, %v15750_v36  ;;  %v6644_v28 = vmul.f32 %v6597_v51, %v15936_v2 }
 0x45c   : > { %v6609_v35 = vrot.slane %v6570_v43, %v15750_v36  ;;  %v6625_v50 = vrot.slane %v6571_v30, %v15750_v36  ;;  %v6645_v12 = vmul.f32 %v6597_v51, %v15937_v11  ;;  %v6646_v41 = vmul.f32 %v6601_v25, %v15936_v2 }
 0x45d   : > { %v6647_v16 = vmul.f32 %v6601_v25, %v15937_v11  ;;  %v6648_v44 = vmul.f32 %v6605_v57, %v15936_v2  ;;  %v6649_v17 = vmul.f32 %v6605_v57, %v15937_v11  ;;  %v6652_v52 = vmul.f32 %v6613_v10, %v15936_v2 }
 0x45e   : > { %v6650_v19 = vmul.f32 %v6609_v35, %v15936_v2  ;;  %v6651_v53 = vmul.f32 %v6609_v35, %v15937_v11  ;;  %v6653_v63 = vmul.f32 %v6613_v10, %v15937_v11  ;;  %v6654_v55 = vmul.f32 %v6617_v22, %v15936_v2 }
 0x45f   : > { %v6655_v15 = vmul.f32 %v6617_v22, %v15937_v11  ;;  %v6656_v7 = vmul.f32 %v6621_v24, %v15936_v2  ;;  %v6657_v60 = vmul.f32 %v6621_v24, %v15937_v11  ;;  %v6658_v39 = vmul.f32 %v6625_v50, %v15936_v2 }
 0x460   : > { %v6659_v29 = vmul.f32 %v6625_v50, %v15937_v11  ;;  %v6660_v46 = vmul.f32 %v6629_v40, %v15936_v2  ;;  %v6661_v13 = vmul.f32 %v6629_v40, %v15937_v11  ;;  %v6662_v62 = vmul.f32 %v6633_v3, %v15936_v2 }
 0x461   : > { %v6663_v34 = vmul.f32 %v6633_v3, %v15937_v11  ;;  %v14084_v20 = vadd.f32 %v6644_v28, %v13973_v6  ;;  %v14087_v51 = vadd.f32 %v6645_v12, %v13976_v21  ;;  %v14090_v43 = vadd.f32 %v6646_v41, %v13979_v14 }
 0x462   : > { %v14093_v30 = vadd.f32 %v6647_v16, %v13982_v56  ;;  %v14096_v25 = vadd.f32 %v6648_v44, %v13985_v0  ;;  %v14099_v10 = vadd.f32 %v6649_v17, %v13988_v54  ;;  %v14102_v57 = vadd.f32 %v6650_v19, %v13991_v23 }
 0x463   : > { %v14105_v6 = vadd.f32 %v6651_v53, %v13994_v47  ;;  %v14108_v21 = vadd.f32 %v6652_v52, %v13997_v59  ;;  %v14111_v14 = vadd.f32 %v6653_v63, %v14000_v33  ;;  %v14114_v56 = vadd.f32 %v6654_v55, %v14003_v58  ;;  %v15938_v52 = vld [vmem:[#allocation24_spill] sm:$0xff]  ;;  %v15939_v55 = vld [vmem:[#allocation25_spill] sm:$0xff] }
 0x464   : > { %v14117_v0 = vadd.f32 %v6655_v15, %v14006_v61  ;;  %v14120_v54 = vadd.f32 %v6656_v7, %v14009_v32  ;;  %v14123_v23 = vadd.f32 %v6657_v60, %v14012_v37  ;;  %v14126_v47 = vadd.f32 %v6658_v39, %v14015_v4 }
 0x465   : > { %v14129_v59 = vadd.f32 %v6659_v29, %v14018_v48  ;;  %v14132_v33 = vadd.f32 %v6660_v46, %v14021_v31  ;;  %v14135_v58 = vadd.f32 %v6661_v13, %v14024_v26  ;;  %v14138_v61 = vadd.f32 %v6662_v62, %v14027_v42 }
 0x466   : > { %v14141_v32 = vadd.f32 %v6663_v34, %v14030_v9  ;;  %v6700_v37 = vrot.slane %v6686_v45, %v15736_v38  ;;  %v6701_v4 = vcombine.high %v14050_v5, %v14050_v5  ;;  %v6709_v48 = vrot.slane %v14050_v5, %v15736_v38 }
 0x467   : > { %v6741_v31 = vrot.slane %v13772_v49, %v15736_v38  ;;  %v6849_v26 = vcombine.high %v13774_v18, %v13774_v18  ;;  %v14155_v9 = vrot.slane %v13774_v18, %v15736_v38  ;;  %v14159_v45 = vrot.slane %v13776_v8, %v15736_v38 }
 0x468   : > { %v6702_v22 = vcombine.high %v6700_v37, %v6700_v37  ;;  %v6716_v42 = vrot.slane %v6700_v37, %v15736_v38  ;;  %v6723_v24 = vrot.slane %v6701_v4, %v15736_v38  ;;  %v6731_v5 = vcombine.high %v6709_v48, %v6709_v48 }
 0x469   : > { %v6742_v40 = vcombine.high %v6741_v31, %v6741_v31  ;;  %v6749_v49 = vrot.slane %v6741_v31, %v15736_v38  ;;  %v6760_v3 = vrot.slane %v6709_v48, %v15750_v36  ;;  %v7019_v18 = vrot.slane %v13778_v1, %v15736_v38 }
 0x46a   : > { %v6730_v35 = vrot.slane %v6702_v22, %v15736_v38  ;;  %v6732_v50 = vcombine.high %v6716_v42, %v6716_v42  ;;  %v6776_v2 = vrot.slane %v6716_v42, %v15750_v36  ;;  %v6733_v28 = vcombine.high %v6723_v24, %v6723_v24 }
 0x46b   : > { %v6756_v11 = vrot.slane %v6742_v40, %v15736_v38  ;;  %v6764_v12 = vrot.slane %v6723_v24, %v15750_v36  ;;  %v6768_v8 = vrot.slane %v6731_v5, %v15750_v36  ;;  %v6792_v17 = vrot.slane %v6749_v49, %v15750_v36 }
 0x46c   : > { %v6734_v41 = vcombine.high %v6730_v35, %v6730_v35  ;;  %v6780_v16 = vrot.slane %v6730_v35, %v15750_v36  ;;  %v6784_v44 = vrot.slane %v6732_v50, %v15750_v36  ;;  %v6772_v19 = vrot.slane %v6733_v28, %v15750_v36 }
 0x46d   : > { %v6796_v53 = vrot.slane %v6756_v11, %v15750_v36  ;;  %v6807_v63 = vmul.f32 %v6760_v3, %v15938_v52  ;;  %v6808_v15 = vmul.f32 %v6760_v3, %v15939_v55  ;;  %v6809_v60 = vmul.f32 %v6764_v12, %v15938_v52 }
 0x46e   : > { %v6788_v7 = vrot.slane %v6734_v41, %v15750_v36  ;;  %v6810_v39 = vmul.f32 %v6764_v12, %v15939_v55  ;;  %v6811_v29 = vmul.f32 %v6768_v8, %v15938_v52  ;;  %v6812_v46 = vmul.f32 %v6768_v8, %v15939_v55 }
 0x46f   : > { %v6813_v13 = vmul.f32 %v6772_v19, %v15938_v52  ;;  %v6814_v62 = vmul.f32 %v6772_v19, %v15939_v55  ;;  %v6815_v34 = vmul.f32 %v6776_v2, %v15938_v52  ;;  %v6816_v37 = vmul.f32 %v6776_v2, %v15939_v55 }
 0x470   : > { %v6817_v4 = vmul.f32 %v6780_v16, %v15938_v52  ;;  %v6818_v48 = vmul.f32 %v6780_v16, %v15939_v55  ;;  %v6819_v31 = vmul.f32 %v6784_v44, %v15938_v52  ;;  %v6820_v22 = vmul.f32 %v6784_v44, %v15939_v55 }
 0x471   : > { %v6821_v42 = vmul.f32 %v6788_v7, %v15938_v52  ;;  %v6822_v24 = vmul.f32 %v6788_v7, %v15939_v55  ;;  %v6823_v5 = vmul.f32 %v6792_v17, %v15938_v52  ;;  %v6824_v40 = vmul.f32 %v6792_v17, %v15939_v55 }
 0x472   : > { %v6825_v49 = vmul.f32 %v6796_v53, %v15938_v52  ;;  %v6826_v35 = vmul.f32 %v6796_v53, %v15939_v55  ;;  %v14196_v50 = vadd.f32 %v6807_v63, %v14084_v20  ;;  %v14199_v3 = vadd.f32 %v6808_v15, %v14087_v51 }
 0x473   : > { %v14202_v2 = vadd.f32 %v6809_v60, %v14090_v43  ;;  %v14205_v28 = vadd.f32 %v6810_v39, %v14093_v30  ;;  %v14208_v11 = vadd.f32 %v6811_v29, %v14096_v25  ;;  %v14211_v12 = vadd.f32 %v6812_v46, %v14099_v10  ;;  %v15940_v39 = vld [vmem:[#allocation26_spill] sm:$0xff] }
 0x474   : > { %v14214_v8 = vadd.f32 %v6813_v13, %v14102_v57  ;;  %v14217_v20 = vadd.f32 %v6814_v62, %v14105_v6  ;;  %v14220_v51 = vadd.f32 %v6815_v34, %v14108_v21  ;;  %v14223_v43 = vadd.f32 %v6816_v37, %v14111_v14  ;;  %v15941_v13 = vld [vmem:[#allocation27_spill] sm:$0xff] }
 0x475   : > { %v14226_v30 = vadd.f32 %v6817_v4, %v14114_v56  ;;  %v14229_v25 = vadd.f32 %v6818_v48, %v14117_v0  ;;  %v14232_v10 = vadd.f32 %v6819_v31, %v14120_v54  ;;  %v14235_v57 = vadd.f32 %v6820_v22, %v14123_v23 }
 0x476   : > { %v14238_v6 = vadd.f32 %v6821_v42, %v14126_v47  ;;  %v14241_v21 = vadd.f32 %v6822_v24, %v14129_v59  ;;  %v14244_v14 = vadd.f32 %v6823_v5, %v14132_v33  ;;  %v14247_v56 = vadd.f32 %v6824_v40, %v14135_v58 }
 0x477   : > { %v14250_v0 = vadd.f32 %v6825_v49, %v14138_v61  ;;  %v14253_v54 = vadd.f32 %v6826_v35, %v14141_v32  ;;  %v6863_v23 = vrot.slane %v6849_v26, %v15736_v38  ;;  %v6864_v47 = vcombine.high %v14155_v9, %v14155_v9 }
 0x478   : > { %v6872_v59 = vrot.slane %v14155_v9, %v15736_v38  ;;  %v6905_v33 = vcombine.high %v14159_v45, %v14159_v45  ;;  %v6912_v58 = vrot.slane %v14159_v45, %v15736_v38  ;;  %v7012_v41 = vcombine.high %v13778_v1, %v13778_v1 }
 0x479   : > { %v6865_v61 = vcombine.high %v6863_v23, %v6863_v23  ;;  %v6879_v32 = vrot.slane %v6863_v23, %v15736_v38  ;;  %v6886_v26 = vrot.slane %v6864_v47, %v15736_v38 }
 0x47a   : > { %v6894_v16 = vcombine.high %v6872_v59, %v6872_v59  ;;  %v6919_v9 = vrot.slane %v6905_v33, %v15736_v38  ;;  %v6923_v44 = vrot.slane %v6872_v59, %v15750_v36  ;;  %v6955_v53 = vrot.slane %v6912_v58, %v15750_v36 }
 0x47b   : > { %v6893_v17 = vrot.slane %v6865_v61, %v15736_v38  ;;  %v6895_v19 = vcombine.high %v6879_v32, %v6879_v32  ;;  %v6939_v45 = vrot.slane %v6879_v32, %v15750_v36  ;;  %v6896_v52 = vcombine.high %v6886_v26, %v6886_v26 }
 0x47c   : > { %v6927_v63 = vrot.slane %v6886_v26, %v15750_v36  ;;  %v6931_v55 = vrot.slane %v6894_v16, %v15750_v36  ;;  %v6959_v1 = vrot.slane %v6919_v9, %v15750_v36  ;;  %v6970_v29 = vmul.f32 %v6923_v44, %v15940_v39 }
 0x47d   : > { %v6897_v15 = vcombine.high %v6893_v17, %v6893_v17  ;;  %v6943_v7 = vrot.slane %v6893_v17, %v15750_v36  ;;  %v6947_v60 = vrot.slane %v6895_v19, %v15750_v36  ;;  %v6935_v46 = vrot.slane %v6896_v52, %v15750_v36 }
 0x47e   : > { %v6971_v62 = vmul.f32 %v6923_v44, %v15941_v13  ;;  %v6972_v34 = vmul.f32 %v6927_v63, %v15940_v39  ;;  %v6973_v37 = vmul.f32 %v6927_v63, %v15941_v13  ;;  %v14290_v48 = vmul.f32 %v6931_v55, %v15940_v39 }
 0x47f   : > { %v6951_v4 = vrot.slane %v6897_v15, %v15750_v36  ;;  %v14293_v31 = vmul.f32 %v6931_v55, %v15941_v13  ;;  %v14296_v22 = vmul.f32 %v6939_v45, %v15940_v39  ;;  %v14299_v42 = vmul.f32 %v6935_v46, %v15940_v39 }
 0x480   : > { %v14302_v24 = vmul.f32 %v6935_v46, %v15941_v13  ;;  %v14305_v5 = vmul.f32 %v6939_v45, %v15941_v13  ;;  %v14308_v40 = vmul.f32 %v6943_v7, %v15940_v39  ;;  %v14311_v49 = vmul.f32 %v6943_v7, %v15941_v13 }
 0x481   : > { %v14314_v35 = vmul.f32 %v6947_v60, %v15940_v39  ;;  %v14317_v23 = vmul.f32 %v6947_v60, %v15941_v13  ;;  %v14320_v47 = vmul.f32 %v6951_v4, %v15940_v39  ;;  %v14323_v59 = vmul.f32 %v6951_v4, %v15941_v13 }
 0x482   : > { %v14326_v33 = vmul.f32 %v6955_v53, %v15940_v39  ;;  %v14329_v58 = vmul.f32 %v6955_v53, %v15941_v13  ;;  %v14332_v61 = vmul.f32 %v6959_v1, %v15940_v39  ;;  %v14335_v32 = vmul.f32 %v6959_v1, %v15941_v13 }
 0x483   : > { %v7026_v26 = vrot.slane %v7012_v41, %v15736_v38  ;;  %v7027_v16 = vcombine.high %v7019_v18, %v7019_v18  ;;  %v7035_v9 = vrot.slane %v7019_v18, %v15736_v38  ;;  %v7067_v44 = vrot.slane %v13780_v27, %v15736_v38 }
 0x484   : > { %15942 = vst [vmem:[#allocation54_spill] sm:$0xff] %v14335_v32  ;;  %v6990_v17 = vadd.f32 %v6970_v29, %v14196_v50  ;;  %v6991_v19 = vadd.f32 %v6971_v62, %v14199_v3  ;;  %v6992_v45 = vadd.f32 %v6972_v34, %v14202_v2  ;;  %v6993_v15 = vadd.f32 %v6973_v37, %v14205_v28  ;;  %v15943_v37 = vld [vmem:[#allocation28_spill] sm:$0xff] }
 0x485   : > { %v7028_v53 = vcombine.high %v7026_v26, %v7026_v26  ;;  %v7042_v52 = vrot.slane %v7026_v26, %v15736_v38  ;;  %v7049_v63 = vrot.slane %v7027_v16, %v15736_v38  ;;  %v7057_v55 = vcombine.high %v7035_v9, %v7035_v9  ;;  %v15944_v26 = vld [vmem:[#allocation29_spill] sm:$0xff] }
 0x486   : > { %v7068_v1 = vcombine.high %v7067_v44, %v7067_v44  ;;  %v7075_v41 = vrot.slane %v7067_v44, %v15736_v38  ;;  %v7086_v18 = vrot.slane %v7035_v9, %v15750_v36  ;;  %v6998_v32 = vadd.f32 %v14296_v22, %v14220_v51 }
 0x487   : > { %v7056_v27 = vrot.slane %v7028_v53, %v15736_v38  ;;  %v7058_v50 = vcombine.high %v7042_v52, %v7042_v52  ;;  %v7059_v7 = vcombine.high %v7049_v63, %v7049_v63  ;;  %v7090_v3 = vrot.slane %v7049_v63, %v15750_v36 }
 0x488   : > { %v7082_v2 = vrot.slane %v7068_v1, %v15736_v38  ;;  %v7094_v60 = vrot.slane %v7057_v55, %v15750_v36  ;;  %v7102_v39 = vrot.slane %v7042_v52, %v15750_v36  ;;  %v7118_v29 = vrot.slane %v7075_v41, %v15750_v36 }
 0x489   : > { %v7060_v46 = vcombine.high %v7056_v27, %v7056_v27  ;;  %v7098_v13 = vrot.slane %v7059_v7, %v15750_v36  ;;  %v7106_v62 = vrot.slane %v7056_v27, %v15750_v36  ;;  %v7110_v28 = vrot.slane %v7058_v50, %v15750_v36 }
 0x48a   : > { %v7122_v34 = vrot.slane %v7082_v2, %v15750_v36  ;;  %v7133_v4 = vmul.f32 %v7086_v18, %v15943_v37  ;;  %v7134_v16 = vmul.f32 %v7086_v18, %v15944_v26  ;;  %v7135_v9 = vmul.f32 %v7090_v3, %v15943_v37 }
 0x48b   : > { %v7114_v44 = vrot.slane %v7060_v46, %v15750_v36  ;;  %v7136_v53 = vmul.f32 %v7090_v3, %v15944_v26  ;;  %v7137_v52 = vmul.f32 %v7094_v60, %v15943_v37  ;;  %v7138_v63 = vmul.f32 %v7094_v60, %v15944_v26 }
 0x48c   : > { %v7139_v55 = vmul.f32 %v7098_v13, %v15943_v37  ;;  %v7140_v1 = vmul.f32 %v7098_v13, %v15944_v26  ;;  %v7141_v41 = vmul.f32 %v7102_v39, %v15943_v37  ;;  %v7142_v27 = vmul.f32 %v7102_v39, %v15944_v26 }
 0x48d   : > { %v7143_v18 = vmul.f32 %v7106_v62, %v15943_v37  ;;  %v7144_v50 = vmul.f32 %v7106_v62, %v15944_v26  ;;  %v7145_v7 = vmul.f32 %v7110_v28, %v15943_v37  ;;  %v7146_v3 = vmul.f32 %v7110_v28, %v15944_v26 }
 0x48e   : > { %v7147_v2 = vmul.f32 %v7114_v44, %v15943_v37  ;;  %v7148_v60 = vmul.f32 %v7114_v44, %v15944_v26  ;;  %v7149_v46 = vmul.f32 %v7118_v29, %v15943_v37  ;;  %v7150_v13 = vmul.f32 %v7118_v29, %v15944_v26 }
 0x48f   : > { %v7151_v36 = vmul.f32 %v7122_v34, %v15943_v37  ;;  %v7152_v39 = vmul.f32 %v7122_v34, %v15944_v26  ;;  %v6994_v38 = vadd.f32 %v14290_v48, %v14208_v11  ;;  %v6995_v62 = vadd.f32 %v14293_v31, %v14211_v12  ;;  %v15951_v37 = vld [vmem:[#allocation44_spill] sm:$0xff]  ;;  %v15952_v26 = vld [vmem:[#allocation14_spill] sm:$0xff] }
 0x490   : > { %v6996_v28 = vadd.f32 %v14299_v42, %v14214_v8  ;;  %v6997_v44 = vadd.f32 %v14302_v24, %v14217_v20  ;;  %v6999_v29 = vadd.f32 %v14305_v5, %v14223_v43  ;;  %v7000_v34 = vadd.f32 %v14308_v40, %v14226_v30 }
 0x491   : > { %v7001_v11 = vadd.f32 %v14311_v49, %v14229_v25  ;;  %v7002_v12 = vadd.f32 %v14314_v35, %v14232_v10  ;;  %v7003_v8 = vadd.f32 %v14317_v23, %v14235_v57  ;;  %v7004_v20 = vadd.f32 %v14320_v47, %v14238_v6  ;;  %v15945_v10 = vld [vmem:[#allocation54_spill] sm:$0xff] }
 0x492   : > { %v7005_v51 = vadd.f32 %v14323_v59, %v14241_v21  ;;  %v7006_v43 = vadd.f32 %v14326_v33, %v14244_v14  ;;  %v7007_v30 = vadd.f32 %v14329_v58, %v14247_v56  ;;  %v7008_v25 = vadd.f32 %v14332_v61, %v14250_v0  ;;  %v15946_v58 = vld [vmem:[#allocation9_spill] sm:$0xff]  ;;  %v15947_v61 = vld [vmem:[#allocation98_spill] sm:$0xff] }
 0x493   : > { %v7009_v48 = vadd.f32 %v15945_v10, %v14253_v54  ;;  %v14412_v31 = vadd.f32 %v7133_v4, %v6990_v17  ;;  %v14414_v57 = vadd.f32 %v7134_v16, %v6991_v19  ;;  %v14416_v6 = vadd.f32 %v7135_v9, %v6992_v45  ;;  %v15948_v17 = vld [vmem:[#allocation12_spill] sm:$0xff]  ;;  %v15949_v19 = vld [vmem:[#allocation99_spill] sm:$0xff] }
 0x494   : > { %v14418_v22 = vadd.f32 %v7136_v53, %v6993_v15  ;;  %v14420_v21 = vadd.f32 %v7137_v52, %v6994_v38  ;;  %v14422_v14 = vadd.f32 %v7138_v63, %v6995_v62  ;;  %v14424_v42 = vadd.f32 %v7139_v55, %v6996_v28  ;;  %v15950_v15 = vld [vmem:[#allocation13_spill] sm:$0xff]  ;;  %v15953_v16 = vld [vmem:[#allocation67_spill] sm:$0xff]  ;;  %v15954_v53 = vld [vmem:[#allocation52_spill] sm:$0xff] }
 0x495   : > { %v14426_v56 = vadd.f32 %v7140_v1, %v6997_v44  ;;  %v14428_v0 = vadd.f32 %v7141_v41, %v6998_v32  ;;  %v14430_v24 = vadd.f32 %v7142_v27, %v6999_v29  ;;  %v14432_v54 = vadd.f32 %v7143_v18, %v7000_v34  ;;  %v15955_v63 = vld [vmem:[#allocation55_spill] sm:$0xff]  ;;  %v15958_v34 = vld [vmem:[#allocation96_spill] sm:$0xff] }
 0x496   : > { %v14434_v5 = vadd.f32 %v7144_v50, %v7001_v11  ;;  %v14436_v40 = vadd.f32 %v7145_v7, %v7002_v12  ;;  %v14438_v49 = vadd.f32 %v7146_v3, %v7003_v8  ;;  %v14440_v38 = vadd.f32 %v7147_v2, %v7004_v20  ;;  %v15956_v3 = vld [vmem:[#allocation4_spill] sm:$0xff]  ;;  %v15957_v44 = vld [vmem:[#allocation95_spill] sm:$0xff] }
 0x497   : > { %v14442_v35 = vadd.f32 %v7148_v60, %v7005_v51  ;;  %v14444_v23 = vadd.f32 %v7149_v46, %v7006_v43  ;;  %v14446_v47 = vadd.f32 %v7150_v13, %v7007_v30  ;;  %v14448_v59 = vadd.f32 %v7151_v36, %v7008_v25 }
 0x498   : > { %v14450_v33 = vadd.f32 %v7152_v39, %v7009_v48  ;;  %v7841_v32 = vadd.f32 %v15947_v61, %v15946_v58  ;;  %v7842_v45 = vadd.f32 %v15949_v19, %v15948_v17  ;;  %v7843_v4 = vadd.f32 %v15951_v37, %v15950_v15 }
 0x499   : > { %v7844_v9 = vadd.f32 %v15953_v16, %v15952_v26  ;;  %v7846_v52 = vcombine.high %v15954_v53, %v15954_v53  ;;  %v7853_v36 = vrot.slane %v15954_v53, %v15955_v63  ;;  %v15959_v26 = vld [vmem:[#allocation15_spill] sm:$0xff]  ;;  %v15960_v53 = vld [vmem:[#allocation45_spill] sm:$0xff] }
 0x49b   : > { %v7860_v55 = vrot.slane %v7846_v52, %v15955_v63  ;;  %v7861_v1 = vcombine.high %v7853_v36, %v7853_v36  ;;  %v7869_v41 = vrot.slane %v7853_v36, %v15955_v63  ;;  %v15961_v36 = vld [vmem:[#allocation46_spill] sm:$0xff] }
 0x49d   : > { %v7862_v27 = vcombine.high %v7860_v55, %v7860_v55  ;;  %v7876_v18 = vrot.slane %v7860_v55, %v15955_v63  ;;  %v7883_v50 = vrot.slane %v7861_v1, %v15955_v63  ;;  %v7891_v7 = vcombine.high %v7869_v41, %v7869_v41  ;;  %v15962_v1 = vld [vmem:[#allocation47_spill] sm:$0xff] }
 0x49e   : > { %v7897_v2 = vrot.slane %v7869_v41, %v15956_v3 }
 0x49f   : > { %v7890_v60 = vrot.slane %v7862_v27, %v15955_v63  ;;  %v7892_v46 = vcombine.high %v7876_v18, %v7876_v18  ;;  %v7893_v13 = vcombine.high %v7883_v50, %v7883_v50  ;;  %v7901_v39 = vrot.slane %v7883_v50, %v15956_v3  ;;  %v15963_v27 = vld [vmem:[#allocation48_spill] sm:$0xff]  ;;  %v15964_v50 = vld [vmem:[#allocation49_spill] sm:$0xff] }
 0x4a0   : > { %v7905_v62 = vrot.slane %v7891_v7, %v15956_v3  ;;  %v7913_v28 = vrot.slane %v7876_v18, %v15956_v3  ;;  %v7929_v29 = vmul.f32 %v7897_v2, %v15957_v44  ;;  %v7930_v11 = vmul.f32 %v7897_v2, %v15958_v34  ;;  %v15965_v2 = vld [vmem:[#allocation50_spill] sm:$0xff] }
 0x4a1   : > { %v7909_v12 = vrot.slane %v7893_v13, %v15956_v3  ;;  %v7917_v8 = vrot.slane %v7890_v60, %v15956_v3  ;;  %v7921_v20 = vrot.slane %v7892_v46, %v15956_v3  ;;  %v7931_v51 = vmul.f32 %v7901_v39, %v15957_v44  ;;  %v15966_v46 = vld [vmem:[#allocation51_spill] sm:$0xff] }
 0x4a2   : > { %v7932_v43 = vmul.f32 %v7901_v39, %v15958_v34  ;;  %v7933_v30 = vmul.f32 %v7905_v62, %v15957_v44  ;;  %v7934_v25 = vmul.f32 %v7905_v62, %v15958_v34  ;;  %v7937_v10 = vmul.f32 %v7913_v28, %v15957_v44  ;;  %v15967_v39 = vld [vmem:[#allocation63_spill] sm:$0xff] }
 0x4a3   : > { %v7935_v48 = vmul.f32 %v7909_v12, %v15957_v44  ;;  %v7936_v58 = vmul.f32 %v7909_v12, %v15958_v34  ;;  %v7938_v61 = vmul.f32 %v7913_v28, %v15958_v34  ;;  %v7939_v17 = vmul.f32 %v7917_v8, %v15957_v44  ;;  %v15968_v28 = vld [vmem:[#allocation53_spill] sm:$0xff] }
 0x4a4   : > { %v7940_v19 = vmul.f32 %v7917_v8, %v15958_v34  ;;  %v7941_v15 = vmul.f32 %v7921_v20, %v15957_v44  ;;  %v7942_v37 = vmul.f32 %v7921_v20, %v15958_v34  ;;  %v7943_v16 = vadd.f32 %v7929_v29, %v15959_v26 }
 0x4a5   : > { %v7944_v52 = vadd.f32 %v7930_v11, %v15960_v53  ;;  %v7945_v55 = vadd.f32 %v7931_v51, %v15961_v36  ;;  %v7946_v41 = vadd.f32 %v7932_v43, %v15962_v1  ;;  %v14495_v18 = vadd.f32 %v7933_v30, %v15963_v27 }
 0x4a6   : > { %v14498_v7 = vadd.f32 %v7934_v25, %v15964_v50  ;;  %v14501_v60 = vadd.f32 %v7935_v48, %v15965_v2  ;;  %v14504_v13 = vadd.f32 %v7936_v58, %v15966_v46  ;;  %v14507_v62 = vadd.f32 %v7937_v10, %v15967_v39  ;;  %v15973_v39 = vld [vmem:[#allocation30_spill] sm:$0xff] }
 0x4a7   : > { %v14510_v44 = vadd.f32 %v7938_v61, %v15968_v28  ;;  %v14512_v29 = vadd.f32 %v7939_v17, %v7841_v32  ;;  %v14514_v34 = vadd.f32 %v7940_v19, %v7842_v45  ;;  %v14516_v11 = vadd.f32 %v7941_v15, %v7843_v4 }
 0x4a8   : > { %v14518_v12 = vadd.f32 %v7942_v37, %v7844_v9  ;;  %v7959_v8 = vcombine.high %v7943_v16, %v7943_v16  ;;  %v7966_v20 = vrot.slane %v7943_v16, %v15955_v63  ;;  %v8014_v51 = vrot.slane %v7944_v52, %v15955_v63 }
 0x4a9   : > { %15969 = vst [vmem:[#allocation57_spill] sm:$0xff] %v14512_v29  ;;  %15970 = vst [vmem:[#allocation58_spill] sm:$0xff] %v14514_v34  ;;  %v8122_v43 = vcombine.high %v7945_v55, %v7945_v55  ;;  %v14523_v30 = vrot.slane %v7945_v55, %v15955_v63  ;;  %v14526_v25 = vrot.slane %v7946_v41, %v15955_v63 }
 0x4aa   : > { %15971 = vst [vmem:[#allocation92_spill] sm:$0xff] %v14516_v11  ;;  %15972 = vst [vmem:[#allocation70_spill] sm:$0xff] %v14518_v12  ;;  %v7973_v45 = vrot.slane %v7959_v8, %v15955_v63  ;;  %v7974_v4 = vcombine.high %v7966_v20, %v7966_v20  ;;  %v7982_v9 = vrot.slane %v7966_v20, %v15955_v63 }
 0x4ab   : > { %v8015_v10 = vcombine.high %v8014_v51, %v8014_v51  ;;  %v8022_v48 = vrot.slane %v8014_v51, %v15955_v63  ;;  %v14534_v58 = vrot.slane %v8122_v43, %v15955_v63  ;;  %v14540_v17 = vrot.slane %v14523_v30, %v15955_v63 }
 0x4ac   : > { %v7975_v19 = vcombine.high %v7973_v45, %v7973_v45  ;;  %v7989_v15 = vrot.slane %v7973_v45, %v15955_v63  ;;  %v7996_v37 = vrot.slane %v7974_v4, %v15955_v63  ;;  %v8004_v26 = vcombine.high %v7982_v9, %v7982_v9  ;;  %v15974_v45 = vld [vmem:[#allocation31_spill] sm:$0xff] }
 0x4ad   : > { %v8029_v16 = vrot.slane %v8015_v10, %v15955_v63  ;;  %v8033_v53 = vrot.slane %v7982_v9, %v15956_v3  ;;  %v8065_v52 = vrot.slane %v8022_v48, %v15956_v3  ;;  %v8138_v36 = vcombine.high %v14534_v58, %v14534_v58 }
 0x4ae   : > { %v8003_v55 = vrot.slane %v7975_v19, %v15955_v63  ;;  %v8005_v1 = vcombine.high %v7989_v15, %v7989_v15  ;;  %v8006_v41 = vcombine.high %v7996_v37, %v7996_v37  ;;  %v8037_v27 = vrot.slane %v7996_v37, %v15956_v3 }
 0x4af   : > { %v8041_v50 = vrot.slane %v8004_v26, %v15956_v3  ;;  %v8049_v2 = vrot.slane %v7989_v15, %v15956_v3  ;;  %v8069_v46 = vrot.slane %v8029_v16, %v15956_v3  ;;  %v8080_v28 = vmul.f32 %v8033_v53, %v15973_v39 }
 0x4b0   : > { %v8007_v8 = vcombine.high %v8003_v55, %v8003_v55  ;;  %v8045_v20 = vrot.slane %v8006_v41, %v15956_v3  ;;  %v8053_v51 = vrot.slane %v8003_v55, %v15956_v3  ;;  %v8057_v43 = vrot.slane %v8005_v1, %v15956_v3 }
 0x4b1   : > { %v8081_v4 = vmul.f32 %v8033_v53, %v15974_v45  ;;  %v8082_v9 = vmul.f32 %v8037_v27, %v15973_v39  ;;  %v8083_v10 = vmul.f32 %v8037_v27, %v15974_v45  ;;  %v8084_v48 = vmul.f32 %v8041_v50, %v15973_v39 }
 0x4b2   : > { %v8061_v19 = vrot.slane %v8007_v8, %v15956_v3  ;;  %v8085_v15 = vmul.f32 %v8041_v50, %v15974_v45  ;;  %v8086_v37 = vmul.f32 %v8045_v20, %v15973_v39  ;;  %v8087_v26 = vmul.f32 %v8045_v20, %v15974_v45 }
 0x4b3   : > { %v8088_v16 = vmul.f32 %v8049_v2, %v15973_v39  ;;  %v8089_v55 = vmul.f32 %v8049_v2, %v15974_v45  ;;  %v8090_v53 = vmul.f32 %v8053_v51, %v15973_v39  ;;  %v8091_v1 = vmul.f32 %v8053_v51, %v15974_v45 }
 0x4b4   : > { %v8092_v41 = vmul.f32 %v8057_v43, %v15973_v39  ;;  %v8093_v27 = vmul.f32 %v8057_v43, %v15974_v45  ;;  %v8094_v8 = vmul.f32 %v8061_v19, %v15973_v39  ;;  %v8095_v50 = vmul.f32 %v8061_v19, %v15974_v45 }
 0x4b5   : > { %v8096_v32 = vmul.f32 %v8065_v52, %v15973_v39  ;;  %v8097_v20 = vmul.f32 %v8065_v52, %v15974_v45  ;;  %v8098_v61 = vmul.f32 %v8069_v46, %v15973_v39  ;;  %v8099_v2 = vmul.f32 %v8069_v46, %v15974_v45 }
 0x4b6   : > { %v8100_v12 = vadd.f32 %v8080_v28, %v14412_v31  ;;  %v8101_v51 = vadd.f32 %v8081_v4, %v14414_v57  ;;  %v8102_v11 = vadd.f32 %v8082_v9, %v14416_v6  ;;  %v8103_v43 = vadd.f32 %v8083_v10, %v14418_v22 }
 0x4b7   : > { %v8104_v34 = vadd.f32 %v8084_v48, %v14420_v21  ;;  %v8105_v19 = vadd.f32 %v8085_v15, %v14422_v14  ;;  %v8106_v29 = vadd.f32 %v8086_v37, %v14424_v42  ;;  %v8107_v52 = vadd.f32 %v8087_v26, %v14426_v56  ;;  %v15976_v48 = vld [vmem:[#allocation32_spill] sm:$0xff]  ;;  %v15977_v37 = vld [vmem:[#allocation33_spill] sm:$0xff] }
 0x4b8   : > { %v8108_v39 = vadd.f32 %v8088_v16, %v14428_v0  ;;  %v8109_v46 = vadd.f32 %v8089_v55, %v14430_v24  ;;  %v8110_v31 = vadd.f32 %v8090_v53, %v14432_v54  ;;  %v8111_v57 = vadd.f32 %v8091_v1, %v14434_v5 }
 0x4b9   : > { %v8112_v6 = vadd.f32 %v8092_v41, %v14436_v40  ;;  %v8113_v22 = vadd.f32 %v8093_v27, %v14438_v49  ;;  %v8114_v21 = vadd.f32 %v8094_v8, %v14440_v38  ;;  %v8115_v14 = vadd.f32 %v8095_v50, %v14442_v35 }
 0x4ba   : > { %v8116_v42 = vadd.f32 %v8096_v32, %v14444_v23  ;;  %v8117_v56 = vadd.f32 %v8097_v20, %v14446_v47  ;;  %v8118_v0 = vadd.f32 %v8098_v61, %v14448_v59  ;;  %v8119_v24 = vadd.f32 %v8099_v2, %v14450_v33 }
 0x4bb   : > { %v8152_v54 = vrot.slane %v14534_v58, %v15955_v63  ;;  %v15975_v5 = vcombine.high %v14523_v30, %v14523_v30  ;;  %v8166_v49 = vrot.slane %v8138_v36, %v15955_v63  ;;  %v8167_v38 = vcombine.high %v14540_v17, %v14540_v17 }
 0x4bc   : > { %v8178_v35 = vcombine.high %v14526_v25, %v14526_v25  ;;  %v8185_v23 = vrot.slane %v14526_v25, %v15955_v63  ;;  %v8196_v47 = vrot.slane %v14540_v17, %v15956_v3  ;;  %v14615_v59 = vrot.slane %v14495_v18, %v15955_v63 }
 0x4bd   : > { %v8159_v40 = vrot.slane %v15975_v5, %v15955_v63  ;;  %v8168_v33 = vcombine.high %v8152_v54, %v8152_v54  ;;  %v8170_v32 = vcombine.high %v8166_v49, %v8166_v49  ;;  %v8204_v36 = vrot.slane %v8167_v38, %v15956_v3 }
 0x4be   : > { %v8192_v61 = vrot.slane %v8178_v35, %v15955_v63  ;;  %v8212_v28 = vrot.slane %v8152_v54, %v15956_v3  ;;  %v8216_v25 = vrot.slane %v8166_v49, %v15956_v3  ;;  %v8228_v9 = vrot.slane %v8185_v23, %v15956_v3 }
 0x4bf   : > { %v8169_v30 = vcombine.high %v8159_v40, %v8159_v40  ;;  %v8200_v58 = vrot.slane %v8159_v40, %v15956_v3  ;;  %v8220_v17 = vrot.slane %v8168_v33, %v15956_v3  ;;  %v8224_v4 = vrot.slane %v8170_v32, %v15956_v3 }
 0x4c0   : > { %v8232_v10 = vrot.slane %v8192_v61, %v15956_v3  ;;  %v8243_v15 = vmul.f32 %v8196_v47, %v15976_v48  ;;  %v8244_v26 = vmul.f32 %v8196_v47, %v15977_v37  ;;  %v8247_v53 = vmul.f32 %v8204_v36, %v15976_v48 }
 0x4c1   : > { %v8208_v45 = vrot.slane %v8169_v30, %v15956_v3  ;;  %v8245_v16 = vmul.f32 %v8200_v58, %v15976_v48  ;;  %v8246_v55 = vmul.f32 %v8200_v58, %v15977_v37  ;;  %v8248_v1 = vmul.f32 %v8204_v36, %v15977_v37 }
 0x4c2   : > { %v8251_v8 = vmul.f32 %v8212_v28, %v15976_v48  ;;  %v8252_v50 = vmul.f32 %v8212_v28, %v15977_v37  ;;  %v8253_v20 = vmul.f32 %v8216_v25, %v15976_v48  ;;  %v8254_v2 = vmul.f32 %v8216_v25, %v15977_v37 }
 0x4c3   : > { %v8249_v41 = vmul.f32 %v8208_v45, %v15976_v48  ;;  %v8250_v27 = vmul.f32 %v8208_v45, %v15977_v37  ;;  %v8255_v54 = vmul.f32 %v8220_v17, %v15976_v48  ;;  %v8256_v5 = vmul.f32 %v8220_v17, %v15977_v37 }
 0x4c4   : > { %v8257_v40 = vmul.f32 %v8224_v4, %v15976_v48  ;;  %v8258_v49 = vmul.f32 %v8224_v4, %v15977_v37  ;;  %v8259_v38 = vmul.f32 %v8228_v9, %v15976_v48  ;;  %v8260_v35 = vmul.f32 %v8228_v9, %v15977_v37 }
 0x4c5   : > { %v8261_v23 = vmul.f32 %v8232_v10, %v15976_v48  ;;  %v8262_v47 = vmul.f32 %v8232_v10, %v15977_v37  ;;  %v14647_v33 = vadd.f32 %v8243_v15, %v8100_v12  ;;  %v14649_v30 = vadd.f32 %v8244_v26, %v8101_v51 }
 0x4c6   : > { %v14651_v32 = vadd.f32 %v8245_v16, %v8102_v11  ;;  %v14653_v58 = vadd.f32 %v8246_v55, %v8103_v43  ;;  %v14655_v61 = vadd.f32 %v8247_v53, %v8104_v34  ;;  %v14657_v36 = vadd.f32 %v8248_v1, %v8105_v19 }
 0x4c7   : > { %v14659_v28 = vadd.f32 %v8249_v41, %v8106_v29  ;;  %v14661_v25 = vadd.f32 %v8250_v27, %v8107_v52  ;;  %v14663_v45 = vadd.f32 %v8251_v8, %v8108_v39  ;;  %v14665_v17 = vadd.f32 %v8252_v50, %v8109_v46  ;;  %v15979_v50 = vld [vmem:[#allocation34_spill] sm:$0xff] }
 0x4c8   : > { %v14667_v12 = vadd.f32 %v8253_v20, %v8110_v31  ;;  %v14669_v51 = vadd.f32 %v8254_v2, %v8111_v57  ;;  %v14671_v11 = vadd.f32 %v8255_v54, %v8112_v6  ;;  %v14673_v43 = vadd.f32 %v8256_v5, %v8113_v22  ;;  %v15980_v2 = vld [vmem:[#allocation35_spill] sm:$0xff] }
 0x4c9   : > { %v14675_v34 = vadd.f32 %v8257_v40, %v8114_v21  ;;  %v14677_v19 = vadd.f32 %v8258_v49, %v8115_v14  ;;  %v14679_v29 = vadd.f32 %v8259_v38, %v8116_v42  ;;  %v14681_v52 = vadd.f32 %v8260_v35, %v8117_v56 }
 0x4ca   : > { %v14683_v39 = vadd.f32 %v8261_v23, %v8118_v0  ;;  %v14685_v46 = vadd.f32 %v8262_v47, %v8119_v24  ;;  %v15978_v31 = vcombine.high %v14495_v18, %v14495_v18  ;;  %v8300_v6 = vcombine.high %v14615_v59, %v14615_v59 }
 0x4cb   : > { %v8308_v22 = vrot.slane %v14615_v59, %v15955_v63  ;;  %v8340_v21 = vrot.slane %v14498_v7, %v15955_v63  ;;  %v8448_v14 = vcombine.high %v14501_v60, %v14501_v60  ;;  %v14701_v42 = vrot.slane %v14501_v60, %v15955_v63 }
 0x4cc   : > { %v8299_v57 = vrot.slane %v15978_v31, %v15955_v63  ;;  %v14705_v18 = vrot.slane %v14504_v13, %v15955_v63  ;;  %v8322_v24 = vrot.slane %v8300_v6, %v15955_v63 }
 0x4cd   : > { %v8330_v59 = vcombine.high %v8308_v22, %v8308_v22  ;;  %v8341_v4 = vcombine.high %v8340_v21, %v8340_v21  ;;  %v8348_v7 = vrot.slane %v8340_v21, %v15955_v63  ;;  %v8359_v9 = vrot.slane %v8308_v22, %v15956_v3 }
 0x4ce   : > { %v8301_v56 = vcombine.high %v8299_v57, %v8299_v57  ;;  %v8315_v0 = vrot.slane %v8299_v57, %v15955_v63  ;;  %v14712_v10 = vrot.slane %v8448_v14, %v15955_v63  ;;  %v8332_v15 = vcombine.high %v8322_v24, %v8322_v24 }
 0x4cf   : > { %v8363_v13 = vrot.slane %v8322_v24, %v15956_v3  ;;  %v8355_v37 = vrot.slane %v8341_v4, %v15955_v63  ;;  %v8367_v26 = vrot.slane %v8330_v59, %v15956_v3  ;;  %v8391_v55 = vrot.slane %v8348_v7, %v15956_v3 }
 0x4d0   : > { %v8329_v60 = vrot.slane %v8301_v56, %v15955_v63  ;;  %v8331_v48 = vcombine.high %v8315_v0, %v8315_v0  ;;  %v8375_v16 = vrot.slane %v8315_v0, %v15956_v3  ;;  %v8371_v1 = vrot.slane %v8332_v15, %v15956_v3 }
 0x4d1   : > { %v8395_v8 = vrot.slane %v8355_v37, %v15956_v3  ;;  %v8406_v20 = vmul.f32 %v8359_v9, %v15979_v50  ;;  %v8407_v54 = vmul.f32 %v8359_v9, %v15980_v2  ;;  %v8408_v5 = vmul.f32 %v8363_v13, %v15979_v50 }
 0x4d2   : > { %v8333_v53 = vcombine.high %v8329_v60, %v8329_v60  ;;  %v8379_v41 = vrot.slane %v8329_v60, %v15956_v3  ;;  %v8383_v27 = vrot.slane %v8331_v48, %v15956_v3  ;;  %v8409_v49 = vmul.f32 %v8363_v13, %v15980_v2 }
 0x4d3   : > { %v8410_v38 = vmul.f32 %v8367_v26, %v15979_v50  ;;  %v8411_v35 = vmul.f32 %v8367_v26, %v15980_v2  ;;  %v8412_v23 = vmul.f32 %v8371_v1, %v15979_v50  ;;  %v8413_v47 = vmul.f32 %v8371_v1, %v15980_v2 }
 0x4d4   : > { %v8387_v40 = vrot.slane %v8333_v53, %v15956_v3  ;;  %v8414_v31 = vmul.f32 %v8375_v16, %v15979_v50  ;;  %v8415_v57 = vmul.f32 %v8375_v16, %v15980_v2  ;;  %v8416_v6 = vmul.f32 %v8379_v41, %v15979_v50 }
 0x4d5   : > { %v8417_v22 = vmul.f32 %v8379_v41, %v15980_v2  ;;  %v8418_v21 = vmul.f32 %v8383_v27, %v15979_v50  ;;  %v8419_v14 = vmul.f32 %v8383_v27, %v15980_v2  ;;  %v8422_v24 = vmul.f32 %v8391_v55, %v15979_v50 }
 0x4d6   : > { %v8420_v56 = vmul.f32 %v8387_v40, %v15979_v50  ;;  %v8421_v0 = vmul.f32 %v8387_v40, %v15980_v2  ;;  %v8423_v59 = vmul.f32 %v8391_v55, %v15980_v2  ;;  %v8424_v4 = vmul.f32 %v8395_v8, %v15979_v50 }
 0x4d7   : > { %v8425_v7 = vmul.f32 %v8395_v8, %v15980_v2  ;;  %v14746_v9 = vadd.f32 %v8406_v20, %v14647_v33  ;;  %v14749_v60 = vadd.f32 %v8407_v54, %v14649_v30  ;;  %v14752_v48 = vadd.f32 %v8408_v5, %v14651_v32 }
 0x4d8   : > { %v14755_v15 = vadd.f32 %v8409_v49, %v14653_v58  ;;  %v14758_v13 = vadd.f32 %v8410_v38, %v14655_v61  ;;  %v14761_v37 = vadd.f32 %v8411_v35, %v14657_v36  ;;  %v14764_v26 = vadd.f32 %v8412_v23, %v14659_v28  ;;  %v15981_v38 = vld [vmem:[#allocation36_spill] sm:$0xff]  ;;  %v15982_v23 = vld [vmem:[#allocation37_spill] sm:$0xff] }
 0x4d9   : > { %v14767_v33 = vadd.f32 %v8413_v47, %v14661_v25  ;;  %v14770_v30 = vadd.f32 %v8414_v31, %v14663_v45  ;;  %v14773_v32 = vadd.f32 %v8415_v57, %v14665_v17  ;;  %v14776_v58 = vadd.f32 %v8416_v6, %v14667_v12 }
 0x4da   : > { %v14779_v61 = vadd.f32 %v8417_v22, %v14669_v51  ;;  %v14782_v36 = vadd.f32 %v8418_v21, %v14671_v11  ;;  %v14785_v28 = vadd.f32 %v8419_v14, %v14673_v43  ;;  %v14788_v25 = vadd.f32 %v8420_v56, %v14675_v34 }
 0x4db   : > { %v14791_v45 = vadd.f32 %v8421_v0, %v14677_v19  ;;  %v14794_v17 = vadd.f32 %v8422_v24, %v14679_v29  ;;  %v14797_v12 = vadd.f32 %v8423_v59, %v14681_v52  ;;  %v14800_v51 = vadd.f32 %v8424_v4, %v14683_v39 }
 0x4dc   : > { %v14803_v11 = vadd.f32 %v8425_v7, %v14685_v46  ;;  %v8463_v43 = vcombine.high %v14701_v42, %v14701_v42  ;;  %v8464_v34 = vcombine.high %v14712_v10, %v14712_v10  ;;  %v8471_v19 = vrot.slane %v14701_v42, %v15955_v63 }
 0x4dd   : > { %v8478_v29 = vrot.slane %v14712_v10, %v15955_v63  ;;  %v8504_v52 = vcombine.high %v14705_v18, %v14705_v18  ;;  %v8511_v39 = vrot.slane %v14705_v18, %v15955_v63  ;;  %v8611_v55 = vcombine.high %v14507_v62, %v14507_v62 }
 0x4de   : > { %v8485_v46 = vrot.slane %v8463_v43, %v15955_v63  ;;  %v8492_v16 = vrot.slane %v8464_v34, %v15955_v63  ;;  %v14823_v53 = vrot.slane %v14507_v62, %v15955_v63  ;;  %v8493_v42 = vcombine.high %v8471_v19, %v8471_v19 }
 0x4df   : > { %v8494_v1 = vcombine.high %v8478_v29, %v8478_v29  ;;  %v8518_v10 = vrot.slane %v8504_v52, %v15955_v63  ;;  %v8522_v41 = vrot.slane %v8471_v19, %v15956_v3  ;;  %v8538_v50 = vrot.slane %v8478_v29, %v15956_v3 }
 0x4e0   : > { %v8495_v27 = vcombine.high %v8485_v46, %v8485_v46  ;;  %v8496_v8 = vcombine.high %v8492_v16, %v8492_v16  ;;  %v8526_v18 = vrot.slane %v8485_v46, %v15956_v3  ;;  %v8530_v20 = vrot.slane %v8493_v42, %v15956_v3 }
 0x4e1   : > { %v8542_v2 = vrot.slane %v8492_v16, %v15956_v3  ;;  %v8546_v54 = vrot.slane %v8494_v1, %v15956_v3  ;;  %v8554_v62 = vrot.slane %v8511_v39, %v15956_v3  ;;  %v8558_v49 = vrot.slane %v8518_v10, %v15956_v3 }
 0x4e2   : > { %v8534_v5 = vrot.slane %v8495_v27, %v15956_v3  ;;  %v8550_v40 = vrot.slane %v8496_v8, %v15956_v3  ;;  %v8569_v35 = vmul.f32 %v8522_v41, %v15981_v38  ;;  %v8570_v47 = vmul.f32 %v8522_v41, %v15982_v23  ;;  %v15983_v8 = vld [vmem:[#allocation57_spill] sm:$0xff] }
 0x4e3   : > { %v8571_v31 = vmul.f32 %v8526_v18, %v15981_v38  ;;  %v8572_v57 = vmul.f32 %v8526_v18, %v15982_v23  ;;  %v8573_v6 = vmul.f32 %v8530_v20, %v15981_v38  ;;  %v8574_v22 = vmul.f32 %v8530_v20, %v15982_v23 }
 0x4e4   : > { %v8575_v21 = vmul.f32 %v8534_v5, %v15981_v38  ;;  %v8576_v14 = vmul.f32 %v8534_v5, %v15982_v23  ;;  %v8577_v56 = vmul.f32 %v8538_v50, %v15981_v38  ;;  %v8578_v0 = vmul.f32 %v8538_v50, %v15982_v23 }
 0x4e5   : > { %v8579_v24 = vmul.f32 %v8542_v2, %v15981_v38  ;;  %v8580_v59 = vmul.f32 %v8542_v2, %v15982_v23  ;;  %v8581_v4 = vmul.f32 %v8546_v54, %v15981_v38  ;;  %v8582_v7 = vmul.f32 %v8546_v54, %v15982_v23 }
 0x4e6   : > { %v8583_v43 = vmul.f32 %v8550_v40, %v15981_v38  ;;  %v8584_v34 = vmul.f32 %v8550_v40, %v15982_v23  ;;  %v8585_v19 = vmul.f32 %v8554_v62, %v15981_v38  ;;  %v8586_v29 = vmul.f32 %v8554_v62, %v15982_v23 }
 0x4e7   : > { %v8587_v52 = vmul.f32 %v8558_v49, %v15981_v38  ;;  %v8588_v39 = vmul.f32 %v8558_v49, %v15982_v23  ;;  %v14857_v46 = vadd.f32 %v8569_v35, %v14746_v9  ;;  %v14860_v16 = vadd.f32 %v8570_v47, %v14749_v60 }
 0x4e8   : > { %v14863_v42 = vadd.f32 %v8571_v31, %v14752_v48  ;;  %v14866_v1 = vadd.f32 %v8572_v57, %v14755_v15  ;;  %v14869_v10 = vadd.f32 %v8573_v6, %v14758_v13  ;;  %v14872_v41 = vadd.f32 %v8574_v22, %v14761_v37 }
 0x4e9   : > { %v14875_v27 = vadd.f32 %v8575_v21, %v14764_v26  ;;  %v14878_v9 = vadd.f32 %v8576_v14, %v14767_v33  ;;  %v14881_v60 = vadd.f32 %v8577_v56, %v14770_v30  ;;  %v14884_v48 = vadd.f32 %v8578_v0, %v14773_v32  ;;  %v15985_v14 = vld [vmem:[#allocation38_spill] sm:$0xff]  ;;  %v15986_v0 = vld [vmem:[#allocation39_spill] sm:$0xff] }
 0x4ea   : > { %v14887_v15 = vadd.f32 %v8579_v24, %v14776_v58  ;;  %v14890_v13 = vadd.f32 %v8580_v59, %v14779_v61  ;;  %v14893_v37 = vadd.f32 %v8581_v4, %v14782_v36  ;;  %v14896_v26 = vadd.f32 %v8582_v7, %v14785_v28 }
 0x4eb   : > { %v14899_v33 = vadd.f32 %v8583_v43, %v14788_v25  ;;  %v14902_v30 = vadd.f32 %v8584_v34, %v14791_v45  ;;  %v14905_v32 = vadd.f32 %v8585_v19, %v14794_v17  ;;  %v14908_v58 = vadd.f32 %v8586_v29, %v14797_v12 }
 0x4ec   : > { %v14911_v61 = vadd.f32 %v8587_v52, %v14800_v51  ;;  %v14914_v36 = vadd.f32 %v8588_v39, %v14803_v11  ;;  %v8625_v28 = vrot.slane %v8611_v55, %v15955_v63  ;;  %v8626_v25 = vcombine.high %v14823_v53, %v14823_v53  ;;  %v15984_v55 = vld [vmem:[#allocation58_spill] sm:$0xff] }
 0x4ed   : > { %v8634_v45 = vrot.slane %v14823_v53, %v15955_v63  ;;  %v8666_v17 = vrot.slane %v14510_v44, %v15955_v63  ;;  %v8774_v12 = vcombine.high %v15983_v8, %v15983_v8  ;;  %v14928_v11 = vrot.slane %v15983_v8, %v15955_v63 }
 0x4ee   : > { %v8627_v18 = vcombine.high %v8625_v28, %v8625_v28  ;;  %v8641_v51 = vrot.slane %v8625_v28, %v15955_v63  ;;  %v14932_v50 = vrot.slane %v15984_v55, %v15955_v63  ;;  %v8648_v20 = vrot.slane %v8626_v25, %v15955_v63 }
 0x4ef   : > { %v8656_v53 = vcombine.high %v8634_v45, %v8634_v45  ;;  %v8667_v2 = vcombine.high %v8666_v17, %v8666_v17  ;;  %v8674_v44 = vrot.slane %v8666_v17, %v15955_v63  ;;  %v8685_v5 = vrot.slane %v8634_v45, %v15956_v3 }
 0x4f0   : > { %v8655_v54 = vrot.slane %v8627_v18, %v15955_v63  ;;  %v8657_v62 = vcombine.high %v8641_v51, %v8641_v51  ;;  %v8701_v40 = vrot.slane %v8641_v51, %v15956_v3  ;;  %v8658_v49 = vcombine.high %v8648_v20, %v8648_v20 }
 0x4f1   : > { %v8681_v38 = vrot.slane %v8667_v2, %v15955_v63  ;;  %v8689_v35 = vrot.slane %v8648_v20, %v15956_v3  ;;  %v8693_v23 = vrot.slane %v8656_v53, %v15956_v3  ;;  %v8717_v6 = vrot.slane %v8674_v44, %v15956_v3 }
 0x4f2   : > { %v8659_v47 = vcombine.high %v8655_v54, %v8655_v54  ;;  %v8705_v31 = vrot.slane %v8655_v54, %v15956_v3  ;;  %v8709_v57 = vrot.slane %v8657_v62, %v15956_v3  ;;  %v8697_v22 = vrot.slane %v8658_v49, %v15956_v3 }
 0x4f3   : > { %v8721_v21 = vrot.slane %v8681_v38, %v15956_v3  ;;  %v8732_v56 = vmul.f32 %v8685_v5, %v15985_v14  ;;  %v8733_v24 = vmul.f32 %v8685_v5, %v15986_v0  ;;  %v8734_v4 = vmul.f32 %v8689_v35, %v15985_v14 }
 0x4f4   : > { %v8713_v59 = vrot.slane %v8659_v47, %v15956_v3  ;;  %v8735_v7 = vmul.f32 %v8689_v35, %v15986_v0  ;;  %v8736_v43 = vmul.f32 %v8693_v23, %v15985_v14  ;;  %v8737_v34 = vmul.f32 %v8693_v23, %v15986_v0  ;;  %v15987_v35 = vld [vmem:[#allocation92_spill] sm:$0xff] }
 0x4f5   : > { %v8738_v19 = vmul.f32 %v8697_v22, %v15985_v14  ;;  %v8739_v29 = vmul.f32 %v8697_v22, %v15986_v0  ;;  %v8740_v52 = vmul.f32 %v8701_v40, %v15985_v14  ;;  %v8741_v39 = vmul.f32 %v8701_v40, %v15986_v0 }
 0x4f6   : > { %v8742_v28 = vmul.f32 %v8705_v31, %v15985_v14  ;;  %v8743_v25 = vmul.f32 %v8705_v31, %v15986_v0  ;;  %v8744_v45 = vmul.f32 %v8709_v57, %v15985_v14  ;;  %v8745_v17 = vmul.f32 %v8709_v57, %v15986_v0 }
 0x4f7   : > { %v8746_v18 = vmul.f32 %v8713_v59, %v15985_v14  ;;  %v8747_v51 = vmul.f32 %v8713_v59, %v15986_v0  ;;  %v8748_v55 = vmul.f32 %v8717_v6, %v15985_v14  ;;  %v8749_v20 = vmul.f32 %v8717_v6, %v15986_v0 }
 0x4f8   : > { %v8750_v53 = vmul.f32 %v8721_v21, %v15985_v14  ;;  %v8751_v2 = vmul.f32 %v8721_v21, %v15986_v0  ;;  %v14969_v44 = vadd.f32 %v8732_v56, %v14857_v46  ;;  %v14972_v54 = vadd.f32 %v8733_v24, %v14860_v16 }
 0x4f9   : > { %v14975_v62 = vadd.f32 %v8734_v4, %v14863_v42  ;;  %v14978_v5 = vadd.f32 %v8735_v7, %v14866_v1  ;;  %v14981_v40 = vadd.f32 %v8736_v43, %v14869_v10  ;;  %v14984_v49 = vadd.f32 %v8737_v34, %v14872_v41  ;;  %v15988_v7 = vld [vmem:[#allocation68_spill] sm:$0xff] }
 0x4fa   : > { %v14987_v38 = vadd.f32 %v8738_v19, %v14875_v27  ;;  %v14990_v46 = vadd.f32 %v8739_v29, %v14878_v9  ;;  %v14993_v16 = vadd.f32 %v8740_v52, %v14881_v60  ;;  %v14996_v42 = vadd.f32 %v8741_v39, %v14884_v48  ;;  %v15989_v19 = vld [vmem:[#allocation93_spill] sm:$0xff] }
 0x4fb   : > { %v14999_v1 = vadd.f32 %v8742_v28, %v14887_v15  ;;  %v15002_v10 = vadd.f32 %v8743_v25, %v14890_v13  ;;  %v15005_v41 = vadd.f32 %v8744_v45, %v14893_v37  ;;  %v15008_v27 = vadd.f32 %v8745_v17, %v14896_v26 }
 0x4fc   : > { %v15011_v9 = vadd.f32 %v8746_v18, %v14899_v33  ;;  %v15014_v60 = vadd.f32 %v8747_v51, %v14902_v30  ;;  %v15017_v48 = vadd.f32 %v8748_v55, %v14905_v32  ;;  %v15020_v15 = vadd.f32 %v8749_v20, %v14908_v58 }
 0x4fd   : > { %v15023_v13 = vadd.f32 %v8750_v53, %v14911_v61  ;;  %v15026_v37 = vadd.f32 %v8751_v2, %v14914_v36  ;;  %v8788_v26 = vrot.slane %v8774_v12, %v15955_v63  ;;  %v8789_v33 = vcombine.high %v14928_v11, %v14928_v11 }
 0x4fe   : > { %v8797_v30 = vrot.slane %v14928_v11, %v15955_v63  ;;  %v8830_v32 = vcombine.high %v14932_v50, %v14932_v50  ;;  %v8837_v58 = vrot.slane %v14932_v50, %v15955_v63  ;;  %v8937_v23 = vcombine.high %v15987_v35, %v15987_v35 }
 0x4ff   : > { %v8790_v61 = vcombine.high %v8788_v26, %v8788_v26  ;;  %v8804_v36 = vrot.slane %v8788_v26, %v15955_v63  ;;  %v15045_v8 = vrot.slane %v15987_v35, %v15955_v63  ;;  %v8811_v12 = vrot.slane %v8789_v33, %v15955_v63 }
 0x500   : > { %v8819_v47 = vcombine.high %v8797_v30, %v8797_v30  ;;  %v8844_v11 = vrot.slane %v8830_v32, %v15955_v63  ;;  %v8848_v31 = vrot.slane %v8797_v30, %v15956_v3  ;;  %v8880_v22 = vrot.slane %v8837_v58, %v15956_v3 }
 0x501   : > { %v8818_v57 = vrot.slane %v8790_v61, %v15955_v63  ;;  %v8820_v50 = vcombine.high %v8804_v36, %v8804_v36  ;;  %v8864_v6 = vrot.slane %v8804_v36, %v15956_v3  ;;  %v8821_v21 = vcombine.high %v8811_v12, %v8811_v12 }
 0x502   : > { %v8852_v14 = vrot.slane %v8811_v12, %v15956_v3  ;;  %v8856_v56 = vrot.slane %v8819_v47, %v15956_v3  ;;  %v8884_v0 = vrot.slane %v8844_v11, %v15956_v3  ;;  %v8895_v43 = vmul.f32 %v8848_v31, %v15988_v7 }
 0x503   : > { %v8822_v24 = vcombine.high %v8818_v57, %v8818_v57  ;;  %v8868_v59 = vrot.slane %v8818_v57, %v15956_v3  ;;  %v8872_v4 = vrot.slane %v8820_v50, %v15956_v3  ;;  %v8860_v34 = vrot.slane %v8821_v21, %v15956_v3 }
 0x504   : > { %v8896_v29 = vmul.f32 %v8848_v31, %v15989_v19  ;;  %v8897_v52 = vmul.f32 %v8852_v14, %v15988_v7  ;;  %v8898_v39 = vmul.f32 %v8852_v14, %v15989_v19  ;;  %v8899_v25 = vmul.f32 %v8856_v56, %v15988_v7 }
 0x505   : > { %v8876_v28 = vrot.slane %v8822_v24, %v15956_v3  ;;  %v8900_v45 = vmul.f32 %v8856_v56, %v15989_v19  ;;  %v8903_v17 = vmul.f32 %v8864_v6, %v15988_v7  ;;  %v8901_v18 = vmul.f32 %v8860_v34, %v15988_v7 }
 0x506   : > { %v8902_v51 = vmul.f32 %v8860_v34, %v15989_v19  ;;  %v8904_v55 = vmul.f32 %v8864_v6, %v15989_v19  ;;  %v8905_v20 = vmul.f32 %v8868_v59, %v15988_v7  ;;  %v8906_v53 = vmul.f32 %v8868_v59, %v15989_v19 }
 0x507   : > { %v8907_v2 = vmul.f32 %v8872_v4, %v15988_v7  ;;  %v8908_v26 = vmul.f32 %v8872_v4, %v15989_v19  ;;  %v8909_v33 = vmul.f32 %v8876_v28, %v15988_v7  ;;  %v8910_v30 = vmul.f32 %v8876_v28, %v15989_v19  ;;  %v15991_v28 = vld [vmem:[#allocation94_spill] sm:$0xff] }
 0x508   : > { %v8911_v32 = vmul.f32 %v8880_v22, %v15988_v7  ;;  %v8912_v58 = vmul.f32 %v8880_v22, %v15989_v19  ;;  %v8913_v61 = vmul.f32 %v8884_v0, %v15988_v7  ;;  %v8914_v36 = vmul.f32 %v8884_v0, %v15989_v19 }
 0x509   : > { %v15081_v35 = vadd.f32 %v8895_v43, %v14969_v44  ;;  %v15084_v12 = vadd.f32 %v8896_v29, %v14972_v54  ;;  %v15087_v47 = vadd.f32 %v8897_v52, %v14975_v62  ;;  %v15090_v11 = vadd.f32 %v8898_v39, %v14978_v5 }
 0x50a   : > { %v15093_v31 = vadd.f32 %v8899_v25, %v14981_v40  ;;  %v15096_v57 = vadd.f32 %v8900_v45, %v14984_v49  ;;  %v15099_v50 = vadd.f32 %v8901_v18, %v14987_v38  ;;  %v15102_v44 = vadd.f32 %v8902_v51, %v14990_v46  ;;  %v15992_v45 = vld [vmem:[#allocation97_spill] sm:$0xff] }
 0x50b   : > { %v15105_v54 = vadd.f32 %v8903_v17, %v14993_v16  ;;  %v15108_v62 = vadd.f32 %v8904_v55, %v14996_v42  ;;  %v15111_v5 = vadd.f32 %v8905_v20, %v14999_v1  ;;  %v15114_v40 = vadd.f32 %v8906_v53, %v15002_v10 }
 0x50c   : > { %v15117_v49 = vadd.f32 %v8907_v2, %v15005_v41  ;;  %v15120_v38 = vadd.f32 %v8908_v26, %v15008_v27  ;;  %v15123_v46 = vadd.f32 %v8909_v33, %v15011_v9  ;;  %v15126_v16 = vadd.f32 %v8910_v30, %v15014_v60 }
 0x50d   : > { %v15129_v42 = vadd.f32 %v8911_v32, %v15017_v48  ;;  %v15132_v1 = vadd.f32 %v8912_v58, %v15020_v15  ;;  %v15135_v10 = vadd.f32 %v8913_v61, %v15023_v13  ;;  %v15138_v41 = vadd.f32 %v8914_v36, %v15026_v37  ;;  %v15990_v48 = vld [vmem:[#allocation70_spill] sm:$0xff] }
 0x50e   : > { %v8951_v27 = vrot.slane %v8937_v23, %v15955_v63  ;;  %v8952_v9 = vcombine.high %v15045_v8, %v15045_v8  ;;  %v8960_v60 = vrot.slane %v15045_v8, %v15955_v63  ;;  %v8992_v6 = vrot.slane %v15990_v48, %v15955_v63 }
 0x510   : > { %v8953_v22 = vcombine.high %v8951_v27, %v8951_v27  ;;  %v8967_v15 = vrot.slane %v8951_v27, %v15955_v63  ;;  %v8974_v13 = vrot.slane %v8952_v9, %v15955_v63  ;;  %v8982_v21 = vcombine.high %v8960_v60, %v8960_v60 }
 0x511   : > { %v8993_v14 = vcombine.high %v8992_v6, %v8992_v6  ;;  %v9000_v37 = vrot.slane %v8992_v6, %v15955_v63  ;;  %v9011_v23 = vrot.slane %v8960_v60, %v15956_v3 }
 0x512   : > { %v8981_v56 = vrot.slane %v8953_v22, %v15955_v63  ;;  %v8983_v0 = vcombine.high %v8967_v15, %v8967_v15  ;;  %v8984_v24 = vcombine.high %v8974_v13, %v8974_v13  ;;  %v9015_v8 = vrot.slane %v8974_v13, %v15956_v3 }
 0x513   : > { %v9007_v59 = vrot.slane %v8993_v14, %v15955_v63  ;;  %v9019_v4 = vrot.slane %v8982_v21, %v15956_v3  ;;  %v9027_v7 = vrot.slane %v8967_v15, %v15956_v3  ;;  %v9043_v43 = vrot.slane %v9000_v37, %v15956_v3 }
 0x514   : > { %v8985_v34 = vcombine.high %v8981_v56, %v8981_v56  ;;  %v9023_v19 = vrot.slane %v8984_v24, %v15956_v3  ;;  %v9031_v29 = vrot.slane %v8981_v56, %v15956_v3  ;;  %v9035_v52 = vrot.slane %v8983_v0, %v15956_v3  ;;  %v9249_v56 = vld [vmem:[%s12745_s24 + $0x40] sm:$0xff] (%p9798_p5)  ;;  %v9251_v0 = vld [vmem:[%s12745_s24 + $0x48] sm:$0xff] (%p9798_p5)  ;;  %v9253_v24 = vld [vmem:[%s12745_s24 + $0x50] sm:$0xff] (%p9798_p5) }
 0x515   : > { %v9047_v39 = vrot.slane %v9007_v59, %v15956_v3  ;;  %v9058_v25 = vmul.f32 %v9011_v23, %v15991_v28  ;;  %v9059_v17 = vmul.f32 %v9011_v23, %v15992_v45  ;;  %v9060_v63 = vmul.f32 %v9015_v8, %v15991_v28  ;;  %9250 = vst [vmem:[%s15231_s11 + $0x80] sm:$0xff] (%p9798_p5), %v9249_v56  ;;  %v9257_v59 = vld [vmem:[%s12745_s24 + $0x60] sm:$0xff] (%p9798_p5) }
 0x516   : > { %v9039_v18 = vrot.slane %v8985_v34, %v15956_v3  ;;  %v9061_v51 = vmul.f32 %v9015_v8, %v15992_v45  ;;  %v9062_v55 = vmul.f32 %v9019_v4, %v15991_v28  ;;  %v9063_v20 = vmul.f32 %v9019_v4, %v15992_v45  ;;  %v9255_v8 = vld [vmem:[%s12745_s24 + $0x58] sm:$0xff] (%p9798_p5)  ;;  %9252 = vst [vmem:[%s15231_s11 + $0x90] sm:$0xff] (%p9798_p5), %v9251_v0  ;;  %v9259_v4 = vld [vmem:[%s12745_s24 + $0x68] sm:$0xff] (%p9798_p5)  ;;  %v9265_v34 = vld [vmem:[%s12745_s24 + $0x80] sm:$0xff] (%p9798_p5) }
 0x517   : > { %v9064_v53 = vmul.f32 %v9023_v19, %v15991_v28  ;;  %v9065_v2 = vmul.f32 %v9023_v19, %v15992_v45  ;;  %v9066_v26 = vmul.f32 %v9027_v7, %v15991_v28  ;;  %v9067_v33 = vmul.f32 %v9027_v7, %v15992_v45  ;;  %9254 = vst [vmem:[%s15231_s11 + $0xa0] sm:$0xff] (%p9798_p5), %v9253_v24  ;;  %v9261_v7 = vld [vmem:[%s12745_s24 + $0x70] sm:$0xff] (%p9798_p5)  ;;  %v9267_v19 = vld [vmem:[%s12745_s24 + $0x88] sm:$0xff] (%p9798_p5) }
 0x518   : > { %v9068_v30 = vmul.f32 %v9031_v29, %v15991_v28  ;;  %v9069_v32 = vmul.f32 %v9031_v29, %v15992_v45  ;;  %v9070_v3 = vmul.f32 %v9035_v52, %v15991_v28  ;;  %v9071_v58 = vmul.f32 %v9035_v52, %v15992_v45  ;;  %9256 = vst [vmem:[%s15231_s11 + $0xb0] sm:$0xff] (%p9798_p5), %v9255_v8  ;;  %v9269_v29 = vld [vmem:[%s12745_s24 + $0x90] sm:$0xff] (%p9798_p5)  ;;  %v9271_v52 = vld [vmem:[%s12745_s24 + $0x98] sm:$0xff] (%p9798_p5) }
 0x519   : > { %v9072_v61 = vmul.f32 %v9039_v18, %v15991_v28  ;;  %v9073_v36 = vmul.f32 %v9039_v18, %v15992_v45  ;;  %v9074_v27 = vmul.f32 %v9043_v43, %v15991_v28  ;;  %v9075_v9 = vmul.f32 %v9043_v43, %v15992_v45  ;;  %9258 = vst [vmem:[%s15231_s11 + $0xc0] sm:$0xff] (%p9798_p5), %v9257_v59  ;;  %v9263_v43 = vld [vmem:[%s12745_s24 + $0x78] sm:$0xff] (%p9798_p5) }
 0x51a   : > { %v9076_v60 = vmul.f32 %v9047_v39, %v15991_v28  ;;  %v9077_v48 = vmul.f32 %v9047_v39, %v15992_v45  ;;  %v9078_v6 = vadd.f32 %v9058_v25, %v15081_v35  ;;  %v9079_v22 = vadd.f32 %v9059_v17, %v15084_v12  ;;  %9260 = vst [vmem:[%s15231_s11 + $0xd0] sm:$0xff] (%p9798_p5), %v9259_v4 }
 0x51b   : > { %v9080_v15 = vadd.f32 %v9060_v63, %v15087_v47  ;;  %v9081_v13 = vadd.f32 %v9061_v51, %v15090_v11  ;;  %v9082_v21 = vadd.f32 %v9062_v55, %v15093_v31  ;;  %v9083_v14 = vadd.f32 %v9063_v20, %v15096_v57  ;;  %9262 = vst [vmem:[%s15231_s11 + $0xe0] sm:$0xff] (%p9798_p5), %v9261_v7 }
 0x51c   : > { %v9084_v37 = vadd.f32 %v9064_v53, %v15099_v50  ;;  %v9085_v23 = vadd.f32 %v9065_v2, %v15102_v44  ;;  %v9086_v35 = vadd.f32 %v9066_v26, %v15105_v54  ;;  %v9087_v12 = vadd.f32 %v9067_v33, %v15108_v62  ;;  %9509 = vst [vmem:[%s12745_s24 + $0xa0] sm:$0xff] %v9078_v6 }
 0x51d   : > { %9510 = vst [vmem:[%s12745_s24 + $0xa8] sm:$0x3] %v9079_v22  ;;  %v9088_v47 = vadd.f32 %v9068_v30, %v15111_v5  ;;  %v9089_v11 = vadd.f32 %v9069_v32, %v15114_v40  ;;  %v9090_v31 = vadd.f32 %v9070_v3, %v15117_v49  ;;  %v9091_v57 = vadd.f32 %v9071_v58, %v15120_v38  ;;  %v9233_v49 = vld [vmem:[%s12745_s24] sm:$0xff] (%p9798_p5)  ;;  %v9235_v38 = vld [vmem:[%s12745_s24 + $0x8] sm:$0xff] (%p9798_p5) }
 0x51e   : > { %9511 = vst [vmem:[%s12745_s24 + $0xb0] sm:$0xff] %v9080_v15  ;;  %9512 = vst [vmem:[%s12745_s24 + $0xb8] sm:$0x3] %v9081_v13  ;;  %v9092_v50 = vadd.f32 %v9072_v61, %v15123_v46  ;;  %v9093_v44 = vadd.f32 %v9073_v36, %v15126_v16  ;;  %v9094_v54 = vadd.f32 %v9074_v27, %v15129_v42  ;;  %v9237_v46 = vld [vmem:[%s12745_s24 + $0x10] sm:$0xff] (%p9798_p5)  ;;  %v9239_v16 = vld [vmem:[%s12745_s24 + $0x18] sm:$0xff] (%p9798_p5) }
 0x51f   : > { %9513 = vst [vmem:[%s12745_s24 + $0xc0] sm:$0xff] %v9082_v21  ;;  %9514 = vst [vmem:[%s12745_s24 + $0xc8] sm:$0x3] %v9083_v14  ;;  %v9095_v62 = vadd.f32 %v9075_v9, %v15132_v1  ;;  %v9096_v5 = vadd.f32 %v9076_v60, %v15135_v10  ;;  %v9097_v40 = vadd.f32 %v9077_v48, %v15138_v41  ;;  %v9241_v42 = vld [vmem:[%s12745_s24 + $0x20] sm:$0xff] (%p9798_p5)  ;;  %v9243_v1 = vld [vmem:[%s12745_s24 + $0x28] sm:$0xff] (%p9798_p5) }
 0x520   : > { %9515 = vst [vmem:[%s12745_s24 + $0xd0] sm:$0xff] %v9084_v37  ;;  %9516 = vst [vmem:[%s12745_s24 + $0xd8] sm:$0x3] %v9085_v23  ;;  %9125 = sbr.rel (!%p9798_p5) target bundleno = 1336 (0x538), region = 90  ;;  %v9245_v10 = vld [vmem:[%s12745_s24 + $0x30] sm:$0xff] (%p9798_p5)  ;;  %v9247_v41 = vld [vmem:[%s12745_s24 + $0x38] sm:$0xff] (%p9798_p5) }
 0x521   : > { %9517 = vst [vmem:[%s12745_s24 + $0xe0] sm:$0xff] %v9086_v35  ;;  %9518 = vst [vmem:[%s12745_s24 + $0xe8] sm:$0x3] %v9087_v12 }
 0x522   : > { %9519 = vst [vmem:[%s12745_s24 + $0xf0] sm:$0xff] %v9088_v47  ;;  %9520 = vst [vmem:[%s12745_s24 + $0xf8] sm:$0x3] %v9089_v11 }
 0x523   : > { %9521 = vst [vmem:[%s12745_s24 + $0x100] sm:$0xff] %v9090_v31  ;;  %9522 = vst [vmem:[%s12745_s24 + $0x108] sm:$0x3] %v9091_v57  ;;  %v9273_v39 = vld [vmem:[%s12745_s24 + $0xa0] sm:$0xff] (%p9798_p5) }
 0x524   : > { %9523 = vst [vmem:[%s12745_s24 + $0x110] sm:$0xff] %v9092_v50  ;;  %9524 = vst [vmem:[%s12745_s24 + $0x118] sm:$0x3] %v9093_v44  ;;  %v9275_v28 = vld [vmem:[%s12745_s24 + $0xa8] sm:$0xff] (%p9798_p5) }
 0x525   : > { %9525 = vst [vmem:[%s12745_s24 + $0x120] sm:$0xff] %v9094_v54  ;;  %9526 = vst [vmem:[%s12745_s24 + $0x128] sm:$0x3] %v9095_v62  ;;  %v9277_v25 = vld [vmem:[%s12745_s24 + $0xb0] sm:$0xff] (%p9798_p5)  ;;  %v9279_v45 = vld [vmem:[%s12745_s24 + $0xb8] sm:$0xff] (%p9798_p5) }
 0x526   : > { %9527 = vst [vmem:[%s12745_s24 + $0x130] sm:$0xff] %v9096_v5  ;;  %9528 = vst [vmem:[%s12745_s24 + $0x138] sm:$0x3] %v9097_v40  ;;  %v9281_v17 = vld [vmem:[%s12745_s24 + $0xc0] sm:$0xff] (%p9798_p5)  ;;  %v9283_v63 = vld [vmem:[%s12745_s24 + $0xc8] sm:$0xff] (%p9798_p5) }
 0x527   : > { %9234 = vst [vmem:[%s15231_s11] sm:$0xff] %v9233_v49  ;;  %9236 = vst [vmem:[%s15231_s11 + $0x10] sm:$0xff] %v9235_v38  ;;  %v9285_v18 = vld [vmem:[%s12745_s24 + $0xd0] sm:$0xff]  ;;  %v9287_v51 = vld [vmem:[%s12745_s24 + $0xd8] sm:$0xff] }
 0x528   : > { %9238 = vst [vmem:[%s15231_s11 + $0x20] sm:$0xff] %v9237_v46  ;;  %9240 = vst [vmem:[%s15231_s11 + $0x30] sm:$0xff] %v9239_v16  ;;  %v9289_v55 = vld [vmem:[%s12745_s24 + $0xe0] sm:$0xff]  ;;  %v9291_v20 = vld [vmem:[%s12745_s24 + $0xe8] sm:$0xff] }
 0x529   : > { %9242 = vst [vmem:[%s15231_s11 + $0x40] sm:$0xff] %v9241_v42  ;;  %9244 = vst [vmem:[%s15231_s11 + $0x50] sm:$0xff] %v9243_v1  ;;  %v9293_v53 = vld [vmem:[%s12745_s24 + $0xf0] sm:$0xff]  ;;  %v9295_v2 = vld [vmem:[%s12745_s24 + $0xf8] sm:$0xff] }
 0x52a   : > { %9246 = vst [vmem:[%s15231_s11 + $0x60] sm:$0xff] %v9245_v10  ;;  %9248 = vst [vmem:[%s15231_s11 + $0x70] sm:$0xff] %v9247_v41  ;;  %v9297_v26 = vld [vmem:[%s12745_s24 + $0x100] sm:$0xff]  ;;  %v9299_v33 = vld [vmem:[%s12745_s24 + $0x108] sm:$0xff] }
 0x52b   : > { %9264 = vst [vmem:[%s15231_s11 + $0xf0] sm:$0xff] %v9263_v43  ;;  %9266 = vst [vmem:[%s15231_s11 + $0x100] sm:$0xff] %v9265_v34  ;;  %v9301_v30 = vld [vmem:[%s12745_s24 + $0x110] sm:$0xff]  ;;  %v9303_v32 = vld [vmem:[%s12745_s24 + $0x118] sm:$0xff] }
 0x52c   : > { %9268 = vst [vmem:[%s15231_s11 + $0x110] sm:$0xff] %v9267_v19  ;;  %9270 = vst [vmem:[%s15231_s11 + $0x120] sm:$0xff] %v9269_v29  ;;  %v9305_v3 = vld [vmem:[%s12745_s24 + $0x120] sm:$0xff]  ;;  %v9307_v58 = vld [vmem:[%s12745_s24 + $0x128] sm:$0xff] }
 0x52d   : > { %9272 = vst [vmem:[%s15231_s11 + $0x130] sm:$0xff] %v9271_v52  ;;  %9274 = vst [vmem:[%s15231_s11 + $0x140] sm:$0xff] %v9273_v39  ;;  %v9309_v61 = vld [vmem:[%s12745_s24 + $0x130] sm:$0xff]  ;;  %v9311_v36 = vld [vmem:[%s12745_s24 + $0x138] sm:$0xff] }
 0x52e   : > { %9276 = vst [vmem:[%s15231_s11 + $0x150] sm:$0xff] %v9275_v28  ;;  %9278 = vst [vmem:[%s15231_s11 + $0x160] sm:$0xff] %v9277_v25 }
 0x52f   : > { %9280 = vst [vmem:[%s15231_s11 + $0x170] sm:$0xff] %v9279_v45  ;;  %9282 = vst [vmem:[%s15231_s11 + $0x180] sm:$0xff] %v9281_v17 }
 0x530   : > { %9284 = vst [vmem:[%s15231_s11 + $0x190] sm:$0xff] %v9283_v63  ;;  %9286 = vst [vmem:[%s15231_s11 + $0x1a0] sm:$0xff] %v9285_v18 }
 0x531   : > { %9288 = vst [vmem:[%s15231_s11 + $0x1b0] sm:$0xff] %v9287_v51  ;;  %9290 = vst [vmem:[%s15231_s11 + $0x1c0] sm:$0xff] %v9289_v55 }
 0x532   : > { %9292 = vst [vmem:[%s15231_s11 + $0x1d0] sm:$0xff] %v9291_v20  ;;  %9294 = vst [vmem:[%s15231_s11 + $0x1e0] sm:$0xff] %v9293_v53 }
 0x533   : > { %9296 = vst [vmem:[%s15231_s11 + $0x1f0] sm:$0xff] %v9295_v2  ;;  %9298 = vst [vmem:[%s15231_s11 + $0x200] sm:$0xff] %v9297_v26 }
 0x534   : > { %9300 = vst [vmem:[%s15231_s11 + $0x210] sm:$0xff] %v9299_v33  ;;  %9302 = vst [vmem:[%s15231_s11 + $0x220] sm:$0xff] %v9301_v30 }
 0x535   : > { %9304 = vst [vmem:[%s15231_s11 + $0x230] sm:$0xff] %v9303_v32  ;;  %9306 = vst [vmem:[%s15231_s11 + $0x240] sm:$0xff] %v9305_v3 }
 0x536   : > { %9308 = vst [vmem:[%s15231_s11 + $0x250] sm:$0xff] %v9307_v58  ;;  %9310 = vst [vmem:[%s15231_s11 + $0x260] sm:$0xff] %v9309_v61 }
 0x537   : > { %9312 = vst [vmem:[%s15231_s11 + $0x270] sm:$0xff] %v9311_v36 }
 0x538 PF: > { %p14_p11 = scmp.ge.s32.totalorder %s9788_s28, 4   ;;  %s15993_s24 = smov %s9725_s25 }
 0x539   : > { %s15994_s25 = smov %s9796_s8  ;;  %s15995_s26 = smov %s9788_s28 }
 0x53a   :  { %16 = sbr.rel (!%p14_p11) target bundleno = 2 (0x2), region = 167 }

</bundles_post_ra>
